<compile_context>
chip_gen: v6e
topology: v6e:2x2x1
jax: 0.10.0
libtpu: 0.0.40
codegen_flags: <defaults>
</compile_context>

<pallas_src>
import functools

import jax
import jax.numpy as jnp
from jax import lax
from jax.experimental import pallas as pl
from jax.experimental.pallas import tpu as pltpu

_VMEM_LIMIT = 32 * 1024 * 1024  # safe on v5e/v6e/v7x
_BN_EPS = 1e-5


# ----------------------------------------------------------------------------------
# helpers
# ----------------------------------------------------------------------------------
def _round_up(x, m):
    return ((x + m - 1) // m) * m


def _cpad(c):
    """Pad a channel count up to a multiple of 128 (lane-dense output stores)."""
    return _round_up(max(c, 128), 128)


# ----------------------------------------------------------------------------------
# Kernel 1: fused 3x3 / stride-2 / pad-1 conv (3 row-tap matmuls, columns folded
#           into K) + batch-wide BatchNorm (centered variance) + affine + ReLU.
#           Whole batch & whole image per invocation.
# ----------------------------------------------------------------------------------
def _conv_bn_relu_kernel(re_ref, ro_ref, w_ref, g_ref, b_ref, o_ref, raw_ref,
                         *, batch, m, wo, bn_train):
    # --- conv: 3 row-tap matmuls per image, register-accumulated -------------
    for b in range(batch):
        acc = jnp.dot(re_ref[b, 0:m, :], w_ref[0],
                      preferred_element_type=jnp.float32)
        acc = acc + jnp.dot(ro_ref[b, 0:m, :], w_ref[1],
                            preferred_element_type=jnp.float32)
        acc = acc + jnp.dot(re_ref[b, wo:wo + m, :], w_ref[2],
                            preferred_element_type=jnp.float32)
        raw_ref[b] = acc

    gamma = g_ref[...]
    beta = b_ref[...]

    # --- batch-wide BN (train) folded into a single scale/shift --------------
    if bn_train:
        inv_cnt = 1.0 / float(batch * m)
        s = jnp.zeros_like(gamma)
        for b in range(batch):
            s = s + jnp.sum(raw_ref[b], axis=0, keepdims=True)
        mean = s * inv_cnt
        v = jnp.zeros_like(gamma)
        for b in range(batch):
            d = raw_ref[b] - mean
            v = v + jnp.sum(d * d, axis=0, keepdims=True)
        var = v * inv_cnt
        scale = gamma * lax.rsqrt(var + _BN_EPS)
        shift = beta - mean * scale
    else:
        scale, shift = gamma, beta

    # --- apply + ReLU, bf16 writeback -----------------------------------------
    for b in range(batch):
        y = raw_ref[b] * scale + shift
        o_ref[b] = jnp.maximum(y, 0.0).astype(o_ref.dtype)


def conv_bn_relu(x_nhwc, w3, gamma, beta, *, bn_train):
    """x: (B,H,W,C) bf16; w3: (3, 3*C, Npad) bf16; gamma/beta: (Npad,) f32.
    Returns (B, Ho*Wo, Npad) bf16 (post-BN, post-ReLU)."""
    B, H, W, C = x_nhwc.shape
    assert H % 2 == 0 and W % 2 == 0
    Ho, Wo = H // 2, W // 2
    m = Ho * Wo
    K3 = 3 * C
    R = (Ho + 1) * Wo
    Np = w3.shape[2]

    # XLA prep (tiny, fused under jit): pad spatially, fold the 3 column taps into
    # the channel/K axis, split even/odd row phases and flatten (row, col) -> M.
    xp = jnp.pad(x_nhwc, ((0, 0), (1, 1), (1, 1), (0, 0)))
    u = jnp.concatenate([xp[:, :, j:j + 2 * Wo:2, :] for j in range(3)], axis=-1)
    re = u[:, 0::2].reshape(B, R, K3)   # rows 0,2,...,H   -> taps ki=0 (rows 0:m) and ki=2 (rows Wo:Wo+m)
    ro = u[:, 1::2].reshape(B, R, K3)   # rows 1,3,...,H+1 -> tap  ki=1 (rows 0:m)

    kernel = functools.partial(_conv_bn_relu_kernel, batch=B, m=m, wo=Wo,
                               bn_train=bn_train)
    out = pl.pallas_call(
        kernel,
        grid=(1,),
        in_specs=[
            pl.BlockSpec((B, R, K3), lambda i: (0, 0, 0)),
            pl.BlockSpec((B, R, K3), lambda i: (0, 0, 0)),
            pl.BlockSpec((3, K3, Np), lambda i: (0, 0, 0)),
            pl.BlockSpec((1, Np), lambda i: (0, 0)),
            pl.BlockSpec((1, Np), lambda i: (0, 0)),
        ],
        out_specs=pl.BlockSpec((B, m, Np), lambda i: (0, 0, 0)),
        out_shape=jax.ShapeDtypeStruct((B, m, Np), jnp.bfloat16),
        scratch_shapes=[pltpu.VMEM((B, m, Np), jnp.float32)],
        compiler_params=pltpu.CompilerParams(
            dimension_semantics=("arbitrary",),
            vmem_limit_bytes=_VMEM_LIMIT),
    )(re, ro, w3, gamma.reshape(1, Np), beta.reshape(1, Np))
    return out


# ----------------------------------------------------------------------------------
# Kernel 2: fused tail = last conv layer (single K=9*Cin matmul, spatial 1x1)
#           + BN + ReLU -> conv_space, then h = conv_space @ Wh (BN+ReLU), then
#           z = h @ Wz + bz. Everything stays in VMEM.
# ----------------------------------------------------------------------------------
def _tail_kernel(x5_ref, w5_ref, g5_ref, b5_ref, wh_ref, gh_ref, bh_ref,
                 wz_ref, bz_ref, cs_ref, h_ref, z_ref, *, bn_train):
    def bn_relu(y, gamma, beta):
        if bn_train:
            mean = jnp.mean(y, axis=0, keepdims=True)
            d = y - mean
            var = jnp.mean(d * d, axis=0, keepdims=True)
            y = d * lax.rsqrt(var + _BN_EPS)
        y = y * gamma + beta
        return jnp.maximum(y, 0.0)

    cs = jnp.dot(x5_ref[...], w5_ref[...], preferred_element_type=jnp.float32)
    cs = bn_relu(cs, g5_ref[...], b5_ref[...])
    cs_ref[...] = cs

    h = jnp.dot(cs.astype(jnp.bfloat16), wh_ref[...],
                preferred_element_type=jnp.float32)
    h = bn_relu(h, gh_ref[...], bh_ref[...])
    h_ref[...] = h

    z = jnp.dot(h.astype(jnp.bfloat16), wz_ref[...],
                preferred_element_type=jnp.float32)
    z_ref[...] = z + bz_ref[...]


def tail_forward(x4, w5_flat, g5, b5, wh, gh, bh, wz, bz, *, bn_train):
    """x4: (B, 2, 2, C4) bf16 (last conv layer input); returns conv_space, h, z_padded."""
    B, Hs, Ws, C4 = x4.shape
    assert Hs == 2 and Ws == 2, "tail fusion expects a 2x2 input to the last conv layer"
    K5 = 9 * C4
    C5 = w5_flat.shape[1]
    Hd = wh.shape[1]
    Zp = wz.shape[1]

    # im2col of the single 3x3/stride-2 output position (spatial output is 1x1).
    xp = jnp.pad(x4, ((0, 0), (1, 1), (1, 1), (0, 0)))
    lhs5 = xp[:, 0:3, 0:3, :].reshape(B, K5)

    cs, h, z = pl.pallas_call(
        functools.partial(_tail_kernel, bn_train=bn_train),
        grid=(1,),
        in_specs=[
            pl.BlockSpec((B, K5), lambda i: (0, 0)),
            pl.BlockSpec((K5, C5), lambda i: (0, 0)),
            pl.BlockSpec((1, C5), lambda i: (0, 0)),
            pl.BlockSpec((1, C5), lambda i: (0, 0)),
            pl.BlockSpec((C5, Hd), lambda i: (0, 0)),
            pl.BlockSpec((1, Hd), lambda i: (0, 0)),
            pl.BlockSpec((1, Hd), lambda i: (0, 0)),
            pl.BlockSpec((Hd, Zp), lambda i: (0, 0)),
            pl.BlockSpec((1, Zp), lambda i: (0, 0)),
        ],
        out_specs=(pl.BlockSpec((B, C5), lambda i: (0, 0)),
                   pl.BlockSpec((B, Hd), lambda i: (0, 0)),
                   pl.BlockSpec((B, Zp), lambda i: (0, 0))),
        out_shape=(jax.ShapeDtypeStruct((B, C5), jnp.float32),
                   jax.ShapeDtypeStruct((B, Hd), jnp.float32),
                   jax.ShapeDtypeStruct((B, Zp), jnp.float32)),
        compiler_params=pltpu.CompilerParams(
            dimension_semantics=("arbitrary",),
            vmem_limit_bytes=_VMEM_LIMIT),
    )(lhs5, w5_flat, g5.reshape(1, C5), b5.reshape(1, C5),
      wh, gh.reshape(1, Hd), bh.reshape(1, Hd), wz, bz.reshape(1, Zp))
    return cs, h, z


# ----------------------------------------------------------------------------------
# Parameter construction (orthogonal init + 1-step spectral norm).
# Weights are stored with TRUE channel counts (no int leaves in the pytree);
# lane padding happens inside the jitted forward.
# ----------------------------------------------------------------------------------
def _orthogonal(key, shape):
    return jax.nn.initializers.orthogonal()(key, shape, jnp.float32)


def _spectral_norm(w, key, power_iterations=1):
    u = jax.random.normal(key, (w.shape[0],), jnp.float32)
    v = None
    for _ in range(power_iterations):
        v = w.T @ u
        v = v / (jnp.linalg.norm(v) + 1e-12)
        u = w @ v
        u = u / (jnp.linalg.norm(u) + 1e-12)
    sigma = u @ (w @ v)
    return w / sigma


def init_params(key, *, in_channels=3, image_hw=(32, 32), layers=5, h_dim=1024,
                z_dim=32, base_channels=16, spectral=True, power_iterations=1):
    H, W = image_hw
    assert H % (2 ** layers) == 0 and W % (2 ** layers) == 0

    params = {"conv": []}
    c_in = in_channels
    for li in range(layers):
        key, kw, ku = jax.random.split(key, 3)
        c_out = base_channels * (2 ** li)
        w2d = _orthogonal(kw, (9 * c_in, c_out))
        if spectral:
            w2d = _spectral_norm(w2d, ku, power_iterations)
        entry = {"gamma": jnp.ones((c_out,), jnp.float32),
                 "beta": jnp.zeros((c_out,), jnp.float32)}
        if li == layers - 1:
            entry["w_flat"] = w2d.astype(jnp.bfloat16)                       # (9*Cin, Cout)
        else:
            entry["w"] = w2d.reshape(3, 3 * c_in, c_out).astype(jnp.bfloat16)  # (3, 3*Cin, Cout)
        params["conv"].append(entry)
        c_in = c_out
        H, W = H // 2, W // 2

    flat = c_in * H * W          # conv_space width (true channels, final spatial)
    key, kh, khu, kz, kzu = jax.random.split(key, 5)
    w_h = _orthogonal(kh, (flat, h_dim))
    w_z = _orthogonal(kz, (h_dim, z_dim))
    if spectral:
        w_h = _spectral_norm(w_h, khu, power_iterations)
        w_z = _spectral_norm(w_z, kzu, power_iterations)
    params["h"] = {"w": w_h.astype(jnp.bfloat16),
                   "gamma": jnp.ones((h_dim,), jnp.float32),
                   "beta": jnp.zeros((h_dim,), jnp.float32)}
    params["z"] = {"w": w_z.astype(jnp.bfloat16),
                   "b": jnp.zeros((z_dim,), jnp.float32)}
    return params


# ----------------------------------------------------------------------------------
# Forward pass:  images (NCHW) -> (conv_space, h_rep, z_rep)
# ----------------------------------------------------------------------------------
@functools.partial(jax.jit, static_argnames=("is_train",))
def representations_pathology_forward(params, images_nchw, is_train):
    x = jnp.transpose(images_nchw, (0, 2, 3, 1)).astype(jnp.bfloat16)   # NCHW -> NHWC
    B = x.shape[0]

    # layers 1 .. L-1 : one fused conv+BN+ReLU kernel each
    for lp in params["conv"][:-1]:
        H, W = x.shape[1], x.shape[2]
        Ho, Wo = H // 2, W // 2
        c_out = lp["w"].shape[2]
        Np = _cpad(c_out)
        w3 = jnp.pad(lp["w"], ((0, 0), (0, 0), (0, Np - c_out)))
        gamma = jnp.pad(lp["gamma"], (0, Np - c_out))
        beta = jnp.pad(lp["beta"], (0, Np - c_out))
        y = conv_bn_relu(x, w3, gamma, beta, bn_train=is_train)
        # drop the zero output-channel padding before it enters the next layer's K
        x = y.reshape(B, Ho, Wo, Np)[..., :c_out]

    # last conv layer + h / z heads fused into one kernel
    lp = params["conv"][-1]
    z_dim = params["z"]["w"].shape[1]
    Zp = _cpad(z_dim)
    wz = jnp.pad(params["z"]["w"], ((0, 0), (0, Zp - z_dim)))
    bz = jnp.pad(params["z"]["b"], (0, Zp - z_dim))
    conv_space, h_rep, z_pad = tail_forward(
        x, lp["w_flat"], lp["gamma"], lp["beta"],
        params["h"]["w"], params["h"]["gamma"], params["h"]["beta"],
        wz, bz, bn_train=is_train)
    z_rep = z_pad[:, :z_dim]
    return conv_space, h_rep, z_rep


# ----------------------------------------------------------------------------------
if __name__ == "__main__":
    key = jax.random.PRNGKey(0)
    key, k_img, k_par = jax.random.split(key, 3)

    batch, channels, height, width = 2, 3, 32, 32
    z_dim, h_dim, layers = 32, 1024, 5

    images = jax.random.normal(k_img, (batch, channels, height, width), jnp.float32)
    params = init_params(k_par, in_channels=channels, image_hw=(height, width),
                         layers=layers, h_dim=h_dim, z_dim=z_dim,
                         spectral=True, power_iterations=1)

    conv_space, h_rep, z_rep = representations_pathology_forward(params, images,
                                                                 is_train=True)
    conv_space, h_rep, z_rep = jax.block_until_ready((conv_space, h_rep, z_rep))

    assert conv_space.shape == (batch, 256)
    assert h_rep.shape == (batch, h_dim)
    assert z_rep.shape == (batch, z_dim)
    assert bool(jnp.all(jnp.isfinite(conv_space)))
    assert bool(jnp.all(jnp.isfinite(h_rep)))
    assert bool(jnp.all(jnp.isfinite(z_rep)))
    print("KERNEL_OK")
</pallas_src>

<mosaic_0001>
module attributes {stable_mosaic.version = 11 : i64} {
  func.func @_conv_bn_relu_kernel(%arg0: i32, %arg1: memref<2x272x9xbf16, #tpu.memory_space<vmem>>, %arg2: memref<2x272x9xbf16, #tpu.memory_space<vmem>>, %arg3: memref<3x9x128xbf16, #tpu.memory_space<vmem>>, %arg4: memref<1x128xf32, #tpu.memory_space<vmem>>, %arg5: memref<1x128xf32, #tpu.memory_space<vmem>>, %arg6: memref<2x256x128xbf16, #tpu.memory_space<vmem>>, %arg7: memref<2x256x128xf32, #tpu.memory_space<vmem>>) attributes {dimension_semantics = [#tpu.dimension_semantics<arbitrary>], iteration_bounds = array<i64: 1>, scalar_prefetch = 0 : i64, scratch_operands = 1 : i64, tpu.core_type = #tpu.core_type<tc>, window_params = [{pipeline_mode = #tpu.pipeline_mode<synchronous>, transform_indices = @transform_0, window_bounds = array<i64: 2, 272, 9>}, {pipeline_mode = #tpu.pipeline_mode<synchronous>, transform_indices = @transform_1, window_bounds = array<i64: 2, 272, 9>}, {pipeline_mode = #tpu.pipeline_mode<synchronous>, transform_indices = @transform_2, window_bounds = array<i64: 3, 9, 128>}, {pipeline_mode = #tpu.pipeline_mode<synchronous>, transform_indices = @transform_3, window_bounds = array<i64: 1, 128>}, {pipeline_mode = #tpu.pipeline_mode<synchronous>, transform_indices = @transform_4, window_bounds = array<i64: 1, 128>}, {pipeline_mode = #tpu.pipeline_mode<synchronous>, transform_indices = @transform_5, window_bounds = array<i64: 2, 256, 128>}]} {
    %c0 = arith.constant 0 : index
    %c0_0 = arith.constant 0 : index
    %c0_1 = arith.constant 0 : index
    %0 = vector.load %arg1[%c0, %c0_0, %c0_1] : memref<2x272x9xbf16, #tpu.memory_space<vmem>>, vector<1x256x9xbf16>
    %1 = vector.shape_cast %0 : vector<1x256x9xbf16> to vector<256x9xbf16>
    %c0_2 = arith.constant 0 : index
    %c0_3 = arith.constant 0 : index
    %c0_4 = arith.constant 0 : index
    %2 = vector.load %arg3[%c0_2, %c0_3, %c0_4] : memref<3x9x128xbf16, #tpu.memory_space<vmem>>, vector<1x9x128xbf16>
    %3 = vector.shape_cast %2 : vector<1x9x128xbf16> to vector<9x128xbf16>
    %cst = arith.constant dense<0.000000e+00> : vector<256x128xf32>
    %4 = tpu.matmul %1, %3, %cst {dimension_numbers = #tpu.dot_dimension_numbers<[1], [0], [0], [1], [0, 0, 1, 1], [], []>} : vector<256x9xbf16>, vector<9x128xbf16>, vector<256x128xf32> -> vector<256x128xf32>
    %c0_5 = arith.constant 0 : index
    %c0_6 = arith.constant 0 : index
    %c0_7 = arith.constant 0 : index
    %5 = vector.load %arg2[%c0_5, %c0_6, %c0_7] : memref<2x272x9xbf16, #tpu.memory_space<vmem>>, vector<1x256x9xbf16>
    %6 = vector.shape_cast %5 : vector<1x256x9xbf16> to vector<256x9xbf16>
    %c1 = arith.constant 1 : index
    %c0_8 = arith.constant 0 : index
    %c0_9 = arith.constant 0 : index
    %7 = vector.load %arg3[%c1, %c0_8, %c0_9] : memref<3x9x128xbf16, #tpu.memory_space<vmem>>, vector<1x9x128xbf16>
    %8 = vector.shape_cast %7 : vector<1x9x128xbf16> to vector<9x128xbf16>
    %cst_10 = arith.constant dense<0.000000e+00> : vector<256x128xf32>
    %9 = tpu.matmul %6, %8, %cst_10 {dimension_numbers = #tpu.dot_dimension_numbers<[1], [0], [0], [1], [0, 0, 1, 1], [], []>} : vector<256x9xbf16>, vector<9x128xbf16>, vector<256x128xf32> -> vector<256x128xf32>
    %10 = arith.addf %4, %9 : vector<256x128xf32>
    %c0_11 = arith.constant 0 : index
    %c16 = arith.constant 16 : index
    %c0_12 = arith.constant 0 : index
    %11 = vector.load %arg1[%c0_11, %c16, %c0_12] : memref<2x272x9xbf16, #tpu.memory_space<vmem>>, vector<1x256x9xbf16>
    %12 = vector.shape_cast %11 : vector<1x256x9xbf16> to vector<256x9xbf16>
    %c2 = arith.constant 2 : index
    %c0_13 = arith.constant 0 : index
    %c0_14 = arith.constant 0 : index
    %13 = vector.load %arg3[%c2, %c0_13, %c0_14] : memref<3x9x128xbf16, #tpu.memory_space<vmem>>, vector<1x9x128xbf16>
    %14 = vector.shape_cast %13 : vector<1x9x128xbf16> to vector<9x128xbf16>
    %cst_15 = arith.constant dense<0.000000e+00> : vector<256x128xf32>
    %15 = tpu.matmul %12, %14, %cst_15 {dimension_numbers = #tpu.dot_dimension_numbers<[1], [0], [0], [1], [0, 0, 1, 1], [], []>} : vector<256x9xbf16>, vector<9x128xbf16>, vector<256x128xf32> -> vector<256x128xf32>
    %16 = arith.addf %10, %15 : vector<256x128xf32>
    %c0_16 = arith.constant 0 : index
    %c0_17 = arith.constant 0 : index
    %c0_18 = arith.constant 0 : index
    %17 = vector.load %arg7[%c0_16, %c0_17, %c0_18] : memref<2x256x128xf32, #tpu.memory_space<vmem>>, vector<1x256x128xf32>
    %18 = vector.shape_cast %17 : vector<1x256x128xf32> to vector<256x128xf32>
    %19 = vector.shape_cast %16 : vector<256x128xf32> to vector<1x256x128xf32>
    tpu.vector_store %arg7[%c0_16, %c0_17, %c0_18], %19 {strides = array<i32>} : memref<2x256x128xf32, #tpu.memory_space<vmem>>, vector<1x256x128xf32>,
    %c1_19 = arith.constant 1 : index
    %c0_20 = arith.constant 0 : index
    %c0_21 = arith.constant 0 : index
    %20 = vector.load %arg1[%c1_19, %c0_20, %c0_21] : memref<2x272x9xbf16, #tpu.memory_space<vmem>>, vector<1x256x9xbf16>
    %21 = vector.shape_cast %20 : vector<1x256x9xbf16> to vector<256x9xbf16>
    %c0_22 = arith.constant 0 : index
    %c0_23 = arith.constant 0 : index
    %c0_24 = arith.constant 0 : index
    %22 = vector.load %arg3[%c0_22, %c0_23, %c0_24] : memref<3x9x128xbf16, #tpu.memory_space<vmem>>, vector<1x9x128xbf16>
    %23 = vector.shape_cast %22 : vector<1x9x128xbf16> to vector<9x128xbf16>
    %cst_25 = arith.constant dense<0.000000e+00> : vector<256x128xf32>
    %24 = tpu.matmul %21, %23, %cst_25 {dimension_numbers = #tpu.dot_dimension_numbers<[1], [0], [0], [1], [0, 0, 1, 1], [], []>} : vector<256x9xbf16>, vector<9x128xbf16>, vector<256x128xf32> -> vector<256x128xf32>
    %c1_26 = arith.constant 1 : index
    %c0_27 = arith.constant 0 : index
    %c0_28 = arith.constant 0 : index
    %25 = vector.load %arg2[%c1_26, %c0_27, %c0_28] : memref<2x272x9xbf16, #tpu.memory_space<vmem>>, vector<1x256x9xbf16>
    %26 = vector.shape_cast %25 : vector<1x256x9xbf16> to vector<256x9xbf16>
    %c1_29 = arith.constant 1 : index
    %c0_30 = arith.constant 0 : index
    %c0_31 = arith.constant 0 : index
    %27 = vector.load %arg3[%c1_29, %c0_30, %c0_31] : memref<3x9x128xbf16, #tpu.memory_space<vmem>>, vector<1x9x128xbf16>
    %28 = vector.shape_cast %27 : vector<1x9x128xbf16> to vector<9x128xbf16>
    %cst_32 = arith.constant dense<0.000000e+00> : vector<256x128xf32>
    %29 = tpu.matmul %26, %28, %cst_32 {dimension_numbers = #tpu.dot_dimension_numbers<[1], [0], [0], [1], [0, 0, 1, 1], [], []>} : vector<256x9xbf16>, vector<9x128xbf16>, vector<256x128xf32> -> vector<256x128xf32>
    %30 = arith.addf %24, %29 : vector<256x128xf32>
    %c1_33 = arith.constant 1 : index
    %c16_34 = arith.constant 16 : index
    %c0_35 = arith.constant 0 : index
    %31 = vector.load %arg1[%c1_33, %c16_34, %c0_35] : memref<2x272x9xbf16, #tpu.memory_space<vmem>>, vector<1x256x9xbf16>
    %32 = vector.shape_cast %31 : vector<1x256x9xbf16> to vector<256x9xbf16>
    %c2_36 = arith.constant 2 : index
    %c0_37 = arith.constant 0 : index
    %c0_38 = arith.constant 0 : index
    %33 = vector.load %arg3[%c2_36, %c0_37, %c0_38] : memref<3x9x128xbf16, #tpu.memory_space<vmem>>, vector<1x9x128xbf16>
    %34 = vector.shape_cast %33 : vector<1x9x128xbf16> to vector<9x128xbf16>
    %cst_39 = arith.constant dense<0.000000e+00> : vector<256x128xf32>
    %35 = tpu.matmul %32, %34, %cst_39 {dimension_numbers = #tpu.dot_dimension_numbers<[1], [0], [0], [1], [0, 0, 1, 1], [], []>} : vector<256x9xbf16>, vector<9x128xbf16>, vector<256x128xf32> -> vector<256x128xf32>
    %36 = arith.addf %30, %35 : vector<256x128xf32>
    %c1_40 = arith.constant 1 : index
    %c0_41 = arith.constant 0 : index
    %c0_42 = arith.constant 0 : index
    %37 = vector.load %arg7[%c1_40, %c0_41, %c0_42] : memref<2x256x128xf32, #tpu.memory_space<vmem>>, vector<1x256x128xf32>
    %38 = vector.shape_cast %37 : vector<1x256x128xf32> to vector<256x128xf32>
    %39 = vector.shape_cast %36 : vector<256x128xf32> to vector<1x256x128xf32>
    tpu.vector_store %arg7[%c1_40, %c0_41, %c0_42], %39 {strides = array<i32>} : memref<2x256x128xf32, #tpu.memory_space<vmem>>, vector<1x256x128xf32>,
    %c0_43 = arith.constant 0 : index
    %c0_44 = arith.constant 0 : index
    %40 = vector.load %arg4[%c0_43, %c0_44] : memref<1x128xf32, #tpu.memory_space<vmem>>, vector<1x128xf32>
    %c0_45 = arith.constant 0 : index
    %c0_46 = arith.constant 0 : index
    %41 = vector.load %arg5[%c0_45, %c0_46] : memref<1x128xf32, #tpu.memory_space<vmem>>, vector<1x128xf32>
    %cst_47 = arith.constant 0.000000e+00 : f32
    %42 = vector.broadcast %cst_47 : f32 to vector<1x128xf32>
    %c0_48 = arith.constant 0 : index
    %c0_49 = arith.constant 0 : index
    %c0_50 = arith.constant 0 : index
    %43 = vector.load %arg7[%c0_48, %c0_49, %c0_50] : memref<2x256x128xf32, #tpu.memory_space<vmem>>, vector<1x256x128xf32>
    %44 = vector.shape_cast %43 : vector<1x256x128xf32> to vector<256x128xf32>
    %cst_51 = arith.constant dense<0.000000e+00> : vector<128xf32>
    %45 = vector.multi_reduction <add>, %44, %cst_51 [0] : vector<256x128xf32> to vector<128xf32>
    %46 = vector.shape_cast %45 : vector<128xf32> to vector<1x128xf32>
    %47 = arith.addf %42, %46 : vector<1x128xf32>
    %c1_52 = arith.constant 1 : index
    %c0_53 = arith.constant 0 : index
    %c0_54 = arith.constant 0 : index
    %48 = vector.load %arg7[%c1_52, %c0_53, %c0_54] : memref<2x256x128xf32, #tpu.memory_space<vmem>>, vector<1x256x128xf32>
    %49 = vector.shape_cast %48 : vector<1x256x128xf32> to vector<256x128xf32>
    %cst_55 = arith.constant dense<0.000000e+00> : vector<128xf32>
    %50 = vector.multi_reduction <add>, %49, %cst_55 [0] : vector<256x128xf32> to vector<128xf32>
    %51 = vector.shape_cast %50 : vector<128xf32> to vector<1x128xf32>
    %52 = arith.addf %47, %51 : vector<1x128xf32>
    %cst_56 = arith.constant 0.001953125 : f32
    %53 = vector.broadcast %cst_56 : f32 to vector<1x128xf32>
    %54 = arith.mulf %52, %53 : vector<1x128xf32>
    %cst_57 = arith.constant 0.000000e+00 : f32
    %55 = vector.broadcast %cst_57 : f32 to vector<1x128xf32>
    %c0_58 = arith.constant 0 : index
    %c0_59 = arith.constant 0 : index
    %c0_60 = arith.constant 0 : index
    %56 = vector.load %arg7[%c0_58, %c0_59, %c0_60] : memref<2x256x128xf32, #tpu.memory_space<vmem>>, vector<1x256x128xf32>
    %57 = vector.shape_cast %56 : vector<1x256x128xf32> to vector<256x128xf32>
    %58 = vector.broadcast %54 : vector<1x128xf32> to vector<256x128xf32>
    %59 = arith.subf %57, %58 : vector<256x128xf32>
    %60 = arith.mulf %59, %59 : vector<256x128xf32>
    %cst_61 = arith.constant dense<0.000000e+00> : vector<128xf32>
    %61 = vector.multi_reduction <add>, %60, %cst_61 [0] : vector<256x128xf32> to vector<128xf32>
    %62 = vector.shape_cast %61 : vector<128xf32> to vector<1x128xf32>
    %63 = arith.addf %55, %62 : vector<1x128xf32>
    %c1_62 = arith.constant 1 : index
    %c0_63 = arith.constant 0 : index
    %c0_64 = arith.constant 0 : index
    %64 = vector.load %arg7[%c1_62, %c0_63, %c0_64] : memref<2x256x128xf32, #tpu.memory_space<vmem>>, vector<1x256x128xf32>
    %65 = vector.shape_cast %64 : vector<1x256x128xf32> to vector<256x128xf32>
    %66 = vector.broadcast %54 : vector<1x128xf32> to vector<256x128xf32>
    %67 = arith.subf %65, %66 : vector<256x128xf32>
    %68 = arith.mulf %67, %67 : vector<256x128xf32>
    %cst_65 = arith.constant dense<0.000000e+00> : vector<128xf32>
    %69 = vector.multi_reduction <add>, %68, %cst_65 [0] : vector<256x128xf32> to vector<128xf32>
    %70 = vector.shape_cast %69 : vector<128xf32> to vector<1x128xf32>
    %71 = arith.addf %63, %70 : vector<1x128xf32>
    %cst_66 = arith.constant 0.001953125 : f32
    %72 = vector.broadcast %cst_66 : f32 to vector<1x128xf32>
    %73 = arith.mulf %71, %72 : vector<1x128xf32>
    %cst_67 = arith.constant 9.99999974E-6 : f32
    %74 = vector.broadcast %cst_67 : f32 to vector<1x128xf32>
    %75 = arith.addf %73, %74 : vector<1x128xf32>
    %76 = math.rsqrt %75 : vector<1x128xf32>
    %77 = arith.mulf %40, %76 : vector<1x128xf32>
    %78 = arith.mulf %54, %77 : vector<1x128xf32>
    %79 = arith.subf %41, %78 : vector<1x128xf32>
    %c0_68 = arith.constant 0 : index
    %c0_69 = arith.constant 0 : index
    %c0_70 = arith.constant 0 : index
    %80 = vector.load %arg7[%c0_68, %c0_69, %c0_70] : memref<2x256x128xf32, #tpu.memory_space<vmem>>, vector<1x256x128xf32>
    %81 = vector.shape_cast %80 : vector<1x256x128xf32> to vector<256x128xf32>
    %82 = vector.broadcast %77 : vector<1x128xf32> to vector<256x128xf32>
    %83 = arith.mulf %81, %82 : vector<256x128xf32>
    %84 = vector.broadcast %79 : vector<1x128xf32> to vector<256x128xf32>
    %85 = arith.addf %83, %84 : vector<256x128xf32>
    %cst_71 = arith.constant 0.000000e+00 : f32
    %86 = vector.broadcast %cst_71 : f32 to vector<256x128xf32>
    %87 = arith.maximumf %85, %86 : vector<256x128xf32>
    %88 = arith.truncf %87 : vector<256x128xf32> to vector<256x128xbf16>
    %c0_72 = arith.constant 0 : index
    %c0_73 = arith.constant 0 : index
    %c0_74 = arith.constant 0 : index
    %89 = vector.load %arg6[%c0_72, %c0_73, %c0_74] : memref<2x256x128xbf16, #tpu.memory_space<vmem>>, vector<1x256x128xbf16>
    %90 = vector.shape_cast %89 : vector<1x256x128xbf16> to vector<256x128xbf16>
    %91 = vector.shape_cast %88 : vector<256x128xbf16> to vector<1x256x128xbf16>
    tpu.vector_store %arg6[%c0_72, %c0_73, %c0_74], %91 {strides = array<i32>} : memref<2x256x128xbf16, #tpu.memory_space<vmem>>, vector<1x256x128xbf16>,
    %c1_75 = arith.constant 1 : index
    %c0_76 = arith.constant 0 : index
    %c0_77 = arith.constant 0 : index
    %92 = vector.load %arg7[%c1_75, %c0_76, %c0_77] : memref<2x256x128xf32, #tpu.memory_space<vmem>>, vector<1x256x128xf32>
    %93 = vector.shape_cast %92 : vector<1x256x128xf32> to vector<256x128xf32>
    %94 = vector.broadcast %77 : vector<1x128xf32> to vector<256x128xf32>
    %95 = arith.mulf %93, %94 : vector<256x128xf32>
    %96 = vector.broadcast %79 : vector<1x128xf32> to vector<256x128xf32>
    %97 = arith.addf %95, %96 : vector<256x128xf32>
    %cst_78 = arith.constant 0.000000e+00 : f32
    %98 = vector.broadcast %cst_78 : f32 to vector<256x128xf32>
    %99 = arith.maximumf %97, %98 : vector<256x128xf32>
    %100 = arith.truncf %99 : vector<256x128xf32> to vector<256x128xbf16>
    %c1_79 = arith.constant 1 : index
    %c0_80 = arith.constant 0 : index
    %c0_81 = arith.constant 0 : index
    %101 = vector.load %arg6[%c1_79, %c0_80, %c0_81] : memref<2x256x128xbf16, #tpu.memory_space<vmem>>, vector<1x256x128xbf16>
    %102 = vector.shape_cast %101 : vector<1x256x128xbf16> to vector<256x128xbf16>
    %103 = vector.shape_cast %100 : vector<256x128xbf16> to vector<1x256x128xbf16>
    tpu.vector_store %arg6[%c1_79, %c0_80, %c0_81], %103 {strides = array<i32>} : memref<2x256x128xbf16, #tpu.memory_space<vmem>>, vector<1x256x128xbf16>,
    return
  }
  func.func @transform_0(%arg0: i32) -> (i32, i32, i32) {
    %c0_i32 = arith.constant 0 : i32
    %c0_i32_0 = arith.constant 0 : i32
    %c0_i32_1 = arith.constant 0 : i32
    %c0_i32_2 = arith.constant 0 : i32
    return %c0_i32, %c0_i32_0, %c0_i32_1 : i32, i32, i32
  }
  func.func @transform_1(%arg0: i32) -> (i32, i32, i32) {
    %c0_i32 = arith.constant 0 : i32
    %c0_i32_0 = arith.constant 0 : i32
    %c0_i32_1 = arith.constant 0 : i32
    %c0_i32_2 = arith.constant 0 : i32
    return %c0_i32, %c0_i32_0, %c0_i32_1 : i32, i32, i32
  }
  func.func @transform_2(%arg0: i32) -> (i32, i32, i32) {
    %c0_i32 = arith.constant 0 : i32
    %c0_i32_0 = arith.constant 0 : i32
    %c0_i32_1 = arith.constant 0 : i32
    %c0_i32_2 = arith.constant 0 : i32
    return %c0_i32, %c0_i32_0, %c0_i32_1 : i32, i32, i32
  }
  func.func @transform_3(%arg0: i32) -> (i32, i32) {
    %c0_i32 = arith.constant 0 : i32
    %c0_i32_0 = arith.constant 0 : i32
    %c0_i32_1 = arith.constant 0 : i32
    return %c0_i32, %c0_i32_0 : i32, i32
  }
  func.func @transform_4(%arg0: i32) -> (i32, i32) {
    %c0_i32 = arith.constant 0 : i32
    %c0_i32_0 = arith.constant 0 : i32
    %c0_i32_1 = arith.constant 0 : i32
    return %c0_i32, %c0_i32_0 : i32, i32
  }
  func.func @transform_5(%arg0: i32) -> (i32, i32, i32) {
    %c0_i32 = arith.constant 0 : i32
    %c0_i32_0 = arith.constant 0 : i32
    %c0_i32_1 = arith.constant 0 : i32
    %c0_i32_2 = arith.constant 0 : i32
    return %c0_i32, %c0_i32_0, %c0_i32_1 : i32, i32, i32
  }
}

module attributes {stable_mosaic.version = 11 : i64} {
  func.func @_conv_bn_relu_kernel(%arg0: i32, %arg1: memref<2x72x48xbf16, #tpu.memory_space<vmem>>, %arg2: memref<2x72x48xbf16, #tpu.memory_space<vmem>>, %arg3: memref<3x48x128xbf16, #tpu.memory_space<vmem>>, %arg4: memref<1x128xf32, #tpu.memory_space<vmem>>, %arg5: memref<1x128xf32, #tpu.memory_space<vmem>>, %arg6: memref<2x64x128xbf16, #tpu.memory_space<vmem>>, %arg7: memref<2x64x128xf32, #tpu.memory_space<vmem>>) attributes {dimension_semantics = [#tpu.dimension_semantics<arbitrary>], iteration_bounds = array<i64: 1>, scalar_prefetch = 0 : i64, scratch_operands = 1 : i64, tpu.core_type = #tpu.core_type<tc>, window_params = [{pipeline_mode = #tpu.pipeline_mode<synchronous>, transform_indices = @transform_0, window_bounds = array<i64: 2, 72, 48>}, {pipeline_mode = #tpu.pipeline_mode<synchronous>, transform_indices = @transform_1, window_bounds = array<i64: 2, 72, 48>}, {pipeline_mode = #tpu.pipeline_mode<synchronous>, transform_indices = @transform_2, window_bounds = array<i64: 3, 48, 128>}, {pipeline_mode = #tpu.pipeline_mode<synchronous>, transform_indices = @transform_3, window_bounds = array<i64: 1, 128>}, {pipeline_mode = #tpu.pipeline_mode<synchronous>, transform_indices = @transform_4, window_bounds = array<i64: 1, 128>}, {pipeline_mode = #tpu.pipeline_mode<synchronous>, transform_indices = @transform_5, window_bounds = array<i64: 2, 64, 128>}]} {
    %c0 = arith.constant 0 : index
    %c0_0 = arith.constant 0 : index
    %c0_1 = arith.constant 0 : index
    %0 = vector.load %arg1[%c0, %c0_0, %c0_1] : memref<2x72x48xbf16, #tpu.memory_space<vmem>>, vector<1x64x48xbf16>
    %1 = vector.shape_cast %0 : vector<1x64x48xbf16> to vector<64x48xbf16>
    %c0_2 = arith.constant 0 : index
    %c0_3 = arith.constant 0 : index
    %c0_4 = arith.constant 0 : index
    %2 = vector.load %arg3[%c0_2, %c0_3, %c0_4] : memref<3x48x128xbf16, #tpu.memory_space<vmem>>, vector<1x48x128xbf16>
    %3 = vector.shape_cast %2 : vector<1x48x128xbf16> to vector<48x128xbf16>
    %cst = arith.constant dense<0.000000e+00> : vector<64x128xf32>
    %4 = tpu.matmul %1, %3, %cst {dimension_numbers = #tpu.dot_dimension_numbers<[1], [0], [0], [1], [0, 0, 1, 1], [], []>} : vector<64x48xbf16>, vector<48x128xbf16>, vector<64x128xf32> -> vector<64x128xf32>
    %c0_5 = arith.constant 0 : index
    %c0_6 = arith.constant 0 : index
    %c0_7 = arith.constant 0 : index
    %5 = vector.load %arg2[%c0_5, %c0_6, %c0_7] : memref<2x72x48xbf16, #tpu.memory_space<vmem>>, vector<1x64x48xbf16>
    %6 = vector.shape_cast %5 : vector<1x64x48xbf16> to vector<64x48xbf16>
    %c1 = arith.constant 1 : index
    %c0_8 = arith.constant 0 : index
    %c0_9 = arith.constant 0 : index
    %7 = vector.load %arg3[%c1, %c0_8, %c0_9] : memref<3x48x128xbf16, #tpu.memory_space<vmem>>, vector<1x48x128xbf16>
    %8 = vector.shape_cast %7 : vector<1x48x128xbf16> to vector<48x128xbf16>
    %cst_10 = arith.constant dense<0.000000e+00> : vector<64x128xf32>
    %9 = tpu.matmul %6, %8, %cst_10 {dimension_numbers = #tpu.dot_dimension_numbers<[1], [0], [0], [1], [0, 0, 1, 1], [], []>} : vector<64x48xbf16>, vector<48x128xbf16>, vector<64x128xf32> -> vector<64x128xf32>
    %10 = arith.addf %4, %9 : vector<64x128xf32>
    %c0_11 = arith.constant 0 : index
    %c8 = arith.constant 8 : index
    %c0_12 = arith.constant 0 : index
    %11 = vector.load %arg1[%c0_11, %c8, %c0_12] : memref<2x72x48xbf16, #tpu.memory_space<vmem>>, vector<1x64x48xbf16>
    %12 = vector.shape_cast %11 : vector<1x64x48xbf16> to vector<64x48xbf16>
    %c2 = arith.constant 2 : index
    %c0_13 = arith.constant 0 : index
    %c0_14 = arith.constant 0 : index
    %13 = vector.load %arg3[%c2, %c0_13, %c0_14] : memref<3x48x128xbf16, #tpu.memory_space<vmem>>, vector<1x48x128xbf16>
    %14 = vector.shape_cast %13 : vector<1x48x128xbf16> to vector<48x128xbf16>
    %cst_15 = arith.constant dense<0.000000e+00> : vector<64x128xf32>
    %15 = tpu.matmul %12, %14, %cst_15 {dimension_numbers = #tpu.dot_dimension_numbers<[1], [0], [0], [1], [0, 0, 1, 1], [], []>} : vector<64x48xbf16>, vector<48x128xbf16>, vector<64x128xf32> -> vector<64x128xf32>
    %16 = arith.addf %10, %15 : vector<64x128xf32>
    %c0_16 = arith.constant 0 : index
    %c0_17 = arith.constant 0 : index
    %c0_18 = arith.constant 0 : index
    %17 = vector.load %arg7[%c0_16, %c0_17, %c0_18] : memref<2x64x128xf32, #tpu.memory_space<vmem>>, vector<1x64x128xf32>
    %18 = vector.shape_cast %17 : vector<1x64x128xf32> to vector<64x128xf32>
    %19 = vector.shape_cast %16 : vector<64x128xf32> to vector<1x64x128xf32>
    tpu.vector_store %arg7[%c0_16, %c0_17, %c0_18], %19 {strides = array<i32>} : memref<2x64x128xf32, #tpu.memory_space<vmem>>, vector<1x64x128xf32>,
    %c1_19 = arith.constant 1 : index
    %c0_20 = arith.constant 0 : index
    %c0_21 = arith.constant 0 : index
    %20 = vector.load %arg1[%c1_19, %c0_20, %c0_21] : memref<2x72x48xbf16, #tpu.memory_space<vmem>>, vector<1x64x48xbf16>
    %21 = vector.shape_cast %20 : vector<1x64x48xbf16> to vector<64x48xbf16>
    %c0_22 = arith.constant 0 : index
    %c0_23 = arith.constant 0 : index
    %c0_24 = arith.constant 0 : index
    %22 = vector.load %arg3[%c0_22, %c0_23, %c0_24] : memref<3x48x128xbf16, #tpu.memory_space<vmem>>, vector<1x48x128xbf16>
    %23 = vector.shape_cast %22 : vector<1x48x128xbf16> to vector<48x128xbf16>
    %cst_25 = arith.constant dense<0.000000e+00> : vector<64x128xf32>
    %24 = tpu.matmul %21, %23, %cst_25 {dimension_numbers = #tpu.dot_dimension_numbers<[1], [0], [0], [1], [0, 0, 1, 1], [], []>} : vector<64x48xbf16>, vector<48x128xbf16>, vector<64x128xf32> -> vector<64x128xf32>
    %c1_26 = arith.constant 1 : index
    %c0_27 = arith.constant 0 : index
    %c0_28 = arith.constant 0 : index
    %25 = vector.load %arg2[%c1_26, %c0_27, %c0_28] : memref<2x72x48xbf16, #tpu.memory_space<vmem>>, vector<1x64x48xbf16>
    %26 = vector.shape_cast %25 : vector<1x64x48xbf16> to vector<64x48xbf16>
    %c1_29 = arith.constant 1 : index
    %c0_30 = arith.constant 0 : index
    %c0_31 = arith.constant 0 : index
    %27 = vector.load %arg3[%c1_29, %c0_30, %c0_31] : memref<3x48x128xbf16, #tpu.memory_space<vmem>>, vector<1x48x128xbf16>
    %28 = vector.shape_cast %27 : vector<1x48x128xbf16> to vector<48x128xbf16>
    %cst_32 = arith.constant dense<0.000000e+00> : vector<64x128xf32>
    %29 = tpu.matmul %26, %28, %cst_32 {dimension_numbers = #tpu.dot_dimension_numbers<[1], [0], [0], [1], [0, 0, 1, 1], [], []>} : vector<64x48xbf16>, vector<48x128xbf16>, vector<64x128xf32> -> vector<64x128xf32>
    %30 = arith.addf %24, %29 : vector<64x128xf32>
    %c1_33 = arith.constant 1 : index
    %c8_34 = arith.constant 8 : index
    %c0_35 = arith.constant 0 : index
    %31 = vector.load %arg1[%c1_33, %c8_34, %c0_35] : memref<2x72x48xbf16, #tpu.memory_space<vmem>>, vector<1x64x48xbf16>
    %32 = vector.shape_cast %31 : vector<1x64x48xbf16> to vector<64x48xbf16>
    %c2_36 = arith.constant 2 : index
    %c0_37 = arith.constant 0 : index
    %c0_38 = arith.constant 0 : index
    %33 = vector.load %arg3[%c2_36, %c0_37, %c0_38] : memref<3x48x128xbf16, #tpu.memory_space<vmem>>, vector<1x48x128xbf16>
    %34 = vector.shape_cast %33 : vector<1x48x128xbf16> to vector<48x128xbf16>
    %cst_39 = arith.constant dense<0.000000e+00> : vector<64x128xf32>
    %35 = tpu.matmul %32, %34, %cst_39 {dimension_numbers = #tpu.dot_dimension_numbers<[1], [0], [0], [1], [0, 0, 1, 1], [], []>} : vector<64x48xbf16>, vector<48x128xbf16>, vector<64x128xf32> -> vector<64x128xf32>
    %36 = arith.addf %30, %35 : vector<64x128xf32>
    %c1_40 = arith.constant 1 : index
    %c0_41 = arith.constant 0 : index
    %c0_42 = arith.constant 0 : index
    %37 = vector.load %arg7[%c1_40, %c0_41, %c0_42] : memref<2x64x128xf32, #tpu.memory_space<vmem>>, vector<1x64x128xf32>
    %38 = vector.shape_cast %37 : vector<1x64x128xf32> to vector<64x128xf32>
    %39 = vector.shape_cast %36 : vector<64x128xf32> to vector<1x64x128xf32>
    tpu.vector_store %arg7[%c1_40, %c0_41, %c0_42], %39 {strides = array<i32>} : memref<2x64x128xf32, #tpu.memory_space<vmem>>, vector<1x64x128xf32>,
    %c0_43 = arith.constant 0 : index
    %c0_44 = arith.constant 0 : index
    %40 = vector.load %arg4[%c0_43, %c0_44] : memref<1x128xf32, #tpu.memory_space<vmem>>, vector<1x128xf32>
    %c0_45 = arith.constant 0 : index
    %c0_46 = arith.constant 0 : index
    %41 = vector.load %arg5[%c0_45, %c0_46] : memref<1x128xf32, #tpu.memory_space<vmem>>, vector<1x128xf32>
    %cst_47 = arith.constant 0.000000e+00 : f32
    %42 = vector.broadcast %cst_47 : f32 to vector<1x128xf32>
    %c0_48 = arith.constant 0 : index
    %c0_49 = arith.constant 0 : index
    %c0_50 = arith.constant 0 : index
    %43 = vector.load %arg7[%c0_48, %c0_49, %c0_50] : memref<2x64x128xf32, #tpu.memory_space<vmem>>, vector<1x64x128xf32>
    %44 = vector.shape_cast %43 : vector<1x64x128xf32> to vector<64x128xf32>
    %cst_51 = arith.constant dense<0.000000e+00> : vector<128xf32>
    %45 = vector.multi_reduction <add>, %44, %cst_51 [0] : vector<64x128xf32> to vector<128xf32>
    %46 = vector.shape_cast %45 : vector<128xf32> to vector<1x128xf32>
    %47 = arith.addf %42, %46 : vector<1x128xf32>
    %c1_52 = arith.constant 1 : index
    %c0_53 = arith.constant 0 : index
    %c0_54 = arith.constant 0 : index
    %48 = vector.load %arg7[%c1_52, %c0_53, %c0_54] : memref<2x64x128xf32, #tpu.memory_space<vmem>>, vector<1x64x128xf32>
    %49 = vector.shape_cast %48 : vector<1x64x128xf32> to vector<64x128xf32>
    %cst_55 = arith.constant dense<0.000000e+00> : vector<128xf32>
    %50 = vector.multi_reduction <add>, %49, %cst_55 [0] : vector<64x128xf32> to vector<128xf32>
    %51 = vector.shape_cast %50 : vector<128xf32> to vector<1x128xf32>
    %52 = arith.addf %47, %51 : vector<1x128xf32>
    %cst_56 = arith.constant 7.812500e-03 : f32
    %53 = vector.broadcast %cst_56 : f32 to vector<1x128xf32>
    %54 = arith.mulf %52, %53 : vector<1x128xf32>
    %cst_57 = arith.constant 0.000000e+00 : f32
    %55 = vector.broadcast %cst_57 : f32 to vector<1x128xf32>
    %c0_58 = arith.constant 0 : index
    %c0_59 = arith.constant 0 : index
    %c0_60 = arith.constant 0 : index
    %56 = vector.load %arg7[%c0_58, %c0_59, %c0_60] : memref<2x64x128xf32, #tpu.memory_space<vmem>>, vector<1x64x128xf32>
    %57 = vector.shape_cast %56 : vector<1x64x128xf32> to vector<64x128xf32>
    %58 = vector.broadcast %54 : vector<1x128xf32> to vector<64x128xf32>
    %59 = arith.subf %57, %58 : vector<64x128xf32>
    %60 = arith.mulf %59, %59 : vector<64x128xf32>
    %cst_61 = arith.constant dense<0.000000e+00> : vector<128xf32>
    %61 = vector.multi_reduction <add>, %60, %cst_61 [0] : vector<64x128xf32> to vector<128xf32>
    %62 = vector.shape_cast %61 : vector<128xf32> to vector<1x128xf32>
    %63 = arith.addf %55, %62 : vector<1x128xf32>
    %c1_62 = arith.constant 1 : index
    %c0_63 = arith.constant 0 : index
    %c0_64 = arith.constant 0 : index
    %64 = vector.load %arg7[%c1_62, %c0_63, %c0_64] : memref<2x64x128xf32, #tpu.memory_space<vmem>>, vector<1x64x128xf32>
    %65 = vector.shape_cast %64 : vector<1x64x128xf32> to vector<64x128xf32>
    %66 = vector.broadcast %54 : vector<1x128xf32> to vector<64x128xf32>
    %67 = arith.subf %65, %66 : vector<64x128xf32>
    %68 = arith.mulf %67, %67 : vector<64x128xf32>
    %cst_65 = arith.constant dense<0.000000e+00> : vector<128xf32>
    %69 = vector.multi_reduction <add>, %68, %cst_65 [0] : vector<64x128xf32> to vector<128xf32>
    %70 = vector.shape_cast %69 : vector<128xf32> to vector<1x128xf32>
    %71 = arith.addf %63, %70 : vector<1x128xf32>
    %cst_66 = arith.constant 7.812500e-03 : f32
    %72 = vector.broadcast %cst_66 : f32 to vector<1x128xf32>
    %73 = arith.mulf %71, %72 : vector<1x128xf32>
    %cst_67 = arith.constant 9.99999974E-6 : f32
    %74 = vector.broadcast %cst_67 : f32 to vector<1x128xf32>
    %75 = arith.addf %73, %74 : vector<1x128xf32>
    %76 = math.rsqrt %75 : vector<1x128xf32>
    %77 = arith.mulf %40, %76 : vector<1x128xf32>
    %78 = arith.mulf %54, %77 : vector<1x128xf32>
    %79 = arith.subf %41, %78 : vector<1x128xf32>
    %c0_68 = arith.constant 0 : index
    %c0_69 = arith.constant 0 : index
    %c0_70 = arith.constant 0 : index
    %80 = vector.load %arg7[%c0_68, %c0_69, %c0_70] : memref<2x64x128xf32, #tpu.memory_space<vmem>>, vector<1x64x128xf32>
    %81 = vector.shape_cast %80 : vector<1x64x128xf32> to vector<64x128xf32>
    %82 = vector.broadcast %77 : vector<1x128xf32> to vector<64x128xf32>
    %83 = arith.mulf %81, %82 : vector<64x128xf32>
    %84 = vector.broadcast %79 : vector<1x128xf32> to vector<64x128xf32>
    %85 = arith.addf %83, %84 : vector<64x128xf32>
    %cst_71 = arith.constant 0.000000e+00 : f32
    %86 = vector.broadcast %cst_71 : f32 to vector<64x128xf32>
    %87 = arith.maximumf %85, %86 : vector<64x128xf32>
    %88 = arith.truncf %87 : vector<64x128xf32> to vector<64x128xbf16>
    %c0_72 = arith.constant 0 : index
    %c0_73 = arith.constant 0 : index
    %c0_74 = arith.constant 0 : index
    %89 = vector.load %arg6[%c0_72, %c0_73, %c0_74] : memref<2x64x128xbf16, #tpu.memory_space<vmem>>, vector<1x64x128xbf16>
    %90 = vector.shape_cast %89 : vector<1x64x128xbf16> to vector<64x128xbf16>
    %91 = vector.shape_cast %88 : vector<64x128xbf16> to vector<1x64x128xbf16>
    tpu.vector_store %arg6[%c0_72, %c0_73, %c0_74], %91 {strides = array<i32>} : memref<2x64x128xbf16, #tpu.memory_space<vmem>>, vector<1x64x128xbf16>,
    %c1_75 = arith.constant 1 : index
    %c0_76 = arith.constant 0 : index
    %c0_77 = arith.constant 0 : index
    %92 = vector.load %arg7[%c1_75, %c0_76, %c0_77] : memref<2x64x128xf32, #tpu.memory_space<vmem>>, vector<1x64x128xf32>
    %93 = vector.shape_cast %92 : vector<1x64x128xf32> to vector<64x128xf32>
    %94 = vector.broadcast %77 : vector<1x128xf32> to vector<64x128xf32>
    %95 = arith.mulf %93, %94 : vector<64x128xf32>
    %96 = vector.broadcast %79 : vector<1x128xf32> to vector<64x128xf32>
    %97 = arith.addf %95, %96 : vector<64x128xf32>
    %cst_78 = arith.constant 0.000000e+00 : f32
    %98 = vector.broadcast %cst_78 : f32 to vector<64x128xf32>
    %99 = arith.maximumf %97, %98 : vector<64x128xf32>
    %100 = arith.truncf %99 : vector<64x128xf32> to vector<64x128xbf16>
    %c1_79 = arith.constant 1 : index
    %c0_80 = arith.constant 0 : index
    %c0_81 = arith.constant 0 : index
    %101 = vector.load %arg6[%c1_79, %c0_80, %c0_81] : memref<2x64x128xbf16, #tpu.memory_space<vmem>>, vector<1x64x128xbf16>
    %102 = vector.shape_cast %101 : vector<1x64x128xbf16> to vector<64x128xbf16>
    %103 = vector.shape_cast %100 : vector<64x128xbf16> to vector<1x64x128xbf16>
    tpu.vector_store %arg6[%c1_79, %c0_80, %c0_81], %103 {strides = array<i32>} : memref<2x64x128xbf16, #tpu.memory_space<vmem>>, vector<1x64x128xbf16>,
    return
  }
  func.func @transform_0(%arg0: i32) -> (i32, i32, i32) {
    %c0_i32 = arith.constant 0 : i32
    %c0_i32_0 = arith.constant 0 : i32
    %c0_i32_1 = arith.constant 0 : i32
    %c0_i32_2 = arith.constant 0 : i32
    return %c0_i32, %c0_i32_0, %c0_i32_1 : i32, i32, i32
  }
  func.func @transform_1(%arg0: i32) -> (i32, i32, i32) {
    %c0_i32 = arith.constant 0 : i32
    %c0_i32_0 = arith.constant 0 : i32
    %c0_i32_1 = arith.constant 0 : i32
    %c0_i32_2 = arith.constant 0 : i32
    return %c0_i32, %c0_i32_0, %c0_i32_1 : i32, i32, i32
  }
  func.func @transform_2(%arg0: i32) -> (i32, i32, i32) {
    %c0_i32 = arith.constant 0 : i32
    %c0_i32_0 = arith.constant 0 : i32
    %c0_i32_1 = arith.constant 0 : i32
    %c0_i32_2 = arith.constant 0 : i32
    return %c0_i32, %c0_i32_0, %c0_i32_1 : i32, i32, i32
  }
  func.func @transform_3(%arg0: i32) -> (i32, i32) {
    %c0_i32 = arith.constant 0 : i32
    %c0_i32_0 = arith.constant 0 : i32
    %c0_i32_1 = arith.constant 0 : i32
    return %c0_i32, %c0_i32_0 : i32, i32
  }
  func.func @transform_4(%arg0: i32) -> (i32, i32) {
    %c0_i32 = arith.constant 0 : i32
    %c0_i32_0 = arith.constant 0 : i32
    %c0_i32_1 = arith.constant 0 : i32
    return %c0_i32, %c0_i32_0 : i32, i32
  }
  func.func @transform_5(%arg0: i32) -> (i32, i32, i32) {
    %c0_i32 = arith.constant 0 : i32
    %c0_i32_0 = arith.constant 0 : i32
    %c0_i32_1 = arith.constant 0 : i32
    %c0_i32_2 = arith.constant 0 : i32
    return %c0_i32, %c0_i32_0, %c0_i32_1 : i32, i32, i32
  }
}

module attributes {stable_mosaic.version = 11 : i64} {
  func.func @_conv_bn_relu_kernel(%arg0: i32, %arg1: memref<2x20x96xbf16, #tpu.memory_space<vmem>>, %arg2: memref<2x20x96xbf16, #tpu.memory_space<vmem>>, %arg3: memref<3x96x128xbf16, #tpu.memory_space<vmem>>, %arg4: memref<1x128xf32, #tpu.memory_space<vmem>>, %arg5: memref<1x128xf32, #tpu.memory_space<vmem>>, %arg6: memref<2x16x128xbf16, #tpu.memory_space<vmem>>, %arg7: memref<2x16x128xf32, #tpu.memory_space<vmem>>) attributes {dimension_semantics = [#tpu.dimension_semantics<arbitrary>], iteration_bounds = array<i64: 1>, scalar_prefetch = 0 : i64, scratch_operands = 1 : i64, tpu.core_type = #tpu.core_type<tc>, window_params = [{pipeline_mode = #tpu.pipeline_mode<synchronous>, transform_indices = @transform_0, window_bounds = array<i64: 2, 20, 96>}, {pipeline_mode = #tpu.pipeline_mode<synchronous>, transform_indices = @transform_1, window_bounds = array<i64: 2, 20, 96>}, {pipeline_mode = #tpu.pipeline_mode<synchronous>, transform_indices = @transform_2, window_bounds = array<i64: 3, 96, 128>}, {pipeline_mode = #tpu.pipeline_mode<synchronous>, transform_indices = @transform_3, window_bounds = array<i64: 1, 128>}, {pipeline_mode = #tpu.pipeline_mode<synchronous>, transform_indices = @transform_4, window_bounds = array<i64: 1, 128>}, {pipeline_mode = #tpu.pipeline_mode<synchronous>, transform_indices = @transform_5, window_bounds = array<i64: 2, 16, 128>}]} {
    %c0 = arith.constant 0 : index
    %c0_0 = arith.constant 0 : index
    %c0_1 = arith.constant 0 : index
    %0 = vector.load %arg1[%c0, %c0_0, %c0_1] : memref<2x20x96xbf16, #tpu.memory_space<vmem>>, vector<1x16x96xbf16>
    %1 = vector.shape_cast %0 : vector<1x16x96xbf16> to vector<16x96xbf16>
    %c0_2 = arith.constant 0 : index
    %c0_3 = arith.constant 0 : index
    %c0_4 = arith.constant 0 : index
    %2 = vector.load %arg3[%c0_2, %c0_3, %c0_4] : memref<3x96x128xbf16, #tpu.memory_space<vmem>>, vector<1x96x128xbf16>
    %3 = vector.shape_cast %2 : vector<1x96x128xbf16> to vector<96x128xbf16>
    %cst = arith.constant dense<0.000000e+00> : vector<16x128xf32>
    %4 = tpu.matmul %1, %3, %cst {dimension_numbers = #tpu.dot_dimension_numbers<[1], [0], [0], [1], [0, 0, 1, 1], [], []>} : vector<16x96xbf16>, vector<96x128xbf16>, vector<16x128xf32> -> vector<16x128xf32>
    %c0_5 = arith.constant 0 : index
    %c0_6 = arith.constant 0 : index
    %c0_7 = arith.constant 0 : index
    %5 = vector.load %arg2[%c0_5, %c0_6, %c0_7] : memref<2x20x96xbf16, #tpu.memory_space<vmem>>, vector<1x16x96xbf16>
    %6 = vector.shape_cast %5 : vector<1x16x96xbf16> to vector<16x96xbf16>
    %c1 = arith.constant 1 : index
    %c0_8 = arith.constant 0 : index
    %c0_9 = arith.constant 0 : index
    %7 = vector.load %arg3[%c1, %c0_8, %c0_9] : memref<3x96x128xbf16, #tpu.memory_space<vmem>>, vector<1x96x128xbf16>
    %8 = vector.shape_cast %7 : vector<1x96x128xbf16> to vector<96x128xbf16>
    %cst_10 = arith.constant dense<0.000000e+00> : vector<16x128xf32>
    %9 = tpu.matmul %6, %8, %cst_10 {dimension_numbers = #tpu.dot_dimension_numbers<[1], [0], [0], [1], [0, 0, 1, 1], [], []>} : vector<16x96xbf16>, vector<96x128xbf16>, vector<16x128xf32> -> vector<16x128xf32>
    %10 = arith.addf %4, %9 : vector<16x128xf32>
    %c0_11 = arith.constant 0 : index
    %c4 = arith.constant 4 : index
    %c0_12 = arith.constant 0 : index
    %11 = vector.load %arg1[%c0_11, %c4, %c0_12] : memref<2x20x96xbf16, #tpu.memory_space<vmem>>, vector<1x16x96xbf16>
    %12 = vector.shape_cast %11 : vector<1x16x96xbf16> to vector<16x96xbf16>
    %c2 = arith.constant 2 : index
    %c0_13 = arith.constant 0 : index
    %c0_14 = arith.constant 0 : index
    %13 = vector.load %arg3[%c2, %c0_13, %c0_14] : memref<3x96x128xbf16, #tpu.memory_space<vmem>>, vector<1x96x128xbf16>
    %14 = vector.shape_cast %13 : vector<1x96x128xbf16> to vector<96x128xbf16>
    %cst_15 = arith.constant dense<0.000000e+00> : vector<16x128xf32>
    %15 = tpu.matmul %12, %14, %cst_15 {dimension_numbers = #tpu.dot_dimension_numbers<[1], [0], [0], [1], [0, 0, 1, 1], [], []>} : vector<16x96xbf16>, vector<96x128xbf16>, vector<16x128xf32> -> vector<16x128xf32>
    %16 = arith.addf %10, %15 : vector<16x128xf32>
    %c0_16 = arith.constant 0 : index
    %c0_17 = arith.constant 0 : index
    %c0_18 = arith.constant 0 : index
    %17 = vector.load %arg7[%c0_16, %c0_17, %c0_18] : memref<2x16x128xf32, #tpu.memory_space<vmem>>, vector<1x16x128xf32>
    %18 = vector.shape_cast %17 : vector<1x16x128xf32> to vector<16x128xf32>
    %19 = vector.shape_cast %16 : vector<16x128xf32> to vector<1x16x128xf32>
    tpu.vector_store %arg7[%c0_16, %c0_17, %c0_18], %19 {strides = array<i32>} : memref<2x16x128xf32, #tpu.memory_space<vmem>>, vector<1x16x128xf32>,
    %c1_19 = arith.constant 1 : index
    %c0_20 = arith.constant 0 : index
    %c0_21 = arith.constant 0 : index
    %20 = vector.load %arg1[%c1_19, %c0_20, %c0_21] : memref<2x20x96xbf16, #tpu.memory_space<vmem>>, vector<1x16x96xbf16>
    %21 = vector.shape_cast %20 : vector<1x16x96xbf16> to vector<16x96xbf16>
    %c0_22 = arith.constant 0 : index
    %c0_23 = arith.constant 0 : index
    %c0_24 = arith.constant 0 : index
    %22 = vector.load %arg3[%c0_22, %c0_23, %c0_24] : memref<3x96x128xbf16, #tpu.memory_space<vmem>>, vector<1x96x128xbf16>
    %23 = vector.shape_cast %22 : vector<1x96x128xbf16> to vector<96x128xbf16>
    %cst_25 = arith.constant dense<0.000000e+00> : vector<16x128xf32>
    %24 = tpu.matmul %21, %23, %cst_25 {dimension_numbers = #tpu.dot_dimension_numbers<[1], [0], [0], [1], [0, 0, 1, 1], [], []>} : vector<16x96xbf16>, vector<96x128xbf16>, vector<16x128xf32> -> vector<16x128xf32>
    %c1_26 = arith.constant 1 : index
    %c0_27 = arith.constant 0 : index
    %c0_28 = arith.constant 0 : index
    %25 = vector.load %arg2[%c1_26, %c0_27, %c0_28] : memref<2x20x96xbf16, #tpu.memory_space<vmem>>, vector<1x16x96xbf16>
    %26 = vector.shape_cast %25 : vector<1x16x96xbf16> to vector<16x96xbf16>
    %c1_29 = arith.constant 1 : index
    %c0_30 = arith.constant 0 : index
    %c0_31 = arith.constant 0 : index
    %27 = vector.load %arg3[%c1_29, %c0_30, %c0_31] : memref<3x96x128xbf16, #tpu.memory_space<vmem>>, vector<1x96x128xbf16>
    %28 = vector.shape_cast %27 : vector<1x96x128xbf16> to vector<96x128xbf16>
    %cst_32 = arith.constant dense<0.000000e+00> : vector<16x128xf32>
    %29 = tpu.matmul %26, %28, %cst_32 {dimension_numbers = #tpu.dot_dimension_numbers<[1], [0], [0], [1], [0, 0, 1, 1], [], []>} : vector<16x96xbf16>, vector<96x128xbf16>, vector<16x128xf32> -> vector<16x128xf32>
    %30 = arith.addf %24, %29 : vector<16x128xf32>
    %c1_33 = arith.constant 1 : index
    %c4_34 = arith.constant 4 : index
    %c0_35 = arith.constant 0 : index
    %31 = vector.load %arg1[%c1_33, %c4_34, %c0_35] : memref<2x20x96xbf16, #tpu.memory_space<vmem>>, vector<1x16x96xbf16>
    %32 = vector.shape_cast %31 : vector<1x16x96xbf16> to vector<16x96xbf16>
    %c2_36 = arith.constant 2 : index
    %c0_37 = arith.constant 0 : index
    %c0_38 = arith.constant 0 : index
    %33 = vector.load %arg3[%c2_36, %c0_37, %c0_38] : memref<3x96x128xbf16, #tpu.memory_space<vmem>>, vector<1x96x128xbf16>
    %34 = vector.shape_cast %33 : vector<1x96x128xbf16> to vector<96x128xbf16>
    %cst_39 = arith.constant dense<0.000000e+00> : vector<16x128xf32>
    %35 = tpu.matmul %32, %34, %cst_39 {dimension_numbers = #tpu.dot_dimension_numbers<[1], [0], [0], [1], [0, 0, 1, 1], [], []>} : vector<16x96xbf16>, vector<96x128xbf16>, vector<16x128xf32> -> vector<16x128xf32>
    %36 = arith.addf %30, %35 : vector<16x128xf32>
    %c1_40 = arith.constant 1 : index
    %c0_41 = arith.constant 0 : index
    %c0_42 = arith.constant 0 : index
    %37 = vector.load %arg7[%c1_40, %c0_41, %c0_42] : memref<2x16x128xf32, #tpu.memory_space<vmem>>, vector<1x16x128xf32>
    %38 = vector.shape_cast %37 : vector<1x16x128xf32> to vector<16x128xf32>
    %39 = vector.shape_cast %36 : vector<16x128xf32> to vector<1x16x128xf32>
    tpu.vector_store %arg7[%c1_40, %c0_41, %c0_42], %39 {strides = array<i32>} : memref<2x16x128xf32, #tpu.memory_space<vmem>>, vector<1x16x128xf32>,
    %c0_43 = arith.constant 0 : index
    %c0_44 = arith.constant 0 : index
    %40 = vector.load %arg4[%c0_43, %c0_44] : memref<1x128xf32, #tpu.memory_space<vmem>>, vector<1x128xf32>
    %c0_45 = arith.constant 0 : index
    %c0_46 = arith.constant 0 : index
    %41 = vector.load %arg5[%c0_45, %c0_46] : memref<1x128xf32, #tpu.memory_space<vmem>>, vector<1x128xf32>
    %cst_47 = arith.constant 0.000000e+00 : f32
    %42 = vector.broadcast %cst_47 : f32 to vector<1x128xf32>
    %c0_48 = arith.constant 0 : index
    %c0_49 = arith.constant 0 : index
    %c0_50 = arith.constant 0 : index
    %43 = vector.load %arg7[%c0_48, %c0_49, %c0_50] : memref<2x16x128xf32, #tpu.memory_space<vmem>>, vector<1x16x128xf32>
    %44 = vector.shape_cast %43 : vector<1x16x128xf32> to vector<16x128xf32>
    %cst_51 = arith.constant dense<0.000000e+00> : vector<128xf32>
    %45 = vector.multi_reduction <add>, %44, %cst_51 [0] : vector<16x128xf32> to vector<128xf32>
    %46 = vector.shape_cast %45 : vector<128xf32> to vector<1x128xf32>
    %47 = arith.addf %42, %46 : vector<1x128xf32>
    %c1_52 = arith.constant 1 : index
    %c0_53 = arith.constant 0 : index
    %c0_54 = arith.constant 0 : index
    %48 = vector.load %arg7[%c1_52, %c0_53, %c0_54] : memref<2x16x128xf32, #tpu.memory_space<vmem>>, vector<1x16x128xf32>
    %49 = vector.shape_cast %48 : vector<1x16x128xf32> to vector<16x128xf32>
    %cst_55 = arith.constant dense<0.000000e+00> : vector<128xf32>
    %50 = vector.multi_reduction <add>, %49, %cst_55 [0] : vector<16x128xf32> to vector<128xf32>
    %51 = vector.shape_cast %50 : vector<128xf32> to vector<1x128xf32>
    %52 = arith.addf %47, %51 : vector<1x128xf32>
    %cst_56 = arith.constant 3.125000e-02 : f32
    %53 = vector.broadcast %cst_56 : f32 to vector<1x128xf32>
    %54 = arith.mulf %52, %53 : vector<1x128xf32>
    %cst_57 = arith.constant 0.000000e+00 : f32
    %55 = vector.broadcast %cst_57 : f32 to vector<1x128xf32>
    %c0_58 = arith.constant 0 : index
    %c0_59 = arith.constant 0 : index
    %c0_60 = arith.constant 0 : index
    %56 = vector.load %arg7[%c0_58, %c0_59, %c0_60] : memref<2x16x128xf32, #tpu.memory_space<vmem>>, vector<1x16x128xf32>
    %57 = vector.shape_cast %56 : vector<1x16x128xf32> to vector<16x128xf32>
    %58 = vector.broadcast %54 : vector<1x128xf32> to vector<16x128xf32>
    %59 = arith.subf %57, %58 : vector<16x128xf32>
    %60 = arith.mulf %59, %59 : vector<16x128xf32>
    %cst_61 = arith.constant dense<0.000000e+00> : vector<128xf32>
    %61 = vector.multi_reduction <add>, %60, %cst_61 [0] : vector<16x128xf32> to vector<128xf32>
    %62 = vector.shape_cast %61 : vector<128xf32> to vector<1x128xf32>
    %63 = arith.addf %55, %62 : vector<1x128xf32>
    %c1_62 = arith.constant 1 : index
    %c0_63 = arith.constant 0 : index
    %c0_64 = arith.constant 0 : index
    %64 = vector.load %arg7[%c1_62, %c0_63, %c0_64] : memref<2x16x128xf32, #tpu.memory_space<vmem>>, vector<1x16x128xf32>
    %65 = vector.shape_cast %64 : vector<1x16x128xf32> to vector<16x128xf32>
    %66 = vector.broadcast %54 : vector<1x128xf32> to vector<16x128xf32>
    %67 = arith.subf %65, %66 : vector<16x128xf32>
    %68 = arith.mulf %67, %67 : vector<16x128xf32>
    %cst_65 = arith.constant dense<0.000000e+00> : vector<128xf32>
    %69 = vector.multi_reduction <add>, %68, %cst_65 [0] : vector<16x128xf32> to vector<128xf32>
    %70 = vector.shape_cast %69 : vector<128xf32> to vector<1x128xf32>
    %71 = arith.addf %63, %70 : vector<1x128xf32>
    %cst_66 = arith.constant 3.125000e-02 : f32
    %72 = vector.broadcast %cst_66 : f32 to vector<1x128xf32>
    %73 = arith.mulf %71, %72 : vector<1x128xf32>
    %cst_67 = arith.constant 9.99999974E-6 : f32
    %74 = vector.broadcast %cst_67 : f32 to vector<1x128xf32>
    %75 = arith.addf %73, %74 : vector<1x128xf32>
    %76 = math.rsqrt %75 : vector<1x128xf32>
    %77 = arith.mulf %40, %76 : vector<1x128xf32>
    %78 = arith.mulf %54, %77 : vector<1x128xf32>
    %79 = arith.subf %41, %78 : vector<1x128xf32>
    %c0_68 = arith.constant 0 : index
    %c0_69 = arith.constant 0 : index
    %c0_70 = arith.constant 0 : index
    %80 = vector.load %arg7[%c0_68, %c0_69, %c0_70] : memref<2x16x128xf32, #tpu.memory_space<vmem>>, vector<1x16x128xf32>
    %81 = vector.shape_cast %80 : vector<1x16x128xf32> to vector<16x128xf32>
    %82 = vector.broadcast %77 : vector<1x128xf32> to vector<16x128xf32>
    %83 = arith.mulf %81, %82 : vector<16x128xf32>
    %84 = vector.broadcast %79 : vector<1x128xf32> to vector<16x128xf32>
    %85 = arith.addf %83, %84 : vector<16x128xf32>
    %cst_71 = arith.constant 0.000000e+00 : f32
    %86 = vector.broadcast %cst_71 : f32 to vector<16x128xf32>
    %87 = arith.maximumf %85, %86 : vector<16x128xf32>
    %88 = arith.truncf %87 : vector<16x128xf32> to vector<16x128xbf16>
    %c0_72 = arith.constant 0 : index
    %c0_73 = arith.constant 0 : index
    %c0_74 = arith.constant 0 : index
    %89 = vector.load %arg6[%c0_72, %c0_73, %c0_74] : memref<2x16x128xbf16, #tpu.memory_space<vmem>>, vector<1x16x128xbf16>
    %90 = vector.shape_cast %89 : vector<1x16x128xbf16> to vector<16x128xbf16>
    %91 = vector.shape_cast %88 : vector<16x128xbf16> to vector<1x16x128xbf16>
    tpu.vector_store %arg6[%c0_72, %c0_73, %c0_74], %91 {strides = array<i32>} : memref<2x16x128xbf16, #tpu.memory_space<vmem>>, vector<1x16x128xbf16>,
    %c1_75 = arith.constant 1 : index
    %c0_76 = arith.constant 0 : index
    %c0_77 = arith.constant 0 : index
    %92 = vector.load %arg7[%c1_75, %c0_76, %c0_77] : memref<2x16x128xf32, #tpu.memory_space<vmem>>, vector<1x16x128xf32>
    %93 = vector.shape_cast %92 : vector<1x16x128xf32> to vector<16x128xf32>
    %94 = vector.broadcast %77 : vector<1x128xf32> to vector<16x128xf32>
    %95 = arith.mulf %93, %94 : vector<16x128xf32>
    %96 = vector.broadcast %79 : vector<1x128xf32> to vector<16x128xf32>
    %97 = arith.addf %95, %96 : vector<16x128xf32>
    %cst_78 = arith.constant 0.000000e+00 : f32
    %98 = vector.broadcast %cst_78 : f32 to vector<16x128xf32>
    %99 = arith.maximumf %97, %98 : vector<16x128xf32>
    %100 = arith.truncf %99 : vector<16x128xf32> to vector<16x128xbf16>
    %c1_79 = arith.constant 1 : index
    %c0_80 = arith.constant 0 : index
    %c0_81 = arith.constant 0 : index
    %101 = vector.load %arg6[%c1_79, %c0_80, %c0_81] : memref<2x16x128xbf16, #tpu.memory_space<vmem>>, vector<1x16x128xbf16>
    %102 = vector.shape_cast %101 : vector<1x16x128xbf16> to vector<16x128xbf16>
    %103 = vector.shape_cast %100 : vector<16x128xbf16> to vector<1x16x128xbf16>
    tpu.vector_store %arg6[%c1_79, %c0_80, %c0_81], %103 {strides = array<i32>} : memref<2x16x128xbf16, #tpu.memory_space<vmem>>, vector<1x16x128xbf16>,
    return
  }
  func.func @transform_0(%arg0: i32) -> (i32, i32, i32) {
    %c0_i32 = arith.constant 0 : i32
    %c0_i32_0 = arith.constant 0 : i32
    %c0_i32_1 = arith.constant 0 : i32
    %c0_i32_2 = arith.constant 0 : i32
    return %c0_i32, %c0_i32_0, %c0_i32_1 : i32, i32, i32
  }
  func.func @transform_1(%arg0: i32) -> (i32, i32, i32) {
    %c0_i32 = arith.constant 0 : i32
    %c0_i32_0 = arith.constant 0 : i32
    %c0_i32_1 = arith.constant 0 : i32
    %c0_i32_2 = arith.constant 0 : i32
    return %c0_i32, %c0_i32_0, %c0_i32_1 : i32, i32, i32
  }
  func.func @transform_2(%arg0: i32) -> (i32, i32, i32) {
    %c0_i32 = arith.constant 0 : i32
    %c0_i32_0 = arith.constant 0 : i32
    %c0_i32_1 = arith.constant 0 : i32
    %c0_i32_2 = arith.constant 0 : i32
    return %c0_i32, %c0_i32_0, %c0_i32_1 : i32, i32, i32
  }
  func.func @transform_3(%arg0: i32) -> (i32, i32) {
    %c0_i32 = arith.constant 0 : i32
    %c0_i32_0 = arith.constant 0 : i32
    %c0_i32_1 = arith.constant 0 : i32
    return %c0_i32, %c0_i32_0 : i32, i32
  }
  func.func @transform_4(%arg0: i32) -> (i32, i32) {
    %c0_i32 = arith.constant 0 : i32
    %c0_i32_0 = arith.constant 0 : i32
    %c0_i32_1 = arith.constant 0 : i32
    return %c0_i32, %c0_i32_0 : i32, i32
  }
  func.func @transform_5(%arg0: i32) -> (i32, i32, i32) {
    %c0_i32 = arith.constant 0 : i32
    %c0_i32_0 = arith.constant 0 : i32
    %c0_i32_1 = arith.constant 0 : i32
    %c0_i32_2 = arith.constant 0 : i32
    return %c0_i32, %c0_i32_0, %c0_i32_1 : i32, i32, i32
  }
}

module attributes {stable_mosaic.version = 11 : i64} {
  func.func @_conv_bn_relu_kernel(%arg0: i32, %arg1: memref<2x6x192xbf16, #tpu.memory_space<vmem>>, %arg2: memref<2x6x192xbf16, #tpu.memory_space<vmem>>, %arg3: memref<3x192x128xbf16, #tpu.memory_space<vmem>>, %arg4: memref<1x128xf32, #tpu.memory_space<vmem>>, %arg5: memref<1x128xf32, #tpu.memory_space<vmem>>, %arg6: memref<2x4x128xbf16, #tpu.memory_space<vmem>>, %arg7: memref<2x4x128xf32, #tpu.memory_space<vmem>>) attributes {dimension_semantics = [#tpu.dimension_semantics<arbitrary>], iteration_bounds = array<i64: 1>, scalar_prefetch = 0 : i64, scratch_operands = 1 : i64, tpu.core_type = #tpu.core_type<tc>, window_params = [{pipeline_mode = #tpu.pipeline_mode<synchronous>, transform_indices = @transform_0, window_bounds = array<i64: 2, 6, 192>}, {pipeline_mode = #tpu.pipeline_mode<synchronous>, transform_indices = @transform_1, window_bounds = array<i64: 2, 6, 192>}, {pipeline_mode = #tpu.pipeline_mode<synchronous>, transform_indices = @transform_2, window_bounds = array<i64: 3, 192, 128>}, {pipeline_mode = #tpu.pipeline_mode<synchronous>, transform_indices = @transform_3, window_bounds = array<i64: 1, 128>}, {pipeline_mode = #tpu.pipeline_mode<synchronous>, transform_indices = @transform_4, window_bounds = array<i64: 1, 128>}, {pipeline_mode = #tpu.pipeline_mode<synchronous>, transform_indices = @transform_5, window_bounds = array<i64: 2, 4, 128>}]} {
    %c0 = arith.constant 0 : index
    %c0_0 = arith.constant 0 : index
    %c0_1 = arith.constant 0 : index
    %0 = vector.load %arg1[%c0, %c0_0, %c0_1] : memref<2x6x192xbf16, #tpu.memory_space<vmem>>, vector<1x4x192xbf16>
    %1 = vector.shape_cast %0 : vector<1x4x192xbf16> to vector<4x192xbf16>
    %c0_2 = arith.constant 0 : index
    %c0_3 = arith.constant 0 : index
    %c0_4 = arith.constant 0 : index
    %2 = vector.load %arg3[%c0_2, %c0_3, %c0_4] : memref<3x192x128xbf16, #tpu.memory_space<vmem>>, vector<1x192x128xbf16>
    %3 = vector.shape_cast %2 : vector<1x192x128xbf16> to vector<192x128xbf16>
    %cst = arith.constant dense<0.000000e+00> : vector<4x128xf32>
    %4 = tpu.matmul %1, %3, %cst {dimension_numbers = #tpu.dot_dimension_numbers<[1], [0], [0], [1], [0, 0, 1, 1], [], []>} : vector<4x192xbf16>, vector<192x128xbf16>, vector<4x128xf32> -> vector<4x128xf32>
    %c0_5 = arith.constant 0 : index
    %c0_6 = arith.constant 0 : index
    %c0_7 = arith.constant 0 : index
    %5 = vector.load %arg2[%c0_5, %c0_6, %c0_7] : memref<2x6x192xbf16, #tpu.memory_space<vmem>>, vector<1x4x192xbf16>
    %6 = vector.shape_cast %5 : vector<1x4x192xbf16> to vector<4x192xbf16>
    %c1 = arith.constant 1 : index
    %c0_8 = arith.constant 0 : index
    %c0_9 = arith.constant 0 : index
    %7 = vector.load %arg3[%c1, %c0_8, %c0_9] : memref<3x192x128xbf16, #tpu.memory_space<vmem>>, vector<1x192x128xbf16>
    %8 = vector.shape_cast %7 : vector<1x192x128xbf16> to vector<192x128xbf16>
    %cst_10 = arith.constant dense<0.000000e+00> : vector<4x128xf32>
    %9 = tpu.matmul %6, %8, %cst_10 {dimension_numbers = #tpu.dot_dimension_numbers<[1], [0], [0], [1], [0, 0, 1, 1], [], []>} : vector<4x192xbf16>, vector<192x128xbf16>, vector<4x128xf32> -> vector<4x128xf32>
    %10 = arith.addf %4, %9 : vector<4x128xf32>
    %c0_11 = arith.constant 0 : index
    %c2 = arith.constant 2 : index
    %c0_12 = arith.constant 0 : index
    %11 = vector.load %arg1[%c0_11, %c2, %c0_12] : memref<2x6x192xbf16, #tpu.memory_space<vmem>>, vector<1x4x192xbf16>
    %12 = vector.shape_cast %11 : vector<1x4x192xbf16> to vector<4x192xbf16>
    %c2_13 = arith.constant 2 : index
    %c0_14 = arith.constant 0 : index
    %c0_15 = arith.constant 0 : index
    %13 = vector.load %arg3[%c2_13, %c0_14, %c0_15] : memref<3x192x128xbf16, #tpu.memory_space<vmem>>, vector<1x192x128xbf16>
    %14 = vector.shape_cast %13 : vector<1x192x128xbf16> to vector<192x128xbf16>
    %cst_16 = arith.constant dense<0.000000e+00> : vector<4x128xf32>
    %15 = tpu.matmul %12, %14, %cst_16 {dimension_numbers = #tpu.dot_dimension_numbers<[1], [0], [0], [1], [0, 0, 1, 1], [], []>} : vector<4x192xbf16>, vector<192x128xbf16>, vector<4x128xf32> -> vector<4x128xf32>
    %16 = arith.addf %10, %15 : vector<4x128xf32>
    %c0_17 = arith.constant 0 : index
    %c0_18 = arith.constant 0 : index
    %c0_19 = arith.constant 0 : index
    %17 = vector.load %arg7[%c0_17, %c0_18, %c0_19] : memref<2x4x128xf32, #tpu.memory_space<vmem>>, vector<1x4x128xf32>
    %18 = vector.shape_cast %17 : vector<1x4x128xf32> to vector<4x128xf32>
    %19 = vector.shape_cast %16 : vector<4x128xf32> to vector<1x4x128xf32>
    tpu.vector_store %arg7[%c0_17, %c0_18, %c0_19], %19 {strides = array<i32>} : memref<2x4x128xf32, #tpu.memory_space<vmem>>, vector<1x4x128xf32>,
    %c1_20 = arith.constant 1 : index
    %c0_21 = arith.constant 0 : index
    %c0_22 = arith.constant 0 : index
    %20 = vector.load %arg1[%c1_20, %c0_21, %c0_22] : memref<2x6x192xbf16, #tpu.memory_space<vmem>>, vector<1x4x192xbf16>
    %21 = vector.shape_cast %20 : vector<1x4x192xbf16> to vector<4x192xbf16>
    %c0_23 = arith.constant 0 : index
    %c0_24 = arith.constant 0 : index
    %c0_25 = arith.constant 0 : index
    %22 = vector.load %arg3[%c0_23, %c0_24, %c0_25] : memref<3x192x128xbf16, #tpu.memory_space<vmem>>, vector<1x192x128xbf16>
    %23 = vector.shape_cast %22 : vector<1x192x128xbf16> to vector<192x128xbf16>
    %cst_26 = arith.constant dense<0.000000e+00> : vector<4x128xf32>
    %24 = tpu.matmul %21, %23, %cst_26 {dimension_numbers = #tpu.dot_dimension_numbers<[1], [0], [0], [1], [0, 0, 1, 1], [], []>} : vector<4x192xbf16>, vector<192x128xbf16>, vector<4x128xf32> -> vector<4x128xf32>
    %c1_27 = arith.constant 1 : index
    %c0_28 = arith.constant 0 : index
    %c0_29 = arith.constant 0 : index
    %25 = vector.load %arg2[%c1_27, %c0_28, %c0_29] : memref<2x6x192xbf16, #tpu.memory_space<vmem>>, vector<1x4x192xbf16>
    %26 = vector.shape_cast %25 : vector<1x4x192xbf16> to vector<4x192xbf16>
    %c1_30 = arith.constant 1 : index
    %c0_31 = arith.constant 0 : index
    %c0_32 = arith.constant 0 : index
    %27 = vector.load %arg3[%c1_30, %c0_31, %c0_32] : memref<3x192x128xbf16, #tpu.memory_space<vmem>>, vector<1x192x128xbf16>
    %28 = vector.shape_cast %27 : vector<1x192x128xbf16> to vector<192x128xbf16>
    %cst_33 = arith.constant dense<0.000000e+00> : vector<4x128xf32>
    %29 = tpu.matmul %26, %28, %cst_33 {dimension_numbers = #tpu.dot_dimension_numbers<[1], [0], [0], [1], [0, 0, 1, 1], [], []>} : vector<4x192xbf16>, vector<192x128xbf16>, vector<4x128xf32> -> vector<4x128xf32>
    %30 = arith.addf %24, %29 : vector<4x128xf32>
    %c1_34 = arith.constant 1 : index
    %c2_35 = arith.constant 2 : index
    %c0_36 = arith.constant 0 : index
    %31 = vector.load %arg1[%c1_34, %c2_35, %c0_36] : memref<2x6x192xbf16, #tpu.memory_space<vmem>>, vector<1x4x192xbf16>
    %32 = vector.shape_cast %31 : vector<1x4x192xbf16> to vector<4x192xbf16>
    %c2_37 = arith.constant 2 : index
    %c0_38 = arith.constant 0 : index
    %c0_39 = arith.constant 0 : index
    %33 = vector.load %arg3[%c2_37, %c0_38, %c0_39] : memref<3x192x128xbf16, #tpu.memory_space<vmem>>, vector<1x192x128xbf16>
    %34 = vector.shape_cast %33 : vector<1x192x128xbf16> to vector<192x128xbf16>
    %cst_40 = arith.constant dense<0.000000e+00> : vector<4x128xf32>
    %35 = tpu.matmul %32, %34, %cst_40 {dimension_numbers = #tpu.dot_dimension_numbers<[1], [0], [0], [1], [0, 0, 1, 1], [], []>} : vector<4x192xbf16>, vector<192x128xbf16>, vector<4x128xf32> -> vector<4x128xf32>
    %36 = arith.addf %30, %35 : vector<4x128xf32>
    %c1_41 = arith.constant 1 : index
    %c0_42 = arith.constant 0 : index
    %c0_43 = arith.constant 0 : index
    %37 = vector.load %arg7[%c1_41, %c0_42, %c0_43] : memref<2x4x128xf32, #tpu.memory_space<vmem>>, vector<1x4x128xf32>
    %38 = vector.shape_cast %37 : vector<1x4x128xf32> to vector<4x128xf32>
    %39 = vector.shape_cast %36 : vector<4x128xf32> to vector<1x4x128xf32>
    tpu.vector_store %arg7[%c1_41, %c0_42, %c0_43], %39 {strides = array<i32>} : memref<2x4x128xf32, #tpu.memory_space<vmem>>, vector<1x4x128xf32>,
    %c0_44 = arith.constant 0 : index
    %c0_45 = arith.constant 0 : index
    %40 = vector.load %arg4[%c0_44, %c0_45] : memref<1x128xf32, #tpu.memory_space<vmem>>, vector<1x128xf32>
    %c0_46 = arith.constant 0 : index
    %c0_47 = arith.constant 0 : index
    %41 = vector.load %arg5[%c0_46, %c0_47] : memref<1x128xf32, #tpu.memory_space<vmem>>, vector<1x128xf32>
    %cst_48 = arith.constant 0.000000e+00 : f32
    %42 = vector.broadcast %cst_48 : f32 to vector<1x128xf32>
    %c0_49 = arith.constant 0 : index
    %c0_50 = arith.constant 0 : index
    %c0_51 = arith.constant 0 : index
    %43 = vector.load %arg7[%c0_49, %c0_50, %c0_51] : memref<2x4x128xf32, #tpu.memory_space<vmem>>, vector<1x4x128xf32>
    %44 = vector.shape_cast %43 : vector<1x4x128xf32> to vector<4x128xf32>
    %cst_52 = arith.constant dense<0.000000e+00> : vector<128xf32>
    %45 = vector.multi_reduction <add>, %44, %cst_52 [0] : vector<4x128xf32> to vector<128xf32>
    %46 = vector.shape_cast %45 : vector<128xf32> to vector<1x128xf32>
    %47 = arith.addf %42, %46 : vector<1x128xf32>
    %c1_53 = arith.constant 1 : index
    %c0_54 = arith.constant 0 : index
    %c0_55 = arith.constant 0 : index
    %48 = vector.load %arg7[%c1_53, %c0_54, %c0_55] : memref<2x4x128xf32, #tpu.memory_space<vmem>>, vector<1x4x128xf32>
    %49 = vector.shape_cast %48 : vector<1x4x128xf32> to vector<4x128xf32>
    %cst_56 = arith.constant dense<0.000000e+00> : vector<128xf32>
    %50 = vector.multi_reduction <add>, %49, %cst_56 [0] : vector<4x128xf32> to vector<128xf32>
    %51 = vector.shape_cast %50 : vector<128xf32> to vector<1x128xf32>
    %52 = arith.addf %47, %51 : vector<1x128xf32>
    %cst_57 = arith.constant 1.250000e-01 : f32
    %53 = vector.broadcast %cst_57 : f32 to vector<1x128xf32>
    %54 = arith.mulf %52, %53 : vector<1x128xf32>
    %cst_58 = arith.constant 0.000000e+00 : f32
    %55 = vector.broadcast %cst_58 : f32 to vector<1x128xf32>
    %c0_59 = arith.constant 0 : index
    %c0_60 = arith.constant 0 : index
    %c0_61 = arith.constant 0 : index
    %56 = vector.load %arg7[%c0_59, %c0_60, %c0_61] : memref<2x4x128xf32, #tpu.memory_space<vmem>>, vector<1x4x128xf32>
    %57 = vector.shape_cast %56 : vector<1x4x128xf32> to vector<4x128xf32>
    %58 = vector.broadcast %54 : vector<1x128xf32> to vector<4x128xf32>
    %59 = arith.subf %57, %58 : vector<4x128xf32>
    %60 = arith.mulf %59, %59 : vector<4x128xf32>
    %cst_62 = arith.constant dense<0.000000e+00> : vector<128xf32>
    %61 = vector.multi_reduction <add>, %60, %cst_62 [0] : vector<4x128xf32> to vector<128xf32>
    %62 = vector.shape_cast %61 : vector<128xf32> to vector<1x128xf32>
    %63 = arith.addf %55, %62 : vector<1x128xf32>
    %c1_63 = arith.constant 1 : index
    %c0_64 = arith.constant 0 : index
    %c0_65 = arith.constant 0 : index
    %64 = vector.load %arg7[%c1_63, %c0_64, %c0_65] : memref<2x4x128xf32, #tpu.memory_space<vmem>>, vector<1x4x128xf32>
    %65 = vector.shape_cast %64 : vector<1x4x128xf32> to vector<4x128xf32>
    %66 = vector.broadcast %54 : vector<1x128xf32> to vector<4x128xf32>
    %67 = arith.subf %65, %66 : vector<4x128xf32>
    %68 = arith.mulf %67, %67 : vector<4x128xf32>
    %cst_66 = arith.constant dense<0.000000e+00> : vector<128xf32>
    %69 = vector.multi_reduction <add>, %68, %cst_66 [0] : vector<4x128xf32> to vector<128xf32>
    %70 = vector.shape_cast %69 : vector<128xf32> to vector<1x128xf32>
    %71 = arith.addf %63, %70 : vector<1x128xf32>
    %cst_67 = arith.constant 1.250000e-01 : f32
    %72 = vector.broadcast %cst_67 : f32 to vector<1x128xf32>
    %73 = arith.mulf %71, %72 : vector<1x128xf32>
    %cst_68 = arith.constant 9.99999974E-6 : f32
    %74 = vector.broadcast %cst_68 : f32 to vector<1x128xf32>
    %75 = arith.addf %73, %74 : vector<1x128xf32>
    %76 = math.rsqrt %75 : vector<1x128xf32>
    %77 = arith.mulf %40, %76 : vector<1x128xf32>
    %78 = arith.mulf %54, %77 : vector<1x128xf32>
    %79 = arith.subf %41, %78 : vector<1x128xf32>
    %c0_69 = arith.constant 0 : index
    %c0_70 = arith.constant 0 : index
    %c0_71 = arith.constant 0 : index
    %80 = vector.load %arg7[%c0_69, %c0_70, %c0_71] : memref<2x4x128xf32, #tpu.memory_space<vmem>>, vector<1x4x128xf32>
    %81 = vector.shape_cast %80 : vector<1x4x128xf32> to vector<4x128xf32>
    %82 = vector.broadcast %77 : vector<1x128xf32> to vector<4x128xf32>
    %83 = arith.mulf %81, %82 : vector<4x128xf32>
    %84 = vector.broadcast %79 : vector<1x128xf32> to vector<4x128xf32>
    %85 = arith.addf %83, %84 : vector<4x128xf32>
    %cst_72 = arith.constant 0.000000e+00 : f32
    %86 = vector.broadcast %cst_72 : f32 to vector<4x128xf32>
    %87 = arith.maximumf %85, %86 : vector<4x128xf32>
    %88 = arith.truncf %87 : vector<4x128xf32> to vector<4x128xbf16>
    %c0_73 = arith.constant 0 : index
    %c0_74 = arith.constant 0 : index
    %c0_75 = arith.constant 0 : index
    %89 = vector.load %arg6[%c0_73, %c0_74, %c0_75] : memref<2x4x128xbf16, #tpu.memory_space<vmem>>, vector<1x4x128xbf16>
    %90 = vector.shape_cast %89 : vector<1x4x128xbf16> to vector<4x128xbf16>
    %91 = vector.shape_cast %88 : vector<4x128xbf16> to vector<1x4x128xbf16>
    tpu.vector_store %arg6[%c0_73, %c0_74, %c0_75], %91 {strides = array<i32>} : memref<2x4x128xbf16, #tpu.memory_space<vmem>>, vector<1x4x128xbf16>,
    %c1_76 = arith.constant 1 : index
    %c0_77 = arith.constant 0 : index
    %c0_78 = arith.constant 0 : index
    %92 = vector.load %arg7[%c1_76, %c0_77, %c0_78] : memref<2x4x128xf32, #tpu.memory_space<vmem>>, vector<1x4x128xf32>
    %93 = vector.shape_cast %92 : vector<1x4x128xf32> to vector<4x128xf32>
    %94 = vector.broadcast %77 : vector<1x128xf32> to vector<4x128xf32>
    %95 = arith.mulf %93, %94 : vector<4x128xf32>
    %96 = vector.broadcast %79 : vector<1x128xf32> to vector<4x128xf32>
    %97 = arith.addf %95, %96 : vector<4x128xf32>
    %cst_79 = arith.constant 0.000000e+00 : f32
    %98 = vector.broadcast %cst_79 : f32 to vector<4x128xf32>
    %99 = arith.maximumf %97, %98 : vector<4x128xf32>
    %100 = arith.truncf %99 : vector<4x128xf32> to vector<4x128xbf16>
    %c1_80 = arith.constant 1 : index
    %c0_81 = arith.constant 0 : index
    %c0_82 = arith.constant 0 : index
    %101 = vector.load %arg6[%c1_80, %c0_81, %c0_82] : memref<2x4x128xbf16, #tpu.memory_space<vmem>>, vector<1x4x128xbf16>
    %102 = vector.shape_cast %101 : vector<1x4x128xbf16> to vector<4x128xbf16>
    %103 = vector.shape_cast %100 : vector<4x128xbf16> to vector<1x4x128xbf16>
    tpu.vector_store %arg6[%c1_80, %c0_81, %c0_82], %103 {strides = array<i32>} : memref<2x4x128xbf16, #tpu.memory_space<vmem>>, vector<1x4x128xbf16>,
    return
  }
  func.func @transform_0(%arg0: i32) -> (i32, i32, i32) {
    %c0_i32 = arith.constant 0 : i32
    %c0_i32_0 = arith.constant 0 : i32
    %c0_i32_1 = arith.constant 0 : i32
    %c0_i32_2 = arith.constant 0 : i32
    return %c0_i32, %c0_i32_0, %c0_i32_1 : i32, i32, i32
  }
  func.func @transform_1(%arg0: i32) -> (i32, i32, i32) {
    %c0_i32 = arith.constant 0 : i32
    %c0_i32_0 = arith.constant 0 : i32
    %c0_i32_1 = arith.constant 0 : i32
    %c0_i32_2 = arith.constant 0 : i32
    return %c0_i32, %c0_i32_0, %c0_i32_1 : i32, i32, i32
  }
  func.func @transform_2(%arg0: i32) -> (i32, i32, i32) {
    %c0_i32 = arith.constant 0 : i32
    %c0_i32_0 = arith.constant 0 : i32
    %c0_i32_1 = arith.constant 0 : i32
    %c0_i32_2 = arith.constant 0 : i32
    return %c0_i32, %c0_i32_0, %c0_i32_1 : i32, i32, i32
  }
  func.func @transform_3(%arg0: i32) -> (i32, i32) {
    %c0_i32 = arith.constant 0 : i32
    %c0_i32_0 = arith.constant 0 : i32
    %c0_i32_1 = arith.constant 0 : i32
    return %c0_i32, %c0_i32_0 : i32, i32
  }
  func.func @transform_4(%arg0: i32) -> (i32, i32) {
    %c0_i32 = arith.constant 0 : i32
    %c0_i32_0 = arith.constant 0 : i32
    %c0_i32_1 = arith.constant 0 : i32
    return %c0_i32, %c0_i32_0 : i32, i32
  }
  func.func @transform_5(%arg0: i32) -> (i32, i32, i32) {
    %c0_i32 = arith.constant 0 : i32
    %c0_i32_0 = arith.constant 0 : i32
    %c0_i32_1 = arith.constant 0 : i32
    %c0_i32_2 = arith.constant 0 : i32
    return %c0_i32, %c0_i32_0, %c0_i32_1 : i32, i32, i32
  }
}

module attributes {stable_mosaic.version = 11 : i64} {
  func.func @_tail_kernel(%arg0: i32, %arg1: memref<2x1152xbf16, #tpu.memory_space<vmem>>, %arg2: memref<1152x256xbf16, #tpu.memory_space<vmem>>, %arg3: memref<1x256xf32, #tpu.memory_space<vmem>>, %arg4: memref<1x256xf32, #tpu.memory_space<vmem>>, %arg5: memref<256x1024xbf16, #tpu.memory_space<vmem>>, %arg6: memref<1x1024xf32, #tpu.memory_space<vmem>>, %arg7: memref<1x1024xf32, #tpu.memory_space<vmem>>, %arg8: memref<1024x128xbf16, #tpu.memory_space<vmem>>, %arg9: memref<1x128xf32, #tpu.memory_space<vmem>>, %arg10: memref<2x256xf32, #tpu.memory_space<vmem>>, %arg11: memref<2x1024xf32, #tpu.memory_space<vmem>>, %arg12: memref<2x128xf32, #tpu.memory_space<vmem>>) attributes {dimension_semantics = [#tpu.dimension_semantics<arbitrary>], iteration_bounds = array<i64: 1>, scalar_prefetch = 0 : i64, scratch_operands = 0 : i64, tpu.core_type = #tpu.core_type<tc>, window_params = [{pipeline_mode = #tpu.pipeline_mode<synchronous>, transform_indices = @transform_0, window_bounds = array<i64: 2, 1152>}, {pipeline_mode = #tpu.pipeline_mode<synchronous>, transform_indices = @transform_1, window_bounds = array<i64: 1152, 256>}, {pipeline_mode = #tpu.pipeline_mode<synchronous>, transform_indices = @transform_2, window_bounds = array<i64: 1, 256>}, {pipeline_mode = #tpu.pipeline_mode<synchronous>, transform_indices = @transform_3, window_bounds = array<i64: 1, 256>}, {pipeline_mode = #tpu.pipeline_mode<synchronous>, transform_indices = @transform_4, window_bounds = array<i64: 256, 1024>}, {pipeline_mode = #tpu.pipeline_mode<synchronous>, transform_indices = @transform_5, window_bounds = array<i64: 1, 1024>}, {pipeline_mode = #tpu.pipeline_mode<synchronous>, transform_indices = @transform_6, window_bounds = array<i64: 1, 1024>}, {pipeline_mode = #tpu.pipeline_mode<synchronous>, transform_indices = @transform_7, window_bounds = array<i64: 1024, 128>}, {pipeline_mode = #tpu.pipeline_mode<synchronous>, transform_indices = @transform_8, window_bounds = array<i64: 1, 128>}, {pipeline_mode = #tpu.pipeline_mode<synchronous>, transform_indices = @transform_9, window_bounds = array<i64: 2, 256>}, {pipeline_mode = #tpu.pipeline_mode<synchronous>, transform_indices = @transform_10, window_bounds = array<i64: 2, 1024>}, {pipeline_mode = #tpu.pipeline_mode<synchronous>, transform_indices = @transform_11, window_bounds = array<i64: 2, 128>}]} {
    %c0 = arith.constant 0 : index
    %c0_0 = arith.constant 0 : index
    %0 = vector.load %arg1[%c0, %c0_0] : memref<2x1152xbf16, #tpu.memory_space<vmem>>, vector<2x1152xbf16>
    %c0_1 = arith.constant 0 : index
    %c0_2 = arith.constant 0 : index
    %1 = vector.load %arg2[%c0_1, %c0_2] : memref<1152x256xbf16, #tpu.memory_space<vmem>>, vector<1152x256xbf16>
    %cst = arith.constant dense<0.000000e+00> : vector<2x256xf32>
    %2 = tpu.matmul %0, %1, %cst {dimension_numbers = #tpu.dot_dimension_numbers<[1], [0], [0], [1], [0, 0, 1, 1], [], []>} : vector<2x1152xbf16>, vector<1152x256xbf16>, vector<2x256xf32> -> vector<2x256xf32>
    %c0_3 = arith.constant 0 : index
    %c0_4 = arith.constant 0 : index
    %3 = vector.load %arg3[%c0_3, %c0_4] : memref<1x256xf32, #tpu.memory_space<vmem>>, vector<1x256xf32>
    %c0_5 = arith.constant 0 : index
    %c0_6 = arith.constant 0 : index
    %4 = vector.load %arg4[%c0_5, %c0_6] : memref<1x256xf32, #tpu.memory_space<vmem>>, vector<1x256xf32>
    %cst_7 = arith.constant dense<0.000000e+00> : vector<256xf32>
    %5 = vector.multi_reduction <add>, %2, %cst_7 [0] : vector<2x256xf32> to vector<256xf32>
    %6 = vector.shape_cast %5 : vector<256xf32> to vector<1x256xf32>
    %cst_8 = arith.constant 2.000000e+00 : f32
    %7 = vector.broadcast %cst_8 : f32 to vector<1x256xf32>
    %8 = arith.divf %6, %7 : vector<1x256xf32>
    %9 = vector.broadcast %8 : vector<1x256xf32> to vector<2x256xf32>
    %10 = arith.subf %2, %9 : vector<2x256xf32>
    %11 = arith.mulf %10, %10 : vector<2x256xf32>
    %cst_9 = arith.constant dense<0.000000e+00> : vector<256xf32>
    %12 = vector.multi_reduction <add>, %11, %cst_9 [0] : vector<2x256xf32> to vector<256xf32>
    %13 = vector.shape_cast %12 : vector<256xf32> to vector<1x256xf32>
    %cst_10 = arith.constant 2.000000e+00 : f32
    %14 = vector.broadcast %cst_10 : f32 to vector<1x256xf32>
    %15 = arith.divf %13, %14 : vector<1x256xf32>
    %cst_11 = arith.constant 9.99999974E-6 : f32
    %16 = vector.broadcast %cst_11 : f32 to vector<1x256xf32>
    %17 = arith.addf %15, %16 : vector<1x256xf32>
    %18 = math.rsqrt %17 : vector<1x256xf32>
    %19 = vector.broadcast %18 : vector<1x256xf32> to vector<2x256xf32>
    %20 = arith.mulf %10, %19 : vector<2x256xf32>
    %21 = vector.broadcast %3 : vector<1x256xf32> to vector<2x256xf32>
    %22 = arith.mulf %20, %21 : vector<2x256xf32>
    %23 = vector.broadcast %4 : vector<1x256xf32> to vector<2x256xf32>
    %24 = arith.addf %22, %23 : vector<2x256xf32>
    %cst_12 = arith.constant 0.000000e+00 : f32
    %25 = vector.broadcast %cst_12 : f32 to vector<2x256xf32>
    %26 = arith.maximumf %24, %25 : vector<2x256xf32>
    %c0_13 = arith.constant 0 : index
    %c0_14 = arith.constant 0 : index
    %27 = vector.load %arg10[%c0_13, %c0_14] : memref<2x256xf32, #tpu.memory_space<vmem>>, vector<2x256xf32>
    tpu.vector_store %arg10[%c0_13, %c0_14], %26 {strides = array<i32>} : memref<2x256xf32, #tpu.memory_space<vmem>>, vector<2x256xf32>,
    %28 = arith.truncf %26 : vector<2x256xf32> to vector<2x256xbf16>
    %c0_15 = arith.constant 0 : index
    %c0_16 = arith.constant 0 : index
    %29 = vector.load %arg5[%c0_15, %c0_16] : memref<256x1024xbf16, #tpu.memory_space<vmem>>, vector<256x1024xbf16>
    %cst_17 = arith.constant dense<0.000000e+00> : vector<2x1024xf32>
    %30 = tpu.matmul %28, %29, %cst_17 {dimension_numbers = #tpu.dot_dimension_numbers<[1], [0], [0], [1], [0, 0, 1, 1], [], []>} : vector<2x256xbf16>, vector<256x1024xbf16>, vector<2x1024xf32> -> vector<2x1024xf32>
    %c0_18 = arith.constant 0 : index
    %c0_19 = arith.constant 0 : index
    %31 = vector.load %arg6[%c0_18, %c0_19] : memref<1x1024xf32, #tpu.memory_space<vmem>>, vector<1x1024xf32>
    %c0_20 = arith.constant 0 : index
    %c0_21 = arith.constant 0 : index
    %32 = vector.load %arg7[%c0_20, %c0_21] : memref<1x1024xf32, #tpu.memory_space<vmem>>, vector<1x1024xf32>
    %cst_22 = arith.constant dense<0.000000e+00> : vector<1024xf32>
    %33 = vector.multi_reduction <add>, %30, %cst_22 [0] : vector<2x1024xf32> to vector<1024xf32>
    %34 = vector.shape_cast %33 : vector<1024xf32> to vector<1x1024xf32>
    %cst_23 = arith.constant 2.000000e+00 : f32
    %35 = vector.broadcast %cst_23 : f32 to vector<1x1024xf32>
    %36 = arith.divf %34, %35 : vector<1x1024xf32>
    %37 = vector.broadcast %36 : vector<1x1024xf32> to vector<2x1024xf32>
    %38 = arith.subf %30, %37 : vector<2x1024xf32>
    %39 = arith.mulf %38, %38 : vector<2x1024xf32>
    %cst_24 = arith.constant dense<0.000000e+00> : vector<1024xf32>
    %40 = vector.multi_reduction <add>, %39, %cst_24 [0] : vector<2x1024xf32> to vector<1024xf32>
    %41 = vector.shape_cast %40 : vector<1024xf32> to vector<1x1024xf32>
    %cst_25 = arith.constant 2.000000e+00 : f32
    %42 = vector.broadcast %cst_25 : f32 to vector<1x1024xf32>
    %43 = arith.divf %41, %42 : vector<1x1024xf32>
    %cst_26 = arith.constant 9.99999974E-6 : f32
    %44 = vector.broadcast %cst_26 : f32 to vector<1x1024xf32>
    %45 = arith.addf %43, %44 : vector<1x1024xf32>
    %46 = math.rsqrt %45 : vector<1x1024xf32>
    %47 = vector.broadcast %46 : vector<1x1024xf32> to vector<2x1024xf32>
    %48 = arith.mulf %38, %47 : vector<2x1024xf32>
    %49 = vector.broadcast %31 : vector<1x1024xf32> to vector<2x1024xf32>
    %50 = arith.mulf %48, %49 : vector<2x1024xf32>
    %51 = vector.broadcast %32 : vector<1x1024xf32> to vector<2x1024xf32>
    %52 = arith.addf %50, %51 : vector<2x1024xf32>
    %cst_27 = arith.constant 0.000000e+00 : f32
    %53 = vector.broadcast %cst_27 : f32 to vector<2x1024xf32>
    %54 = arith.maximumf %52, %53 : vector<2x1024xf32>
    %c0_28 = arith.constant 0 : index
    %c0_29 = arith.constant 0 : index
    %55 = vector.load %arg11[%c0_28, %c0_29] : memref<2x1024xf32, #tpu.memory_space<vmem>>, vector<2x1024xf32>
    tpu.vector_store %arg11[%c0_28, %c0_29], %54 {strides = array<i32>} : memref<2x1024xf32, #tpu.memory_space<vmem>>, vector<2x1024xf32>,
    %56 = arith.truncf %54 : vector<2x1024xf32> to vector<2x1024xbf16>
    %c0_30 = arith.constant 0 : index
    %c0_31 = arith.constant 0 : index
    %57 = vector.load %arg8[%c0_30, %c0_31] : memref<1024x128xbf16, #tpu.memory_space<vmem>>, vector<1024x128xbf16>
    %cst_32 = arith.constant dense<0.000000e+00> : vector<2x128xf32>
    %58 = tpu.matmul %56, %57, %cst_32 {dimension_numbers = #tpu.dot_dimension_numbers<[1], [0], [0], [1], [0, 0, 1, 1], [], []>} : vector<2x1024xbf16>, vector<1024x128xbf16>, vector<2x128xf32> -> vector<2x128xf32>
    %c0_33 = arith.constant 0 : index
    %c0_34 = arith.constant 0 : index
    %59 = vector.load %arg9[%c0_33, %c0_34] : memref<1x128xf32, #tpu.memory_space<vmem>>, vector<1x128xf32>
    %60 = vector.broadcast %59 : vector<1x128xf32> to vector<2x128xf32>
    %61 = arith.addf %58, %60 : vector<2x128xf32>
    %c0_35 = arith.constant 0 : index
    %c0_36 = arith.constant 0 : index
    %62 = vector.load %arg12[%c0_35, %c0_36] : memref<2x128xf32, #tpu.memory_space<vmem>>, vector<2x128xf32>
    tpu.vector_store %arg12[%c0_35, %c0_36], %61 {strides = array<i32>} : memref<2x128xf32, #tpu.memory_space<vmem>>, vector<2x128xf32>,
    return
  }
  func.func @transform_0(%arg0: i32) -> (i32, i32) {
    %c0_i32 = arith.constant 0 : i32
    %c0_i32_0 = arith.constant 0 : i32
    %c0_i32_1 = arith.constant 0 : i32
    return %c0_i32, %c0_i32_0 : i32, i32
  }
  func.func @transform_1(%arg0: i32) -> (i32, i32) {
    %c0_i32 = arith.constant 0 : i32
    %c0_i32_0 = arith.constant 0 : i32
    %c0_i32_1 = arith.constant 0 : i32
    return %c0_i32, %c0_i32_0 : i32, i32
  }
  func.func @transform_2(%arg0: i32) -> (i32, i32) {
    %c0_i32 = arith.constant 0 : i32
    %c0_i32_0 = arith.constant 0 : i32
    %c0_i32_1 = arith.constant 0 : i32
    return %c0_i32, %c0_i32_0 : i32, i32
  }
  func.func @transform_3(%arg0: i32) -> (i32, i32) {
    %c0_i32 = arith.constant 0 : i32
    %c0_i32_0 = arith.constant 0 : i32
    %c0_i32_1 = arith.constant 0 : i32
    return %c0_i32, %c0_i32_0 : i32, i32
  }
  func.func @transform_4(%arg0: i32) -> (i32, i32) {
    %c0_i32 = arith.constant 0 : i32
    %c0_i32_0 = arith.constant 0 : i32
    %c0_i32_1 = arith.constant 0 : i32
    return %c0_i32, %c0_i32_0 : i32, i32
  }
  func.func @transform_5(%arg0: i32) -> (i32, i32) {
    %c0_i32 = arith.constant 0 : i32
    %c0_i32_0 = arith.constant 0 : i32
    %c0_i32_1 = arith.constant 0 : i32
    return %c0_i32, %c0_i32_0 : i32, i32
  }
  func.func @transform_6(%arg0: i32) -> (i32, i32) {
    %c0_i32 = arith.constant 0 : i32
    %c0_i32_0 = arith.constant 0 : i32
    %c0_i32_1 = arith.constant 0 : i32
    return %c0_i32, %c0_i32_0 : i32, i32
  }
  func.func @transform_7(%arg0: i32) -> (i32, i32) {
    %c0_i32 = arith.constant 0 : i32
    %c0_i32_0 = arith.constant 0 : i32
    %c0_i32_1 = arith.constant 0 : i32
    return %c0_i32, %c0_i32_0 : i32, i32
  }
  func.func @transform_8(%arg0: i32) -> (i32, i32) {
    %c0_i32 = arith.constant 0 : i32
    %c0_i32_0 = arith.constant 0 : i32
    %c0_i32_1 = arith.constant 0 : i32
    return %c0_i32, %c0_i32_0 : i32, i32
  }
  func.func @transform_9(%arg0: i32) -> (i32, i32) {
    %c0_i32 = arith.constant 0 : i32
    %c0_i32_0 = arith.constant 0 : i32
    %c0_i32_1 = arith.constant 0 : i32
    return %c0_i32, %c0_i32_0 : i32, i32
  }
  func.func @transform_10(%arg0: i32) -> (i32, i32) {
    %c0_i32 = arith.constant 0 : i32
    %c0_i32_0 = arith.constant 0 : i32
    %c0_i32_1 = arith.constant 0 : i32
    return %c0_i32, %c0_i32_0 : i32, i32
  }
  func.func @transform_11(%arg0: i32) -> (i32, i32) {
    %c0_i32 = arith.constant 0 : i32
    %c0_i32_0 = arith.constant 0 : i32
    %c0_i32_1 = arith.constant 0 : i32
    return %c0_i32, %c0_i32_0 : i32, i32
  }
}

</mosaic_0001>

<bundles_post_ra>
// kernel: representations_pathology_forward.6
= control target key start
LH: loop header
LB: loop body
LE: loop exit
PB: predicated region body
PF: predicated region fallthrough
CT: control target
= control target key end

     0   :  { %vm88_vm0 = vcmask 392192   ;;  %s1779_s2 = inlined_call_operand.vmem [shape: bf16[3,48,128], index: 2, kind: input, shape index: {}]   ;;  %s1780_s1 = inlined_call_operand.vmem [shape: bf16[2,72,48], index: 1, kind: input, shape index: {}]   ;;  %s1781_s0 = inlined_call_operand.vmem [shape: bf16[2,72,48], index: 0, kind: input, shape index: {}]   ;;  %s1782_s3 = inlined_call_operand.vmem [shape: f32[1,128], index: 3, kind: input, shape index: {}]   ;;  %s1783_s4 = inlined_call_operand.vmem [shape: f32[1,128], index: 4, kind: input, shape index: {}]   ;;  %s1784_s5 = inlined_call_operand.vmem [shape: bf16[2,64,128], index: 5, kind: output, shape index: {}]  }
   0x1   :  { %v1426_v0 = vld [vmem:[%s1779_s2 + $0x28] sm:$0xff]   ;;  %v1427_v1 = vld [vmem:[%s1779_s2 + $0x10] sm:$0xff]   ;;  %v1428_v2 = vld [vmem:[%s1779_s2 + $0x20] sm:$0xff]  }
   0x2   :  { %1342 = vmatprep.subr.bf16.mxu0 %v1426_v0  ;;  %1356 = vmatprep.subr.bf16.mxu1 %v1427_v1  ;;  %v1429_v3 = vld [vmem:[%s1779_s2 + $0x8] sm:$0xff]   ;;  %v1430_v4 = vld [vmem:[%s1779_s2 + $0x18] sm:$0xff]   ;;  %v1431_v5 = vld [vmem:[%s1779_s2] sm:$0xff]  }
   0x3   :  { %1343 = vmatpush3.bf16.msra.mxu0 %v1426_v0  ;;  %1357 = vmatpush3.bf16.msra.mxu1 %v1427_v1  ;;  %v1432_v6 = vld [vmem:[%s1780_s1] sm:$0xff]   ;;  %v1434_v8 = vld [vmem:[%s1780_s1 + $0x8] sm:$0xff]   ;;  %v1438_v12 = vld [vmem:[%s1779_s2 + $0x38] sm:$0xff]  }
   0x4   :  { %1344 = vmatprep.subr.bf16.mxu0 %v1428_v2  ;;  %1358 = vmatprep.subr.bf16.mxu1 %v1429_v3  ;;  %v1433_v7 = vld [vmem:[%s1781_s0] sm:$0xff]   ;;  %v1435_v9 = vld [vmem:[%s1781_s0 + $0x8] sm:$0xff]   ;;  %v1439_v13 = vld [vmem:[%s1780_s1 + $0x10] sm:$0xff]  }
   0x5   :  { %1348 = vmatprep.mubr.msk.bf16.mxu0 %vm88_vm0, %v1432_v6  ;;  %1362 = vmatprep.mubr.msk.bf16.mxu1 %vm88_vm0, %v1433_v7  ;;  %v1436_v10 = vld [vmem:[%s1779_s2 + $0x40] sm:$0xff]   ;;  %v1437_v11 = vld [vmem:[%s1779_s2 + $0x28] sm:$0xff]   ;;  %v1440_v14 = vld [vmem:[%s1781_s0 + $0x10] sm:$0xff]  }
   0x6   :  { %v1441_v15 = vld [vmem:[%s1780_s1 + $0x18] sm:$0xff]   ;;  %v1443_v17 = vld [vmem:[%s1779_s2 + $0x20] sm:$0xff]   ;;  %v1444_v18 = vld [vmem:[%s1779_s2 + $0x30] sm:$0xff]  }
   0x7   :  { %1345 = vmatpush3.bf16.msra.mxu0 %v1428_v2  ;;  %1359 = vmatpush3.bf16.msra.mxu1 %v1429_v3  ;;  %v1442_v16 = vld [vmem:[%s1781_s0 + $0x18] sm:$0xff]   ;;  %v1446_v20 = vld [vmem:[%s1781_s0 + $0x4] sm:$0xff]   ;;  %v1448_v22 = vld [vmem:[%s1781_s0 + $0xc] sm:$0xff]  }
   0x8   :  { %1346 = vmatprep.subr.bf16.mxu0 %v1430_v4  ;;  %1360 = vmatprep.subr.bf16.mxu1 %v1431_v5  ;;  %v1445_v19 = vld [vmem:[%s1779_s2 + $0x18] sm:$0xff]   ;;  %v1447_v21 = vld [vmem:[%s1780_s1 + $0x24] sm:$0xff]   ;;  %v1450_v23 = vld [vmem:[%s1779_s2 + $0x10] sm:$0xff]  }
   0x9   :  { %v1451_v24 = vld [vmem:[%s1779_s2 + $0x40] sm:$0xff]   ;;  %v1449_v25 = vld [vmem:[%s1780_s1 + $0x2c] sm:$0xff]   ;;  %v1453_v27 = vld [vmem:[%s1781_s0 + $0x14] sm:$0xff]  }
   0xa   :  { %v1452_v26 = vld [vmem:[%s1779_s2 + $0x8] sm:$0xff]   ;;  %v1454_v28 = vld [vmem:[%s1780_s1 + $0x34] sm:$0xff]   ;;  %v1458_v30 = vld [vmem:[%s1779_s2] sm:$0xff]  }
   0xb   :  { %1347 = vmatpush3.bf16.msra.mxu0 %v1430_v4  ;;  %1361 = vmatpush3.bf16.msra.mxu1 %v1431_v5  ;;  %v1457_v29 = vld [vmem:[%s1779_s2 + $0x38] sm:$0xff]   ;;  %v1459_v31 = vld [vmem:[%s1779_s2 + $0x30] sm:$0xff]   ;;  %v1460_v34 = vld [vmem:[%s1781_s0 + $0x24] sm:$0xff]  }
   0xc   :  { %1370 = vmatprep.subr.bf16.mxu0 %v1436_v10  ;;  %1384 = vmatprep.subr.bf16.mxu1 %v1437_v11  ;;  %v1455_v32 = vld [vmem:[%s1781_s0 + $0x1c] sm:$0xff]   ;;  %v1461_v35 = vld [vmem:[%s1781_s0 + $0x28] sm:$0xff]   ;;  %v1463_v37 = vld [vmem:[%s1781_s0 + $0x30] sm:$0xff]  }
   0xd   :  { %v1456_v33 = vld [vmem:[%s1780_s1 + $0x3c] sm:$0xff]   ;;  %v1462_v36 = vld [vmem:[%s1781_s0 + $0x2c] sm:$0xff]   ;;  %v1464_v38 = vld [vmem:[%s1781_s0 + $0x34] sm:$0xff]  }
   0xe   :  { %1349 = vmatmul.mubr.msk.bf16.vlgmr.msra.gmra.mxu0 %vm88_vm0, %v1434_v8  ;;  %1363 = vmatmul.mubr.msk.bf16.vlgmr.msra.gmra.mxu1 %vm88_vm0, %v1435_v9  ;;  %v1465_v39 = vld [vmem:[%s1781_s0 + $0x38] sm:$0xff]   ;;  %v1467_v41 = vld [vmem:[%s1781_s0 + $0x40] sm:$0xff]  }
   0xf   :  { %1371 = vmatpush3.bf16.msra.mxu0 %v1436_v10  ;;  %1385 = vmatpush3.bf16.msra.mxu1 %v1437_v11  ;;  %v1466_v40 = vld [vmem:[%s1781_s0 + $0x3c] sm:$0xff]  }
  0x10   :  { %1372 = vmatprep.subr.bf16.mxu0 %v1438_v12  ;;  %1352 = vmatprep.mubr.msk.bf16.mxu0 %vm88_vm0, %v1439_v13 }
  0x11   :  { %1366 = vmatprep.mubr.msk.bf16.mxu1 %vm88_vm0, %v1440_v14  ;;  %1386 = vmatprep.subr.bf16.mxu1 %v1443_v17 }
  0x13   :  { %1373 = vmatpush3.bf16.msra.mxu0 %v1438_v12  ;;  %1387 = vmatpush3.bf16.msra.mxu1 %v1443_v17 }
  0x14   :  { %1374 = vmatprep.subr.bf16.mxu0 %v1444_v18  ;;  %1388 = vmatprep.subr.bf16.mxu1 %v1445_v19 }
  0x16   :  { %1353 = vmatmul.mubr.msk.bf16.gmra.mxu0 %vm88_vm0, %v1441_v15  ;;  %1367 = vmatmul.mubr.msk.bf16.gmra.mxu1 %vm88_vm0, %v1442_v16 }
  0x17   :  { %1375 = vmatpush3.bf16.msra.mxu0 %v1444_v18  ;;  %1389 = vmatpush3.bf16.msra.mxu1 %v1445_v19 }
  0x18   :  { %1376 = vmatprep.mubr.msk.bf16.mxu0 %vm88_vm0, %v1446_v20  ;;  %1390 = vmatprep.mubr.msk.bf16.mxu1 %vm88_vm0, %v1447_v21 }
  0x19   :  { %1398 = vmatprep.subr.bf16.mxu0 %v1450_v23  ;;  %1412 = vmatprep.subr.bf16.mxu1 %v1451_v24 }
  0x1e   :  { %1377 = vmatmul.mubr.msk.bf16.vlgmr.msra.gmra.mxu0 %vm88_vm0, %v1448_v22  ;;  %1391 = vmatmul.mubr.msk.bf16.vlgmr.msra.gmra.mxu1 %vm88_vm0, %v1449_v25 }
  0x1f   :  { %1399 = vmatpush3.bf16.msra.mxu0 %v1450_v23  ;;  %1413 = vmatpush3.bf16.msra.mxu1 %v1451_v24 }
  0x20   :  { %1400 = vmatprep.subr.bf16.mxu0 %v1452_v26  ;;  %1380 = vmatprep.mubr.msk.bf16.mxu0 %vm88_vm0, %v1453_v27 }
  0x21   :  { %1394 = vmatprep.mubr.msk.bf16.mxu1 %vm88_vm0, %v1454_v28  ;;  %1414 = vmatprep.subr.bf16.mxu1 %v1457_v29 }
  0x23   :  { %1401 = vmatpush3.bf16.msra.mxu0 %v1452_v26  ;;  %1415 = vmatpush3.bf16.msra.mxu1 %v1457_v29 }
  0x24   :  { %1402 = vmatprep.subr.bf16.mxu0 %v1458_v30  ;;  %1416 = vmatprep.subr.bf16.mxu1 %v1459_v31 }
  0x26   :  { %1381 = vmatmul.mubr.msk.bf16.gmra.mxu0 %vm88_vm0, %v1455_v32  ;;  %1395 = vmatmul.mubr.msk.bf16.gmra.mxu1 %vm88_vm0, %v1456_v33 }
  0x27   :  { %1403 = vmatpush3.bf16.msra.mxu0 %v1458_v30  ;;  %1417 = vmatpush3.bf16.msra.mxu1 %v1459_v31 }
  0x28   :  { %1404 = vmatprep.mubr.msk.bf16.mxu0 %vm88_vm0, %v1460_v34  ;;  %1418 = vmatprep.mubr.msk.bf16.mxu1 %vm88_vm0, %v1461_v35 }
  0x2e   :  { %1405 = vmatmul.mubr.msk.bf16.vlgmr.msra.gmra.mxu0 %vm88_vm0, %v1462_v36  ;;  %1419 = vmatmul.mubr.msk.bf16.vlgmr.msra.gmra.mxu1 %vm88_vm0, %v1463_v37 }
  0x2f   :  { %1408 = vmatprep.mubr.msk.bf16.mxu0 %vm88_vm0, %v1464_v38  ;;  %1422 = vmatprep.mubr.msk.bf16.mxu1 %vm88_vm0, %v1465_v39 }
  0x36   :  { %1409 = vmatmul.mubr.msk.bf16.gmra.mxu0 %vm88_vm0, %v1466_v40  ;;  %1423 = vmatmul.mubr.msk.bf16.gmra.mxu1 %vm88_vm0, %v1467_v41 }
  0xce   :  { %v1350_v42 = vpop.f32.mrf.mxu0  ;;  %v1364_v43 = vpop.f32.mrf.mxu1 }
  0xcf   :  { %v259_v3 = vadd.f32 %v1364_v43, %v1350_v42 }
  0xd0   :  { %v135_v44 = vpop.f32.mrf.mxu0  ;;  %v250_v45 = vpop.f32.mrf.mxu1 }
  0xd1   :  { %v251_v63 = vadd.f32 %v250_v45, %v135_v44 }
  0xd2   :  { %v1351_v46 = vpop.f32.mrf.mxu0  ;;  %v1365_v47 = vpop.f32.mrf.mxu1 }
  0xd3   :  { %v262_v8 = vadd.f32 %v1365_v47, %v1351_v46 }
  0xd4   :  { %v138_v48 = vpop.f32.mrf.mxu0  ;;  %v253_v49 = vpop.f32.mrf.mxu1 }
  0xd5   :  { %v254_v0 = vadd.f32 %v253_v49, %v138_v48 }
  0xd6   :  { %v1354_v50 = vpop.f32.mrf.mxu0  ;;  %v1368_v51 = vpop.f32.mrf.mxu1 }
  0xd7   :  { %v275_v28 = vadd.f32 %v1368_v51, %v1354_v50 }
  0xd8   :  { %v151_v52 = vpop.f32.mrf.mxu0  ;;  %v266_v53 = vpop.f32.mrf.mxu1 }
  0xd9   :  { %v267_v13 = vadd.f32 %v266_v53, %v151_v52 }
  0xda   :  { %v1355_v54 = vpop.f32.mrf.mxu0  ;;  %v1369_v55 = vpop.f32.mrf.mxu1 }
  0xdb   :  { %v278_v36 = vadd.f32 %v1369_v55, %v1355_v54 }
  0xdc   :  { %v154_v56 = vpop.f32.mrf.mxu0  ;;  %v269_v57 = vpop.f32.mrf.mxu1 }
  0xdd   :  { %v270_v18 = vadd.f32 %v269_v57, %v154_v56 }
  0xde   :  { %v1378_v58 = vpop.f32.mrf.mxu0  ;;  %v1392_v59 = vpop.f32.mrf.mxu1 }
  0xdf   :  { %v1654_v9 = vadd.f32 %v1378_v58, %v259_v3 }
  0xe0   :  { %v380_v60 = vpop.f32.mrf.mxu0  ;;  %v541_v61 = vpop.f32.mrf.mxu1 }
  0xe1   :  { %v1650_v4 = vadd.f32 %v380_v60, %v251_v63 }
  0xe2   :  { %v1379_v62 = vpop.f32.mrf.mxu0  ;;  %v1393_v1 = vpop.f32.mrf.mxu1 }
  0xe3   :  { %v1658_v14 = vadd.f32 %v1379_v62, %v262_v8 }
  0xe4   :  { %v383_v2 = vpop.f32.mrf.mxu0  ;;  %v544_v6 = vpop.f32.mrf.mxu1 }
  0xe5   :  { %v1652_v5 = vadd.f32 %v383_v2, %v254_v0 }
  0xe6   :  { %v1382_v7 = vpop.f32.mrf.mxu0  ;;  %v1396_v11 = vpop.f32.mrf.mxu1 }
  0xe7   :  { %v843_v10 = vadd.f32 %v1652_v5, %v1650_v4  ;;  %v1668_v32 = vadd.f32 %v1382_v7, %v275_v28 }
  0xe8   :  { %v396_v12 = vpop.f32.mrf.mxu0  ;;  %v557_v16 = vpop.f32.mrf.mxu1 }
  0xe9   :  { %v844_v15 = vadd.f32 %v843_v10, %v1654_v9  ;;  %v1661_v19 = vadd.f32 %v396_v12, %v267_v13 }
  0xea   :  { %v1383_v17 = vpop.f32.mrf.mxu0  ;;  %v1397_v21 = vpop.f32.mrf.mxu1 }
  0xeb   :  { %v845_v20 = vadd.f32 %v844_v15, %v1658_v14  ;;  %v1671_v42 = vadd.f32 %v1383_v17, %v278_v36 }
  0xec   :  { %v399_v22 = vpop.f32.mrf.mxu0  ;;  %v560_v25 = vpop.f32.mrf.mxu1 }
  0xed   :  { %v846_v23 = vadd.f32 %v845_v20, %v1661_v19  ;;  %v1665_v24 = vadd.f32 %v399_v22, %v270_v18 }
  0xee   :  { %v1406_v26 = vpop.f32.mrf.mxu0  ;;  %v1420_v27 = vpop.f32.mrf.mxu1 }
  0xef   :  { %v847_v29 = vadd.f32 %v846_v23, %v1665_v24  ;;  %v665_v39 = vadd.f32 %v1406_v26, %v1392_v59 }
  0xf0   :  { %v656_v30 = vpop.f32.mrf.mxu0  ;;  %v785_v31 = vpop.f32.mrf.mxu1 }
  0xf1   :  { %v657_v34 = vadd.f32 %v656_v30, %v541_v61  ;;  %v848_v37 = vadd.f32 %v847_v29, %v1668_v32  ;;  %v1678_v50 = vadd.f32 %v1420_v27, %v665_v39 }
  0xf2   :  { %v1407_v33 = vpop.f32.mrf.mxu0  ;;  %v1421_v35 = vpop.f32.mrf.mxu1 }
  0xf3   :  { %v1673_v44 = vadd.f32 %v785_v31, %v657_v34  ;;  %v668_v45 = vadd.f32 %v1407_v33, %v1393_v1  ;;  %v849_v48 = vadd.f32 %v848_v37, %v1671_v42 }
  0xf4   :  { %v659_v38 = vpop.f32.mrf.mxu0  ;;  %v788_v41 = vpop.f32.mrf.mxu1 }
  0xf5   :  { %v660_v40 = vadd.f32 %v659_v38, %v544_v6  ;;  %v1682_v55 = vadd.f32 %v1421_v35, %v668_v45  ;;  %v850_v58 = vrot.slane %v849_v48, 4 }
  0xf6   :  { %v1410_v43 = vpop.f32.mrf.mxu0  ;;  %v1424_v47 = vpop.f32.mrf.mxu1 }
  0xf7   :  { %v1675_v46 = vadd.f32 %v788_v41, %v660_v40  ;;  %v681_v60 = vadd.f32 %v1410_v43, %v1396_v11  ;;  %v851_v6 = vadd.f32 %v850_v58, %v849_v48 }
  0xf8   :  { %v672_v49 = vpop.f32.mrf.mxu0  ;;  %v801_v53 = vpop.f32.mrf.mxu1 }
  0xf9   :  { %v865_v51 = vadd.f32 %v1675_v46, %v1673_v44  ;;  %v673_v52 = vadd.f32 %v672_v49, %v557_v16  ;;  %v1691_v7 = vadd.f32 %v1424_v47, %v681_v60  ;;  %v852_v12 = vrot.slane %v851_v6, 2 }
  0xfa   :  { %v1411_v54 = vpop.f32.mrf.mxu0  ;;  %v1425_v57 = vpop.f32.mrf.mxu1 }
  0xfb   :  { %v866_v56 = vadd.f32 %v865_v51, %v1678_v50  ;;  %v1685_v61 = vadd.f32 %v801_v53, %v673_v52  ;;  %v684_v2 = vadd.f32 %v1411_v54, %v1397_v21  ;;  %v853_v16 = vadd.f32 %v852_v12, %v851_v6 }
  0xfc   :  { %v675_v59 = vpop.f32.mrf.mxu0  ;;  %v804_v0 = vpop.f32.mrf.mxu1 }
  0xfd   :  { %v867_v62 = vadd.f32 %v866_v56, %v1682_v55  ;;  %v676_v63 = vadd.f32 %v675_v59, %v560_v25  ;;  %v1694_v10 = vadd.f32 %v1425_v57, %v684_v2  ;;  %v854_v20 = vrot.slane %v853_v16, 1 }
  0xff   :  { %v868_v1 = vadd.f32 %v867_v62, %v1685_v61  ;;  %v1689_v3 = vadd.f32 %v804_v0, %v676_v63  ;;  %v855_v23 = vadd.f32 %v854_v20, %v853_v16 }
 0x101   :  { %v869_v8 = vadd.f32 %v868_v1, %v1689_v3 }
 0x103   :  { %v870_v11 = vadd.f32 %v869_v8, %v1691_v7 }
 0x105   :  { %v871_v13 = vadd.f32 %v870_v11, %v1694_v10 }
 0x107   :  { %v872_v15 = vrot.slane %v871_v13, 4 }
 0x109   :  { %v873_v17 = vadd.f32 %v872_v15, %v871_v13 }
 0x10b   :  { %v874_v18 = vrot.slane %v873_v17, 2 }
 0x10d   :  { %v875_v21 = vadd.f32 %v874_v18, %v873_v17 }
 0x10f   :  { %v876_v22 = vrot.slane %v875_v21, 1 }
 0x111   :  { %v877_v25 = vadd.f32 %v876_v22, %v875_v21 }
 0x113   :  { %v878_v26 = vadd.f32 %v877_v25, %v855_v23 }
 0x115   :  { %v1698_v27 = vmul.f32 0.0078125, %v878_v26 }
 0x117   :  { %v880_v28 = vsub.f32 %v1650_v4, %v1698_v27  ;;  %v881_v29 = vsub.f32 %v1652_v5, %v1698_v27  ;;  %v882_v30 = vsub.f32 %v1654_v9, %v1698_v27  ;;  %v883_v31 = vsub.f32 %v1658_v14, %v1698_v27 }
 0x118   :  { %v884_v35 = vsub.f32 %v1661_v19, %v1698_v27  ;;  %v910_v38 = vsub.f32 %v1673_v44, %v1698_v27  ;;  %v911_v39 = vsub.f32 %v1675_v46, %v1698_v27  ;;  %v912_v40 = vsub.f32 %v1678_v50, %v1698_v27 }
 0x119   :  { %v888_v33 = vmul.f32 %v880_v28, %v880_v28  ;;  %v889_v34 = vmul.f32 %v881_v29, %v881_v29  ;;  %v890_v36 = vmul.f32 %v882_v30, %v882_v30  ;;  %v885_v41 = vsub.f32 %v1665_v24, %v1698_v27 }
 0x11a   :  { %v891_v43 = vmul.f32 %v883_v31, %v883_v31  ;;  %v913_v47 = vsub.f32 %v1682_v55, %v1698_v27  ;;  %v918_v48 = vmul.f32 %v910_v38, %v910_v38  ;;  %v919_v49 = vmul.f32 %v911_v39, %v911_v39 }
 0x11b   :  { %v896_v37 = vadd.f32 %v889_v34, %v888_v33  ;;  %v886_v51 = vsub.f32 %v1668_v32, %v1698_v27  ;;  %v892_v52 = vmul.f32 %v884_v35, %v884_v35  ;;  %v914_v54 = vsub.f32 %v1685_v61, %v1698_v27 }
 0x11c   :  { %v920_v56 = vmul.f32 %v912_v40, %v912_v40  ;;  %v926_v57 = vadd.f32 %v919_v49, %v918_v48  ;;  %v887_v58 = vsub.f32 %v1671_v42, %v1698_v27  ;;  %v893_v59 = vmul.f32 %v885_v41, %v885_v41  ;;  %v833_v48 = vld [vmem:[%s1782_s3] sm:$0x1] }
 0x11d   :  { %v897_v45 = vadd.f32 %v896_v37, %v890_v36  ;;  %v915_v62 = vsub.f32 %v1689_v3, %v1698_v27  ;;  %v921_v63 = vmul.f32 %v913_v47, %v913_v47  ;;  %v894_v1 = vmul.f32 %v886_v51, %v886_v51 }
 0x11e   :  { %v927_v0 = vadd.f32 %v926_v57, %v920_v56  ;;  %v916_v6 = vsub.f32 %v1691_v7, %v1698_v27  ;;  %v922_v8 = vmul.f32 %v914_v54, %v914_v54  ;;  %v895_v12 = vmul.f32 %v887_v58, %v887_v58 }
 0x11f   :  { %v898_v53 = vadd.f32 %v897_v45, %v891_v43  ;;  %v917_v15 = vsub.f32 %v1694_v10, %v1698_v27  ;;  %v923_v16 = vmul.f32 %v915_v62, %v915_v62  ;;  %v947_v45 = vlaneseq }
 0x120   :  { %v928_v11 = vadd.f32 %v927_v0, %v921_v63  ;;  %v924_v20 = vmul.f32 %v916_v6, %v916_v6 }
 0x121   :  { %v899_v60 = vadd.f32 %v898_v53, %v892_v52  ;;  %v925_v23 = vmul.f32 %v917_v15, %v917_v15  ;;  %v948_v47 = vshrl.u32 %v947_v45, 7  ;;  %v834_v53 = vld [vmem:[%s1783_s4] sm:$0x1] }
 0x122   :  { %v929_v17 = vadd.f32 %v928_v11, %v922_v8 }
 0x123   :  { %v900_v2 = vadd.f32 %v899_v60, %v893_v59  ;;  %v949_v49 = vsub.s32 0, %v948_v47 }
 0x124   :  { %v930_v21 = vadd.f32 %v929_v17, %v923_v16 }
 0x125   :  { %v901_v13 = vadd.f32 %v900_v2, %v894_v1 }
 0x126   :  { %v931_v25 = vadd.f32 %v930_v21, %v924_v20 }
 0x127   :  { %v902_v18 = vadd.f32 %v901_v13, %v895_v12 }
 0x128   :  { %v932_v28 = vadd.f32 %v931_v25, %v925_v23 }
 0x129   :  { %v903_v22 = vrot.slane %v902_v18, 4 }
 0x12a   :  { %v933_v30 = vrot.slane %v932_v28, 4 }
 0x12b   :  { %v904_v26 = vadd.f32 %v903_v22, %v902_v18 }
 0x12c   :  { %v934_v33 = vadd.f32 %v933_v30, %v932_v28 }
 0x12d   :  { %v905_v29 = vrot.slane %v904_v26, 2 }
 0x12e   :  { %v935_v35 = vrot.slane %v934_v33, 2 }
 0x12f   :  { %v906_v31 = vadd.f32 %v905_v29, %v904_v26 }
 0x130   :  { %v936_v36 = vadd.f32 %v935_v35, %v934_v33 }
 0x131   :  { %v907_v34 = vrot.slane %v906_v31, 1 }
 0x132   :  { %v937_v38 = vrot.slane %v936_v36, 1 }
 0x133   :  { %v908_v37 = vadd.f32 %v907_v34, %v906_v31 }
 0x134   :  { %v938_v39 = vadd.f32 %v937_v38, %v936_v36 }
 0x136   :  { %v939_v40 = vadd.f32 %v938_v39, %v908_v37 }
 0x138   :  { %v940_v41 = vmul.f32 0.0078125, %v939_v40 }
 0x13a   :  { %v941_v43 = vadd.f32 1e-05, %v940_v41 }
 0x13c   :  { %1468 = vrsqrt.f32 %v941_v43 }
 0x149   :  { %v1469_v51 = vpop.eup %1468 }
 0x14a   :  { %v943_v52 = vmul.f32 %v1469_v51, %v833_v48 }
 0x14c   :  { %v944_v54 = vmul.f32 %v943_v52, %v1698_v27  ;;  %v950_v56 = vrot.slane %v943_v52, %v949_v49 }
 0x14e   :  { %v945_v57 = vsub.f32 %v834_v53, %v944_v54  ;;  %v952_v58 = vmul.f32 %v950_v56, %v1650_v4  ;;  %v953_v59 = vmul.f32 %v950_v56, %v1652_v5  ;;  %v954_v60 = vmul.f32 %v950_v56, %v1654_v9 }
 0x14f   :  { %v955_v62 = vmul.f32 %v950_v56, %v1658_v14  ;;  %v956_v63 = vmul.f32 %v950_v56, %v1661_v19  ;;  %v957_v0 = vmul.f32 %v950_v56, %v1665_v24  ;;  %v958_v1 = vmul.f32 %v950_v56, %v1668_v32 }
 0x150   :  { %v959_v2 = vmul.f32 %v950_v56, %v1671_v42  ;;  %v964_v6 = vrot.slane %v945_v57, %v949_v49  ;;  %v1030_v27 = vmul.f32 %v950_v56, %v1673_v44  ;;  %v1031_v8 = vmul.f32 %v950_v56, %v1675_v46 }
 0x151   :  { %v1032_v4 = vmul.f32 %v950_v56, %v1678_v50  ;;  %v1033_v5 = vmul.f32 %v950_v56, %v1682_v55  ;;  %v1034_v9 = vmul.f32 %v950_v56, %v1685_v61  ;;  %v1035_v14 = vmul.f32 %v950_v56, %v1689_v3 }
 0x152   :  { %v966_v19 = vadd.f32 %v964_v6, %v952_v58  ;;  %v967_v11 = vadd.f32 %v964_v6, %v953_v59  ;;  %v968_v24 = vadd.f32 %v964_v6, %v954_v60  ;;  %v969_v12 = vadd.f32 %v964_v6, %v955_v62 }
 0x153   :  { %v970_v32 = vadd.f32 %v964_v6, %v956_v63  ;;  %v971_v13 = vadd.f32 %v964_v6, %v957_v0  ;;  %v972_v42 = vadd.f32 %v964_v6, %v958_v1  ;;  %v973_v15 = vadd.f32 %v964_v6, %v959_v2 }
 0x154   :  { %v974_v16 = vmax.f32 %v966_v19, 0.0  ;;  %v975_v44 = vmax.f32 %v967_v11, 0.0  ;;  %v976_v17 = vmax.f32 %v968_v24, 0.0  ;;  %v977_v46 = vmax.f32 %v969_v12, 0.0 }
 0x155   :  { %v978_v18 = vmax.f32 %v970_v32, 0.0  ;;  %v979_v50 = vmax.f32 %v971_v13, 0.0  ;;  %v980_v20 = vmax.f32 %v972_v42, 0.0  ;;  %v981_v55 = vmax.f32 %v973_v15, 0.0 }
 0x156   :  { %v1256_v21 = vpack.c.bf16 %v975_v44, %v974_v16  ;;  %v1261_v61 = vpack.c.bf16 %v977_v46, %v976_v17  ;;  %v1036_v3 = vmul.f32 %v950_v56, %v1691_v7  ;;  %v1037_v22 = vmul.f32 %v950_v56, %v1694_v10 }
 0x157   :  { %v1266_v23 = vpack.c.bf16 %v979_v50, %v978_v18  ;;  %v1271_v25 = vpack.c.bf16 %v981_v55, %v980_v20  ;;  %v1038_v26 = vadd.f32 %v1030_v27, %v964_v6  ;;  %v1039_v28 = vadd.f32 %v1031_v8, %v964_v6 }
 0x158   :  { %1257 = vst [vmem:[%s1784_s5] sm:$0xff] %v1256_v21   ;;  %1293 = vst [vmem:[%s1784_s5 + $0x8] sm:$0xff] %v1261_v61   ;;  %v1040_v29 = vadd.f32 %v1032_v4, %v964_v6  ;;  %v1041_v30 = vadd.f32 %v1033_v5, %v964_v6  ;;  %v1042_v31 = vadd.f32 %v1034_v9, %v964_v6 }
 0x159   :  { %v1043_v33 = vadd.f32 %v1035_v14, %v964_v6  ;;  %1294 = vst [vmem:[%s1784_s5 + $0x10] sm:$0xff] %v1266_v23   ;;  %1295 = vst [vmem:[%s1784_s5 + $0x18] sm:$0xff] %v1271_v25   ;;  %v1044_v7 = vadd.f32 %v1036_v3, %v964_v6  ;;  %v1045_v10 = vadd.f32 %v1037_v22, %v964_v6  ;;  %v1046_v34 = vmax.f32 %v1038_v26, 0.0 }
 0x15a   :  { %v1047_v35 = vmax.f32 %v1039_v28, 0.0  ;;  %v1048_v36 = vmax.f32 %v1040_v29, 0.0  ;;  %v1049_v37 = vmax.f32 %v1041_v30, 0.0  ;;  %v1050_v38 = vmax.f32 %v1042_v31, 0.0 }
 0x15b   :  { %v1051_v39 = vmax.f32 %v1043_v33, 0.0  ;;  %v1052_v40 = vmax.f32 %v1044_v7, 0.0  ;;  %v1053_v41 = vmax.f32 %v1045_v10, 0.0 }
 0x15c   :  { %v1276_v43 = vpack.c.bf16 %v1047_v35, %v1046_v34  ;;  %v1281_v45 = vpack.c.bf16 %v1049_v37, %v1048_v36 }
 0x15d   :  { %v1286_v47 = vpack.c.bf16 %v1051_v39, %v1050_v38  ;;  %v1291_v48 = vpack.c.bf16 %v1053_v41, %v1052_v40 }
 0x15e   :  { %1296 = vst [vmem:[%s1784_s5 + $0x20] sm:$0xff] %v1276_v43   ;;  %1297 = vst [vmem:[%s1784_s5 + $0x28] sm:$0xff] %v1281_v45  }
 0x15f   :  { %1298 = vst [vmem:[%s1784_s5 + $0x30] sm:$0xff] %v1286_v47   ;;  %1299 = vst [vmem:[%s1784_s5 + $0x38] sm:$0xff] %v1291_v48  }

// kernel: representations_pathology_forward.5
= control target key start
LH: loop header
LB: loop body
LE: loop exit
PB: predicated region body
PF: predicated region fallthrough
CT: control target
= control target key end

     0   :  { %vm224_vm0 = vcmask 1043456   ;;  %vm225_vm1 = vcmask 1044480   ;;  %vm175_vm2 = vcmask 72704   ;;  %v4123_v1 = vmov 65535   ;;  %s5423_s2 = inlined_call_operand.vmem [shape: bf16[3,9,128], index: 2, kind: input, shape index: {}]   ;;  %s5424_s1 = inlined_call_operand.vmem [shape: bf16[2,272,9], index: 1, kind: input, shape index: {}]   ;;  %s5425_s0 = inlined_call_operand.vmem [shape: bf16[2,272,9], index: 0, kind: input, shape index: {}]   ;;  %s5426_s3 = inlined_call_operand.vmem [shape: f32[1,128], index: 3, kind: input, shape index: {}]   ;;  %s5427_s4 = inlined_call_operand.vmem [shape: f32[1,128], index: 4, kind: input, shape index: {}]   ;;  %s5428_s5 = inlined_call_operand.vmem [shape: bf16[2,256,128], index: 5, kind: output, shape index: {}]  }
   0x1   :  { %v4019_v0 = vld [vmem:[%s5423_s2 + $0x8] sm:$0x1f]   ;;  %v226_v2 = vsel %vm224_vm0, 4294967295, %v4123_v1  ;;  %v4021_v3 = vld [vmem:[%s5424_s1] sm:$0xff]   ;;  %v4025_v11 = vld [vmem:[%s5423_s2 + $0x10] sm:$0x1f]  }
   0x2   :  { %v227_v4 = vsel %vm225_vm1, %v226_v2, 0  ;;  %v4020_v5 = vld [vmem:[%s5423_s2] sm:$0x1f]   ;;  %3816 = vmatprep.mubr.msk.bf16.mxu0 %vm175_vm2, %v4021_v3  ;;  %v4023_v9 = vld [vmem:[%s5424_s1 + $0x8] sm:$0xff]   ;;  %v4027_v14 = vld [vmem:[%s5424_s1 + $0x10] sm:$0xff]  }
   0x3   :  { %v4022_v6 = vld [vmem:[%s5425_s0] sm:$0xff]   ;;  %v229_v7 = vand.u32 %v4019_v0, %v227_v4  ;;  %v526_v8 = vand.u32 %v4020_v5, %v227_v4  ;;  %v4024_v10 = vld [vmem:[%s5425_s0 + $0x8] sm:$0xff]   ;;  %v858_v13 = vand.u32 %v4025_v11, %v227_v4  ;;  %v4028_v16 = vld [vmem:[%s5425_s0 + $0x10] sm:$0xff]  }
   0x4   :  { %3850 = vmatprep.mubr.msk.bf16.mxu1 %vm175_vm2, %v4022_v6  ;;  %v4026_v12 = vld [vmem:[%s5423_s2 + $0x8] sm:$0x1f]   ;;  %v4029_v17 = vld [vmem:[%s5424_s1 + $0x18] sm:$0xff]   ;;  %v4031_v19 = vld [vmem:[%s5424_s1 + $0x20] sm:$0xff]  }
   0x5   :  { %3814 = vmatprep.subr.bf16.mxu0 %v229_v7  ;;  %3848 = vmatprep.subr.bf16.mxu1 %v526_v8  ;;  %v1289_v15 = vand.u32 %v4026_v12, %v227_v4  ;;  %v4030_v18 = vld [vmem:[%s5425_s0 + $0x18] sm:$0xff]   ;;  %v4032_v20 = vld [vmem:[%s5425_s0 + $0x20] sm:$0xff]   ;;  %v4033_v21 = vld [vmem:[%s5424_s1 + $0x28] sm:$0xff]  }
   0x6   :  { %3815 = vmatpush3.bf16.msra.mxu0 %v229_v7  ;;  %3849 = vmatpush3.bf16.msra.mxu1 %v526_v8  ;;  %v4034_v22 = vld [vmem:[%s5425_s0 + $0x28] sm:$0xff]   ;;  %v4035_v23 = vld [vmem:[%s5424_s1 + $0x30] sm:$0xff]   ;;  %v4037_v25 = vld [vmem:[%s5424_s1 + $0x38] sm:$0xff]  }
   0x7   :  { %3882 = vmatprep.subr.bf16.mxu0 %v858_v13  ;;  %3916 = vmatprep.subr.bf16.mxu1 %v1289_v15  ;;  %v4036_v24 = vld [vmem:[%s5425_s0 + $0x30] sm:$0xff]   ;;  %v4038_v26 = vld [vmem:[%s5425_s0 + $0x38] sm:$0xff]   ;;  %v4039_v27 = vld [vmem:[%s5424_s1 + $0x40] sm:$0xff]  }
   0x8   :  { %v4040_v28 = vld [vmem:[%s5425_s0 + $0x40] sm:$0xff]   ;;  %v4041_v29 = vld [vmem:[%s5424_s1 + $0x48] sm:$0xff]   ;;  %v4043_v31 = vld [vmem:[%s5424_s1 + $0x50] sm:$0xff]  }
   0x9   :  { %3817 = vmatmul.mubr.msk.bf16.vlgmr.msra.gmra.mxu0 %vm175_vm2, %v4023_v9  ;;  %3851 = vmatmul.mubr.msk.bf16.vlgmr.msra.gmra.mxu1 %vm175_vm2, %v4024_v10  ;;  %v4042_v30 = vld [vmem:[%s5425_s0 + $0x48] sm:$0xff]   ;;  %v4044_v32 = vld [vmem:[%s5425_s0 + $0x50] sm:$0xff]   ;;  %v4059_v33 = vld [vmem:[%s5423_s2] sm:$0x1f]  }
   0xa   :  { %3883 = vmatpush3.bf16.msra.mxu0 %v858_v13  ;;  %3917 = vmatpush3.bf16.msra.mxu1 %v1289_v15  ;;  %v4060_v34 = vld [vmem:[%s5423_s2 + $0x10] sm:$0x1f]   ;;  %v1586_v35 = vand.u32 %v4059_v33, %v227_v4  ;;  %v4045_v37 = vld [vmem:[%s5424_s1 + $0x58] sm:$0xff]   ;;  %v4047_v39 = vld [vmem:[%s5424_s1 + $0x60] sm:$0xff]  }
   0xb   :  { %3820 = vmatprep.mubr.msk.bf16.mxu0 %vm175_vm2, %v4027_v14  ;;  %3854 = vmatprep.mubr.msk.bf16.mxu1 %vm175_vm2, %v4028_v16  ;;  %v1917_v36 = vand.u32 %v4060_v34, %v227_v4  ;;  %v4046_v38 = vld [vmem:[%s5425_s0 + $0x58] sm:$0xff]   ;;  %v4048_v40 = vld [vmem:[%s5425_s0 + $0x60] sm:$0xff]   ;;  %v4049_v41 = vld [vmem:[%s5424_s1 + $0x68] sm:$0xff]  }
   0xc   :  { %3950 = vmatprep.subr.bf16.mxu0 %v1586_v35  ;;  %v4050_v42 = vld [vmem:[%s5425_s0 + $0x68] sm:$0xff]   ;;  %v4051_v43 = vld [vmem:[%s5424_s1 + $0x70] sm:$0xff]   ;;  %v4053_v45 = vld [vmem:[%s5424_s1 + $0x78] sm:$0xff]  }
   0xd   :  { %3984 = vmatprep.subr.bf16.mxu1 %v1917_v36  ;;  %v4052_v44 = vld [vmem:[%s5425_s0 + $0x70] sm:$0xff]   ;;  %v4054_v46 = vld [vmem:[%s5425_s0 + $0x78] sm:$0xff]   ;;  %v4055_v47 = vld [vmem:[%s5425_s0 + $0x8] sm:$0xff]  }
   0xe   :  { %v4056_v48 = vld [vmem:[%s5424_s1 + $0x88] sm:$0xff]   ;;  %v4057_v49 = vld [vmem:[%s5425_s0 + $0x10] sm:$0xff]   ;;  %v4061_v51 = vld [vmem:[%s5425_s0 + $0x18] sm:$0xff]  }
   0xf   :  { %v4058_v50 = vld [vmem:[%s5424_s1 + $0x90] sm:$0xff]   ;;  %v4062_v52 = vld [vmem:[%s5424_s1 + $0x98] sm:$0xff]   ;;  %v4063_v53 = vld [vmem:[%s5425_s0 + $0x20] sm:$0xff]  }
  0x10   :  { %v4064_v54 = vld [vmem:[%s5424_s1 + $0xa0] sm:$0xff]   ;;  %v4065_v55 = vld [vmem:[%s5425_s0 + $0x28] sm:$0xff]   ;;  %v4067_v57 = vld [vmem:[%s5425_s0 + $0x30] sm:$0xff]  }
  0x11   :  { %3821 = vmatmul.mubr.msk.bf16.gmra.mxu0 %vm175_vm2, %v4029_v17  ;;  %3855 = vmatmul.mubr.msk.bf16.gmra.mxu1 %vm175_vm2, %v4030_v18  ;;  %v4066_v56 = vld [vmem:[%s5424_s1 + $0xa8] sm:$0xff]   ;;  %v4068_v58 = vld [vmem:[%s5424_s1 + $0xb0] sm:$0xff]   ;;  %v4069_v59 = vld [vmem:[%s5425_s0 + $0x38] sm:$0xff]  }
  0x12   :  { %3824 = vmatprep.mubr.msk.bf16.mxu0 %vm175_vm2, %v4031_v19  ;;  %3858 = vmatprep.mubr.msk.bf16.mxu1 %vm175_vm2, %v4032_v20  ;;  %v4070_v60 = vld [vmem:[%s5424_s1 + $0xb8] sm:$0xff]   ;;  %v4071_v61 = vld [vmem:[%s5425_s0 + $0x40] sm:$0xff]   ;;  %v4073_v63 = vld [vmem:[%s5425_s0 + $0x48] sm:$0xff]  }
  0x13   :  { %v4072_v62 = vld [vmem:[%s5424_s1 + $0xc0] sm:$0xff]   ;;  %v4074_v0 = vld [vmem:[%s5424_s1 + $0xc8] sm:$0xff]   ;;  %v4075_v1 = vld [vmem:[%s5425_s0 + $0x50] sm:$0xff]  }
  0x14   :  { %v4076_v2 = vld [vmem:[%s5424_s1 + $0xd0] sm:$0xff]   ;;  %v4077_v3 = vld [vmem:[%s5425_s0 + $0x58] sm:$0xff]   ;;  %v4079_v5 = vld [vmem:[%s5425_s0 + $0x60] sm:$0xff]  }
  0x15   :  { %v4078_v4 = vld [vmem:[%s5424_s1 + $0xd8] sm:$0xff]   ;;  %v4080_v6 = vld [vmem:[%s5424_s1 + $0xe0] sm:$0xff]   ;;  %v4081_v7 = vld [vmem:[%s5425_s0 + $0x68] sm:$0xff]  }
  0x16   :  { %v4082_v8 = vld [vmem:[%s5424_s1 + $0xe8] sm:$0xff]   ;;  %v4083_v9 = vld [vmem:[%s5425_s0 + $0x70] sm:$0xff]   ;;  %v4085_v11 = vld [vmem:[%s5425_s0 + $0x78] sm:$0xff]  }
  0x17   :  { %v4084_v10 = vld [vmem:[%s5424_s1 + $0xf0] sm:$0xff]   ;;  %v4086_v12 = vld [vmem:[%s5424_s1 + $0xf8] sm:$0xff]   ;;  %v4087_v13 = vld [vmem:[%s5425_s0 + $0x80] sm:$0xff]  }
  0x18   :  { %v4088_v14 = vld [vmem:[%s5424_s1 + $0x100] sm:$0xff]   ;;  %v4089_v15 = vld [vmem:[%s5425_s0 + $0x88] sm:$0xff]   ;;  %v4090_v16 = vld [vmem:[%s5425_s0 + $0x90] sm:$0xff]  }
  0x19   :  { %3825 = vmatmul.mubr.msk.bf16.gmra.mxu0 %vm175_vm2, %v4033_v21  ;;  %3859 = vmatmul.mubr.msk.bf16.gmra.mxu1 %vm175_vm2, %v4034_v22  ;;  %v4091_v17 = vld [vmem:[%s5425_s0 + $0x90] sm:$0xff]   ;;  %v4092_v18 = vld [vmem:[%s5425_s0 + $0x98] sm:$0xff]   ;;  %v4094_v20 = vld [vmem:[%s5425_s0 + $0xa0] sm:$0xff]  }
  0x1a   :  { %3828 = vmatprep.mubr.msk.bf16.mxu0 %vm175_vm2, %v4035_v23  ;;  %3862 = vmatprep.mubr.msk.bf16.mxu1 %vm175_vm2, %v4036_v24  ;;  %v4093_v19 = vld [vmem:[%s5425_s0 + $0x98] sm:$0xff]   ;;  %v4095_v21 = vld [vmem:[%s5425_s0 + $0xa0] sm:$0xff]   ;;  %v4096_v22 = vld [vmem:[%s5425_s0 + $0xa8] sm:$0xff]  }
  0x1b   :  { %v4097_v23 = vld [vmem:[%s5425_s0 + $0xa8] sm:$0xff]   ;;  %v4098_v24 = vld [vmem:[%s5425_s0 + $0xb0] sm:$0xff]   ;;  %v4108_v34 = vld [vmem:[%s5425_s0 + $0xd8] sm:$0xff]  }
  0x1c   :  { %v4107_v33 = vld [vmem:[%s5425_s0 + $0xd0] sm:$0xff]  }
  0x21   :  { %3829 = vmatmul.mubr.msk.bf16.gmra.mxu0 %vm175_vm2, %v4037_v25  ;;  %3863 = vmatmul.mubr.msk.bf16.gmra.mxu1 %vm175_vm2, %v4038_v26  ;;  %v4099_v25 = vld [vmem:[%s5425_s0 + $0xb0] sm:$0xff]   ;;  %v4100_v26 = vld [vmem:[%s5425_s0 + $0xb8] sm:$0xff]  }
  0x22   :  { %3832 = vmatprep.mubr.msk.bf16.mxu0 %vm175_vm2, %v4039_v27  ;;  %3866 = vmatprep.mubr.msk.bf16.mxu1 %vm175_vm2, %v4040_v28  ;;  %v4101_v27 = vld [vmem:[%s5425_s0 + $0xb8] sm:$0xff]   ;;  %v4102_v28 = vld [vmem:[%s5425_s0 + $0xc0] sm:$0xff]  }
  0x29   :  { %3833 = vmatmul.mubr.msk.bf16.gmra.mxu0 %vm175_vm2, %v4041_v29  ;;  %3867 = vmatmul.mubr.msk.bf16.gmra.mxu1 %vm175_vm2, %v4042_v30  ;;  %v4103_v29 = vld [vmem:[%s5425_s0 + $0xc0] sm:$0xff]   ;;  %v4104_v30 = vld [vmem:[%s5425_s0 + $0xc8] sm:$0xff]  }
  0x2a   :  { %3836 = vmatprep.mubr.msk.bf16.mxu0 %vm175_vm2, %v4043_v31  ;;  %3870 = vmatprep.mubr.msk.bf16.mxu1 %vm175_vm2, %v4044_v32  ;;  %v4105_v31 = vld [vmem:[%s5425_s0 + $0xc8] sm:$0xff]   ;;  %v4106_v32 = vld [vmem:[%s5425_s0 + $0xd0] sm:$0xff]  }
  0x31   :  { %3837 = vmatmul.mubr.msk.bf16.gmra.mxu0 %vm175_vm2, %v4045_v37  ;;  %3871 = vmatmul.mubr.msk.bf16.gmra.mxu1 %vm175_vm2, %v4046_v38  ;;  %v4111_v37 = vld [vmem:[%s5425_s0 + $0xe0] sm:$0xff]   ;;  %v4112_v38 = vld [vmem:[%s5425_s0 + $0xe8] sm:$0xff]  }
  0x32   :  { %3840 = vmatprep.mubr.msk.bf16.mxu0 %vm175_vm2, %v4047_v39  ;;  %3874 = vmatprep.mubr.msk.bf16.mxu1 %vm175_vm2, %v4048_v40  ;;  %v4113_v39 = vld [vmem:[%s5425_s0 + $0xe8] sm:$0xff]   ;;  %v4114_v40 = vld [vmem:[%s5425_s0 + $0xf0] sm:$0xff]  }
  0x39   :  { %3841 = vmatmul.mubr.msk.bf16.gmra.mxu0 %vm175_vm2, %v4049_v41  ;;  %3875 = vmatmul.mubr.msk.bf16.gmra.mxu1 %vm175_vm2, %v4050_v42  ;;  %v4115_v41 = vld [vmem:[%s5425_s0 + $0xf0] sm:$0xff]   ;;  %v4116_v42 = vld [vmem:[%s5425_s0 + $0xf8] sm:$0xff]  }
  0x3a   :  { %3844 = vmatprep.mubr.msk.bf16.mxu0 %vm175_vm2, %v4051_v43  ;;  %3878 = vmatprep.mubr.msk.bf16.mxu1 %vm175_vm2, %v4052_v44  ;;  %v4117_v43 = vld [vmem:[%s5425_s0 + $0xf8] sm:$0xff]   ;;  %v4118_v44 = vld [vmem:[%s5425_s0 + $0x100] sm:$0xff]  }
  0x41   :  { %3845 = vmatmul.mubr.msk.bf16.gmra.mxu0 %vm175_vm2, %v4053_v45  ;;  %3879 = vmatmul.mubr.msk.bf16.gmra.mxu1 %vm175_vm2, %v4054_v46  ;;  %v4119_v45 = vld [vmem:[%s5425_s0 + $0x100] sm:$0xff]   ;;  %v4120_v46 = vld [vmem:[%s5425_s0 + $0x108] sm:$0xff]  }
  0x42   :  { %3884 = vmatprep.mubr.msk.bf16.mxu0 %vm175_vm2, %v4055_v47  ;;  %3918 = vmatprep.mubr.msk.bf16.mxu1 %vm175_vm2, %v4056_v48 }
  0x49   :  { %3885 = vmatmul.mubr.msk.bf16.vlgmr.msra.gmra.mxu0 %vm175_vm2, %v4057_v49  ;;  %3919 = vmatmul.mubr.msk.bf16.vlgmr.msra.gmra.mxu1 %vm175_vm2, %v4058_v50 }
  0x4a   :  { %3951 = vmatpush3.bf16.msra.mxu0 %v1586_v35  ;;  %3985 = vmatpush3.bf16.msra.mxu1 %v1917_v36  ;;  %v4109_v35 = vld [vmem:[%s5425_s0 + $0xd8] sm:$0xff]   ;;  %v4110_v36 = vld [vmem:[%s5425_s0 + $0xe0] sm:$0xff]  }
  0x4b   :  { %3888 = vmatprep.mubr.msk.bf16.mxu0 %vm175_vm2, %v4061_v51  ;;  %3922 = vmatprep.mubr.msk.bf16.mxu1 %vm175_vm2, %v4062_v52 }
  0x51   :  { %3889 = vmatmul.mubr.msk.bf16.gmra.mxu0 %vm175_vm2, %v4063_v53  ;;  %3923 = vmatmul.mubr.msk.bf16.gmra.mxu1 %vm175_vm2, %v4064_v54 }
  0x52   :  { %3892 = vmatprep.mubr.msk.bf16.mxu0 %vm175_vm2, %v4065_v55  ;;  %3926 = vmatprep.mubr.msk.bf16.mxu1 %vm175_vm2, %v4066_v56 }
  0x59   :  { %3893 = vmatmul.mubr.msk.bf16.gmra.mxu0 %vm175_vm2, %v4067_v57  ;;  %3927 = vmatmul.mubr.msk.bf16.gmra.mxu1 %vm175_vm2, %v4068_v58 }
  0x5a   :  { %3896 = vmatprep.mubr.msk.bf16.mxu0 %vm175_vm2, %v4069_v59  ;;  %3930 = vmatprep.mubr.msk.bf16.mxu1 %vm175_vm2, %v4070_v60 }
  0x61   :  { %3897 = vmatmul.mubr.msk.bf16.gmra.mxu0 %vm175_vm2, %v4071_v61  ;;  %3931 = vmatmul.mubr.msk.bf16.gmra.mxu1 %vm175_vm2, %v4072_v62 }
  0x62   :  { %3900 = vmatprep.mubr.msk.bf16.mxu0 %vm175_vm2, %v4073_v63  ;;  %3934 = vmatprep.mubr.msk.bf16.mxu1 %vm175_vm2, %v4074_v0 }
  0x69   :  { %3901 = vmatmul.mubr.msk.bf16.gmra.mxu0 %vm175_vm2, %v4075_v1  ;;  %3935 = vmatmul.mubr.msk.bf16.gmra.mxu1 %vm175_vm2, %v4076_v2 }
  0x6a   :  { %3904 = vmatprep.mubr.msk.bf16.mxu0 %vm175_vm2, %v4077_v3  ;;  %3938 = vmatprep.mubr.msk.bf16.mxu1 %vm175_vm2, %v4078_v4 }
  0x71   :  { %3905 = vmatmul.mubr.msk.bf16.gmra.mxu0 %vm175_vm2, %v4079_v5  ;;  %3939 = vmatmul.mubr.msk.bf16.gmra.mxu1 %vm175_vm2, %v4080_v6 }
  0x72   :  { %3908 = vmatprep.mubr.msk.bf16.mxu0 %vm175_vm2, %v4081_v7  ;;  %3942 = vmatprep.mubr.msk.bf16.mxu1 %vm175_vm2, %v4082_v8 }
  0x79   :  { %3909 = vmatmul.mubr.msk.bf16.gmra.mxu0 %vm175_vm2, %v4083_v9  ;;  %3943 = vmatmul.mubr.msk.bf16.gmra.mxu1 %vm175_vm2, %v4084_v10 }
  0x7a   :  { %3912 = vmatprep.mubr.msk.bf16.mxu0 %vm175_vm2, %v4085_v11  ;;  %3946 = vmatprep.mubr.msk.bf16.mxu1 %vm175_vm2, %v4086_v12 }
  0x81   :  { %3913 = vmatmul.mubr.msk.bf16.gmra.mxu0 %vm175_vm2, %v4087_v13  ;;  %3947 = vmatmul.mubr.msk.bf16.gmra.mxu1 %vm175_vm2, %v4088_v14 }
  0x82   :  { %3952 = vmatprep.mubr.msk.bf16.mxu0 %vm175_vm2, %v4089_v15  ;;  %3986 = vmatprep.mubr.msk.bf16.mxu1 %vm175_vm2, %v4090_v16 }
  0x89   :  { %3953 = vmatmul.mubr.msk.bf16.vlgmr.msra.gmra.mxu0 %vm175_vm2, %v4091_v17  ;;  %3987 = vmatmul.mubr.msk.bf16.vlgmr.msra.gmra.mxu1 %vm175_vm2, %v4092_v18 }
  0x8a   :  { %3956 = vmatprep.mubr.msk.bf16.mxu0 %vm175_vm2, %v4093_v19  ;;  %3990 = vmatprep.mubr.msk.bf16.mxu1 %vm175_vm2, %v4094_v20 }
  0x91   :  { %3957 = vmatmul.mubr.msk.bf16.gmra.mxu0 %vm175_vm2, %v4095_v21  ;;  %3991 = vmatmul.mubr.msk.bf16.gmra.mxu1 %vm175_vm2, %v4096_v22 }
  0x92   :  { %3960 = vmatprep.mubr.msk.bf16.mxu0 %vm175_vm2, %v4097_v23  ;;  %3994 = vmatprep.mubr.msk.bf16.mxu1 %vm175_vm2, %v4098_v24 }
  0x99   :  { %3961 = vmatmul.mubr.msk.bf16.gmra.mxu0 %vm175_vm2, %v4099_v25  ;;  %3995 = vmatmul.mubr.msk.bf16.gmra.mxu1 %vm175_vm2, %v4100_v26 }
  0x9a   :  { %3964 = vmatprep.mubr.msk.bf16.mxu0 %vm175_vm2, %v4101_v27  ;;  %3998 = vmatprep.mubr.msk.bf16.mxu1 %vm175_vm2, %v4102_v28 }
  0xa1   :  { %3965 = vmatmul.mubr.msk.bf16.gmra.mxu0 %vm175_vm2, %v4103_v29  ;;  %3999 = vmatmul.mubr.msk.bf16.gmra.mxu1 %vm175_vm2, %v4104_v30 }
  0xa2   :  { %3968 = vmatprep.mubr.msk.bf16.mxu0 %vm175_vm2, %v4105_v31  ;;  %4002 = vmatprep.mubr.msk.bf16.mxu1 %vm175_vm2, %v4106_v32 }
  0xa9   :  { %3969 = vmatmul.mubr.msk.bf16.gmra.mxu0 %vm175_vm2, %v4107_v33  ;;  %4003 = vmatmul.mubr.msk.bf16.gmra.mxu1 %vm175_vm2, %v4108_v34 }
  0xaa   :  { %3972 = vmatprep.mubr.msk.bf16.mxu0 %vm175_vm2, %v4109_v35  ;;  %4006 = vmatprep.mubr.msk.bf16.mxu1 %vm175_vm2, %v4110_v36 }
  0xb1   :  { %3973 = vmatmul.mubr.msk.bf16.gmra.mxu0 %vm175_vm2, %v4111_v37  ;;  %4007 = vmatmul.mubr.msk.bf16.gmra.mxu1 %vm175_vm2, %v4112_v38 }
  0xb2   :  { %3976 = vmatprep.mubr.msk.bf16.mxu0 %vm175_vm2, %v4113_v39  ;;  %4010 = vmatprep.mubr.msk.bf16.mxu1 %vm175_vm2, %v4114_v40 }
  0xb9   :  { %3977 = vmatmul.mubr.msk.bf16.gmra.mxu0 %vm175_vm2, %v4115_v41  ;;  %4011 = vmatmul.mubr.msk.bf16.gmra.mxu1 %vm175_vm2, %v4116_v42 }
  0xba   :  { %3980 = vmatprep.mubr.msk.bf16.mxu0 %vm175_vm2, %v4117_v43  ;;  %4014 = vmatprep.mubr.msk.bf16.mxu1 %vm175_vm2, %v4118_v44 }
  0xc1   :  { %3981 = vmatmul.mubr.msk.bf16.gmra.mxu0 %vm175_vm2, %v4119_v45  ;;  %4015 = vmatmul.mubr.msk.bf16.gmra.mxu1 %vm175_vm2, %v4120_v46 }
  0xc9   :  { %v3818_v47 = vpop.f32.mrf.mxu0  ;;  %v3852_v48 = vpop.f32.mrf.mxu1 }
  0xca   :  { %v4556_v49 = vadd.f32 %v3852_v48, %v3818_v47 }
  0xcb   :  { %v265_v50 = vpop.f32.mrf.mxu0  ;;  %v562_v51 = vpop.f32.mrf.mxu1 }
  0xcc   :  { %v4558_v52 = vadd.f32 %v562_v51, %v265_v50 }
  0xcd   :  { %v3819_v53 = vpop.f32.mrf.mxu0  ;;  %v3853_v54 = vpop.f32.mrf.mxu1 }
  0xce   :  { %v4560_v55 = vadd.f32 %v3853_v54, %v3819_v53 }
  0xcf   :  { %v268_v56 = vpop.f32.mrf.mxu0  ;;  %v565_v57 = vpop.f32.mrf.mxu1 }
  0xd0   :  { %v4562_v58 = vadd.f32 %v565_v57, %v268_v56 }
  0xd1   :  { %v3822_v59 = vpop.f32.mrf.mxu0  ;;  %v3856_v60 = vpop.f32.mrf.mxu1 }
  0xd2   :  { %v4564_v61 = vadd.f32 %v3856_v60, %v3822_v59 }
  0xd3   :  { %v281_v62 = vpop.f32.mrf.mxu0  ;;  %v578_v63 = vpop.f32.mrf.mxu1 }
  0xd4   :  { %v4566_v0 = vadd.f32 %v578_v63, %v281_v62 }
  0xd5   :  { %v3823_v1 = vpop.f32.mrf.mxu0  ;;  %v3857_v2 = vpop.f32.mrf.mxu1 }
  0xd6   :  { %v4568_v3 = vadd.f32 %v3857_v2, %v3823_v1 }
  0xd7   :  { %v284_v4 = vpop.f32.mrf.mxu0  ;;  %v581_v5 = vpop.f32.mrf.mxu1 }
  0xd8   :  { %v4570_v6 = vadd.f32 %v581_v5, %v284_v4 }
  0xd9   :  { %v3826_v7 = vpop.f32.mrf.mxu0  ;;  %v3860_v8 = vpop.f32.mrf.mxu1 }
  0xda   :  { %v4572_v9 = vadd.f32 %v3860_v8, %v3826_v7 }
  0xdb   :  { %v297_v10 = vpop.f32.mrf.mxu0  ;;  %v594_v11 = vpop.f32.mrf.mxu1 }
  0xdc   :  { %v4574_v12 = vadd.f32 %v594_v11, %v297_v10 }
  0xdd   :  { %v3827_v13 = vpop.f32.mrf.mxu0  ;;  %v3861_v14 = vpop.f32.mrf.mxu1 }
  0xde   :  { %v4576_v15 = vadd.f32 %v3861_v14, %v3827_v13 }
  0xdf   :  { %v300_v16 = vpop.f32.mrf.mxu0  ;;  %v597_v17 = vpop.f32.mrf.mxu1 }
  0xe0   :  { %v4578_v18 = vadd.f32 %v597_v17, %v300_v16 }
  0xe1   :  { %v3830_v19 = vpop.f32.mrf.mxu0  ;;  %v3864_v20 = vpop.f32.mrf.mxu1 }
  0xe2   :  { %v4580_v21 = vadd.f32 %v3864_v20, %v3830_v19 }
  0xe3   :  { %v313_v22 = vpop.f32.mrf.mxu0  ;;  %v610_v23 = vpop.f32.mrf.mxu1 }
  0xe4   :  { %v4582_v24 = vadd.f32 %v610_v23, %v313_v22 }
  0xe5   :  { %v3831_v25 = vpop.f32.mrf.mxu0  ;;  %v3865_v26 = vpop.f32.mrf.mxu1 }
  0xe6   :  { %v4584_v27 = vadd.f32 %v3865_v26, %v3831_v25 }
  0xe7   :  { %v316_v28 = vpop.f32.mrf.mxu0  ;;  %v613_v29 = vpop.f32.mrf.mxu1 }
  0xe8   :  { %v4586_v30 = vadd.f32 %v613_v29, %v316_v28 }
  0xe9   :  { %v3834_v31 = vpop.f32.mrf.mxu0  ;;  %v3868_v32 = vpop.f32.mrf.mxu1 }
  0xea   :  { %v4588_v33 = vadd.f32 %v3868_v32, %v3834_v31 }
  0xeb   :  { %v329_v34 = vpop.f32.mrf.mxu0  ;;  %v626_v35 = vpop.f32.mrf.mxu1 }
  0xec   :  { %v4590_v36 = vadd.f32 %v626_v35, %v329_v34 }
  0xed   :  { %v3835_v37 = vpop.f32.mrf.mxu0  ;;  %v3869_v38 = vpop.f32.mrf.mxu1 }
  0xee   :  { %v4592_v39 = vadd.f32 %v3869_v38, %v3835_v37 }
  0xef   :  { %v332_v40 = vpop.f32.mrf.mxu0  ;;  %v629_v41 = vpop.f32.mrf.mxu1 }
  0xf0   :  { %v4594_v42 = vadd.f32 %v629_v41, %v332_v40 }
  0xf1   :  { %v3838_v43 = vpop.f32.mrf.mxu0  ;;  %v3872_v44 = vpop.f32.mrf.mxu1 }
  0xf2   :  { %v4596_v45 = vadd.f32 %v3872_v44, %v3838_v43 }
  0xf3   :  { %v345_v46 = vpop.f32.mrf.mxu0  ;;  %v642_v47 = vpop.f32.mrf.mxu1 }
  0xf4   :  { %v4598_v48 = vadd.f32 %v642_v47, %v345_v46 }
  0xf5   :  { %v3839_v50 = vpop.f32.mrf.mxu0  ;;  %v3873_v51 = vpop.f32.mrf.mxu1 }
  0xf6   :  { %v4600_v53 = vadd.f32 %v3873_v51, %v3839_v50 }
  0xf7   :  { %v348_v54 = vpop.f32.mrf.mxu0  ;;  %v645_v56 = vpop.f32.mrf.mxu1 }
  0xf8   :  { %v4602_v57 = vadd.f32 %v645_v56, %v348_v54 }
  0xf9   :  { %v3842_v59 = vpop.f32.mrf.mxu0  ;;  %v3876_v60 = vpop.f32.mrf.mxu1 }
  0xfa   :  { %v4604_v62 = vadd.f32 %v3876_v60, %v3842_v59 }
  0xfb   :  { %v361_v63 = vpop.f32.mrf.mxu0  ;;  %v658_v1 = vpop.f32.mrf.mxu1 }
  0xfc   :  { %v4606_v2 = vadd.f32 %v658_v1, %v361_v63 }
  0xfd   :  { %v3843_v4 = vpop.f32.mrf.mxu0  ;;  %v3877_v5 = vpop.f32.mrf.mxu1 }
  0xfe   :  { %v4608_v7 = vadd.f32 %v3877_v5, %v3843_v4 }
  0xff   :  { %v364_v8 = vpop.f32.mrf.mxu0  ;;  %v661_v10 = vpop.f32.mrf.mxu1 }
 0x100   :  { %v4610_v11 = vadd.f32 %v661_v10, %v364_v8 }
 0x101   :  { %v3846_v13 = vpop.f32.mrf.mxu0  ;;  %v3880_v14 = vpop.f32.mrf.mxu1 }
 0x102   :  { %v4612_v16 = vadd.f32 %v3880_v14, %v3846_v13 }
 0x103   :  { %v377_v17 = vpop.f32.mrf.mxu0  ;;  %v674_v19 = vpop.f32.mrf.mxu1 }
 0x104   :  { %v4614_v20 = vadd.f32 %v674_v19, %v377_v17 }
 0x105   :  { %v3847_v22 = vpop.f32.mrf.mxu0  ;;  %v3881_v23 = vpop.f32.mrf.mxu1 }
 0x106   :  { %v4616_v25 = vadd.f32 %v3881_v23, %v3847_v22 }
 0x107   :  { %v380_v26 = vpop.f32.mrf.mxu0  ;;  %v677_v28 = vpop.f32.mrf.mxu1 }
 0x108   :  { %v4618_v29 = vadd.f32 %v677_v28, %v380_v26 }
 0x109   :  { %v3886_v31 = vpop.f32.mrf.mxu0  ;;  %v4623_v34 = vpop.f32.mrf.mxu1 }
 0x10a   :  { %v4621_v32 = vadd.f32 %v3886_v31, %v4556_v49 }
 0x10b   :  { %v894_v35 = vpop.f32.mrf.mxu0  ;;  %v4628_v38 = vpop.f32.mrf.mxu1 }
 0x10c   :  { %5492 = vst [vmem:[#allocation3_spill] sm:$0xff] %v4621_v32  ;;  %v4626_v37 = vadd.f32 %v894_v35, %v4558_v52 }
 0x10d   :  { %v3887_v40 = vpop.f32.mrf.mxu0  ;;  %v4633_v43 = vpop.f32.mrf.mxu1 }
 0x10e   :  { %5493 = vst [vmem:[#allocation4_spill] sm:$0xff] %v4626_v37  ;;  %v4631_v41 = vadd.f32 %v3887_v40, %v4560_v55 }
 0x10f   :  { %v897_v44 = vpop.f32.mrf.mxu0  ;;  %v4638_v49 = vpop.f32.mrf.mxu1 }
 0x110   :  { %5494 = vst [vmem:[#allocation5_spill] sm:$0xff] %v4631_v41  ;;  %v4636_v46 = vadd.f32 %v897_v44, %v4562_v58 }
 0x111   :  { %v3890_v47 = vpop.f32.mrf.mxu0  ;;  %v4645_v51 = vpop.f32.mrf.mxu1 }
 0x112   :  { %5495 = vst [vmem:[#allocation6_spill] sm:$0xff] %v4636_v46  ;;  %v2179_v50 = vadd.f32 %v4636_v46, %v4626_v37  ;;  %v4643_v52 = vadd.f32 %v3890_v47, %v4564_v61 }
 0x113   :  { %v910_v54 = vpop.f32.mrf.mxu0  ;;  %v4651_v59 = vpop.f32.mrf.mxu1 }
 0x114   :  { %5496 = vst [vmem:[#allocation7_spill] sm:$0xff] %v4643_v52  ;;  %v2180_v55 = vadd.f32 %v2179_v50, %v4621_v32  ;;  %v4649_v56 = vadd.f32 %v910_v54, %v4566_v0 }
 0x115   :  { %v3891_v58 = vpop.f32.mrf.mxu0  ;;  %v4656_v63 = vpop.f32.mrf.mxu1 }
 0x116   :  { %5497 = vst [vmem:[#allocation8_spill] sm:$0xff] %v4649_v56  ;;  %v4654_v60 = vadd.f32 %v3891_v58, %v4568_v3  ;;  %v2181_v1 = vadd.f32 %v2180_v55, %v4631_v41 }
 0x117   :  { %v913_v61 = vpop.f32.mrf.mxu0  ;;  %v4662_v5 = vpop.f32.mrf.mxu1 }
 0x118   :  { %5498 = vst [vmem:[#allocation9_spill] sm:$0xff] %v4654_v60  ;;  %v4660_v4 = vadd.f32 %v913_v61, %v4570_v6  ;;  %v2182_v13 = vadd.f32 %v2181_v1, %v4649_v56 }
 0x119   :  { %v3894_v8 = vpop.f32.mrf.mxu0  ;;  %v4667_v10 = vpop.f32.mrf.mxu1 }
 0x11a   :  { %5499 = vst [vmem:[#allocation10_spill] sm:$0xff] %v4660_v4  ;;  %v4665_v0 = vadd.f32 %v3894_v8, %v4572_v9  ;;  %v2183_v23 = vadd.f32 %v2182_v13, %v4660_v4 }
 0x11b   :  { %v926_v3 = vpop.f32.mrf.mxu0  ;;  %v4673_v17 = vpop.f32.mrf.mxu1 }
 0x11c   :  { %5500 = vst [vmem:[#allocation11_spill] sm:$0xff] %v4665_v0  ;;  %v4671_v14 = vadd.f32 %v926_v3, %v4574_v12  ;;  %v2184_v40 = vadd.f32 %v2183_v23, %v4643_v52 }
 0x11d   :  { %v3895_v19 = vpop.f32.mrf.mxu0  ;;  %v4678_v22 = vpop.f32.mrf.mxu1 }
 0x11e   :  { %5501 = vst [vmem:[#allocation12_spill] sm:$0xff] %v4671_v14  ;;  %v4676_v6 = vadd.f32 %v3895_v19, %v4576_v15  ;;  %v2185_v55 = vadd.f32 %v2184_v40, %v4654_v60 }
 0x11f   :  { %v929_v9 = vpop.f32.mrf.mxu0  ;;  %v4684_v28 = vpop.f32.mrf.mxu1 }
 0x120   :  { %5502 = vst [vmem:[#allocation13_spill] sm:$0xff] %v4676_v6  ;;  %v4682_v26 = vadd.f32 %v929_v9, %v4578_v18  ;;  %v2186_v13 = vadd.f32 %v2185_v55, %v4671_v14 }
 0x121   :  { %v3898_v31 = vpop.f32.mrf.mxu0  ;;  %v4689_v35 = vpop.f32.mrf.mxu1 }
 0x122   :  { %5503 = vst [vmem:[#allocation14_spill] sm:$0xff] %v4682_v26  ;;  %v4687_v12 = vadd.f32 %v3898_v31, %v4580_v21  ;;  %v2187_v31 = vadd.f32 %v2186_v13, %v4682_v26 }
 0x123   :  { %v942_v15 = vpop.f32.mrf.mxu0  ;;  %v4695_v47 = vpop.f32.mrf.mxu1 }
 0x124   :  { %5504 = vst [vmem:[#allocation15_spill] sm:$0xff] %v4687_v12  ;;  %v4693_v44 = vadd.f32 %v942_v15, %v4582_v24 }
 0x125   :  { %v3899_v50 = vpop.f32.mrf.mxu0  ;;  %v4700_v54 = vpop.f32.mrf.mxu1 }
 0x126   :  { %5505 = vst [vmem:[#allocation16_spill] sm:$0xff] %v4693_v44  ;;  %v4698_v18 = vadd.f32 %v3899_v50, %v4584_v27 }
 0x127   :  { %v945_v21 = vpop.f32.mrf.mxu0  ;;  %v4706_v1 = vpop.f32.mrf.mxu1 }
 0x128   :  { %5506 = vst [vmem:[#allocation17_spill] sm:$0xff] %v4698_v18  ;;  %v4704_v58 = vadd.f32 %v945_v21, %v4586_v30  ;;  %v2188_v21 = vadd.f32 %v2187_v31, %v4665_v0 }
 0x129   :  { %v3902_v61 = vpop.f32.mrf.mxu0  ;;  %v4711_v8 = vpop.f32.mrf.mxu1 }
 0x12a   :  { %5507 = vst [vmem:[#allocation18_spill] sm:$0xff] %v4704_v58  ;;  %v4709_v24 = vadd.f32 %v3902_v61, %v4588_v33 }
 0x12b   :  { %v958_v27 = vpop.f32.mrf.mxu0  ;;  %v4717_v19 = vpop.f32.mrf.mxu1 }
 0x12c   :  { %5508 = vst [vmem:[#allocation19_spill] sm:$0xff] %v4709_v24  ;;  %v4715_v3 = vadd.f32 %v958_v27, %v4590_v36 }
 0x12d   :  { %v3903_v23 = vpop.f32.mrf.mxu0  ;;  %v4722_v9 = vpop.f32.mrf.mxu1 }
 0x12e   :  { %5509 = vst [vmem:[#allocation20_spill] sm:$0xff] %v4715_v3  ;;  %v4720_v30 = vadd.f32 %v3903_v23, %v4592_v39 }
 0x12f   :  { %v961_v33 = vpop.f32.mrf.mxu0  ;;  %v4728_v15 = vpop.f32.mrf.mxu1 }
 0x130   :  { %5510 = vst [vmem:[#allocation21_spill] sm:$0xff] %v4720_v30  ;;  %v4726_v40 = vadd.f32 %v961_v33, %v4594_v42  ;;  %v2189_v33 = vadd.f32 %v2188_v21, %v4676_v6 }
 0x131   :  { %v3906_v50 = vpop.f32.mrf.mxu0  ;;  %v4733_v55 = vpop.f32.mrf.mxu1 }
 0x132   :  { %v4731_v36 = vadd.f32 %v3906_v50, %v4596_v45  ;;  %v2190_v0 = vadd.f32 %v2189_v33, %v4693_v44 }
 0x133   :  { %v974_v39 = vpop.f32.mrf.mxu0  ;;  %v4739_v27 = vpop.f32.mrf.mxu1 }
 0x134   :  { %v4737_v61 = vadd.f32 %v974_v39, %v4598_v48  ;;  %v2191_v6 = vadd.f32 %v2190_v0, %v4704_v58 }
 0x135   :  { %v3907_v13 = vpop.f32.mrf.mxu0  ;;  %v4744_v23 = vpop.f32.mrf.mxu1 }
 0x136   :  { %v4742_v42 = vadd.f32 %v3907_v13, %v4600_v53  ;;  %v2192_v44 = vadd.f32 %v2191_v6, %v4687_v12 }
 0x137   :  { %v977_v45 = vpop.f32.mrf.mxu0  ;;  %v4750_v26 = vpop.f32.mrf.mxu1 }
 0x138   :  { %v4748_v50 = vadd.f32 %v977_v45, %v4602_v57  ;;  %v2193_v58 = vadd.f32 %v2192_v44, %v4698_v18 }
 0x139   :  { %v3910_v31 = vpop.f32.mrf.mxu0  ;;  %v4755_v39 = vpop.f32.mrf.mxu1 }
 0x13a   :  { %v4753_v48 = vadd.f32 %v3910_v31, %v4604_v62 }
 0x13b   :  { %v990_v53 = vpop.f32.mrf.mxu0  ;;  %v4761_v14 = vpop.f32.mrf.mxu1 }
 0x13c   :  { %v4759_v13 = vadd.f32 %v990_v53, %v4606_v2 }
 0x13d   :  { %v3911_v21 = vpop.f32.mrf.mxu0  ;;  %v4766_v45 = vpop.f32.mrf.mxu1 }
 0x13e   :  { %v4764_v57 = vadd.f32 %v3911_v21, %v4608_v7 }
 0x13f   :  { %v993_v62 = vpop.f32.mrf.mxu0  ;;  %v4772_v60 = vpop.f32.mrf.mxu1 }
 0x140   :  { %v4770_v31 = vadd.f32 %v993_v62, %v4610_v11 }
 0x141   :  { %v3914_v33 = vpop.f32.mrf.mxu0  ;;  %v4777_v53 = vpop.f32.mrf.mxu1 }
 0x142   :  { %v4775_v2 = vadd.f32 %v3914_v33, %v4612_v16 }
 0x143   :  { %v1006_v7 = vpop.f32.mrf.mxu0  ;;  %v4783_v52 = vpop.f32.mrf.mxu1 }
 0x144   :  { %v4781_v21 = vadd.f32 %v1006_v7, %v4614_v20  ;;  %v2194_v20 = vadd.f32 %v2193_v58, %v4715_v3 }
 0x145   :  { %v3915_v0 = vpop.f32.mrf.mxu0  ;;  %v4788_v62 = vpop.f32.mrf.mxu1 }
 0x146   :  { %v4786_v11 = vadd.f32 %v3915_v0, %v4616_v25  ;;  %5511 = vst [vmem:[#allocation22_spill] sm:$0xff] %v4788_v62  ;;  %v2195_v32 = vadd.f32 %v2194_v20, %v4726_v40 }
 0x147   :  { %v1009_v16 = vpop.f32.mrf.mxu0  ;;  %v4794_v4 = vpop.f32.mrf.mxu1 }
 0x148   :  { %v4792_v33 = vadd.f32 %v1009_v16, %v4618_v29  ;;  %5512 = vst [vmem:[#allocation23_spill] sm:$0xff] %v4794_v4  ;;  %v2196_v4 = vadd.f32 %v2195_v32, %v4709_v24 }
 0x149   :  { %v3954_v6 = vpop.f32.mrf.mxu0  ;;  %v3988_v12 = vpop.f32.mrf.mxu1 }
 0x14a   :  { %v1631_v44 = vadd.f32 %v3954_v6, %v4623_v34 }
 0x14b   :  { %v1622_v7 = vpop.f32.mrf.mxu0  ;;  %v1953_v56 = vpop.f32.mrf.mxu1 }
 0x14c   :  { %v1623_v25 = vadd.f32 %v1622_v7, %v4628_v38  ;;  %v4807_v7 = vadd.f32 %v3988_v12, %v1631_v44 }
 0x14d   :  { %v3955_v41 = vpop.f32.mrf.mxu0  ;;  %v3989_v0 = vpop.f32.mrf.mxu1 }
 0x14e   :  { %v4801_v37 = vadd.f32 %v1953_v56, %v1623_v25  ;;  %v1634_v62 = vadd.f32 %v3955_v41, %v4633_v43  ;;  %5515 = vst [vmem:[#allocation26_spill] sm:$0xff] %v4807_v7  ;;  %v2197_v43 = vadd.f32 %v2196_v4, %v4720_v30 }
 0x14f   :  { %v1625_v46 = vpop.f32.mrf.mxu0  ;;  %v1956_v16 = vpop.f32.mrf.mxu1 }
 0x150   :  { %v1626_v29 = vadd.f32 %v1625_v46, %v4638_v49  ;;  %5513 = vst [vmem:[#allocation24_spill] sm:$0xff] %v4801_v37  ;;  %v4812_v6 = vadd.f32 %v3989_v0, %v1634_v62  ;;  %v2198_v4 = vadd.f32 %v2197_v43, %v4737_v61 }
 0x151   :  { %v3958_v18 = vpop.f32.mrf.mxu0  ;;  %v3992_v3 = vpop.f32.mrf.mxu1 }
 0x152   :  { %v4804_v58 = vadd.f32 %v1956_v16, %v1626_v29  ;;  %5516 = vst [vmem:[#allocation27_spill] sm:$0xff] %v4812_v6  ;;  %v1647_v32 = vadd.f32 %v3958_v18, %v4645_v51 }
 0x153   :  { %v1638_v38 = vpop.f32.mrf.mxu0  ;;  %v1969_v46 = vpop.f32.mrf.mxu1 }
 0x154   :  { %5514 = vst [vmem:[#allocation25_spill] sm:$0xff] %v4804_v58  ;;  %v2249_v20 = vadd.f32 %v4804_v58, %v4801_v37  ;;  %v1639_v34 = vadd.f32 %v1638_v38, %v4651_v59  ;;  %v4826_v24 = vadd.f32 %v3992_v3, %v1647_v32 }
 0x155   :  { %v3959_v49 = vpop.f32.mrf.mxu0  ;;  %v3993_v41 = vpop.f32.mrf.mxu1 }
 0x156   :  { %v2250_v56 = vadd.f32 %v2249_v20, %v4807_v7  ;;  %v4817_v29 = vadd.f32 %v1969_v46, %v1639_v34  ;;  %v1650_v62 = vadd.f32 %v3959_v49, %v4656_v63  ;;  %5518 = vst [vmem:[#allocation29_spill] sm:$0xff] %v4826_v24  ;;  %v2199_v63 = vadd.f32 %v2198_v4, %v4748_v50 }
 0x157   :  { %v1641_v25 = vpop.f32.mrf.mxu0  ;;  %v1972_v16 = vpop.f32.mrf.mxu1 }
 0x158   :  { %5517 = vst [vmem:[#allocation28_spill] sm:$0xff] %v4817_v29  ;;  %v2251_v12 = vadd.f32 %v2250_v56, %v4812_v6  ;;  %v1642_v44 = vadd.f32 %v1641_v25, %v4662_v5  ;;  %v4830_v46 = vadd.f32 %v3993_v41, %v1650_v62  ;;  %v2200_v62 = vadd.f32 %v2199_v63, %v4731_v36 }
 0x159   :  { %v3962_v59 = vpop.f32.mrf.mxu0  ;;  %v3996_v20 = vpop.f32.mrf.mxu1 }
 0x15a   :  { %v2252_v38 = vadd.f32 %v2251_v12, %v4817_v29  ;;  %v4823_v0 = vadd.f32 %v1972_v16, %v1642_v44  ;;  %5519 = vst [vmem:[#allocation30_spill] sm:$0xff] %v4830_v46  ;;  %v1663_v12 = vadd.f32 %v3962_v59, %v4667_v10 }
 0x15b   :  { %v1654_v30 = vpop.f32.mrf.mxu0  ;;  %v1985_v34 = vpop.f32.mrf.mxu1 }
 0x15c   :  { %v2253_v51 = vadd.f32 %v2252_v38, %v4823_v0  ;;  %v1655_v18 = vadd.f32 %v1654_v30, %v4673_v17 }
 0x15d   :  { %v3963_v5 = vpop.f32.mrf.mxu0  ;;  %v3997_v25 = vpop.f32.mrf.mxu1 }
 0x15e   :  { %v2254_v56 = vadd.f32 %v2253_v51, %v4826_v24  ;;  %v4835_v43 = vadd.f32 %v1985_v34, %v1655_v18  ;;  %v1666_v41 = vadd.f32 %v3963_v5, %v4678_v22  ;;  %v4844_v51 = vadd.f32 %v3996_v20, %v1663_v12 }
 0x15f   :  { %v1657_v49 = vpop.f32.mrf.mxu0  ;;  %v1988_v44 = vpop.f32.mrf.mxu1  ;;  %v2201_v22 = vadd.f32 %v2200_v62, %v4742_v42 }
 0x160   :  { %v2255_v3 = vadd.f32 %v2254_v56, %v4830_v46  ;;  %v1658_v32 = vadd.f32 %v1657_v49, %v4684_v28  ;;  %v4848_v34 = vadd.f32 %v3997_v25, %v1666_v41 }
 0x161   :  { %v3966_v17 = vpop.f32.mrf.mxu0  ;;  %v4000_v38 = vpop.f32.mrf.mxu1  ;;  %v2202_v62 = vadd.f32 %v2201_v22, %v4759_v13 }
 0x162   :  { %v2256_v30 = vadd.f32 %v2255_v3, %v4835_v43  ;;  %v4841_v16 = vadd.f32 %v1988_v44, %v1658_v32  ;;  %v1679_v3 = vadd.f32 %v3966_v17, %v4689_v35 }
 0x163   :  { %v1670_v4 = vpop.f32.mrf.mxu0  ;;  %v2001_v18 = vpop.f32.mrf.mxu1 }
 0x164   :  { %v2257_v10 = vadd.f32 %v2256_v30, %v4841_v16  ;;  %v1671_v59 = vadd.f32 %v1670_v4, %v4695_v47 }
 0x165   :  { %v3967_v28 = vpop.f32.mrf.mxu0  ;;  %v4001_v49 = vpop.f32.mrf.mxu1 }
 0x166   :  { %v2258_v56 = vadd.f32 %v2257_v10, %v4844_v51  ;;  %v4853_v63 = vadd.f32 %v2001_v18, %v1671_v59  ;;  %v1682_v25 = vadd.f32 %v3967_v28, %v4700_v54  ;;  %v4862_v10 = vadd.f32 %v4000_v38, %v1679_v3 }
 0x167   :  { %v1673_v5 = vpop.f32.mrf.mxu0  ;;  %v2004_v32 = vpop.f32.mrf.mxu1  ;;  %v2203_v54 = vadd.f32 %v2202_v62, %v4770_v31 }
 0x168   :  { %v2259_v20 = vadd.f32 %v2258_v56, %v4848_v34  ;;  %v1674_v12 = vadd.f32 %v1673_v5, %v4706_v1  ;;  %v4866_v18 = vadd.f32 %v4001_v49, %v1682_v25 }
 0x169   :  { %v3970_v47 = vpop.f32.mrf.mxu0  ;;  %v4004_v41 = vpop.f32.mrf.mxu1  ;;  %v2204_v62 = vadd.f32 %v2203_v54, %v4753_v48 }
 0x16a   :  { %v2260_v44 = vadd.f32 %v2259_v20, %v4853_v63  ;;  %v4859_v30 = vadd.f32 %v2004_v32, %v1674_v12  ;;  %v1695_v20 = vadd.f32 %v3970_v47, %v4711_v8 }
 0x16b   :  { %v1686_v4 = vpop.f32.mrf.mxu0  ;;  %v2017_v59 = vpop.f32.mrf.mxu1 }
 0x16c   :  { %v2261_v35 = vadd.f32 %v2260_v44, %v4859_v30  ;;  %v1687_v17 = vadd.f32 %v1686_v4, %v4717_v19 }
 0x16d   :  { %v3971_v1 = vpop.f32.mrf.mxu0  ;;  %v4005_v5 = vpop.f32.mrf.mxu1 }
 0x16e   :  { %v2262_v56 = vadd.f32 %v2261_v35, %v4862_v10  ;;  %v4871_v22 = vadd.f32 %v2017_v59, %v1687_v17  ;;  %v1698_v49 = vadd.f32 %v3971_v1, %v4722_v9  ;;  %v4880_v35 = vadd.f32 %v4004_v41, %v1695_v20 }
 0x16f   :  { %v1689_v28 = vpop.f32.mrf.mxu0  ;;  %v2020_v12 = vpop.f32.mrf.mxu1  ;;  %v2205_v9 = vadd.f32 %v2204_v62, %v4764_v57 }
 0x170   :  { %v2263_v38 = vadd.f32 %v2262_v56, %v4866_v18  ;;  %v1690_v3 = vadd.f32 %v1689_v28, %v4728_v15  ;;  %5520 = vst [vmem:[#allocation31_spill] sm:$0xff] %v4880_v35  ;;  %v4884_v59 = vadd.f32 %v4005_v5, %v1698_v49 }
 0x171   :  { %v3974_v19 = vpop.f32.mrf.mxu0  ;;  %v4008_v25 = vpop.f32.mrf.mxu1  ;;  %v2206_v62 = vadd.f32 %v2205_v9, %v4781_v21 }
 0x172   :  { %v2264_v32 = vadd.f32 %v2263_v38, %v4871_v22  ;;  %v4877_v44 = vadd.f32 %v2020_v12, %v1690_v3  ;;  %v1711_v38 = vadd.f32 %v3974_v19, %v4733_v55 }
 0x173   :  { %v1702_v4 = vpop.f32.mrf.mxu0  ;;  %v2033_v17 = vpop.f32.mrf.mxu1 }
 0x174   :  { %v2265_v8 = vadd.f32 %v2264_v32, %v4877_v44  ;;  %v1703_v47 = vadd.f32 %v1702_v4, %v4739_v27 }
 0x175   :  { %v3975_v15 = vpop.f32.mrf.mxu0  ;;  %v4009_v28 = vpop.f32.mrf.mxu1 }
 0x176   :  { %v2266_v56 = vadd.f32 %v2265_v8, %v4880_v35  ;;  %v4889_v54 = vadd.f32 %v2033_v17, %v1703_v47  ;;  %v1714_v5 = vadd.f32 %v3975_v15, %v4744_v23  ;;  %v4898_v8 = vadd.f32 %v4008_v25, %v1711_v38 }
 0x177   :  { %v1705_v1 = vpop.f32.mrf.mxu0  ;;  %v2036_v3 = vpop.f32.mrf.mxu1  ;;  %v2207_v23 = vadd.f32 %v2206_v62, %v4792_v33 }
 0x178   :  { %5521 = vst [vmem:[#allocation32_spill] sm:$0xff] %v4889_v54  ;;  %v2267_v41 = vadd.f32 %v2266_v56, %v4884_v59  ;;  %v1706_v20 = vadd.f32 %v1705_v1, %v4750_v26  ;;  %5523 = vst [vmem:[#allocation34_spill] sm:$0xff] %v4898_v8  ;;  %v4902_v17 = vadd.f32 %v4009_v28, %v1714_v5 }
 0x179   :  { %v3978_v27 = vpop.f32.mrf.mxu0  ;;  %v4012_v49 = vpop.f32.mrf.mxu1  ;;  %v2208_v62 = vadd.f32 %v2207_v23, %v4775_v2 }
 0x17a   :  { %v2268_v12 = vadd.f32 %v2267_v41, %v4889_v54  ;;  %v4895_v32 = vadd.f32 %v2036_v3, %v1706_v20  ;;  %5524 = vst [vmem:[#allocation35_spill] sm:$0xff] %v4902_v17  ;;  %v1727_v41 = vadd.f32 %v3978_v27, %v4755_v39 }
 0x17b   :  { %v1718_v4 = vpop.f32.mrf.mxu0  ;;  %v2049_v47 = vpop.f32.mrf.mxu1 }
 0x17c   :  { %5522 = vst [vmem:[#allocation33_spill] sm:$0xff] %v4895_v32  ;;  %v2269_v55 = vadd.f32 %v2268_v12, %v4895_v32  ;;  %v1719_v19 = vadd.f32 %v1718_v4, %v4761_v14 }
 0x17d   :  { %v3979_v26 = vpop.f32.mrf.mxu0  ;;  %v4013_v1 = vpop.f32.mrf.mxu1 }
 0x17e   :  { %v2270_v56 = vadd.f32 %v2269_v55, %v4898_v8  ;;  %v4907_v9 = vadd.f32 %v2049_v47, %v1719_v19  ;;  %v1730_v28 = vadd.f32 %v3979_v26, %v4766_v45  ;;  %v4916_v55 = vadd.f32 %v4012_v49, %v1727_v41  ;;  %v5530_v41 = vld [vmem:[#allocation23_spill] sm:$0xff] }
 0x17f   :  { %v1721_v15 = vpop.f32.mrf.mxu0  ;;  %v2052_v20 = vpop.f32.mrf.mxu1  ;;  %v2209_v45 = vadd.f32 %v2208_v62, %v4786_v11 }
 0x180   :  { %5525 = vst [vmem:[#allocation36_spill] sm:$0xff] %v4907_v9  ;;  %v2271_v25 = vadd.f32 %v2270_v56, %v4902_v17  ;;  %v1722_v38 = vadd.f32 %v1721_v15, %v4772_v60  ;;  %5527 = vst [vmem:[#allocation38_spill] sm:$0xff] %v4916_v55  ;;  %v4920_v47 = vadd.f32 %v4013_v1, %v1730_v28 }
 0x181   :  { %v3982_v14 = vpop.f32.mrf.mxu0  ;;  %v4016_v5 = vpop.f32.mrf.mxu1 }
 0x182   :  { %v2272_v3 = vadd.f32 %v2271_v25, %v4907_v9  ;;  %v4913_v12 = vadd.f32 %v2052_v20, %v1722_v38  ;;  %5528 = vst [vmem:[#allocation39_spill] sm:$0xff] %v4920_v47  ;;  %v1743_v25 = vadd.f32 %v3982_v14, %v4777_v53 }
 0x183   :  { %v1734_v4 = vpop.f32.mrf.mxu0  ;;  %v2065_v19 = vpop.f32.mrf.mxu1 }
 0x184   :  { %5526 = vst [vmem:[#allocation37_spill] sm:$0xff] %v4913_v12  ;;  %v2273_v39 = vadd.f32 %v2272_v3, %v4913_v12  ;;  %v1735_v27 = vadd.f32 %v1734_v4, %v4783_v52  ;;  %v5531_v3 = vld [vmem:[#allocation22_spill] sm:$0xff]  ;;  %v2210_v4 = vrot.slane %v2209_v45, 4 }
 0x185   :  { %v3983_v60 = vpop.f32.mrf.mxu0  ;;  %v4017_v15 = vpop.f32.mrf.mxu1 }
 0x186   :  { %v2274_v56 = vadd.f32 %v2273_v39, %v4916_v55  ;;  %v4925_v23 = vadd.f32 %v2065_v19, %v1735_v27  ;;  %v1746_v1 = vadd.f32 %v3983_v60, %v5531_v3  ;;  %v4933_v39 = vadd.f32 %v4016_v5, %v1743_v25 }
 0x187   :  { %v1737_v26 = vpop.f32.mrf.mxu0  ;;  %v2068_v20 = vpop.f32.mrf.mxu1  ;;  %v2211_v14 = vadd.f32 %v2210_v4, %v2209_v45  ;;  %v5536_v45 = vld [vmem:[#allocation6_spill] sm:$0xff]  ;;  %v5537_v4 = vld [vmem:[#allocation3_spill] sm:$0xff] }
 0x188   :  { %5529 = vst [vmem:[#allocation40_spill] sm:$0xff] %v4925_v23  ;;  %v2275_v49 = vadd.f32 %v2274_v56, %v4920_v47  ;;  %v1738_v38 = vadd.f32 %v1737_v26, %v5530_v41  ;;  %5533 = vst [vmem:[#allocation22_spill] sm:$0xff] %v4933_v39  ;;  %v4936_v55 = vadd.f32 %v4017_v15, %v1746_v1  ;;  %v5535_v15 = vld [vmem:[#allocation4_spill] sm:$0xff] }
 0x189   :  { %v2212_v56 = vrot.slane %v2211_v14, 2 }
 0x18a   :  { %v2276_v52 = vadd.f32 %v2275_v49, %v4925_v23  ;;  %v4931_v28 = vadd.f32 %v2068_v20, %v1738_v38  ;;  %5534 = vst [vmem:[#allocation41_spill] sm:$0xff] %v4936_v55 }
 0x18b   :  { %v2213_v41 = vadd.f32 %v2212_v56, %v2211_v14  ;;  %v5538_v14 = vld [vmem:[#allocation5_spill] sm:$0xff]  ;;  %v5539_v56 = vld [vmem:[#allocation8_spill] sm:$0xff] }
 0x18c   :  { %5532 = vst [vmem:[#allocation23_spill] sm:$0xff] %v4931_v28  ;;  %v2277_v62 = vadd.f32 %v2276_v52, %v4931_v28 }
 0x18d   :  { %v2214_v20 = vrot.slane %v2213_v41, 1 }
 0x18e   :  { %v2278_v53 = vadd.f32 %v2277_v62, %v4933_v39 }
 0x18f   :  { %v2215_v5 = vadd.f32 %v2214_v20, %v2213_v41 }
 0x190   :  { %v2279_v27 = vadd.f32 %v2278_v53, %v4936_v55  ;;  %v5543_v55 = vld [vmem:[#allocation12_spill] sm:$0xff] }
 0x192   :  { %v2280_v19 = vrot.slane %v2279_v27, 4 }
 0x194   :  { %v2281_v26 = vadd.f32 %v2280_v19, %v2279_v27 }
 0x196   :  { %v2282_v49 = vrot.slane %v2281_v26, 2 }
 0x198   :  { %v2283_v60 = vadd.f32 %v2282_v49, %v2281_v26 }
 0x19a   :  { %v2284_v38 = vrot.slane %v2283_v60, 1 }
 0x19c   :  { %v2285_v3 = vadd.f32 %v2284_v38, %v2283_v60  ;;  %v5540_v60 = vld [vmem:[#allocation10_spill] sm:$0xff] }
 0x19e   :  { %v2286_v25 = vadd.f32 %v2285_v3, %v2215_v5  ;;  %v5541_v5 = vld [vmem:[#allocation7_spill] sm:$0xff] }
 0x1a0   :  { %v4940_v23 = vmul.f32 0.001953125, %v2286_v25 }
 0x1a2   :  { %v2288_v52 = vsub.f32 %v5535_v15, %v4940_v23  ;;  %v2289_v1 = vsub.f32 %v5536_v45, %v4940_v23  ;;  %v2290_v62 = vsub.f32 %v5537_v4, %v4940_v23  ;;  %v2291_v19 = vsub.f32 %v5538_v14, %v4940_v23 }
 0x1a3   :  { %v2292_v26 = vsub.f32 %v5539_v56, %v4940_v23  ;;  %v2293_v38 = vsub.f32 %v5540_v60, %v4940_v23  ;;  %v2294_v25 = vsub.f32 %v5541_v5, %v4940_v23  ;;  %v2296_v56 = vsub.f32 %v5543_v55, %v4940_v23 }
 0x1a4   :  { %v2320_v53 = vmul.f32 %v2288_v52, %v2288_v52  ;;  %v2321_v27 = vmul.f32 %v2289_v1, %v2289_v1  ;;  %v2322_v49 = vmul.f32 %v2290_v62, %v2290_v62  ;;  %v2323_v20 = vmul.f32 %v2291_v19, %v2291_v19  ;;  %v5542_v52 = vld [vmem:[#allocation9_spill] sm:$0xff] }
 0x1a5   :  { %v2324_v45 = vmul.f32 %v2292_v26, %v2292_v26  ;;  %v2295_v1 = vsub.f32 %v5542_v52, %v4940_v23  ;;  %v2325_v15 = vmul.f32 %v2293_v38, %v2293_v38  ;;  %v2326_v62 = vmul.f32 %v2294_v25, %v2294_v25 }
 0x1a6   :  { %v2352_v41 = vadd.f32 %v2321_v27, %v2320_v53  ;;  %v5544_v27 = vld [vmem:[#allocation14_spill] sm:$0xff]  ;;  %v2391_v26 = vsub.f32 %v4804_v58, %v4940_v23 }
 0x1a7   :  { %v2297_v60 = vsub.f32 %v5544_v27, %v4940_v23  ;;  %v2327_v19 = vmul.f32 %v2295_v1, %v2295_v1  ;;  %v2392_v1 = vsub.f32 %v4807_v7, %v4940_v23 }
 0x1a8   :  { %v2353_v3 = vadd.f32 %v2352_v41, %v2322_v49  ;;  %v2390_v41 = vsub.f32 %v4801_v37, %v4940_v23  ;;  %v5547_v37 = vld [vmem:[#allocation16_spill] sm:$0xff] }
 0x1a9   :  { %v2300_v27 = vsub.f32 %v5547_v37, %v4940_v23 }
 0x1aa   :  { %v2354_v4 = vadd.f32 %v2353_v3, %v2323_v20  ;;  %v5545_v20 = vld [vmem:[#allocation11_spill] sm:$0xff]  ;;  %v5546_v3 = vld [vmem:[#allocation13_spill] sm:$0xff] }
 0x1ab   :  { %v2298_v38 = vsub.f32 %v5545_v20, %v4940_v23  ;;  %v2299_v25 = vsub.f32 %v5546_v3, %v4940_v23  ;;  %v2393_v20 = vsub.f32 %v4812_v6, %v4940_v23  ;;  %v2332_v7 = vmul.f32 %v2300_v27, %v2300_v27  ;;  %v5550_v6 = vld [vmem:[#allocation17_spill] sm:$0xff] }
 0x1ac   :  { %v2355_v14 = vadd.f32 %v2354_v4, %v2324_v45  ;;  %v2328_v45 = vmul.f32 %v2296_v56, %v2296_v56  ;;  %v5548_v56 = vld [vmem:[#allocation18_spill] sm:$0xff] }
 0x1ad   :  { %v2330_v55 = vmul.f32 %v2298_v38, %v2298_v38  ;;  %v2395_v38 = vsub.f32 %v4823_v0, %v4940_v23 }
 0x1ae   :  { %v2356_v53 = vadd.f32 %v2355_v14, %v2325_v15  ;;  %v2329_v15 = vmul.f32 %v2297_v60, %v2297_v60  ;;  %v2394_v60 = vsub.f32 %v4817_v29, %v4940_v23 }
 0x1b0   :  { %v2357_v49 = vadd.f32 %v2356_v53, %v2326_v62  ;;  %v2422_v62 = vmul.f32 %v2390_v41, %v2390_v41  ;;  %v2423_v53 = vmul.f32 %v2391_v26, %v2391_v26  ;;  %v5549_v41 = vld [vmem:[#allocation15_spill] sm:$0xff] }
 0x1b1   :  { %v2302_v26 = vsub.f32 %v5549_v41, %v4940_v23 }
 0x1b2   :  { %v2358_v4 = vadd.f32 %v2357_v49, %v2327_v19  ;;  %v2301_v19 = vsub.f32 %v5548_v56, %v4940_v23  ;;  %v2331_v49 = vmul.f32 %v2299_v25, %v2299_v25  ;;  %v2303_v56 = vsub.f32 %v5550_v6, %v4940_v23 }
 0x1b3   :  { %v2334_v27 = vmul.f32 %v2302_v26, %v2302_v26 }
 0x1b4   :  { %v2359_v14 = vadd.f32 %v2358_v4, %v2328_v45  ;;  %v2424_v45 = vmul.f32 %v2392_v1, %v2392_v1  ;;  %v2454_v4 = vadd.f32 %v2423_v53, %v2422_v62  ;;  %v2333_v25 = vmul.f32 %v2301_v19, %v2301_v19  ;;  %v5551_v53 = vld [vmem:[#allocation20_spill] sm:$0xff] }
 0x1b5   :  { %v2426_v1 = vmul.f32 %v2394_v60, %v2394_v60  ;;  %v2304_v29 = vsub.f32 %v5551_v53, %v4940_v23  ;;  %v2335_v19 = vmul.f32 %v2303_v56, %v2303_v56 }
 0x1b6   :  { %v2360_v58 = vadd.f32 %v2359_v14, %v2329_v15  ;;  %v2425_v15 = vmul.f32 %v2393_v20, %v2393_v20  ;;  %v2455_v14 = vadd.f32 %v2454_v4, %v2424_v45  ;;  %v2427_v20 = vmul.f32 %v2395_v38, %v2395_v38 }
 0x1b7   :  { %v2305_v4 = vsub.f32 %v4726_v40, %v4940_v23  ;;  %v2336_v26 = vmul.f32 %v2304_v29, %v2304_v29 }
 0x1b8   :  { %v2361_v3 = vadd.f32 %v2360_v58, %v2330_v55  ;;  %v2396_v55 = vsub.f32 %v4826_v24, %v4940_v23  ;;  %v2456_v62 = vadd.f32 %v2455_v14, %v2425_v15  ;;  %v5552_v14 = vld [vmem:[#allocation19_spill] sm:$0xff] }
 0x1b9   :  { %v2306_v24 = vsub.f32 %v5552_v14, %v4940_v23  ;;  %v2337_v56 = vmul.f32 %v2305_v4, %v2305_v4 }
 0x1ba   :  { %v2362_v37 = vadd.f32 %v2361_v3, %v2331_v49  ;;  %v2397_v49 = vsub.f32 %v4830_v46, %v4940_v23  ;;  %v2457_v45 = vadd.f32 %v2456_v62, %v2426_v1  ;;  %v2428_v60 = vmul.f32 %v2396_v55, %v2396_v55  ;;  %v5553_v62 = vld [vmem:[#allocation21_spill] sm:$0xff] }
 0x1bb   :  { %v2307_v46 = vsub.f32 %v5553_v62, %v4940_v23  ;;  %v2338_v29 = vmul.f32 %v2306_v24, %v2306_v24 }
 0x1bc   :  { %v2363_v58 = vadd.f32 %v2362_v37, %v2332_v7  ;;  %v2398_v7 = vsub.f32 %v4835_v43, %v4940_v23  ;;  %v2458_v15 = vadd.f32 %v2457_v45, %v2427_v20  ;;  %v2429_v38 = vmul.f32 %v2397_v49, %v2397_v49 }
 0x1bd   :  { %v2308_v45 = vsub.f32 %v4737_v61, %v4940_v23  ;;  %v2339_v4 = vmul.f32 %v2307_v46, %v2307_v46 }
 0x1be   :  { %v2364_v3 = vadd.f32 %v2363_v58, %v2333_v25  ;;  %v2399_v58 = vsub.f32 %v4841_v16, %v4940_v23  ;;  %v2459_v1 = vadd.f32 %v2458_v15, %v2428_v60  ;;  %v2430_v55 = vmul.f32 %v2398_v7, %v2398_v7 }
 0x1bf   :  { %v2309_v15 = vsub.f32 %v4748_v50, %v4940_v23  ;;  %v2340_v24 = vmul.f32 %v2308_v45, %v2308_v45 }
 0x1c0   :  { %v2365_v37 = vadd.f32 %v2364_v3, %v2334_v27  ;;  %v2400_v3 = vsub.f32 %v4844_v51, %v4940_v23  ;;  %v2460_v20 = vadd.f32 %v2459_v1, %v2429_v38  ;;  %v2431_v49 = vmul.f32 %v2399_v58, %v2399_v58 }
 0x1c1   :  { %v2310_v1 = vsub.f32 %v4731_v36, %v4940_v23  ;;  %v2341_v46 = vmul.f32 %v2309_v15, %v2309_v15 }
 0x1c2   :  { %v2366_v25 = vadd.f32 %v2365_v37, %v2335_v19  ;;  %v2401_v37 = vsub.f32 %v4848_v34, %v4940_v23  ;;  %v2461_v60 = vadd.f32 %v2460_v20, %v2430_v55  ;;  %v2432_v7 = vmul.f32 %v2400_v3, %v2400_v3 }
 0x1c3   :  { %v2311_v20 = vsub.f32 %v4742_v42, %v4940_v23  ;;  %v2342_v45 = vmul.f32 %v2310_v1, %v2310_v1 }
 0x1c4   :  { %v2367_v27 = vadd.f32 %v2366_v25, %v2336_v26  ;;  %v2402_v25 = vsub.f32 %v4853_v63, %v4940_v23  ;;  %v2462_v38 = vadd.f32 %v2461_v60, %v2431_v49  ;;  %v2433_v58 = vmul.f32 %v2401_v37, %v2401_v37 }
 0x1c5   :  { %v2312_v60 = vsub.f32 %v4759_v13, %v4940_v23  ;;  %v2343_v15 = vmul.f32 %v2311_v20, %v2311_v20 }
 0x1c6   :  { %v2368_v19 = vadd.f32 %v2367_v27, %v2337_v56  ;;  %v2403_v27 = vsub.f32 %v4859_v30, %v4940_v23  ;;  %v2463_v55 = vadd.f32 %v2462_v38, %v2432_v7  ;;  %v2434_v3 = vmul.f32 %v2402_v25, %v2402_v25 }
 0x1c7   :  { %v2313_v38 = vsub.f32 %v4770_v31, %v4940_v23  ;;  %v2344_v1 = vmul.f32 %v2312_v60, %v2312_v60 }
 0x1c8   :  { %v2369_v26 = vadd.f32 %v2368_v19, %v2338_v29  ;;  %v2404_v19 = vsub.f32 %v4862_v10, %v4940_v23  ;;  %v2464_v49 = vadd.f32 %v2463_v55, %v2433_v58  ;;  %v2435_v37 = vmul.f32 %v2403_v27, %v2403_v27 }
 0x1c9   :  { %v2314_v55 = vsub.f32 %v4753_v48, %v4940_v23  ;;  %v2345_v20 = vmul.f32 %v2313_v38, %v2313_v38 }
 0x1ca   :  { %v2370_v56 = vadd.f32 %v2369_v26, %v2339_v4  ;;  %v2405_v26 = vsub.f32 %v4866_v18, %v4940_v23  ;;  %v2465_v7 = vadd.f32 %v2464_v49, %v2434_v3  ;;  %v2436_v25 = vmul.f32 %v2404_v19, %v2404_v19 }
 0x1cb   :  { %v2315_v49 = vsub.f32 %v4764_v57, %v4940_v23  ;;  %v2346_v60 = vmul.f32 %v2314_v55, %v2314_v55  ;;  %v2411_v55 = vsub.f32 %v4895_v32, %v4940_v23 }
 0x1cc   :  { %v2371_v29 = vadd.f32 %v2370_v56, %v2340_v24  ;;  %v2406_v56 = vsub.f32 %v4871_v22, %v4940_v23  ;;  %v2466_v58 = vadd.f32 %v2465_v7, %v2435_v37  ;;  %v2437_v27 = vmul.f32 %v2405_v26, %v2405_v26 }
 0x1cd   :  { %v2316_v7 = vsub.f32 %v4781_v21, %v4940_v23  ;;  %v2347_v38 = vmul.f32 %v2315_v49, %v2315_v49  ;;  %v2412_v49 = vsub.f32 %v4898_v8, %v4940_v23 }
 0x1ce   :  { %v2372_v4 = vadd.f32 %v2371_v29, %v2341_v46  ;;  %v2407_v29 = vsub.f32 %v4877_v44, %v4940_v23  ;;  %v2467_v3 = vadd.f32 %v2466_v58, %v2436_v25  ;;  %v2438_v19 = vmul.f32 %v2406_v56, %v2406_v56 }
 0x1cf   :  { %v2317_v58 = vsub.f32 %v4792_v33, %v4940_v23 }
 0x1d0   :  { %v2373_v24 = vadd.f32 %v2372_v4, %v2342_v45  ;;  %v2408_v4 = vsub.f32 %v4880_v35, %v4940_v23  ;;  %v2468_v37 = vadd.f32 %v2467_v3, %v2437_v27  ;;  %v2439_v26 = vmul.f32 %v2407_v29, %v2407_v29 }
 0x1d1   :  { %v2348_v3 = vmul.f32 %v2316_v7, %v2316_v7  ;;  %v2318_v29 = vsub.f32 %v4775_v2, %v4940_v23  ;;  %v2443_v7 = vmul.f32 %v2411_v55, %v2411_v55 }
 0x1d2   :  { %v2374_v46 = vadd.f32 %v2373_v24, %v2343_v15  ;;  %v2409_v24 = vsub.f32 %v4884_v59, %v4940_v23  ;;  %v2469_v25 = vadd.f32 %v2468_v37, %v2438_v19  ;;  %v2440_v56 = vmul.f32 %v2408_v4, %v2408_v4 }
 0x1d3   :  { %v2349_v19 = vmul.f32 %v2317_v58, %v2317_v58  ;;  %v2413_v4 = vsub.f32 %v4902_v17, %v4940_v23  ;;  %v2444_v58 = vmul.f32 %v2412_v49, %v2412_v49  ;;  %v5555_v49 = vld [vmem:[#allocation40_spill] sm:$0xff] }
 0x1d4   :  { %v2375_v45 = vadd.f32 %v2374_v46, %v2344_v1  ;;  %v2410_v46 = vsub.f32 %v4889_v54, %v4940_v23  ;;  %v2470_v27 = vadd.f32 %v2469_v25, %v2439_v26  ;;  %v2350_v25 = vmul.f32 %v2318_v29, %v2318_v29 }
 0x1d5   :  { %v2417_v29 = vsub.f32 %v4920_v47, %v4940_v23 }
 0x1d6   :  { %v2376_v15 = vadd.f32 %v2375_v45, %v2345_v20  ;;  %v2441_v20 = vmul.f32 %v2409_v24, %v2409_v24  ;;  %v2471_v45 = vadd.f32 %v2470_v27, %v2440_v56  ;;  %v2319_v24 = vsub.f32 %v4786_v11, %v4940_v23 }
 0x1d7   :  { %v2445_v56 = vmul.f32 %v2413_v4, %v2413_v4  ;;  %v2419_v4 = vsub.f32 %v4931_v28, %v4940_v23 }
 0x1d8   :  { %v2377_v1 = vadd.f32 %v2376_v15, %v2346_v60  ;;  %v2442_v60 = vmul.f32 %v2410_v46, %v2410_v46  ;;  %v2472_v15 = vadd.f32 %v2471_v45, %v2441_v20  ;;  %v2415_v46 = vsub.f32 %v4913_v12, %v4940_v23  ;;  %v5554_v20 = vld [vmem:[#allocation38_spill] sm:$0xff] }
 0x1d9   :  { %v2416_v55 = vsub.f32 %v5554_v20, %v4940_v23 }
 0x1da   :  { %v2378_v35 = vadd.f32 %v2377_v1, %v2347_v38  ;;  %v2473_v26 = vadd.f32 %v2472_v15, %v2442_v60  ;;  %v2414_v38 = vsub.f32 %v4907_v9, %v4940_v23  ;;  %v2447_v60 = vmul.f32 %v2415_v46, %v2415_v46  ;;  %v5556_v46 = vld [vmem:[#allocation41_spill] sm:$0xff] }
 0x1dc   :  { %v2379_v37 = vadd.f32 %v2378_v35, %v2348_v3  ;;  %v2474_v35 = vadd.f32 %v2473_v26, %v2443_v7  ;;  %v2351_v3 = vmul.f32 %v2319_v24, %v2319_v24  ;;  %v2446_v45 = vmul.f32 %v2414_v38, %v2414_v38 }
 0x1dd   :  { %v2448_v7 = vmul.f32 %v2416_v55, %v2416_v55  ;;  %v2449_v24 = vmul.f32 %v2417_v29, %v2417_v29  ;;  %v2420_v38 = vsub.f32 %v4933_v39, %v4940_v23 }
 0x1de   :  { %v2380_v54 = vadd.f32 %v2379_v37, %v2349_v19  ;;  %v2475_v27 = vadd.f32 %v2474_v35, %v2444_v58 }
 0x1e0   :  { %v2381_v1 = vadd.f32 %v2380_v54, %v2350_v25  ;;  %v2476_v19 = vadd.f32 %v2475_v27, %v2445_v56  ;;  %v2418_v54 = vsub.f32 %v5555_v49, %v4940_v23  ;;  %v2421_v27 = vsub.f32 %v5556_v46, %v4940_v23 }
 0x1e2   :  { %v2382_v37 = vadd.f32 %v2381_v1, %v2351_v3  ;;  %v2477_v15 = vadd.f32 %v2476_v19, %v2446_v45  ;;  %v2450_v35 = vmul.f32 %v2418_v54, %v2418_v54  ;;  %v2451_v3 = vmul.f32 %v2419_v4, %v2419_v4 }
 0x1e3   :  { %v2452_v19 = vmul.f32 %v2420_v38, %v2420_v38  ;;  %v2499_v4 = vlaneseq }
 0x1e4   :  { %v2478_v26 = vadd.f32 %v2477_v15, %v2447_v60  ;;  %v2383_v25 = vrot.slane %v2382_v37, 4  ;;  %v2453_v15 = vmul.f32 %v2421_v27, %v2421_v27  ;;  %v5557_v27 = vld [vmem:[#allocation4_spill] sm:$0xff] }
 0x1e5   :  { %v2500_v38 = vshrl.u32 %v2499_v4, 7 }
 0x1e6   :  { %v2479_v58 = vadd.f32 %v2478_v26, %v2448_v7  ;;  %v2384_v56 = vadd.f32 %v2383_v25, %v2382_v37 }
 0x1e8   :  { %v2480_v1 = vadd.f32 %v2479_v58, %v2449_v24  ;;  %v2385_v60 = vrot.slane %v2384_v56, 2 }
 0x1ea   :  { %v2481_v45 = vadd.f32 %v2480_v1, %v2450_v35  ;;  %v2386_v28 = vadd.f32 %v2385_v60, %v2384_v56  ;;  %v2145_v35 = vld [vmem:[%s5426_s3] sm:$0x1]  ;;  %v5560_v60 = vld [vmem:[#allocation5_spill] sm:$0xff] }
 0x1ec   :  { %v2482_v55 = vadd.f32 %v2481_v45, %v2451_v3  ;;  %v2387_v26 = vrot.slane %v2386_v28, 1  ;;  %v5558_v3 = vld [vmem:[#allocation6_spill] sm:$0xff] }
 0x1ee   :  { %v2483_v49 = vadd.f32 %v2482_v55, %v2452_v19  ;;  %v2388_v54 = vadd.f32 %v2387_v26, %v2386_v28  ;;  %v5559_v19 = vld [vmem:[#allocation3_spill] sm:$0xff]  ;;  %v5562_v26 = vld [vmem:[#allocation10_spill] sm:$0xff] }
 0x1f0   :  { %v2484_v47 = vadd.f32 %v2483_v49, %v2453_v15  ;;  %v2501_v49 = vsub.s32 0, %v2500_v38  ;;  %v5565_v38 = vld [vmem:[#allocation11_spill] sm:$0xff] }
 0x1f2   :  { %v2485_v29 = vrot.slane %v2484_v47, 4 }
 0x1f4   :  { %v2486_v7 = vadd.f32 %v2485_v29, %v2484_v47  ;;  %v2146_v47 = vld [vmem:[%s5427_s4] sm:$0x1]  ;;  %v5561_v29 = vld [vmem:[#allocation8_spill] sm:$0xff] }
 0x1f6   :  { %v2487_v20 = vrot.slane %v2486_v7, 2 }
 0x1f8   :  { %v2488_v39 = vadd.f32 %v2487_v20, %v2486_v7 }
 0x1fa   :  { %v2489_v24 = vrot.slane %v2488_v39, 1 }
 0x1fc   :  { %v2490_v37 = vadd.f32 %v2489_v24, %v2488_v39 }
 0x1fe   :  { %v2491_v25 = vadd.f32 %v2490_v37, %v2388_v54  ;;  %v5563_v37 = vld [vmem:[#allocation12_spill] sm:$0xff] }
 0x200   :  { %v2492_v58 = vmul.f32 0.001953125, %v2491_v25 }
 0x202   :  { %v2493_v46 = vadd.f32 1e-05, %v2492_v58  ;;  %v5564_v58 = vld [vmem:[#allocation14_spill] sm:$0xff] }
 0x204   :  { %4121 = vrsqrt.f32 %v2493_v46 }
 0x211   :  { %v4122_v1 = vpop.eup %4121 }
 0x212   :  { %v2495_v56 = vmul.f32 %v4122_v1, %v2145_v35  ;;  %v5566_v1 = vld [vmem:[#allocation13_spill] sm:$0xff] }
 0x214   :  { %v2496_v28 = vmul.f32 %v2495_v56, %v4940_v23  ;;  %v5077_v39 = vrot.slane %v2495_v56, %v2501_v49 }
 0x216   :  { %v2497_v20 = vsub.f32 %v2146_v47, %v2496_v28  ;;  %v2504_v46 = vmul.f32 %v5077_v39, %v5557_v27  ;;  %v2505_v45 = vmul.f32 %v5077_v39, %v5558_v3  ;;  %v2506_v55 = vmul.f32 %v5077_v39, %v5559_v19  ;;  %v5567_v47 = vld [vmem:[#allocation16_spill] sm:$0xff]  ;;  %v5568_v27 = vld [vmem:[#allocation18_spill] sm:$0xff] }
 0x217   :  { %v2507_v15 = vmul.f32 %v5077_v39, %v5560_v60  ;;  %v2508_v7 = vmul.f32 %v5077_v39, %v5561_v29  ;;  %v2509_v23 = vmul.f32 %v5077_v39, %v5562_v26  ;;  %v2510_v54 = vmul.f32 %v5077_v39, %v5541_v5 }
 0x218   :  { %v2511_v24 = vmul.f32 %v5077_v39, %v5542_v52  ;;  %v2512_v25 = vmul.f32 %v5077_v39, %v5563_v37  ;;  %v2513_v4 = vmul.f32 %v5077_v39, %v5564_v58  ;;  %v2514_v35 = vmul.f32 %v5077_v39, %v5565_v38  ;;  %v5572_v38 = vld [vmem:[#allocation25_spill] sm:$0xff] }
 0x219   :  { %v2515_v56 = vmul.f32 %v5077_v39, %v5566_v1  ;;  %v2516_v28 = vmul.f32 %v5077_v39, %v5567_v47  ;;  %v2517_v5 = vmul.f32 %v5077_v39, %v5568_v27  ;;  %v2518_v52 = vmul.f32 %v5077_v39, %v5549_v41  ;;  %v5578_v47 = vld [vmem:[#allocation28_spill] sm:$0xff] }
 0x21a   :  { %v2519_v3 = vmul.f32 %v5077_v39, %v5550_v6  ;;  %v2520_v19 = vmul.f32 %v5077_v39, %v5551_v53  ;;  %v2521_v60 = vmul.f32 %v5077_v39, %v4726_v40  ;;  %v2522_v29 = vmul.f32 %v5077_v39, %v5552_v14 }
 0x21b   :  { %v2523_v26 = vmul.f32 %v5077_v39, %v5553_v62  ;;  %v2524_v37 = vmul.f32 %v5077_v39, %v4737_v61  ;;  %v2525_v41 = vmul.f32 %v5077_v39, %v4748_v50  ;;  %v2526_v6 = vmul.f32 %v5077_v39, %v4731_v36 }
 0x21c   :  { %v2527_v53 = vmul.f32 %v5077_v39, %v4742_v42  ;;  %v2528_v40 = vmul.f32 %v5077_v39, %v4759_v13  ;;  %v2529_v14 = vmul.f32 %v5077_v39, %v4770_v31  ;;  %v2530_v62 = vmul.f32 %v5077_v39, %v4753_v48  ;;  %v5570_v31 = vld [vmem:[#allocation24_spill] sm:$0xff] }
 0x21d   :  { %v2531_v61 = vmul.f32 %v5077_v39, %v4764_v57  ;;  %v2532_v50 = vmul.f32 %v5077_v39, %v4781_v21  ;;  %v2533_v36 = vmul.f32 %v5077_v39, %v4792_v33  ;;  %v2534_v42 = vmul.f32 %v5077_v39, %v4775_v2  ;;  %v5574_v21 = vld [vmem:[#allocation26_spill] sm:$0xff]  ;;  %v5576_v33 = vld [vmem:[#allocation27_spill] sm:$0xff] }
 0x21e   :  { %v2535_v13 = vmul.f32 %v5077_v39, %v4786_v11  ;;  %v5143_v58 = vrot.slane %v2497_v20, %v2501_v49  ;;  %v5147_v48 = vmul.f32 %v5077_v39, %v5570_v31  ;;  %v5151_v57 = vmul.f32 %v5077_v39, %v5572_v38 }
 0x21f   :  { %v5155_v1 = vmul.f32 %v5077_v39, %v5574_v21  ;;  %v5159_v2 = vmul.f32 %v5077_v39, %v5576_v33  ;;  %v5163_v11 = vmul.f32 %v5077_v39, %v5578_v47  ;;  %v5167_v49 = vmul.f32 %v5077_v39, %v4823_v0 }
 0x220   :  { %5569 = vst [vmem:[#allocation7_spill] sm:$0xff] %v5143_v58  ;;  %5571 = vst [vmem:[#allocation9_spill] sm:$0xff] %v5147_v48  ;;  %v5170_v20 = vadd.f32 %v5143_v58, %v2504_v46  ;;  %v5173_v27 = vadd.f32 %v5143_v58, %v2505_v45  ;;  %v5176_v31 = vadd.f32 %v5143_v58, %v2506_v55 }
 0x221   :  { %5573 = vst [vmem:[#allocation15_spill] sm:$0xff] %v5151_v57  ;;  %5575 = vst [vmem:[#allocation17_spill] sm:$0xff] %v5155_v1  ;;  %v5179_v38 = vadd.f32 %v5143_v58, %v2507_v15  ;;  %v5182_v21 = vadd.f32 %v5143_v58, %v2508_v7  ;;  %v5185_v33 = vadd.f32 %v5143_v58, %v2509_v23 }
 0x222   :  { %5577 = vst [vmem:[#allocation20_spill] sm:$0xff] %v5159_v2  ;;  %5579 = vst [vmem:[#allocation19_spill] sm:$0xff] %v5163_v11  ;;  %v5188_v0 = vadd.f32 %v5143_v58, %v2510_v54  ;;  %v2549_v46 = vadd.f32 %v5143_v58, %v2511_v24  ;;  %v2550_v45 = vadd.f32 %v5143_v58, %v2512_v25 }
 0x223   :  { %5580 = vst [vmem:[#allocation21_spill] sm:$0xff] %v5167_v49  ;;  %v2551_v47 = vadd.f32 %v5143_v58, %v2513_v4  ;;  %v2552_v55 = vadd.f32 %v5143_v58, %v2514_v35  ;;  %v2553_v15 = vadd.f32 %v5143_v58, %v2515_v56  ;;  %v2554_v49 = vadd.f32 %v5143_v58, %v2516_v28 }
 0x224   :  { %v2555_v7 = vadd.f32 %v5143_v58, %v2517_v5  ;;  %v2556_v23 = vadd.f32 %v5143_v58, %v2518_v52  ;;  %v2557_v11 = vadd.f32 %v5143_v58, %v2519_v3  ;;  %v2558_v54 = vadd.f32 %v5143_v58, %v2520_v19 }
 0x225   :  { %v2559_v24 = vadd.f32 %v5143_v58, %v2521_v60  ;;  %v2560_v25 = vadd.f32 %v5143_v58, %v2522_v29  ;;  %v2561_v4 = vadd.f32 %v5143_v58, %v2523_v26  ;;  %v2562_v35 = vadd.f32 %v5143_v58, %v2524_v37 }
 0x226   :  { %v2563_v56 = vadd.f32 %v5143_v58, %v2525_v41  ;;  %v2564_v28 = vadd.f32 %v5143_v58, %v2526_v6  ;;  %v2565_v5 = vadd.f32 %v5143_v58, %v2527_v53  ;;  %v2566_v52 = vadd.f32 %v5143_v58, %v2528_v40 }
 0x227   :  { %v2567_v3 = vadd.f32 %v5143_v58, %v2529_v14  ;;  %v2568_v19 = vadd.f32 %v5143_v58, %v2530_v62  ;;  %v2569_v60 = vadd.f32 %v5143_v58, %v2531_v61  ;;  %v2570_v29 = vadd.f32 %v5143_v58, %v2532_v50 }
 0x228   :  { %v2571_v26 = vadd.f32 %v5143_v58, %v2533_v36  ;;  %v2572_v37 = vadd.f32 %v5143_v58, %v2534_v42  ;;  %v2573_v41 = vadd.f32 %v5143_v58, %v2535_v13  ;;  %v2574_v6 = vmax.f32 %v5170_v20, 0.0 }
 0x229   :  { %v2575_v53 = vmax.f32 %v5173_v27, 0.0  ;;  %v2576_v40 = vmax.f32 %v5176_v31, 0.0  ;;  %v2577_v14 = vmax.f32 %v5179_v38, 0.0  ;;  %v2578_v62 = vmax.f32 %v5182_v21, 0.0 }
 0x22a   :  { %v2579_v61 = vmax.f32 %v5185_v33, 0.0  ;;  %v2580_v50 = vmax.f32 %v5188_v0, 0.0  ;;  %v2581_v2 = vmax.f32 %v2549_v46, 0.0  ;;  %v2582_v36 = vmax.f32 %v2550_v45, 0.0 }
 0x22b   :  { %v2583_v1 = vmax.f32 %v2551_v47, 0.0  ;;  %v2584_v42 = vmax.f32 %v2552_v55, 0.0  ;;  %v2585_v57 = vmax.f32 %v2553_v15, 0.0  ;;  %v2586_v13 = vmax.f32 %v2554_v49, 0.0 }
 0x22c   :  { %v2587_v48 = vmax.f32 %v2555_v7, 0.0  ;;  %v2588_v20 = vmax.f32 %v2556_v23, 0.0  ;;  %v2589_v58 = vmax.f32 %v2557_v11, 0.0  ;;  %v2590_v27 = vmax.f32 %v2558_v54, 0.0 }
 0x22d   :  { %v2591_v12 = vmax.f32 %v2559_v24, 0.0  ;;  %v2592_v31 = vmax.f32 %v2560_v25, 0.0  ;;  %v2593_v9 = vmax.f32 %v2561_v4, 0.0  ;;  %v2594_v38 = vmax.f32 %v2562_v35, 0.0  ;;  %v5582_v35 = vld [vmem:[#allocation30_spill] sm:$0xff] }
 0x22e   :  { %v2595_v17 = vmax.f32 %v2563_v56, 0.0  ;;  %v2596_v21 = vmax.f32 %v2564_v28, 0.0  ;;  %v2597_v8 = vmax.f32 %v2565_v5, 0.0  ;;  %v2598_v33 = vmax.f32 %v2566_v52, 0.0 }
 0x22f   :  { %v2599_v32 = vmax.f32 %v2567_v3, 0.0  ;;  %v2600_v0 = vmax.f32 %v2568_v19, 0.0  ;;  %v2601_v46 = vmax.f32 %v2569_v60, 0.0  ;;  %v2602_v45 = vmax.f32 %v2570_v29, 0.0 }
 0x230   :  { %v2603_v47 = vmax.f32 %v2571_v26, 0.0  ;;  %v2604_v55 = vmax.f32 %v2572_v37, 0.0  ;;  %v2605_v15 = vmax.f32 %v2573_v41, 0.0  ;;  %v3524_v49 = vpack.c.bf16 %v2575_v53, %v2574_v6  ;;  %v5583_v26 = vld [vmem:[#allocation31_spill] sm:$0xff]  ;;  %v5584_v37 = vld [vmem:[#allocation32_spill] sm:$0xff]  ;;  %v5585_v41 = vld [vmem:[#allocation33_spill] sm:$0xff] }
 0x231   :  { %v3529_v7 = vpack.c.bf16 %v2577_v14, %v2576_v40  ;;  %v3534_v23 = vpack.c.bf16 %v2579_v61, %v2578_v62  ;;  %v3539_v11 = vpack.c.bf16 %v2581_v2, %v2580_v50  ;;  %v3544_v54 = vpack.c.bf16 %v2583_v1, %v2582_v36  ;;  %v5586_v6 = vld [vmem:[#allocation34_spill] sm:$0xff]  ;;  %v5587_v53 = vld [vmem:[#allocation35_spill] sm:$0xff]  ;;  %v5588_v40 = vld [vmem:[#allocation36_spill] sm:$0xff] }
 0x232   :  { %v3549_v24 = vpack.c.bf16 %v2585_v57, %v2584_v42  ;;  %v3554_v25 = vpack.c.bf16 %v2587_v48, %v2586_v13  ;;  %v3559_v4 = vpack.c.bf16 %v2589_v58, %v2588_v20  ;;  %3525 = vst [vmem:[%s5428_s5] sm:$0xff] %v3524_v49   ;;  %v3564_v1 = vpack.c.bf16 %v2591_v12, %v2590_v27  ;;  %v5589_v14 = vld [vmem:[#allocation37_spill] sm:$0xff]  ;;  %v5590_v61 = vld [vmem:[#allocation38_spill] sm:$0xff]  ;;  %v5591_v50 = vld [vmem:[#allocation39_spill] sm:$0xff] }
 0x233   :  { %3681 = vst [vmem:[%s5428_s5 + $0x8] sm:$0xff] %v3529_v7   ;;  %3682 = vst [vmem:[%s5428_s5 + $0x10] sm:$0xff] %v3534_v23   ;;  %v3569_v57 = vpack.c.bf16 %v2593_v9, %v2592_v31  ;;  %v3574_v48 = vpack.c.bf16 %v2595_v17, %v2594_v38  ;;  %v3579_v58 = vpack.c.bf16 %v2597_v8, %v2596_v21  ;;  %v5592_v42 = vld [vmem:[#allocation40_spill] sm:$0xff]  ;;  %v5593_v20 = vld [vmem:[#allocation23_spill] sm:$0xff] }
 0x234   :  { %3683 = vst [vmem:[%s5428_s5 + $0x18] sm:$0xff] %v3539_v11   ;;  %3684 = vst [vmem:[%s5428_s5 + $0x20] sm:$0xff] %v3544_v54   ;;  %v3584_v12 = vpack.c.bf16 %v2599_v32, %v2598_v33  ;;  %v3589_v9 = vpack.c.bf16 %v2601_v46, %v2600_v0  ;;  %v3594_v17 = vpack.c.bf16 %v2603_v47, %v2602_v45  ;;  %v5581_v32 = vld [vmem:[#allocation29_spill] sm:$0xff]  ;;  %v5594_v31 = vld [vmem:[#allocation22_spill] sm:$0xff] }
 0x235   :  { %3685 = vst [vmem:[%s5428_s5 + $0x28] sm:$0xff] %v3549_v24   ;;  %3686 = vst [vmem:[%s5428_s5 + $0x30] sm:$0xff] %v3554_v25   ;;  %v3599_v8 = vpack.c.bf16 %v2605_v15, %v2604_v55  ;;  %v2804_v2 = vmul.f32 %v5077_v39, %v5581_v32  ;;  %v2805_v56 = vmul.f32 %v5077_v39, %v5582_v35  ;;  %v5595_v21 = vld [vmem:[#allocation41_spill] sm:$0xff]  ;;  %v5596_v0 = vld [vmem:[#allocation7_spill] sm:$0xff] }
 0x236   :  { %3687 = vst [vmem:[%s5428_s5 + $0x38] sm:$0xff] %v3559_v4   ;;  %3688 = vst [vmem:[%s5428_s5 + $0x40] sm:$0xff] %v3564_v1   ;;  %v2806_v28 = vmul.f32 %v5077_v39, %v4835_v43  ;;  %v2807_v5 = vmul.f32 %v5077_v39, %v4841_v16  ;;  %v2808_v43 = vmul.f32 %v5077_v39, %v4844_v51  ;;  %v5597_v46 = vld [vmem:[#allocation9_spill] sm:$0xff]  ;;  %v5598_v47 = vld [vmem:[#allocation15_spill] sm:$0xff] }
 0x237   :  { %3689 = vst [vmem:[%s5428_s5 + $0x48] sm:$0xff] %v3569_v57   ;;  %3690 = vst [vmem:[%s5428_s5 + $0x50] sm:$0xff] %v3574_v48   ;;  %v2809_v16 = vmul.f32 %v5077_v39, %v4848_v34  ;;  %v2810_v52 = vmul.f32 %v5077_v39, %v4853_v63  ;;  %v2811_v3 = vmul.f32 %v5077_v39, %v4859_v30  ;;  %v5599_v15 = vld [vmem:[#allocation17_spill] sm:$0xff]  ;;  %v5600_v7 = vld [vmem:[#allocation20_spill] sm:$0xff] }
 0x238   :  { %3691 = vst [vmem:[%s5428_s5 + $0x58] sm:$0xff] %v3579_v58   ;;  %3692 = vst [vmem:[%s5428_s5 + $0x60] sm:$0xff] %v3584_v12   ;;  %v2812_v19 = vmul.f32 %v5077_v39, %v4862_v10  ;;  %v2813_v60 = vmul.f32 %v5077_v39, %v4866_v18  ;;  %v2814_v29 = vmul.f32 %v5077_v39, %v4871_v22  ;;  %v5601_v11 = vld [vmem:[#allocation19_spill] sm:$0xff] }
 0x239   :  { %3693 = vst [vmem:[%s5428_s5 + $0x68] sm:$0xff] %v3589_v9   ;;  %3694 = vst [vmem:[%s5428_s5 + $0x70] sm:$0xff] %v3594_v17   ;;  %v2815_v51 = vmul.f32 %v5077_v39, %v4877_v44  ;;  %v2816_v34 = vmul.f32 %v5077_v39, %v5583_v26  ;;  %v2817_v63 = vmul.f32 %v5077_v39, %v4884_v59 }
 0x23a   :  { %3695 = vst [vmem:[%s5428_s5 + $0x78] sm:$0xff] %v3599_v8   ;;  %v2818_v30 = vmul.f32 %v5077_v39, %v5584_v37  ;;  %v2819_v10 = vmul.f32 %v5077_v39, %v5585_v41  ;;  %v2820_v18 = vmul.f32 %v5077_v39, %v5586_v6  ;;  %v2821_v22 = vmul.f32 %v5077_v39, %v5587_v53 }
 0x23b   :  { %v2822_v44 = vmul.f32 %v5077_v39, %v5588_v40  ;;  %v2823_v62 = vmul.f32 %v5077_v39, %v5589_v14  ;;  %v2824_v59 = vmul.f32 %v5077_v39, %v5590_v61  ;;  %v2825_v36 = vmul.f32 %v5077_v39, %v5591_v50 }
 0x23c   :  { %v2826_v13 = vmul.f32 %v5077_v39, %v5592_v42  ;;  %v2827_v27 = vmul.f32 %v5077_v39, %v5593_v20  ;;  %v2828_v38 = vmul.f32 %v5077_v39, %v5594_v31  ;;  %v2829_v33 = vmul.f32 %v5077_v39, %v5595_v21  ;;  %v5602_v39 = vld [vmem:[#allocation21_spill] sm:$0xff] }
 0x23d   :  { %v5324_v45 = vadd.f32 %v5597_v46, %v5596_v0  ;;  %v5328_v55 = vadd.f32 %v5598_v47, %v5596_v0  ;;  %v5332_v49 = vadd.f32 %v5599_v15, %v5596_v0  ;;  %v5336_v23 = vadd.f32 %v5600_v7, %v5596_v0 }
 0x23e   :  { %v5340_v54 = vadd.f32 %v5601_v11, %v5596_v0  ;;  %v2835_v24 = vadd.f32 %v5602_v39, %v5596_v0  ;;  %v2836_v25 = vadd.f32 %v2804_v2, %v5596_v0  ;;  %v2837_v4 = vadd.f32 %v2805_v56, %v5596_v0 }
 0x23f   :  { %v2838_v1 = vadd.f32 %v2806_v28, %v5596_v0  ;;  %v2839_v57 = vadd.f32 %v2807_v5, %v5596_v0  ;;  %v2840_v48 = vadd.f32 %v2808_v43, %v5596_v0  ;;  %v2841_v58 = vadd.f32 %v2809_v16, %v5596_v0 }
 0x240   :  { %v2842_v12 = vadd.f32 %v2810_v52, %v5596_v0  ;;  %v2843_v9 = vadd.f32 %v2811_v3, %v5596_v0  ;;  %v2844_v17 = vadd.f32 %v2812_v19, %v5596_v0  ;;  %v2845_v8 = vadd.f32 %v2813_v60, %v5596_v0 }
 0x241   :  { %v2846_v32 = vadd.f32 %v2814_v29, %v5596_v0  ;;  %v2847_v2 = vadd.f32 %v2815_v51, %v5596_v0  ;;  %v2848_v35 = vadd.f32 %v2816_v34, %v5596_v0  ;;  %v2849_v56 = vadd.f32 %v2817_v63, %v5596_v0 }
 0x242   :  { %v2850_v28 = vadd.f32 %v2818_v30, %v5596_v0  ;;  %v2851_v5 = vadd.f32 %v2819_v10, %v5596_v0  ;;  %v2852_v43 = vadd.f32 %v2820_v18, %v5596_v0  ;;  %v2853_v16 = vadd.f32 %v2821_v22, %v5596_v0 }
 0x243   :  { %v2854_v52 = vadd.f32 %v2822_v44, %v5596_v0  ;;  %v2855_v3 = vadd.f32 %v2823_v62, %v5596_v0  ;;  %v2856_v19 = vadd.f32 %v2824_v59, %v5596_v0  ;;  %v2857_v60 = vadd.f32 %v2825_v36, %v5596_v0 }
 0x244   :  { %v2858_v29 = vadd.f32 %v2826_v13, %v5596_v0  ;;  %v2859_v51 = vadd.f32 %v2827_v27, %v5596_v0  ;;  %v2860_v26 = vadd.f32 %v2828_v38, %v5596_v0  ;;  %v2861_v34 = vadd.f32 %v2829_v33, %v5596_v0 }
 0x245   :  { %v2862_v63 = vmax.f32 %v5324_v45, 0.0  ;;  %v2863_v37 = vmax.f32 %v5328_v55, 0.0  ;;  %v2864_v30 = vmax.f32 %v5332_v49, 0.0  ;;  %v2865_v41 = vmax.f32 %v5336_v23, 0.0 }
 0x246   :  { %v2866_v10 = vmax.f32 %v5340_v54, 0.0  ;;  %v2867_v6 = vmax.f32 %v2835_v24, 0.0  ;;  %v2868_v18 = vmax.f32 %v2836_v25, 0.0  ;;  %v2869_v53 = vmax.f32 %v2837_v4, 0.0 }
 0x247   :  { %v2870_v22 = vmax.f32 %v2838_v1, 0.0  ;;  %v2871_v40 = vmax.f32 %v2839_v57, 0.0  ;;  %v2872_v44 = vmax.f32 %v2840_v48, 0.0  ;;  %v2873_v14 = vmax.f32 %v2841_v58, 0.0 }
 0x248   :  { %v2874_v62 = vmax.f32 %v2842_v12, 0.0  ;;  %v2875_v61 = vmax.f32 %v2843_v9, 0.0  ;;  %v2876_v59 = vmax.f32 %v2844_v17, 0.0  ;;  %v2877_v50 = vmax.f32 %v2845_v8, 0.0 }
 0x249   :  { %v2878_v36 = vmax.f32 %v2846_v32, 0.0  ;;  %v2879_v42 = vmax.f32 %v2847_v2, 0.0  ;;  %v2880_v13 = vmax.f32 %v2848_v35, 0.0  ;;  %v2881_v20 = vmax.f32 %v2849_v56, 0.0 }
 0x24a   :  { %v2882_v27 = vmax.f32 %v2850_v28, 0.0  ;;  %v2883_v31 = vmax.f32 %v2851_v5, 0.0  ;;  %v2884_v38 = vmax.f32 %v2852_v43, 0.0  ;;  %v2885_v21 = vmax.f32 %v2853_v16, 0.0 }
 0x24b   :  { %v2886_v33 = vmax.f32 %v2854_v52, 0.0  ;;  %v2887_v0 = vmax.f32 %v2855_v3, 0.0  ;;  %v2888_v46 = vmax.f32 %v2856_v19, 0.0  ;;  %v2889_v45 = vmax.f32 %v2857_v60, 0.0 }
 0x24c   :  { %v2890_v47 = vmax.f32 %v2858_v29, 0.0  ;;  %v2891_v55 = vmax.f32 %v2859_v51, 0.0  ;;  %v2892_v15 = vmax.f32 %v2860_v26, 0.0  ;;  %v2893_v49 = vmax.f32 %v2861_v34, 0.0 }
 0x24d   :  { %v3604_v7 = vpack.c.bf16 %v2863_v37, %v2862_v63  ;;  %v3609_v23 = vpack.c.bf16 %v2865_v41, %v2864_v30  ;;  %v3614_v11 = vpack.c.bf16 %v2867_v6, %v2866_v10  ;;  %v3619_v54 = vpack.c.bf16 %v2869_v53, %v2868_v18 }
 0x24e   :  { %v3624_v39 = vpack.c.bf16 %v2871_v40, %v2870_v22  ;;  %v3629_v24 = vpack.c.bf16 %v2873_v14, %v2872_v44  ;;  %v3634_v25 = vpack.c.bf16 %v2875_v61, %v2874_v62  ;;  %v3639_v4 = vpack.c.bf16 %v2877_v50, %v2876_v59 }
 0x24f   :  { %3696 = vst [vmem:[%s5428_s5 + $0x80] sm:$0xff] %v3604_v7   ;;  %3697 = vst [vmem:[%s5428_s5 + $0x88] sm:$0xff] %v3609_v23   ;;  %v3644_v1 = vpack.c.bf16 %v2879_v42, %v2878_v36  ;;  %v3649_v57 = vpack.c.bf16 %v2881_v20, %v2880_v13  ;;  %v3654_v48 = vpack.c.bf16 %v2883_v31, %v2882_v27 }
 0x250   :  { %3698 = vst [vmem:[%s5428_s5 + $0x90] sm:$0xff] %v3614_v11   ;;  %3699 = vst [vmem:[%s5428_s5 + $0x98] sm:$0xff] %v3619_v54   ;;  %v3659_v58 = vpack.c.bf16 %v2885_v21, %v2884_v38  ;;  %v3664_v12 = vpack.c.bf16 %v2887_v0, %v2886_v33  ;;  %v3669_v9 = vpack.c.bf16 %v2889_v45, %v2888_v46 }
 0x251   :  { %3700 = vst [vmem:[%s5428_s5 + $0xa0] sm:$0xff] %v3624_v39   ;;  %3701 = vst [vmem:[%s5428_s5 + $0xa8] sm:$0xff] %v3629_v24   ;;  %v3674_v17 = vpack.c.bf16 %v2891_v55, %v2890_v47  ;;  %v3679_v8 = vpack.c.bf16 %v2893_v49, %v2892_v15 }
 0x252   :  { %3702 = vst [vmem:[%s5428_s5 + $0xb0] sm:$0xff] %v3634_v25   ;;  %3703 = vst [vmem:[%s5428_s5 + $0xb8] sm:$0xff] %v3639_v4  }
 0x253   :  { %3704 = vst [vmem:[%s5428_s5 + $0xc0] sm:$0xff] %v3644_v1   ;;  %3705 = vst [vmem:[%s5428_s5 + $0xc8] sm:$0xff] %v3649_v57  }
 0x254   :  { %3706 = vst [vmem:[%s5428_s5 + $0xd0] sm:$0xff] %v3654_v48   ;;  %3707 = vst [vmem:[%s5428_s5 + $0xd8] sm:$0xff] %v3659_v58  }
 0x255   :  { %3708 = vst [vmem:[%s5428_s5 + $0xe0] sm:$0xff] %v3664_v12   ;;  %3709 = vst [vmem:[%s5428_s5 + $0xe8] sm:$0xff] %v3669_v9  }
 0x256   :  { %3710 = vst [vmem:[%s5428_s5 + $0xf0] sm:$0xff] %v3674_v17   ;;  %3711 = vst [vmem:[%s5428_s5 + $0xf8] sm:$0xff] %v3679_v8  }

// kernel: representations_pathology_forward.7
= control target key start
LH: loop header
LB: loop body
LE: loop exit
PB: predicated region body
PF: predicated region fallthrough
CT: control target
= control target key end

     0   :  { %v1060_v0 = vmov 0.0   ;;  %vm1061_vm0 = vmmov 0   ;;  %vm91_vm1 = vcmask 785408   ;;  %vm245_vm2 = vcmask 1045504   ;;  %s1302_s2 = inlined_call_operand.vmem [shape: bf16[3,96,128], index: 2, kind: input, shape index: {}]   ;;  %s1303_s1 = inlined_call_operand.vmem [shape: bf16[2,20,96], index: 1, kind: input, shape index: {}]   ;;  %s1304_s0 = inlined_call_operand.vmem [shape: bf16[2,20,96], index: 0, kind: input, shape index: {}]   ;;  %s1305_s3 = inlined_call_operand.vmem [shape: f32[1,128], index: 3, kind: input, shape index: {}]   ;;  %s1306_s4 = inlined_call_operand.vmem [shape: f32[1,128], index: 4, kind: input, shape index: {}]   ;;  %s1307_s5 = inlined_call_operand.vmem [shape: bf16[2,16,128], index: 5, kind: output, shape index: {}]  }
   0x1   :  { %916 = vmatprep.subr.bf16.mxu0 %v1060_v0  ;;  %932 = vmatprep.subr.bf16.mxu1 %v1060_v0  ;;  %v1014_v1 = vld [vmem:[%s1302_s2 + $0x58] sm:$0xff]   ;;  %v1015_v2 = vld [vmem:[%s1302_s2 + $0x28] sm:$0xff]   ;;  %v1016_v3 = vld [vmem:[%s1302_s2 + $0x50] sm:$0xff]  }
   0x2   :  { %928 = vmatprep.mubr.msk.bf16.mxu0 %vm1061_vm0, %v1060_v0  ;;  %944 = vmatprep.mubr.msk.bf16.mxu1 %vm1061_vm0, %v1060_v0  ;;  %v1017_v4 = vld [vmem:[%s1302_s2 + $0x20] sm:$0xff]   ;;  %v1018_v5 = vld [vmem:[%s1302_s2 + $0x48] sm:$0xff]   ;;  %v1019_v6 = vld [vmem:[%s1302_s2 + $0x18] sm:$0xff]  }
   0x3   :  { %917 = vmatpush3.bf16.msra.mxu0 %v1014_v1  ;;  %933 = vmatpush3.bf16.msra.mxu1 %v1015_v2  ;;  %v1020_v7 = vld [vmem:[%s1302_s2 + $0x40] sm:$0xff]   ;;  %v1021_v8 = vld [vmem:[%s1302_s2 + $0x10] sm:$0xff]   ;;  %v1022_v9 = vld [vmem:[%s1302_s2 + $0x38] sm:$0xff]  }
   0x4   :  { %918 = vmatprep.subr.bf16.mxu0 %v1060_v0  ;;  %934 = vmatprep.subr.bf16.mxu1 %v1060_v0  ;;  %v1023_v10 = vld [vmem:[%s1302_s2 + $0x8] sm:$0xff]   ;;  %v1024_v11 = vld [vmem:[%s1302_s2 + $0x30] sm:$0xff]   ;;  %v1025_v12 = vld [vmem:[%s1302_s2] sm:$0xff]  }
   0x5   :  { %v1026_v13 = vld [vmem:[%s1303_s1] sm:$0xff]   ;;  %v1028_v15 = vld [vmem:[%s1302_s2 + $0x88] sm:$0xff]   ;;  %v1029_v16 = vld [vmem:[%s1302_s2 + $0x58] sm:$0xff]  }
   0x6   :  { %v1027_v14 = vld [vmem:[%s1304_s0] sm:$0xff]   ;;  %v1031_v18 = vld [vmem:[%s1302_s2 + $0x50] sm:$0xff]   ;;  %v1032_v19 = vld [vmem:[%s1302_s2 + $0x78] sm:$0xff]  }
   0x7   :  { %919 = vmatpush3.bf16.msra.mxu0 %v1016_v3  ;;  %935 = vmatpush3.bf16.msra.mxu1 %v1017_v4  ;;  %v1030_v17 = vld [vmem:[%s1302_s2 + $0x80] sm:$0xff]   ;;  %v1033_v20 = vld [vmem:[%s1302_s2 + $0x48] sm:$0xff]   ;;  %v1034_v21 = vld [vmem:[%s1302_s2 + $0x70] sm:$0xff]  }
   0x8   :  { %920 = vmatprep.subr.bf16.mxu0 %v1060_v0  ;;  %936 = vmatprep.subr.bf16.mxu1 %v1060_v0  ;;  %v1035_v22 = vld [vmem:[%s1302_s2 + $0x40] sm:$0xff]   ;;  %v1041_v23 = vld [vmem:[%s1304_s0 + $0x8] ss:$0 sps:$4 sm:$0x33]   ;;  %v1037_v26 = vld [vmem:[%s1302_s2 + $0x38] sm:$0xff]  }
   0x9   :  { %v1036_v24 = vld [vmem:[%s1302_s2 + $0x68] sm:$0xff]   ;;  %v1040_v25 = vld [vmem:[%s1304_s0] sm:$0xfc]   ;;  %v247_v29 = vrot.slane %v1041_v23, 2  ;;  %v1039_v30 = vld [vmem:[%s1302_s2 + $0x30] sm:$0xff]  }
   0xa   :  { %v1038_v27 = vld [vmem:[%s1302_s2 + $0x60] sm:$0xff]   ;;  %v246_v28 = vrot.slane %v1040_v25, 2  ;;  %v1042_v32 = vld [vmem:[%s1303_s1 + $0xc] sm:$0xff]   ;;  %v1047_v37 = vld [vmem:[%s1302_s2 + $0x18] sm:$0xff]  }
   0xb   :  { %921 = vmatpush3.bf16.msra.mxu0 %v1018_v5  ;;  %937 = vmatpush3.bf16.msra.mxu1 %v1019_v6  ;;  %v1043_v33 = vld [vmem:[%s1302_s2 + $0x28] sm:$0xff]   ;;  %v1045_v35 = vld [vmem:[%s1302_s2 + $0x20] sm:$0xff]   ;;  %v1048_v38 = vld [vmem:[%s1302_s2 + $0x78] sm:$0xff]  }
   0xc   :  { %922 = vmatprep.subr.bf16.mxu0 %v1060_v0  ;;  %938 = vmatprep.subr.bf16.mxu1 %v1060_v0  ;;  %v248_v31 = vsel %vm245_vm2, %v246_v28, %v247_v29  ;;  %v1044_v34 = vld [vmem:[%s1302_s2 + $0x88] sm:$0xff]   ;;  %v1046_v36 = vld [vmem:[%s1302_s2 + $0x80] sm:$0xff]   ;;  %v1049_v39 = vld [vmem:[%s1302_s2 + $0x10] sm:$0xff]  }
   0xd   :  { %v1050_v40 = vld [vmem:[%s1302_s2 + $0x70] sm:$0xff]   ;;  %v1051_v41 = vld [vmem:[%s1302_s2 + $0x8] sm:$0xff]   ;;  %v1053_v45 = vld [vmem:[%s1302_s2] sm:$0xff]  }
   0xe   :  { %v1052_v42 = vld [vmem:[%s1302_s2 + $0x68] sm:$0xff]   ;;  %v1057_v44 = vld [vmem:[%s1304_s0 + $0x14] ss:$0 sps:$4 sm:$0x33]   ;;  %v1054_v46 = vld [vmem:[%s1302_s2 + $0x60] sm:$0xff]  }
   0xf   :  { %923 = vmatpush3.bf16.msra.mxu0 %v1020_v7  ;;  %939 = vmatpush3.bf16.msra.mxu1 %v1021_v8  ;;  %v1056_v43 = vld [vmem:[%s1304_s0 + $0xc] sm:$0xfc]   ;;  %v557_v48 = vrot.slane %v1057_v44, 2 }
  0x10   :  { %924 = vmatprep.subr.bf16.mxu0 %v1060_v0  ;;  %940 = vmatprep.subr.bf16.mxu1 %v1060_v0  ;;  %v556_v47 = vrot.slane %v1056_v43, 2  ;;  %v1055_v49 = vld [vmem:[%s1304_s0 + $0xc] sm:$0xff]  }
  0x12   :  { %v558_v50 = vsel %vm245_vm2, %v556_v47, %v557_v48 }
  0x13   :  { %925 = vmatpush3.bf16.msra.mxu0 %v1022_v9  ;;  %941 = vmatpush3.bf16.msra.mxu1 %v1023_v10 }
  0x14   :  { %926 = vmatprep.subr.bf16.mxu0 %v1060_v0  ;;  %942 = vmatprep.subr.bf16.mxu1 %v1060_v0 }
  0x17   :  { %927 = vmatpush3.bf16.msra.mxu0 %v1024_v11  ;;  %943 = vmatpush3.bf16.msra.mxu1 %v1025_v12 }
  0x18   :  { %948 = vmatprep.subr.bf16.mxu0 %v1060_v0  ;;  %964 = vmatprep.subr.bf16.mxu1 %v1060_v0 }
  0x1a   :  { %929 = vmatmul.mubr.msk.bf16.vlgmr.msra.gmra.mxu0 %vm91_vm1, %v1026_v13  ;;  %945 = vmatmul.mubr.msk.bf16.vlgmr.msra.gmra.mxu1 %vm91_vm1, %v1027_v14 }
  0x1b   :  { %949 = vmatpush3.bf16.msra.mxu0 %v1028_v15  ;;  %965 = vmatpush3.bf16.msra.mxu1 %v1029_v16 }
  0x1c   :  { %950 = vmatprep.subr.bf16.mxu0 %v1060_v0  ;;  %966 = vmatprep.subr.bf16.mxu1 %v1060_v0 }
  0x1d   :  { %960 = vmatprep.mubr.msk.bf16.mxu0 %vm1061_vm0, %v1060_v0  ;;  %976 = vmatprep.mubr.msk.bf16.mxu1 %vm1061_vm0, %v1060_v0 }
  0x1f   :  { %951 = vmatpush3.bf16.msra.mxu0 %v1030_v17  ;;  %967 = vmatpush3.bf16.msra.mxu1 %v1031_v18 }
  0x20   :  { %952 = vmatprep.subr.bf16.mxu0 %v1060_v0  ;;  %968 = vmatprep.subr.bf16.mxu1 %v1060_v0 }
  0x23   :  { %953 = vmatpush3.bf16.msra.mxu0 %v1032_v19  ;;  %969 = vmatpush3.bf16.msra.mxu1 %v1033_v20 }
  0x24   :  { %954 = vmatprep.subr.bf16.mxu0 %v1060_v0  ;;  %970 = vmatprep.subr.bf16.mxu1 %v1060_v0 }
  0x27   :  { %955 = vmatpush3.bf16.msra.mxu0 %v1034_v21  ;;  %971 = vmatpush3.bf16.msra.mxu1 %v1035_v22 }
  0x28   :  { %956 = vmatprep.subr.bf16.mxu0 %v1060_v0  ;;  %972 = vmatprep.subr.bf16.mxu1 %v1060_v0 }
  0x2b   :  { %957 = vmatpush3.bf16.msra.mxu0 %v1036_v24  ;;  %973 = vmatpush3.bf16.msra.mxu1 %v1037_v26 }
  0x2c   :  { %958 = vmatprep.subr.bf16.mxu0 %v1060_v0  ;;  %974 = vmatprep.subr.bf16.mxu1 %v1060_v0 }
  0x2f   :  { %959 = vmatpush3.bf16.msra.mxu0 %v1038_v27  ;;  %975 = vmatpush3.bf16.msra.mxu1 %v1039_v30 }
  0x30   :  { %980 = vmatprep.subr.bf16.mxu0 %v1060_v0  ;;  %996 = vmatprep.subr.bf16.mxu1 %v1060_v0 }
  0x32   :  { %961 = vmatmul.mubr.msk.bf16.vlgmr.msra.gmra.mxu0 %vm91_vm1, %v248_v31  ;;  %977 = vmatmul.mubr.msk.bf16.vlgmr.msra.gmra.mxu1 %vm91_vm1, %v1042_v32 }
  0x33   :  { %981 = vmatpush3.bf16.msra.mxu0 %v1043_v33  ;;  %997 = vmatpush3.bf16.msra.mxu1 %v1044_v34 }
  0x34   :  { %982 = vmatprep.subr.bf16.mxu0 %v1060_v0  ;;  %998 = vmatprep.subr.bf16.mxu1 %v1060_v0 }
  0x35   :  { %992 = vmatprep.mubr.msk.bf16.mxu0 %vm1061_vm0, %v1060_v0  ;;  %1008 = vmatprep.mubr.msk.bf16.mxu1 %vm1061_vm0, %v1060_v0 }
  0x37   :  { %983 = vmatpush3.bf16.msra.mxu0 %v1045_v35  ;;  %999 = vmatpush3.bf16.msra.mxu1 %v1046_v36 }
  0x38   :  { %984 = vmatprep.subr.bf16.mxu0 %v1060_v0  ;;  %1000 = vmatprep.subr.bf16.mxu1 %v1060_v0 }
  0x3b   :  { %985 = vmatpush3.bf16.msra.mxu0 %v1047_v37  ;;  %1001 = vmatpush3.bf16.msra.mxu1 %v1048_v38 }
  0x3c   :  { %986 = vmatprep.subr.bf16.mxu0 %v1060_v0  ;;  %1002 = vmatprep.subr.bf16.mxu1 %v1060_v0 }
  0x3f   :  { %987 = vmatpush3.bf16.msra.mxu0 %v1049_v39  ;;  %1003 = vmatpush3.bf16.msra.mxu1 %v1050_v40 }
  0x40   :  { %988 = vmatprep.subr.bf16.mxu0 %v1060_v0  ;;  %1004 = vmatprep.subr.bf16.mxu1 %v1060_v0 }
  0x43   :  { %989 = vmatpush3.bf16.msra.mxu0 %v1051_v41  ;;  %1005 = vmatpush3.bf16.msra.mxu1 %v1052_v42 }
  0x44   :  { %990 = vmatprep.subr.bf16.mxu0 %v1060_v0  ;;  %1006 = vmatprep.subr.bf16.mxu1 %v1060_v0 }
  0x47   :  { %991 = vmatpush3.bf16.msra.mxu0 %v1053_v45  ;;  %1007 = vmatpush3.bf16.msra.mxu1 %v1054_v46 }
  0x4a   :  { %993 = vmatmul.mubr.msk.bf16.vlgmr.msra.gmra.mxu0 %vm91_vm1, %v1055_v49  ;;  %1009 = vmatmul.mubr.msk.bf16.vlgmr.msra.gmra.mxu1 %vm91_vm1, %v558_v50 }
  0xda   :  { %v129_v51 = vpop.f32.mrf.mxu0  ;;  %v214_v52 = vpop.f32.mrf.mxu1 }
  0xdb   :  { %v215_v4 = vadd.f32 %v214_v52, %v129_v51 }
  0xdc   :  { %v930_v53 = vpop.f32.mrf.mxu0  ;;  %v946_v54 = vpop.f32.mrf.mxu1 }
  0xde   :  { %v132_v55 = vpop.f32.mrf.mxu0  ;;  %v217_v56 = vpop.f32.mrf.mxu1 }
  0xdf   :  { %v218_v3 = vadd.f32 %v217_v56, %v132_v55 }
  0xe0   :  { %v931_v57 = vpop.f32.mrf.mxu0  ;;  %v947_v58 = vpop.f32.mrf.mxu1 }
  0xf2   :  { %v322_v59 = vpop.f32.mrf.mxu0  ;;  %v441_v60 = vpop.f32.mrf.mxu1 }
  0xf3   :  { %v1282_v6 = vadd.f32 %v322_v59, %v215_v4 }
  0xf4   :  { %v962_v61 = vpop.f32.mrf.mxu0  ;;  %v978_v62 = vpop.f32.mrf.mxu1 }
  0xf5   :  { %v644_v62 = vld [vmem:[%s1305_s3] sm:$0x1] }
  0xf6   :  { %v325_v63 = vpop.f32.mrf.mxu0  ;;  %v444_v0 = vpop.f32.mrf.mxu1 }
  0xf7   :  { %v1280_v5 = vadd.f32 %v325_v63, %v218_v3 }
  0xf8   :  { %v963_v1 = vpop.f32.mrf.mxu0  ;;  %v979_v2 = vpop.f32.mrf.mxu1 }
  0xf9   :  { %v648_v7 = vadd.f32 %v1280_v5, %v1282_v6  ;;  %v645_v2 = vld [vmem:[%s1306_s4] sm:$0x1] }
  0xfb   :  { %v649_v9 = vrot.slane %v648_v7, 4 }
  0xfd   :  { %v650_v15 = vadd.f32 %v649_v9, %v648_v7 }
  0xff   :  { %v651_v22 = vrot.slane %v650_v15, 2 }
 0x101   :  { %v652_v25 = vadd.f32 %v651_v22, %v650_v15 }
 0x103   :  { %v653_v28 = vrot.slane %v652_v25, 1 }
 0x105   :  { %v654_v31 = vadd.f32 %v653_v28, %v652_v25 }
 0x10a   :  { %v526_v8 = vpop.f32.mrf.mxu0  ;;  %v632_v10 = vpop.f32.mrf.mxu1 }
 0x10b   :  { %v527_v12 = vadd.f32 %v526_v8, %v441_v60  ;;  %v698_v60 = vlaneseq }
 0x10c   :  { %v994_v11 = vpop.f32.mrf.mxu0  ;;  %v1010_v13 = vpop.f32.mrf.mxu1 }
 0x10d   :  { %v639_v19 = vadd.f32 %v632_v10, %v527_v12  ;;  %v699_v61 = vshrl.u32 %v698_v60, 7 }
 0x10e   :  { %v529_v14 = vpop.f32.mrf.mxu0  ;;  %v635_v17 = vpop.f32.mrf.mxu1 }
 0x10f   :  { %v530_v16 = vadd.f32 %v529_v14, %v444_v0  ;;  %v700_v63 = vsub.s32 0, %v699_v61 }
 0x110   :  { %v995_v18 = vpop.f32.mrf.mxu0  ;;  %v1011_v21 = vpop.f32.mrf.mxu1 }
 0x111   :  { %v640_v20 = vadd.f32 %v635_v17, %v530_v16 }
 0x113   :  { %v658_v23 = vadd.f32 %v640_v20, %v639_v19 }
 0x115   :  { %v659_v24 = vrot.slane %v658_v23, 4 }
 0x117   :  { %v660_v26 = vadd.f32 %v659_v24, %v658_v23 }
 0x119   :  { %v661_v27 = vrot.slane %v660_v26, 2 }
 0x11b   :  { %v662_v29 = vadd.f32 %v661_v27, %v660_v26 }
 0x11d   :  { %v663_v30 = vrot.slane %v662_v29, 1 }
 0x11f   :  { %v664_v32 = vadd.f32 %v663_v30, %v662_v29 }
 0x121   :  { %v665_v33 = vadd.f32 %v664_v32, %v654_v31 }
 0x123   :  { %v666_v34 = vmul.f32 0.03125, %v665_v33 }
 0x125   :  { %v667_v35 = vsub.f32 %v1282_v6, %v666_v34  ;;  %v668_v36 = vsub.f32 %v1280_v5, %v666_v34  ;;  %v679_v37 = vsub.f32 %v639_v19, %v666_v34  ;;  %v680_v38 = vsub.f32 %v640_v20, %v666_v34 }
 0x127   :  { %v669_v39 = vmul.f32 %v667_v35, %v667_v35  ;;  %v670_v40 = vmul.f32 %v668_v36, %v668_v36  ;;  %v681_v41 = vmul.f32 %v679_v37, %v679_v37  ;;  %v682_v42 = vmul.f32 %v680_v38, %v680_v38 }
 0x129   :  { %v671_v43 = vadd.f32 %v670_v40, %v669_v39  ;;  %v683_v44 = vadd.f32 %v682_v42, %v681_v41 }
 0x12b   :  { %v672_v45 = vrot.slane %v671_v43, 4  ;;  %v684_v46 = vrot.slane %v683_v44, 4 }
 0x12d   :  { %v673_v47 = vadd.f32 %v672_v45, %v671_v43  ;;  %v685_v48 = vadd.f32 %v684_v46, %v683_v44 }
 0x12f   :  { %v674_v49 = vrot.slane %v673_v47, 2  ;;  %v686_v50 = vrot.slane %v685_v48, 2 }
 0x131   :  { %v675_v51 = vadd.f32 %v674_v49, %v673_v47  ;;  %v687_v52 = vadd.f32 %v686_v50, %v685_v48 }
 0x133   :  { %v676_v53 = vrot.slane %v675_v51, 1  ;;  %v688_v54 = vrot.slane %v687_v52, 1 }
 0x135   :  { %v677_v55 = vadd.f32 %v676_v53, %v675_v51  ;;  %v689_v56 = vadd.f32 %v688_v54, %v687_v52 }
 0x137   :  { %v690_v57 = vadd.f32 %v689_v56, %v677_v55 }
 0x139   :  { %v691_v58 = vmul.f32 0.03125, %v690_v57 }
 0x13b   :  { %v692_v59 = vadd.f32 1e-05, %v691_v58 }
 0x13d   :  { %1058 = vrsqrt.f32 %v692_v59 }
 0x14a   :  { %v1059_v0 = vpop.eup %1058 }
 0x14b   :  { %v694_v1 = vmul.f32 %v1059_v0, %v644_v62 }
 0x14d   :  { %v695_v3 = vmul.f32 %v694_v1, %v666_v34  ;;  %v701_v4 = vrot.slane %v694_v1, %v700_v63 }
 0x14f   :  { %v696_v7 = vsub.f32 %v645_v2, %v695_v3  ;;  %v703_v8 = vmul.f32 %v701_v4, %v1282_v6  ;;  %v704_v9 = vmul.f32 %v701_v4, %v1280_v5  ;;  %v727_v11 = vmul.f32 %v701_v4, %v639_v19 }
 0x150   :  { %v728_v12 = vmul.f32 %v701_v4, %v640_v20 }
 0x151   :  { %v709_v10 = vrot.slane %v696_v7, %v700_v63 }
 0x153   :  { %v711_v13 = vadd.f32 %v709_v10, %v703_v8  ;;  %v712_v14 = vadd.f32 %v709_v10, %v704_v9  ;;  %v729_v15 = vadd.f32 %v727_v11, %v709_v10  ;;  %v730_v16 = vadd.f32 %v728_v12, %v709_v10 }
 0x155   :  { %v713_v17 = vmax.f32 %v711_v13, 0.0  ;;  %v714_v18 = vmax.f32 %v712_v14, 0.0  ;;  %v731_v21 = vmax.f32 %v729_v15, 0.0  ;;  %v732_v22 = vmax.f32 %v730_v16, 0.0 }
 0x157   :  { %v866_v23 = vpack.c.bf16 %v714_v18, %v713_v17  ;;  %v871_v24 = vpack.c.bf16 %v732_v22, %v731_v21 }
 0x159   :  { %867 = vst [vmem:[%s1307_s5] sm:$0xff] %v866_v23   ;;  %873 = vst [vmem:[%s1307_s5 + $0x8] sm:$0xff] %v871_v24  }

// kernel: representations_pathology_forward.8
= control target key start
LH: loop header
LB: loop body
LE: loop exit
PB: predicated region body
PF: predicated region fallthrough
CT: control target
= control target key end

     0   :  { %v1264_v0 = vmov 0   ;;  %vm150_vm0 = vcmask 523264   ;;  %vm914_vm1 = vcmask 1043456   ;;  %s1652_s2 = inlined_call_operand.vmem [shape: bf16[3,192,128], index: 2, kind: input, shape index: {}]   ;;  %s1653_s1 = inlined_call_operand.vmem [shape: bf16[2,6,192], index: 1, kind: input, shape index: {}]   ;;  %s1654_s0 = inlined_call_operand.vmem [shape: bf16[2,6,192], index: 0, kind: input, shape index: {}]   ;;  %s1655_s3 = inlined_call_operand.vmem [shape: f32[1,128], index: 3, kind: input, shape index: {}]   ;;  %s1656_s4 = inlined_call_operand.vmem [shape: f32[1,128], index: 4, kind: input, shape index: {}]   ;;  %s1657_s5 = inlined_call_operand.vmem [shape: bf16[2,4,128], index: 5, kind: output, shape index: {}]  }
   0x1   :  { %154 = vmatprep.subr.bf16.mxu0 %v1264_v0  ;;  %275 = vmatprep.subr.bf16.mxu1 %v1264_v0  ;;  %v1178_v1 = vld [vmem:[%s1652_s2 + $0x98] sm:$0xff]   ;;  %v1180_v3 = vld [vmem:[%s1652_s2 + $0x90] sm:$0xff]   ;;  %v1182_v5 = vld [vmem:[%s1652_s2 + $0x88] sm:$0xff]  }
   0x2   :  { %v1179_v2 = vld [vmem:[%s1652_s2 + $0x38] sm:$0xff]   ;;  %155 = vmatpush1.bf16.msra.mxu0 %v1178_v1  ;;  %v1181_v4 = vld [vmem:[%s1652_s2 + $0x30] sm:$0xff]   ;;  %v1183_v6 = vld [vmem:[%s1652_s2 + $0x28] sm:$0xff]  }
   0x3   :  { %276 = vmatpush1.bf16.msra.mxu1 %v1179_v2  ;;  %156 = vmatprep.subr.bf16.mxu0 %v1264_v0  ;;  %v1184_v7 = vld [vmem:[%s1652_s2 + $0x80] sm:$0xff]   ;;  %v1186_v9 = vld [vmem:[%s1652_s2 + $0x78] sm:$0xff]   ;;  %v1188_v11 = vld [vmem:[%s1652_s2 + $0x70] sm:$0xff]  }
   0x4   :  { %277 = vmatprep.subr.bf16.mxu1 %v1264_v0  ;;  %v1185_v8 = vld [vmem:[%s1652_s2 + $0x20] sm:$0xff]   ;;  %v1187_v10 = vld [vmem:[%s1652_s2 + $0x18] sm:$0xff]   ;;  %v1189_v12 = vld [vmem:[%s1652_s2 + $0x10] sm:$0xff]  }
   0x5   :  { %v1190_v13 = vld [vmem:[%s1652_s2 + $0x68] sm:$0xff]   ;;  %v46_v15 = vld [vmem:[%s1653_s1] sm:$0x33]  ;;  %v1194_v21 = vld [vmem:[%s1652_s2 + $0xb8] sm:$0xff]  }
   0x6   :  { %157 = vmatpush1.bf16.msra.mxu0 %v1180_v3  ;;  %v1191_v14 = vld [vmem:[%s1652_s2 + $0x8] sm:$0xff]   ;;  %v21_v16 = vld [vmem:[%s1654_s0] sm:$0x33]  ;;  %v1012_v17 = vcombine.high %v46_v15, %v46_v15  ;;  %v1195_v22 = vld [vmem:[%s1652_s2 + $0x58] sm:$0xff]   ;;  %v1011_v29 = vcombine.low %v46_v15, %v46_v15 }
   0x7   :  { %278 = vmatpush1.bf16.msra.mxu1 %v1181_v4  ;;  %158 = vmatprep.subr.bf16.mxu0 %v1264_v0  ;;  %v1192_v18 = vld [vmem:[%s1652_s2 + $0x60] sm:$0xff]   ;;  %v1027_v19 = vcombine.high %v21_v16, %v21_v16  ;;  %v1196_v23 = vld [vmem:[%s1652_s2 + $0xb0] sm:$0xff]   ;;  %v1198_v25 = vld [vmem:[%s1652_s2 + $0xa8] sm:$0xff]   ;;  %v1026_v31 = vcombine.low %v21_v16, %v21_v16 }
   0x8   :  { %279 = vmatprep.subr.bf16.mxu1 %v1264_v0  ;;  %v1193_v20 = vld [vmem:[%s1652_s2] sm:$0xff]   ;;  %1025 = vmatprep.mubr.msk.bf16.mxu0 %vm150_vm0, %v1012_v17  ;;  %v1197_v24 = vld [vmem:[%s1652_s2 + $0x50] sm:$0xff]   ;;  %v1199_v26 = vld [vmem:[%s1652_s2 + $0x48] sm:$0xff]  }
   0x9   :  { %1040 = vmatprep.mubr.msk.bf16.mxu1 %vm150_vm0, %v1027_v19  ;;  %v1200_v27 = vld [vmem:[%s1652_s2 + $0xa0] sm:$0xff]   ;;  %v1402_v30 = vld [vmem:[%s1653_s1 + $0x8] sm:$0x33]  ;;  %v1208_v32 = vld [vmem:[%s1652_s2 + $0xf8] sm:$0xff]  }
   0xa   :  { %159 = vmatpush1.bf16.msra.mxu0 %v1182_v5  ;;  %v1201_v28 = vld [vmem:[%s1652_s2 + $0x40] sm:$0xff]   ;;  %v1209_v33 = vld [vmem:[%s1652_s2 + $0x98] sm:$0xff]   ;;  %v1107_v34 = vcombine.high %v1402_v30, %v1402_v30  ;;  %v1210_v36 = vld [vmem:[%s1652_s2 + $0xf0] sm:$0xff]   ;;  %v1106_v2 = vcombine.low %v1402_v30, %v1402_v30 }
   0xb   :  { %280 = vmatpush1.bf16.msra.mxu1 %v1183_v6  ;;  %160 = vmatprep.subr.bf16.mxu0 %v1264_v0  ;;  %v1417_v35 = vld [vmem:[%s1654_s0] sm:$0x66]  ;;  %v1211_v38 = vld [vmem:[%s1652_s2 + $0x90] sm:$0xff]   ;;  %v1212_v40 = vld [vmem:[%s1652_s2 + $0xe8] sm:$0xff]  }
   0xc   :  { %281 = vmatprep.subr.bf16.mxu1 %v1264_v0  ;;  %v1066_v37 = vcombine.high %v1417_v35, %v1417_v35  ;;  %v1213_v41 = vld [vmem:[%s1652_s2 + $0x88] sm:$0xff]   ;;  %v1214_v42 = vld [vmem:[%s1652_s2 + $0xe0] sm:$0xff]   ;;  %v1216_v44 = vld [vmem:[%s1652_s2 + $0xd8] sm:$0xff]   ;;  %v1065_v58 = vcombine.low %v1417_v35, %v1417_v35 }
   0xd   :  { %v1215_v43 = vld [vmem:[%s1652_s2 + $0x80] sm:$0xff]   ;;  %v1217_v45 = vld [vmem:[%s1652_s2 + $0x78] sm:$0xff]   ;;  %v1218_v46 = vld [vmem:[%s1652_s2 + $0xd0] sm:$0xff]  }
   0xe   :  { %161 = vmatpush1.bf16.msra.mxu0 %v1184_v7  ;;  %v347_v39 = vrot.slane %v1066_v37, 1  ;;  %v1219_v47 = vld [vmem:[%s1652_s2 + $0x70] sm:$0xff]   ;;  %v1220_v48 = vld [vmem:[%s1652_s2 + $0xc8] sm:$0xff]   ;;  %v1222_v50 = vld [vmem:[%s1652_s2 + $0xc0] sm:$0xff]   ;;  %v346_v62 = vrot.slane %v1065_v58, 1 }
   0xf   :  { %282 = vmatpush1.bf16.msra.mxu1 %v1185_v8  ;;  %162 = vmatprep.subr.bf16.mxu0 %v1264_v0  ;;  %v1221_v49 = vld [vmem:[%s1652_s2 + $0x68] sm:$0xff]   ;;  %v1223_v51 = vld [vmem:[%s1652_s2 + $0x60] sm:$0xff]   ;;  %v1224_v52 = vld [vmem:[%s1652_s2 + $0x118] sm:$0xff]  }
  0x10   :  { %283 = vmatprep.subr.bf16.mxu1 %v1264_v0  ;;  %v1225_v53 = vld [vmem:[%s1652_s2 + $0xb8] sm:$0xff]   ;;  %v1226_v54 = vld [vmem:[%s1652_s2 + $0x110] sm:$0xff]   ;;  %v1228_v56 = vld [vmem:[%s1652_s2 + $0x108] sm:$0xff]  }
  0x11   :  { %v1227_v55 = vld [vmem:[%s1652_s2 + $0xb0] sm:$0xff]   ;;  %v1229_v57 = vld [vmem:[%s1652_s2 + $0xa8] sm:$0xff]   ;;  %v1230_v59 = vld [vmem:[%s1652_s2 + $0x100] sm:$0xff]  }
  0x12   :  { %163 = vmatpush1.bf16.msra.mxu0 %v1186_v9  ;;  %v1511_v60 = vld [vmem:[%s1654_s0 + $0x8] sm:$0x66]  ;;  %v1231_v61 = vld [vmem:[%s1652_s2 + $0xa0] sm:$0xff]   ;;  %v1234_v3 = vld [vmem:[%s1652_s2 + $0x38] sm:$0xff]  }
  0x13   :  { %284 = vmatpush1.bf16.msra.mxu1 %v1187_v10  ;;  %164 = vmatprep.subr.bf16.mxu0 %v1264_v0  ;;  %v1521_v63 = vld [vmem:[%s1654_s0 + $0x8] sm:$0x33]  ;;  %v1162_v1 = vcombine.high %v1511_v60, %v1511_v60  ;;  %v1235_v4 = vld [vmem:[%s1652_s2 + $0xf8] sm:$0xff]   ;;  %v1236_v7 = vld [vmem:[%s1652_s2 + $0x30] sm:$0xff]  }
  0x14   :  { %285 = vmatprep.subr.bf16.mxu1 %v1264_v0  ;;  %v1122_v5 = vcombine.high %v1521_v63, %v1521_v63  ;;  %v1237_v8 = vld [vmem:[%s1652_s2 + $0xf0] sm:$0xff]   ;;  %v1238_v9 = vld [vmem:[%s1652_s2 + $0x28] sm:$0xff]   ;;  %v1248_v19 = vld [vmem:[%s1652_s2] sm:$0xff]   ;;  %v1121_v30 = vcombine.low %v1521_v63, %v1521_v63 }
  0x15   :  { %v791_v6 = vrot.slane %v1162_v1, 1  ;;  %v1239_v10 = vld [vmem:[%s1652_s2 + $0xe8] sm:$0xff]   ;;  %v1244_v15 = vld [vmem:[%s1652_s2 + $0x10] sm:$0xff]  }
  0x16   :  { %165 = vmatpush1.bf16.msra.mxu0 %v1188_v11  ;;  %v1240_v11 = vld [vmem:[%s1652_s2 + $0x20] sm:$0xff]   ;;  %v1245_v16 = vld [vmem:[%s1652_s2 + $0xd0] sm:$0xff]   ;;  %v1246_v17 = vld [vmem:[%s1652_s2 + $0x8] sm:$0xff]  }
  0x17   :  { %286 = vmatpush1.bf16.msra.mxu1 %v1189_v12  ;;  %166 = vmatprep.subr.bf16.mxu0 %v1264_v0  ;;  %v1241_v12 = vld [vmem:[%s1652_s2 + $0xe0] sm:$0xff]  }
  0x18   :  { %287 = vmatprep.subr.bf16.mxu1 %v1264_v0 }
  0x1a   :  { %167 = vmatpush1.bf16.msra.mxu0 %v1190_v13  ;;  %v1242_v13 = vld [vmem:[%s1652_s2 + $0x18] sm:$0xff]  }
  0x1b   :  { %288 = vmatpush1.bf16.msra.mxu1 %v1191_v14  ;;  %168 = vmatprep.subr.bf16.mxu0 %v1264_v0  ;;  %v1243_v14 = vld [vmem:[%s1652_s2 + $0xd8] sm:$0xff]  }
  0x1c   :  { %289 = vmatprep.subr.bf16.mxu1 %v1264_v0 }
  0x1e   :  { %169 = vmatpush1.bf16.msra.mxu0 %v1192_v18  ;;  %v1247_v18 = vld [vmem:[%s1652_s2 + $0xc8] sm:$0xff]  }
  0x1f   :  { %290 = vmatpush1.bf16.msra.mxu1 %v1193_v20  ;;  %178 = vmatprep.subr.bf16.mxu0 %v1264_v0  ;;  %v1249_v20 = vld [vmem:[%s1652_s2 + $0xc0] sm:$0xff]  }
  0x20   :  { %299 = vmatprep.subr.bf16.mxu1 %v1264_v0 }
  0x22   :  { %179 = vmatpush2.bf16.msra.mxu0 %v1194_v21  ;;  %v1250_v21 = vld [vmem:[%s1652_s2 + $0x58] sm:$0xff]  }
  0x23   :  { %300 = vmatpush2.bf16.msra.mxu1 %v1195_v22  ;;  %180 = vmatprep.subr.bf16.mxu0 %v1264_v0  ;;  %v1251_v22 = vld [vmem:[%s1652_s2 + $0x118] sm:$0xff]  }
  0x24   :  { %301 = vmatprep.subr.bf16.mxu1 %v1264_v0 }
  0x26   :  { %181 = vmatpush2.bf16.msra.mxu0 %v1196_v23  ;;  %v1252_v23 = vld [vmem:[%s1652_s2 + $0x50] sm:$0xff]  }
  0x27   :  { %302 = vmatpush2.bf16.msra.mxu1 %v1197_v24  ;;  %182 = vmatprep.subr.bf16.mxu0 %v1264_v0  ;;  %v1253_v24 = vld [vmem:[%s1652_s2 + $0x110] sm:$0xff]  }
  0x28   :  { %303 = vmatprep.subr.bf16.mxu1 %v1264_v0 }
  0x2a   :  { %183 = vmatpush2.bf16.msra.mxu0 %v1198_v25  ;;  %v1254_v25 = vld [vmem:[%s1652_s2 + $0x48] sm:$0xff]  }
  0x2b   :  { %304 = vmatpush2.bf16.msra.mxu1 %v1199_v26  ;;  %184 = vmatprep.subr.bf16.mxu0 %v1264_v0  ;;  %v1255_v26 = vld [vmem:[%s1652_s2 + $0x108] sm:$0xff]  }
  0x2c   :  { %305 = vmatprep.subr.bf16.mxu1 %v1264_v0 }
  0x2e   :  { %185 = vmatpush2.bf16.msra.mxu0 %v1200_v27  ;;  %v1256_v27 = vld [vmem:[%s1652_s2 + $0x40] sm:$0xff]  }
  0x2f   :  { %306 = vmatpush2.bf16.msra.mxu1 %v1201_v28  ;;  %424 = vmatprep.subr.bf16.mxu0 %v1264_v0  ;;  %v1161_v28 = vcombine.low %v1511_v60, %v1511_v60 }
  0x30   :  { %599 = vmatprep.subr.bf16.mxu1 %v1264_v0 }
  0x31   :  { %187 = vmatmul.mubr.bf16.vlgmr.msra.gmra.mxu0 %v1011_v29  ;;  %v1257_v29 = vld [vmem:[%s1652_s2 + $0x100] sm:$0xff]  }
  0x32   :  { %308 = vmatmul.mubr.bf16.vlgmr.msra.gmra.mxu1 %v1026_v31  ;;  %425 = vmatpush1.bf16.msra.mxu0 %v1208_v32  ;;  %v790_v31 = vrot.slane %v1161_v28, 1 }
  0x33   :  { %600 = vmatpush1.bf16.msra.mxu1 %v1209_v33  ;;  %426 = vmatprep.subr.bf16.mxu0 %v1264_v0 }
  0x34   :  { %601 = vmatprep.subr.bf16.mxu1 %v1264_v0  ;;  %1120 = vmatprep.mubr.msk.bf16.mxu1 %vm150_vm0, %v1107_v34 }
  0x35   :  { %1079 = vmatprep.mubr.msk.bf16.mxu0 %vm150_vm0, %v347_v39 }
  0x36   :  { %427 = vmatpush1.bf16.msra.mxu0 %v1210_v36 }
  0x37   :  { %602 = vmatpush1.bf16.msra.mxu1 %v1211_v38  ;;  %428 = vmatprep.subr.bf16.mxu0 %v1264_v0 }
  0x38   :  { %603 = vmatprep.subr.bf16.mxu1 %v1264_v0 }
  0x3a   :  { %429 = vmatpush1.bf16.msra.mxu0 %v1212_v40 }
  0x3b   :  { %604 = vmatpush1.bf16.msra.mxu1 %v1213_v41  ;;  %430 = vmatprep.subr.bf16.mxu0 %v1264_v0 }
  0x3c   :  { %605 = vmatprep.subr.bf16.mxu1 %v1264_v0 }
  0x3e   :  { %431 = vmatpush1.bf16.msra.mxu0 %v1214_v42 }
  0x3f   :  { %606 = vmatpush1.bf16.msra.mxu1 %v1215_v43  ;;  %432 = vmatprep.subr.bf16.mxu0 %v1264_v0 }
  0x40   :  { %607 = vmatprep.subr.bf16.mxu1 %v1264_v0 }
  0x42   :  { %433 = vmatpush1.bf16.msra.mxu0 %v1216_v44 }
  0x43   :  { %608 = vmatpush1.bf16.msra.mxu1 %v1217_v45  ;;  %434 = vmatprep.subr.bf16.mxu0 %v1264_v0 }
  0x44   :  { %609 = vmatprep.subr.bf16.mxu1 %v1264_v0 }
  0x46   :  { %435 = vmatpush1.bf16.msra.mxu0 %v1218_v46 }
  0x47   :  { %610 = vmatpush1.bf16.msra.mxu1 %v1219_v47  ;;  %436 = vmatprep.subr.bf16.mxu0 %v1264_v0 }
  0x48   :  { %611 = vmatprep.subr.bf16.mxu1 %v1264_v0 }
  0x4a   :  { %437 = vmatpush1.bf16.msra.mxu0 %v1220_v48 }
  0x4b   :  { %612 = vmatpush1.bf16.msra.mxu1 %v1221_v49  ;;  %438 = vmatprep.subr.bf16.mxu0 %v1264_v0 }
  0x4c   :  { %613 = vmatprep.subr.bf16.mxu1 %v1264_v0 }
  0x4e   :  { %439 = vmatpush1.bf16.msra.mxu0 %v1222_v50 }
  0x4f   :  { %614 = vmatpush1.bf16.msra.mxu1 %v1223_v51  ;;  %448 = vmatprep.subr.bf16.mxu0 %v1264_v0 }
  0x50   :  { %623 = vmatprep.subr.bf16.mxu1 %v1264_v0 }
  0x52   :  { %449 = vmatpush2.bf16.msra.mxu0 %v1224_v52 }
  0x53   :  { %624 = vmatpush2.bf16.msra.mxu1 %v1225_v53  ;;  %450 = vmatprep.subr.bf16.mxu0 %v1264_v0 }
  0x54   :  { %625 = vmatprep.subr.bf16.mxu1 %v1264_v0 }
  0x56   :  { %451 = vmatpush2.bf16.msra.mxu0 %v1226_v54 }
  0x57   :  { %626 = vmatpush2.bf16.msra.mxu1 %v1227_v55  ;;  %452 = vmatprep.subr.bf16.mxu0 %v1264_v0 }
  0x58   :  { %627 = vmatprep.subr.bf16.mxu1 %v1264_v0 }
  0x5a   :  { %453 = vmatpush2.bf16.msra.mxu0 %v1228_v56 }
  0x5b   :  { %628 = vmatpush2.bf16.msra.mxu1 %v1229_v57  ;;  %454 = vmatprep.subr.bf16.mxu0 %v1264_v0 }
  0x5c   :  { %629 = vmatprep.subr.bf16.mxu1 %v1264_v0 }
  0x5e   :  { %455 = vmatpush2.bf16.msra.mxu0 %v1230_v59 }
  0x5f   :  { %630 = vmatpush2.bf16.msra.mxu1 %v1231_v61  ;;  %720 = vmatprep.subr.bf16.mxu0 %v1264_v0 }
  0x60   :  { %868 = vmatprep.subr.bf16.mxu1 %v1264_v0 }
  0x61   :  { %457 = vmatmul.mubr.bf16.vlgmr.msra.gmra.mxu0 %v346_v62 }
  0x62   :  { %632 = vmatmul.mubr.bf16.vlgmr.msra.gmra.mxu1 %v1106_v2  ;;  %721 = vmatpush1.bf16.msra.mxu0 %v1234_v3 }
  0x63   :  { %869 = vmatpush1.bf16.msra.mxu1 %v1235_v4  ;;  %722 = vmatprep.subr.bf16.mxu0 %v1264_v0 }
  0x64   :  { %870 = vmatprep.subr.bf16.mxu1 %v1264_v0  ;;  %1135 = vmatprep.mubr.msk.bf16.mxu0 %vm150_vm0, %v1122_v5 }
  0x65   :  { %1175 = vmatprep.mubr.msk.bf16.mxu1 %vm150_vm0, %v791_v6 }
  0x66   :  { %723 = vmatpush1.bf16.msra.mxu0 %v1236_v7 }
  0x67   :  { %871 = vmatpush1.bf16.msra.mxu1 %v1237_v8  ;;  %724 = vmatprep.subr.bf16.mxu0 %v1264_v0 }
  0x68   :  { %872 = vmatprep.subr.bf16.mxu1 %v1264_v0 }
  0x6a   :  { %725 = vmatpush1.bf16.msra.mxu0 %v1238_v9 }
  0x6b   :  { %873 = vmatpush1.bf16.msra.mxu1 %v1239_v10  ;;  %726 = vmatprep.subr.bf16.mxu0 %v1264_v0 }
  0x6c   :  { %874 = vmatprep.subr.bf16.mxu1 %v1264_v0 }
  0x6e   :  { %727 = vmatpush1.bf16.msra.mxu0 %v1240_v11 }
  0x6f   :  { %875 = vmatpush1.bf16.msra.mxu1 %v1241_v12  ;;  %728 = vmatprep.subr.bf16.mxu0 %v1264_v0 }
  0x70   :  { %876 = vmatprep.subr.bf16.mxu1 %v1264_v0 }
  0x72   :  { %729 = vmatpush1.bf16.msra.mxu0 %v1242_v13 }
  0x73   :  { %877 = vmatpush1.bf16.msra.mxu1 %v1243_v14  ;;  %730 = vmatprep.subr.bf16.mxu0 %v1264_v0 }
  0x74   :  { %878 = vmatprep.subr.bf16.mxu1 %v1264_v0 }
  0x76   :  { %731 = vmatpush1.bf16.msra.mxu0 %v1244_v15 }
  0x77   :  { %879 = vmatpush1.bf16.msra.mxu1 %v1245_v16  ;;  %732 = vmatprep.subr.bf16.mxu0 %v1264_v0 }
  0x78   :  { %880 = vmatprep.subr.bf16.mxu1 %v1264_v0 }
  0x7a   :  { %733 = vmatpush1.bf16.msra.mxu0 %v1246_v17 }
  0x7b   :  { %881 = vmatpush1.bf16.msra.mxu1 %v1247_v18  ;;  %734 = vmatprep.subr.bf16.mxu0 %v1264_v0 }
  0x7c   :  { %882 = vmatprep.subr.bf16.mxu1 %v1264_v0 }
  0x7e   :  { %735 = vmatpush1.bf16.msra.mxu0 %v1248_v19 }
  0x7f   :  { %883 = vmatpush1.bf16.msra.mxu1 %v1249_v20  ;;  %744 = vmatprep.subr.bf16.mxu0 %v1264_v0 }
  0x80   :  { %892 = vmatprep.subr.bf16.mxu1 %v1264_v0 }
  0x82   :  { %745 = vmatpush2.bf16.msra.mxu0 %v1250_v21 }
  0x83   :  { %893 = vmatpush2.bf16.msra.mxu1 %v1251_v22  ;;  %746 = vmatprep.subr.bf16.mxu0 %v1264_v0 }
  0x84   :  { %894 = vmatprep.subr.bf16.mxu1 %v1264_v0 }
  0x86   :  { %747 = vmatpush2.bf16.msra.mxu0 %v1252_v23 }
  0x87   :  { %895 = vmatpush2.bf16.msra.mxu1 %v1253_v24  ;;  %748 = vmatprep.subr.bf16.mxu0 %v1264_v0 }
  0x88   :  { %896 = vmatprep.subr.bf16.mxu1 %v1264_v0 }
  0x8a   :  { %749 = vmatpush2.bf16.msra.mxu0 %v1254_v25 }
  0x8b   :  { %897 = vmatpush2.bf16.msra.mxu1 %v1255_v26  ;;  %750 = vmatprep.subr.bf16.mxu0 %v1264_v0 }
  0x8c   :  { %898 = vmatprep.subr.bf16.mxu1 %v1264_v0 }
  0x8e   :  { %751 = vmatpush2.bf16.msra.mxu0 %v1256_v27 }
  0x8f   :  { %899 = vmatpush2.bf16.msra.mxu1 %v1257_v29 }
  0x91   :  { %753 = vmatmul.mubr.bf16.vlgmr.msra.gmra.mxu0 %v1121_v30 }
  0x92   :  { %901 = vmatmul.mubr.bf16.vlgmr.msra.gmra.mxu1 %v790_v31 }
  0xf1   :  { %v188_v32 = vpop.f32.mrf.mxu0 }
  0xf2   :  { %v309_v33 = vpop.f32.mrf.mxu1 }
  0xf3   :  { %v190_v34 = vpop.f32.mrf.mxu0  ;;  %v310_v40 = vadd.f32 %v309_v33, %v188_v32 }
  0xf4   :  { %v311_v35 = vpop.f32.mrf.mxu1 }
  0xf5   :  { %v191_v36 = vpop.f32.mrf.mxu0  ;;  %v960_v35 = vlaneseq }
  0xf6   :  { %v312_v37 = vpop.f32.mrf.mxu1 }
  0xf7   :  { %v192_v38 = vpop.f32.mrf.mxu0  ;;  %v961_v36 = vshrl.u32 %v960_v35, 7  ;;  %v911_v37 = vld [vmem:[%s1655_s3] sm:$0x1] }
  0xf8   :  { %v313_v39 = vpop.f32.mrf.mxu1 }
  0xf9   :  { %v962_v38 = vsub.s32 0, %v961_v36 }
 0x121   :  { %v458_v41 = vpop.f32.mrf.mxu0 }
 0x122   :  { %v464_v42 = vadd.f32 %v458_v41, %v310_v40  ;;  %v633_v0 = vpop.f32.mrf.mxu1  ;;  %v912_v41 = vld [vmem:[%s1656_s4] sm:$0x1] }
 0x123   :  { %v460_v43 = vpop.f32.mrf.mxu0 }
 0x124   :  { %465 = vst [vmem:[#allocation2] sm:$0xf] %v464_v42  ;;  %v635_v44 = vpop.f32.mrf.mxu1 }
 0x125   :  { %v461_v45 = vpop.f32.mrf.mxu0 }
 0x126   :  { %v636_v46 = vpop.f32.mrf.mxu1 }
 0x127   :  { %v462_v47 = vpop.f32.mrf.mxu0 }
 0x128   :  { %v637_v48 = vpop.f32.mrf.mxu1 }
 0x12b   :  { %v1631_v49 = vld [vmem:[#allocation2] sm:$0xf] }
 0x12c   :  { %v915_v51 = vsel %vm914_vm1, %v1631_v49, 0.0 }
 0x12d   :  { %v916_v57 = vrot.slane %v915_v51, 4 }
 0x12f   :  { %v917_v62 = vadd.f32 %v916_v57, %v915_v51 }
 0x131   :  { %v918_v63 = vrot.slane %v917_v62, 2 }
 0x133   :  { %v919_v4 = vadd.f32 %v918_v63, %v917_v62 }
 0x135   :  { %v920_v7 = vrot.slane %v919_v4, 1 }
 0x137   :  { %v921_v10 = vadd.f32 %v920_v7, %v919_v4 }
 0x151   :  { %v754_v50 = vpop.f32.mrf.mxu0 }
 0x152   :  { %v755_v52 = vadd.f32 %v754_v50, %v633_v0  ;;  %v902_v53 = vpop.f32.mrf.mxu1 }
 0x153   :  { %v756_v54 = vpop.f32.mrf.mxu0 }
 0x154   :  { %v908_v55 = vadd.f32 %v902_v53, %v755_v52  ;;  %v904_v56 = vpop.f32.mrf.mxu1 }
 0x155   :  { %v757_v58 = vpop.f32.mrf.mxu0 }
 0x156   :  { %910 = vst [vmem:[#allocation2 + $0x4] sm:$0xf] %v908_v55  ;;  %v905_v59 = vpop.f32.mrf.mxu1 }
 0x157   :  { %v758_v60 = vpop.f32.mrf.mxu0 }
 0x158   :  { %v906_v61 = vpop.f32.mrf.mxu1 }
 0x15d   :  { %v923_v1 = vld [vmem:[#allocation2 + $0x4] sm:$0xf] }
 0x15e   :  { %v924_v2 = vsel %vm914_vm1, %v923_v1, 0.0  ;;  %v976_v44 = vld [vmem:[#allocation2 + $0x4] sm:$0xf] }
 0x15f   :  { %v925_v3 = vrot.slane %v924_v2, 4 }
 0x161   :  { %v926_v5 = vadd.f32 %v925_v3, %v924_v2 }
 0x163   :  { %v927_v6 = vrot.slane %v926_v5, 2 }
 0x165   :  { %v928_v8 = vadd.f32 %v927_v6, %v926_v5 }
 0x167   :  { %v929_v9 = vrot.slane %v928_v8, 1 }
 0x169   :  { %v930_v11 = vadd.f32 %v929_v9, %v928_v8 }
 0x16b   :  { %v931_v12 = vadd.f32 %v930_v11, %v921_v10 }
 0x16d   :  { %v932_v13 = vmul.f32 0.125, %v931_v12 }
 0x16f   :  { %v933_v14 = vsub.f32 %v1631_v49, %v932_v13  ;;  %v943_v15 = vsub.f32 %v923_v1, %v932_v13 }
 0x171   :  { %v934_v16 = vmul.f32 %v933_v14, %v933_v14  ;;  %v944_v17 = vmul.f32 %v943_v15, %v943_v15 }
 0x173   :  { %v935_v18 = vsel %vm914_vm1, %v934_v16, 0.0  ;;  %v945_v19 = vsel %vm914_vm1, %v944_v17, 0.0 }
 0x174   :  { %v936_v20 = vrot.slane %v935_v18, 4  ;;  %v946_v21 = vrot.slane %v945_v19, 4 }
 0x176   :  { %v937_v22 = vadd.f32 %v936_v20, %v935_v18  ;;  %v947_v23 = vadd.f32 %v946_v21, %v945_v19 }
 0x178   :  { %v938_v24 = vrot.slane %v937_v22, 2  ;;  %v948_v25 = vrot.slane %v947_v23, 2 }
 0x17a   :  { %v939_v26 = vadd.f32 %v938_v24, %v937_v22  ;;  %v949_v27 = vadd.f32 %v948_v25, %v947_v23 }
 0x17c   :  { %v940_v28 = vrot.slane %v939_v26, 1  ;;  %v950_v29 = vrot.slane %v949_v27, 1 }
 0x17e   :  { %v941_v30 = vadd.f32 %v940_v28, %v939_v26  ;;  %v951_v31 = vadd.f32 %v950_v29, %v949_v27 }
 0x180   :  { %v952_v32 = vadd.f32 %v951_v31, %v941_v30 }
 0x182   :  { %v953_v33 = vmul.f32 0.125, %v952_v32 }
 0x184   :  { %v954_v34 = vadd.f32 1e-05, %v953_v33 }
 0x186   :  { %1262 = vrsqrt.f32 %v954_v34 }
 0x193   :  { %v1263_v39 = vpop.eup %1262 }
 0x194   :  { %v956_v40 = vmul.f32 %v1263_v39, %v911_v37 }
 0x196   :  { %v957_v42 = vmul.f32 %v956_v40, %v932_v13  ;;  %v963_v0 = vrot.slane %v956_v40, %v962_v38 }
 0x198   :  { %v958_v43 = vsub.f32 %v912_v41, %v957_v42  ;;  %v965_v45 = vmul.f32 %v963_v0, %v1631_v49  ;;  %v977_v47 = vmul.f32 %v976_v44, %v963_v0 }
 0x19a   :  { %v970_v46 = vrot.slane %v958_v43, %v962_v38 }
 0x19c   :  { %v972_v48 = vadd.f32 %v970_v46, %v965_v45  ;;  %v978_v50 = vadd.f32 %v977_v47, %v970_v46 }
 0x19e   :  { %v973_v51 = vmax.f32 %v972_v48, 0.0  ;;  %v979_v52 = vmax.f32 %v978_v50, 0.0 }
 0x1a0   :  { %v974_v53 = vpack.c.bf16 %v973_v51, %v973_v51  ;;  %v980_v54 = vpack.c.bf16 %v979_v52, %v979_v52 }
 0x1a2   :  { %975 = vst [vmem:[%s1657_s5] sm:$0x3] %v974_v53  ;;  %1176 = vst [vmem:[%s1657_s5 + $0x2] sm:$0x3] %v980_v54 }

// kernel: representations_pathology_forward.9
= control target key start
LH: loop header
LB: loop body
LE: loop exit
PB: predicated region body
PF: predicated region fallthrough
CT: control target
= control target key end

     0   :  { %17 = vsyncpa [#allocation3], 0  ;;  %v4052_v36 = vmov 1966171168   ;;  %v190_v38 = vlaneseq  ;;  %s5325_s0 = inlined_call_operand.vmem [shape: bf16[2,1152], index: 0, kind: input, shape index: {}]   ;;  %s5326_s1 = inlined_call_operand.vmem [shape: bf16[1152,256], index: 1, kind: input, shape index: {}]   ;;  %s5327_s2 = inlined_call_operand.vmem [shape: f32[1,256], index: 2, kind: input, shape index: {}]   ;;  %s5328_s3 = inlined_call_operand.vmem [shape: f32[1,256], index: 3, kind: input, shape index: {}]   ;;  %s5329_s4 = inlined_call_operand.vmem [shape: bf16[256,1024], index: 4, kind: input, shape index: {}]   ;;  %s5330_s5 = inlined_call_operand.vmem [shape: f32[1,1024], index: 5, kind: input, shape index: {}]   ;;  %s5331_s6 = inlined_call_operand.vmem [shape: f32[1,1024], index: 6, kind: input, shape index: {}]   ;;  %s5332_s7 = inlined_call_operand.vmem [shape: bf16[1024,128], index: 7, kind: input, shape index: {}]   ;;  %s5333_s8 = inlined_call_operand.vmem [shape: f32[1,128], index: 8, kind: input, shape index: {}]   ;;  %s5334_s9 = inlined_call_operand.hbm [shape: f32[2,256], index: 9, kind: output, shape index: {0}]   ;;  %s5335_s10 = inlined_call_operand.hbm [shape: f32[2,1024], index: 10, kind: output, shape index: {1}]   ;;  %s5336_s11 = inlined_call_operand.hbm [shape: f32[2,128], index: 11, kind: output, shape index: {2}]  }
   0x1   :  { %v3687_v0 = vld [vmem:[%s5326_s1 + $0x74] ss:$8 sps:$4 sm:$0xff]   ;;  %v3691_v2 = vld [vmem:[%s5326_s1 + $0x70] ss:$8 sps:$4 sm:$0xff]   ;;  %v3693_v4 = vld [vmem:[%s5326_s1 + $0x64] ss:$8 sps:$4 sm:$0xff]   ;;  %v188_v37 = vunpack.c.l.s4 %v4052_v36 }
   0x2   :  { %v3689_v1 = vld [vmem:[%s5326_s1 + $0x174] ss:$8 sps:$4 sm:$0xff]   ;;  %978 = vmatprep.subr.bf16.mxu0 %v3687_v0  ;;  %v3692_v3 = vld [vmem:[%s5326_s1 + $0x170] ss:$8 sps:$4 sm:$0xff]   ;;  %v3695_v5 = vld [vmem:[%s5326_s1 + $0x164] ss:$8 sps:$4 sm:$0xff]  }
   0x3   :  { %1019 = vmatprep.subr.bf16.mxu1 %v3689_v1  ;;  %979 = vmatpush1.bf16.msra.mxu0 %v3691_v2  ;;  %v3697_v6 = vld [vmem:[%s5326_s1 + $0x60] ss:$8 sps:$4 sm:$0xff]   ;;  %v3699_v8 = vld [vmem:[%s5326_s1 + $0x54] ss:$8 sps:$4 sm:$0xff]   ;;  %v3703_v10 = vld [vmem:[%s5326_s1 + $0x50] ss:$8 sps:$4 sm:$0xff]   ;;  %v189_v42 = vunpack.c.0.s8 %v188_v37 }
   0x4   :  { %1020 = vmatpush1.bf16.msra.mxu1 %v3692_v3  ;;  %980 = vmatprep.subr.bf16.mxu0 %v3693_v4  ;;  %v3698_v7 = vld [vmem:[%s5326_s1 + $0x160] ss:$8 sps:$4 sm:$0xff]   ;;  %v3701_v9 = vld [vmem:[%s5326_s1 + $0x154] ss:$8 sps:$4 sm:$0xff]   ;;  %v3704_v11 = vld [vmem:[%s5326_s1 + $0x150] ss:$8 sps:$4 sm:$0xff]  }
   0x5   :  { %1021 = vmatprep.subr.bf16.mxu1 %v3695_v5  ;;  %v3705_v12 = vld [vmem:[%s5326_s1 + $0x44] ss:$8 sps:$4 sm:$0xff]   ;;  %v3709_v14 = vld [vmem:[%s5326_s1 + $0x40] ss:$8 sps:$4 sm:$0xff]   ;;  %v3711_v16 = vld [vmem:[%s5326_s1 + $0x34] ss:$8 sps:$4 sm:$0xff]  }
   0x6   :  { %v3707_v13 = vld [vmem:[%s5326_s1 + $0x144] ss:$8 sps:$4 sm:$0xff]   ;;  %v3710_v15 = vld [vmem:[%s5326_s1 + $0x140] ss:$8 sps:$4 sm:$0xff]   ;;  %v3713_v17 = vld [vmem:[%s5326_s1 + $0x134] ss:$8 sps:$4 sm:$0xff]  }
   0x7   :  { %981 = vmatpush1.bf16.msra.mxu0 %v3697_v6  ;;  %v3715_v18 = vld [vmem:[%s5326_s1 + $0x30] ss:$8 sps:$4 sm:$0xff]   ;;  %v3717_v20 = vld [vmem:[%s5326_s1 + $0x24] ss:$8 sps:$4 sm:$0xff]   ;;  %v3721_v22 = vld [vmem:[%s5326_s1 + $0x20] ss:$8 sps:$4 sm:$0xff]  }
   0x8   :  { %1022 = vmatpush1.bf16.msra.mxu1 %v3698_v7  ;;  %982 = vmatprep.subr.bf16.mxu0 %v3699_v8  ;;  %v3716_v19 = vld [vmem:[%s5326_s1 + $0x130] ss:$8 sps:$4 sm:$0xff]   ;;  %v3719_v21 = vld [vmem:[%s5326_s1 + $0x124] ss:$8 sps:$4 sm:$0xff]   ;;  %v3722_v23 = vld [vmem:[%s5326_s1 + $0x120] ss:$8 sps:$4 sm:$0xff]  }
   0x9   :  { %1023 = vmatprep.subr.bf16.mxu1 %v3701_v9  ;;  %v3723_v24 = vld [vmem:[%s5326_s1 + $0x14] ss:$8 sps:$4 sm:$0xff]   ;;  %v3727_v26 = vld [vmem:[%s5326_s1 + $0x10] ss:$8 sps:$4 sm:$0xff]   ;;  %v3729_v28 = vld [vmem:[%s5326_s1 + $0x4] ss:$8 sps:$4 sm:$0xff]  }
   0xa   :  { %v3725_v25 = vld [vmem:[%s5326_s1 + $0x114] ss:$8 sps:$4 sm:$0xff]   ;;  %v3728_v27 = vld [vmem:[%s5326_s1 + $0x110] ss:$8 sps:$4 sm:$0xff]   ;;  %v3731_v29 = vld [vmem:[%s5326_s1 + $0x104] ss:$8 sps:$4 sm:$0xff]  }
   0xb   :  { %983 = vmatpush1.bf16.msra.mxu0 %v3703_v10  ;;  %v3733_v30 = vld [vmem:[%s5326_s1] ss:$8 sps:$4 sm:$0xff]   ;;  %v3735_v32 = vld [vmem:[%s5326_s1 + $0xf4] ss:$8 sps:$4 sm:$0xff]   ;;  %v3739_v34 = vld [vmem:[%s5326_s1 + $0xf0] ss:$8 sps:$4 sm:$0xff]  }
   0xc   :  { %1024 = vmatpush1.bf16.msra.mxu1 %v3704_v11  ;;  %984 = vmatprep.subr.bf16.mxu0 %v3705_v12  ;;  %v3734_v31 = vld [vmem:[%s5326_s1 + $0x100] ss:$8 sps:$4 sm:$0xff]   ;;  %v3737_v33 = vld [vmem:[%s5326_s1 + $0x1f4] ss:$8 sps:$4 sm:$0xff]   ;;  %v3740_v35 = vld [vmem:[%s5326_s1 + $0x1f0] ss:$8 sps:$4 sm:$0xff]  }
   0xd   :  { %1025 = vmatprep.subr.bf16.mxu1 %v3707_v13  ;;  %v3741_v39 = vld [vmem:[%s5326_s1 + $0xe4] ss:$8 sps:$4 sm:$0xff]   ;;  %v3745_v41 = vld [vmem:[%s5326_s1 + $0xe0] ss:$8 sps:$4 sm:$0xff]   ;;  %v4235_v43 = vshrl.u32 %v190_v38, 7 }
   0xe   :  { %v3743_v40 = vld [vmem:[%s5326_s1 + $0x1e4] ss:$8 sps:$4 sm:$0xff]   ;;  %v3746_v44 = vld [vmem:[%s5326_s1 + $0x1e0] ss:$8 sps:$4 sm:$0xff]   ;;  %v3747_v45 = vld [vmem:[%s5326_s1 + $0xd4] ss:$8 sps:$4 sm:$0xff]  }
   0xf   :  { %985 = vmatpush1.bf16.msra.mxu0 %v3709_v14  ;;  %v3749_v46 = vld [vmem:[%s5326_s1 + $0x1d4] ss:$8 sps:$4 sm:$0xff]   ;;  %v3751_v47 = vld [vmem:[%s5326_s1 + $0xd0] ss:$8 sps:$4 sm:$0xff]   ;;  %v4253_v49 = vsub.s32 %v189_v42, %v4235_v43  ;;  %v3753_v50 = vld [vmem:[%s5326_s1 + $0xc4] ss:$8 sps:$4 sm:$0xff]  }
  0x10   :  { %1026 = vmatpush1.bf16.msra.mxu1 %v3710_v15  ;;  %986 = vmatprep.subr.bf16.mxu0 %v3711_v16  ;;  %v3752_v48 = vld [vmem:[%s5326_s1 + $0x1d0] ss:$8 sps:$4 sm:$0xff]   ;;  %v3755_v51 = vld [vmem:[%s5326_s1 + $0x1c4] ss:$8 sps:$4 sm:$0xff]   ;;  %v3757_v53 = vld [vmem:[%s5326_s1 + $0xc0] ss:$8 sps:$4 sm:$0xff]  }
  0x11   :  { %1027 = vmatprep.subr.bf16.mxu1 %v3713_v17  ;;  %v38_v52 = vld [vmem:[%s5325_s0] sm:$0xff]  ;;  %v3759_v57 = vld [vmem:[%s5326_s1 + $0xb4] ss:$8 sps:$4 sm:$0xff]   ;;  %v3763_v61 = vld [vmem:[%s5326_s1 + $0xb0] ss:$8 sps:$4 sm:$0xff]  }
  0x12   :  { %v186_v54 = vcombine.high %v38_v52, %v38_v52  ;;  %v193_v55 = vrot.slane %v38_v52, %v4253_v49  ;;  %v3758_v56 = vld [vmem:[%s5326_s1 + $0x1c0] ss:$8 sps:$4 sm:$0xff]   ;;  %v3761_v58 = vld [vmem:[%s5326_s1 + $0x1b4] ss:$8 sps:$4 sm:$0xff]   ;;  %v3764_v0 = vld [vmem:[%s5326_s1 + $0x1b0] ss:$8 sps:$4 sm:$0xff]  }
  0x13   :  { %987 = vmatpush1.bf16.msra.mxu0 %v3715_v18  ;;  %v3765_v1 = vld [vmem:[%s5326_s1 + $0xa4] ss:$8 sps:$4 sm:$0xff]   ;;  %v3769_v4 = vld [vmem:[%s5326_s1 + $0xa0] ss:$8 sps:$4 sm:$0xff]   ;;  %v3771_v6 = vld [vmem:[%s5326_s1 + $0x94] ss:$8 sps:$4 sm:$0xff]  }
  0x14   :  { %1028 = vmatpush1.bf16.msra.mxu1 %v3716_v19  ;;  %988 = vmatprep.subr.bf16.mxu0 %v3717_v20  ;;  %v201_v59 = vcombine.high %v193_v55, %v193_v55  ;;  %v200_v60 = vrot.slane %v186_v54, %v4253_v49  ;;  %v3767_v2 = vld [vmem:[%s5326_s1 + $0x1a4] ss:$8 sps:$4 sm:$0xff]   ;;  %v3770_v5 = vld [vmem:[%s5326_s1 + $0x1a0] ss:$8 sps:$4 sm:$0xff]   ;;  %v3773_v7 = vld [vmem:[%s5326_s1 + $0x194] ss:$8 sps:$4 sm:$0xff]   ;;  %v209_v14 = vrot.slane %v193_v55, %v4253_v49 }
  0x15   :  { %1029 = vmatprep.subr.bf16.mxu1 %v3719_v21  ;;  %v3775_v8 = vld [vmem:[%s5326_s1 + $0x90] ss:$8 sps:$4 sm:$0xff]   ;;  %v3777_v10 = vld [vmem:[%s5326_s1 + $0x84] ss:$8 sps:$4 sm:$0xff]   ;;  %v3781_v13 = vld [vmem:[%s5326_s1 + $0x80] ss:$8 sps:$4 sm:$0xff]  }
  0x16   :  { %v223_v62 = vrot.slane %v201_v59, %v4253_v49  ;;  %v4283_v63 = vrot.slane %v200_v60, %v4253_v49  ;;  %v3776_v9 = vld [vmem:[%s5326_s1 + $0x190] ss:$8 sps:$4 sm:$0xff]   ;;  %v3779_v11 = vld [vmem:[%s5326_s1 + $0x184] ss:$8 sps:$4 sm:$0xff]   ;;  %v202_v12 = vcombine.high %v200_v60, %v200_v60  ;;  %v3782_v15 = vld [vmem:[%s5326_s1 + $0x180] ss:$8 sps:$4 sm:$0xff]   ;;  %v231_v19 = vcombine.high %v209_v14, %v209_v14 }
  0x17   :  { %989 = vmatpush1.bf16.msra.mxu0 %v3721_v22  ;;  %v3786_v16 = vld [vmem:[%s5326_s1 + $0x274] ss:$8 sps:$4 sm:$0xff]   ;;  %v3784_v20 = vld [vmem:[%s5326_s1 + $0x270] ss:$8 sps:$4 sm:$0xff]   ;;  %v3792_v22 = vld [vmem:[%s5326_s1 + $0x264] ss:$8 sps:$4 sm:$0xff]  }
  0x18   :  { %1030 = vmatpush1.bf16.msra.mxu1 %v3722_v23  ;;  %990 = vmatprep.subr.bf16.mxu0 %v3723_v24  ;;  %v233_v3 = vcombine.high %v223_v62, %v223_v62  ;;  %v3789_v17 = vld [vmem:[%s5326_s1 + $0x374] ss:$8 sps:$4 sm:$0xff]   ;;  %v230_v18 = vrot.slane %v202_v12, %v4253_v49  ;;  %v3787_v21 = vld [vmem:[%s5326_s1 + $0x370] ss:$8 sps:$4 sm:$0xff]   ;;  %v3795_v23 = vld [vmem:[%s5326_s1 + $0x364] ss:$8 sps:$4 sm:$0xff]  }
  0x19   :  { %1031 = vmatprep.subr.bf16.mxu1 %v3725_v25  ;;  %1010 = vmatprep.mubr.bf16.mxu0 %v223_v62  ;;  %v3790_v25 = vld [vmem:[%s5326_s1 + $0x260] ss:$8 sps:$4 sm:$0xff]   ;;  %v3813_v36 = vld [vmem:[%s5326_s1 + $0x334] ss:$8 sps:$4 sm:$0xff]   ;;  %v3808_v37 = vld [vmem:[%s5326_s1 + $0x230] ss:$8 sps:$4 sm:$0xff]  }
  0x1a   :  { %1051 = vmatprep.mubr.bf16.mxu1 %v233_v3  ;;  %v234_v24 = vcombine.high %v230_v18, %v230_v18  ;;  %v3811_v38 = vld [vmem:[%s5326_s1 + $0x330] ss:$8 sps:$4 sm:$0xff]   ;;  %v3817_v42 = vld [vmem:[%s5326_s1 + $0x320] ss:$8 sps:$4 sm:$0xff]   ;;  %v3837_v54 = vld [vmem:[%s5326_s1 + $0x3f4] ss:$8 sps:$4 sm:$0xff]  }
  0x1b   :  { %991 = vmatpush1.bf16.msra.mxu0 %v3727_v26  ;;  %v3793_v26 = vld [vmem:[%s5326_s1 + $0x360] ss:$8 sps:$4 sm:$0xff]   ;;  %v3832_v55 = vld [vmem:[%s5326_s1 + $0x2f0] ss:$8 sps:$4 sm:$0xff]   ;;  %v3849_v62 = vld [vmem:[%s5326_s1 + $0x3d4] ss:$8 sps:$4 sm:$0xff]  }
  0x1c   :  { %1032 = vmatpush1.bf16.msra.mxu1 %v3728_v27  ;;  %992 = vmatprep.subr.bf16.mxu0 %v3729_v28  ;;  %v3798_v27 = vld [vmem:[%s5326_s1 + $0x254] ss:$8 sps:$4 sm:$0xff]   ;;  %v3829_v52 = vld [vmem:[%s5326_s1 + $0x300] ss:$8 sps:$4 sm:$0xff]   ;;  %v3855_v3 = vld [vmem:[%s5326_s1 + $0x3c4] ss:$8 sps:$4 sm:$0xff]  }
  0x1d   :  { %1033 = vmatprep.subr.bf16.mxu1 %v3731_v29  ;;  %v3801_v28 = vld [vmem:[%s5326_s1 + $0x354] ss:$8 sps:$4 sm:$0xff]   ;;  %v3796_v29 = vld [vmem:[%s5326_s1 + $0x250] ss:$8 sps:$4 sm:$0xff]   ;;  %v3838_v59 = vld [vmem:[%s5326_s1 + $0x2e0] ss:$8 sps:$4 sm:$0xff]  }
  0x1e   :  { %v3841_v60 = vld [vmem:[%s5326_s1 + $0x3e0] ss:$8 sps:$4 sm:$0xff]  }
  0x1f   :  { %993 = vmatpush1.bf16.msra.mxu0 %v3733_v30  ;;  %v3799_v30 = vld [vmem:[%s5326_s1 + $0x350] ss:$8 sps:$4 sm:$0xff]   ;;  %v3862_v12 = vld [vmem:[%s5326_s1 + $0x2a0] ss:$8 sps:$4 sm:$0xff]  }
  0x20   :  { %1034 = vmatpush1.bf16.msra.mxu1 %v3734_v31  ;;  %994 = vmatprep.subr.bf16.mxu0 %v3735_v32  ;;  %v3804_v31 = vld [vmem:[%s5326_s1 + $0x244] ss:$8 sps:$4 sm:$0xff]  }
  0x21   :  { %1035 = vmatprep.subr.bf16.mxu1 %v3737_v33  ;;  %v3807_v32 = vld [vmem:[%s5326_s1 + $0x344] ss:$8 sps:$4 sm:$0xff]   ;;  %v3802_v33 = vld [vmem:[%s5326_s1 + $0x240] ss:$8 sps:$4 sm:$0xff]  }
  0x23   :  { %995 = vmatpush2.bf16.msra.mxu0 %v3739_v34  ;;  %v3805_v34 = vld [vmem:[%s5326_s1 + $0x340] ss:$8 sps:$4 sm:$0xff]  }
  0x24   :  { %1036 = vmatpush2.bf16.msra.mxu1 %v3740_v35  ;;  %996 = vmatprep.subr.bf16.mxu0 %v3741_v39  ;;  %v3810_v35 = vld [vmem:[%s5326_s1 + $0x234] ss:$8 sps:$4 sm:$0xff]   ;;  %v3816_v39 = vld [vmem:[%s5326_s1 + $0x224] ss:$8 sps:$4 sm:$0xff]  }
  0x25   :  { %1037 = vmatprep.subr.bf16.mxu1 %v3743_v40  ;;  %v3819_v40 = vld [vmem:[%s5326_s1 + $0x324] ss:$8 sps:$4 sm:$0xff]  }
  0x27   :  { %997 = vmatpush2.bf16.msra.mxu0 %v3745_v41  ;;  %v3814_v41 = vld [vmem:[%s5326_s1 + $0x220] ss:$8 sps:$4 sm:$0xff]  }
  0x28   :  { %1038 = vmatpush2.bf16.msra.mxu1 %v3746_v44  ;;  %998 = vmatprep.subr.bf16.mxu0 %v3747_v45  ;;  %v3822_v44 = vld [vmem:[%s5326_s1 + $0x214] ss:$8 sps:$4 sm:$0xff]  }
  0x29   :  { %1039 = vmatprep.subr.bf16.mxu1 %v3749_v46  ;;  %v3825_v45 = vld [vmem:[%s5326_s1 + $0x314] ss:$8 sps:$4 sm:$0xff]   ;;  %v3820_v46 = vld [vmem:[%s5326_s1 + $0x210] ss:$8 sps:$4 sm:$0xff]  }
  0x2b   :  { %999 = vmatpush2.bf16.msra.mxu0 %v3751_v47  ;;  %v3823_v47 = vld [vmem:[%s5326_s1 + $0x310] ss:$8 sps:$4 sm:$0xff]  }
  0x2c   :  { %1040 = vmatpush2.bf16.msra.mxu1 %v3752_v48  ;;  %1000 = vmatprep.subr.bf16.mxu0 %v3753_v50  ;;  %v3828_v48 = vld [vmem:[%s5326_s1 + $0x204] ss:$8 sps:$4 sm:$0xff]  }
  0x2d   :  { %1041 = vmatprep.subr.bf16.mxu1 %v3755_v51  ;;  %v3831_v50 = vld [vmem:[%s5326_s1 + $0x304] ss:$8 sps:$4 sm:$0xff]   ;;  %v3826_v51 = vld [vmem:[%s5326_s1 + $0x200] ss:$8 sps:$4 sm:$0xff]  }
  0x2f   :  { %1001 = vmatpush2.bf16.msra.mxu0 %v3757_v53  ;;  %v3834_v53 = vld [vmem:[%s5326_s1 + $0x2f4] ss:$8 sps:$4 sm:$0xff]  }
  0x30   :  { %1042 = vmatpush2.bf16.msra.mxu1 %v3758_v56  ;;  %1002 = vmatprep.subr.bf16.mxu0 %v3759_v57  ;;  %v3835_v56 = vld [vmem:[%s5326_s1 + $0x3f0] ss:$8 sps:$4 sm:$0xff]   ;;  %v3840_v57 = vld [vmem:[%s5326_s1 + $0x2e4] ss:$8 sps:$4 sm:$0xff]  }
  0x31   :  { %1043 = vmatprep.subr.bf16.mxu1 %v3761_v58  ;;  %v3843_v58 = vld [vmem:[%s5326_s1 + $0x3e4] ss:$8 sps:$4 sm:$0xff]  }
  0x33   :  { %1003 = vmatpush2.bf16.msra.mxu0 %v3763_v61  ;;  %v3846_v61 = vld [vmem:[%s5326_s1 + $0x2d4] ss:$8 sps:$4 sm:$0xff]  }
  0x34   :  { %1044 = vmatpush2.bf16.msra.mxu1 %v3764_v0  ;;  %1004 = vmatprep.subr.bf16.mxu0 %v3765_v1  ;;  %v3844_v0 = vld [vmem:[%s5326_s1 + $0x2d0] ss:$8 sps:$4 sm:$0xff]  }
  0x35   :  { %1045 = vmatprep.subr.bf16.mxu1 %v3767_v2  ;;  %v3847_v1 = vld [vmem:[%s5326_s1 + $0x3d0] ss:$8 sps:$4 sm:$0xff]   ;;  %v3852_v2 = vld [vmem:[%s5326_s1 + $0x2c4] ss:$8 sps:$4 sm:$0xff]  }
  0x37   :  { %1005 = vmatpush2.bf16.msra.mxu0 %v3769_v4  ;;  %v3850_v4 = vld [vmem:[%s5326_s1 + $0x2c0] ss:$8 sps:$4 sm:$0xff]  }
  0x38   :  { %1046 = vmatpush2.bf16.msra.mxu1 %v3770_v5  ;;  %1006 = vmatprep.subr.bf16.mxu0 %v3771_v6  ;;  %v3853_v5 = vld [vmem:[%s5326_s1 + $0x3c0] ss:$8 sps:$4 sm:$0xff]   ;;  %v3858_v6 = vld [vmem:[%s5326_s1 + $0x2b4] ss:$8 sps:$4 sm:$0xff]  }
  0x39   :  { %1047 = vmatprep.subr.bf16.mxu1 %v3773_v7  ;;  %v3861_v7 = vld [vmem:[%s5326_s1 + $0x3b4] ss:$8 sps:$4 sm:$0xff]  }
  0x3b   :  { %1007 = vmatpush2.bf16.msra.mxu0 %v3775_v8  ;;  %v3856_v8 = vld [vmem:[%s5326_s1 + $0x2b0] ss:$8 sps:$4 sm:$0xff]  }
  0x3c   :  { %1048 = vmatpush2.bf16.msra.mxu1 %v3776_v9  ;;  %1008 = vmatprep.subr.bf16.mxu0 %v3777_v10  ;;  %v3859_v9 = vld [vmem:[%s5326_s1 + $0x3b0] ss:$8 sps:$4 sm:$0xff]   ;;  %v3864_v10 = vld [vmem:[%s5326_s1 + $0x2a4] ss:$8 sps:$4 sm:$0xff]  }
  0x3d   :  { %1049 = vmatprep.subr.bf16.mxu1 %v3779_v11  ;;  %v3867_v11 = vld [vmem:[%s5326_s1 + $0x3a4] ss:$8 sps:$4 sm:$0xff]  }
  0x3f   :  { %1009 = vmatpush2.bf16.msra.mxu0 %v3781_v13  ;;  %v3865_v13 = vld [vmem:[%s5326_s1 + $0x3a0] ss:$8 sps:$4 sm:$0xff]  }
  0x40   :  { %1050 = vmatpush2.bf16.msra.mxu1 %v3782_v15  ;;  %1060 = vmatprep.subr.bf16.mxu0 %v3786_v16  ;;  %v3873_v15 = vld [vmem:[%s5326_s1 + $0x394] ss:$8 sps:$4 sm:$0xff]   ;;  %v3868_v16 = vld [vmem:[%s5326_s1 + $0x290] ss:$8 sps:$4 sm:$0xff]  }
  0x41   :  { %1101 = vmatprep.subr.bf16.mxu1 %v3789_v17  ;;  %v3871_v17 = vld [vmem:[%s5326_s1 + $0x390] ss:$8 sps:$4 sm:$0xff]  }
  0x42   :  { %1011 = vmatmul.mubr.bf16.vlgmr.msra.gmra.mxu0 %v209_v14  ;;  %v3870_v14 = vld [vmem:[%s5326_s1 + $0x294] ss:$8 sps:$4 sm:$0xff]  }
  0x43   :  { %1052 = vmatmul.mubr.bf16.vlgmr.msra.gmra.mxu1 %v231_v19  ;;  %1061 = vmatpush1.bf16.msra.mxu0 %v3784_v20  ;;  %v3879_v19 = vld [vmem:[%s5326_s1 + $0x384] ss:$8 sps:$4 sm:$0xff]   ;;  %v3874_v20 = vld [vmem:[%s5326_s1 + $0x280] ss:$8 sps:$4 sm:$0xff]  }
  0x44   :  { %1102 = vmatpush1.bf16.msra.mxu1 %v3787_v21  ;;  %1062 = vmatprep.subr.bf16.mxu0 %v3792_v22  ;;  %v3877_v21 = vld [vmem:[%s5326_s1 + $0x380] ss:$8 sps:$4 sm:$0xff]   ;;  %v3882_v22 = vld [vmem:[%s5326_s1 + $0x474] ss:$8 sps:$4 sm:$0xff]  }
  0x45   :  { %1103 = vmatprep.subr.bf16.mxu1 %v3795_v23  ;;  %1092 = vmatprep.mubr.bf16.mxu0 %v230_v18  ;;  %v3876_v18 = vld [vmem:[%s5326_s1 + $0x284] ss:$8 sps:$4 sm:$0xff]   ;;  %v3880_v23 = vld [vmem:[%s5326_s1 + $0x470] ss:$8 sps:$4 sm:$0xff]  }
  0x46   :  { %1133 = vmatprep.mubr.bf16.mxu1 %v234_v24  ;;  %v232_v24 = vcombine.high %v4283_v63, %v4283_v63 }
  0x47   :  { %1063 = vmatpush1.bf16.msra.mxu0 %v3790_v25  ;;  %v3885_v25 = vld [vmem:[%s5326_s1 + $0x464] ss:$8 sps:$4 sm:$0xff]  }
  0x48   :  { %1104 = vmatpush1.bf16.msra.mxu1 %v3793_v26  ;;  %1064 = vmatprep.subr.bf16.mxu0 %v3798_v27  ;;  %v3883_v26 = vld [vmem:[%s5326_s1 + $0x460] ss:$8 sps:$4 sm:$0xff]   ;;  %v3888_v27 = vld [vmem:[%s5326_s1 + $0x454] ss:$8 sps:$4 sm:$0xff]  }
  0x49   :  { %1105 = vmatprep.subr.bf16.mxu1 %v3801_v28  ;;  %v4053_v28 = vmov 0  }
  0x4b   :  { %1065 = vmatpush1.bf16.msra.mxu0 %v3796_v29  ;;  %v3886_v29 = vld [vmem:[%s5326_s1 + $0x450] ss:$8 sps:$4 sm:$0xff]  }
  0x4c   :  { %1106 = vmatpush1.bf16.msra.mxu1 %v3799_v30  ;;  %1066 = vmatprep.subr.bf16.mxu0 %v3804_v31  ;;  %v3891_v30 = vld [vmem:[%s5326_s1 + $0x444] ss:$8 sps:$4 sm:$0xff]  }
  0x4d   :  { %1107 = vmatprep.subr.bf16.mxu1 %v3807_v32 }
  0x4f   :  { %1067 = vmatpush1.bf16.msra.mxu0 %v3802_v33 }
  0x50   :  { %1108 = vmatpush1.bf16.msra.mxu1 %v3805_v34  ;;  %1068 = vmatprep.subr.bf16.mxu0 %v3810_v35 }
  0x51   :  { %1109 = vmatprep.subr.bf16.mxu1 %v3813_v36 }
  0x53   :  { %1069 = vmatpush1.bf16.msra.mxu0 %v3808_v37 }
  0x54   :  { %1110 = vmatpush1.bf16.msra.mxu1 %v3811_v38  ;;  %1070 = vmatprep.subr.bf16.mxu0 %v3816_v39 }
  0x55   :  { %1111 = vmatprep.subr.bf16.mxu1 %v3819_v40 }
  0x57   :  { %1071 = vmatpush1.bf16.msra.mxu0 %v3814_v41 }
  0x58   :  { %1112 = vmatpush1.bf16.msra.mxu1 %v3817_v42  ;;  %1072 = vmatprep.subr.bf16.mxu0 %v3822_v44 }
  0x59   :  { %1113 = vmatprep.subr.bf16.mxu1 %v3825_v45 }
  0x5b   :  { %1073 = vmatpush1.bf16.msra.mxu0 %v3820_v46 }
  0x5c   :  { %1114 = vmatpush1.bf16.msra.mxu1 %v3823_v47  ;;  %1074 = vmatprep.subr.bf16.mxu0 %v3828_v48 }
  0x5d   :  { %1115 = vmatprep.subr.bf16.mxu1 %v3831_v50 }
  0x5f   :  { %1075 = vmatpush1.bf16.msra.mxu0 %v3826_v51 }
  0x60   :  { %1116 = vmatpush1.bf16.msra.mxu1 %v3829_v52  ;;  %1076 = vmatprep.subr.bf16.mxu0 %v3834_v53 }
  0x61   :  { %1117 = vmatprep.subr.bf16.mxu1 %v3837_v54 }
  0x63   :  { %1077 = vmatpush2.bf16.msra.mxu0 %v3832_v55 }
  0x64   :  { %1118 = vmatpush2.bf16.msra.mxu1 %v3835_v56  ;;  %1078 = vmatprep.subr.bf16.mxu0 %v3840_v57 }
  0x65   :  { %1119 = vmatprep.subr.bf16.mxu1 %v3843_v58 }
  0x67   :  { %1079 = vmatpush2.bf16.msra.mxu0 %v3838_v59 }
  0x68   :  { %1120 = vmatpush2.bf16.msra.mxu1 %v3841_v60  ;;  %1080 = vmatprep.subr.bf16.mxu0 %v3846_v61 }
  0x69   :  { %1121 = vmatprep.subr.bf16.mxu1 %v3849_v62 }
  0x6b   :  { %1081 = vmatpush2.bf16.msra.mxu0 %v3844_v0 }
  0x6c   :  { %1122 = vmatpush2.bf16.msra.mxu1 %v3847_v1  ;;  %1082 = vmatprep.subr.bf16.mxu0 %v3852_v2 }
  0x6d   :  { %1123 = vmatprep.subr.bf16.mxu1 %v3855_v3 }
  0x6f   :  { %1083 = vmatpush2.bf16.msra.mxu0 %v3850_v4 }
  0x70   :  { %1124 = vmatpush2.bf16.msra.mxu1 %v3853_v5  ;;  %1084 = vmatprep.subr.bf16.mxu0 %v3858_v6 }
  0x71   :  { %1125 = vmatprep.subr.bf16.mxu1 %v3861_v7 }
  0x73   :  { %1085 = vmatpush2.bf16.msra.mxu0 %v3856_v8 }
  0x74   :  { %1126 = vmatpush2.bf16.msra.mxu1 %v3859_v9  ;;  %1086 = vmatprep.subr.bf16.mxu0 %v3864_v10 }
  0x75   :  { %1127 = vmatprep.subr.bf16.mxu1 %v3867_v11 }
  0x77   :  { %1087 = vmatpush2.bf16.msra.mxu0 %v3862_v12 }
  0x78   :  { %1128 = vmatpush2.bf16.msra.mxu1 %v3865_v13  ;;  %1088 = vmatprep.subr.bf16.mxu0 %v3870_v14 }
  0x79   :  { %1129 = vmatprep.subr.bf16.mxu1 %v3873_v15 }
  0x7b   :  { %1089 = vmatpush2.bf16.msra.mxu0 %v3868_v16 }
  0x7c   :  { %1130 = vmatpush2.bf16.msra.mxu1 %v3871_v17  ;;  %1090 = vmatprep.subr.bf16.mxu0 %v3876_v18 }
  0x7d   :  { %1131 = vmatprep.subr.bf16.mxu1 %v3879_v19 }
  0x7f   :  { %1091 = vmatpush2.bf16.msra.mxu0 %v3874_v20 }
  0x80   :  { %1132 = vmatpush2.bf16.msra.mxu1 %v3877_v21  ;;  %1142 = vmatprep.subr.bf16.mxu0 %v3882_v22 }
  0x82   :  { %1093 = vmatmul.mubr.bf16.vlgmr.msra.gmra.mxu0 %v4283_v63 }
  0x83   :  { %1134 = vmatmul.mubr.bf16.vlgmr.msra.gmra.mxu1 %v232_v24  ;;  %1143 = vmatpush1.bf16.msra.mxu0 %v3880_v23 }
  0x84   :  { %1174 = vmatprep.mubr.bf16.mxu0 %v4053_v28  ;;  %1144 = vmatprep.subr.bf16.mxu0 %v3885_v25 }
  0x87   :  { %1145 = vmatpush1.bf16.msra.mxu0 %v3883_v26 }
  0x88   :  { %1146 = vmatprep.subr.bf16.mxu0 %v3888_v27 }
  0x89   :  { %18 = vsyncpa [#allocation5], 0  ;;  %v3889_v63 = vld [vmem:[%s5326_s1 + $0x440] ss:$8 sps:$4 sm:$0xff]   ;;  %v3894_v31 = vld [vmem:[%s5326_s1 + $0x434] ss:$8 sps:$4 sm:$0xff]  }
  0x8a   :  { %v3892_v32 = vld [vmem:[%s5326_s1 + $0x430] ss:$8 sps:$4 sm:$0xff]   ;;  %v3897_v33 = vld [vmem:[%s5326_s1 + $0x424] ss:$8 sps:$4 sm:$0xff]   ;;  %v3895_v34 = vld [vmem:[%s5326_s1 + $0x420] ss:$8 sps:$4 sm:$0xff]  }
  0x8b   :  { %1147 = vmatpush1.bf16.msra.mxu0 %v3886_v29  ;;  %v3900_v35 = vld [vmem:[%s5326_s1 + $0x414] ss:$8 sps:$4 sm:$0xff]   ;;  %v3898_v36 = vld [vmem:[%s5326_s1 + $0x410] ss:$8 sps:$4 sm:$0xff]   ;;  %v3903_v37 = vld [vmem:[%s5326_s1 + $0x404] ss:$8 sps:$4 sm:$0xff]  }
  0x8c   :  { %1148 = vmatprep.subr.bf16.mxu0 %v3891_v30  ;;  %v3901_v38 = vld [vmem:[%s5326_s1 + $0x400] ss:$8 sps:$4 sm:$0xff]   ;;  %vm1185_vm0 = vcmask 1041408   ;;  %s4056_s26 = smov [#allocation2]  }
  0x8d   :  { %v3254_v39 = vld.sshfl [vmem:[%s5325_s0 + $0x8] sm:$0x1 pattern:$0x75316420]  ;;  %v1327_v41 = vld [vmem:[%s5329_s4 + $0x1c0] sm:$0xff]  ;;  %s3219_s27 = sshll.u32 %s4056_s26, 4  ;;  %s3220_s27 = int_to_ptr.vmem [resolvable:$true] %s3219_s27 }
  0x8e   :  { %v248_v40 = vrot.slane %v3254_v39, %v4253_v49  ;;  %v1331_v42 = vld [vmem:[%s5329_s4 + $0x1e0] sm:$0xff]  ;;  %v1328_v44 = vld [vmem:[%s5329_s4 + $0x1c8] sm:$0xff] }
  0x8f   :  { %1149 = vmatpush1.bf16.msra.mxu0 %v3889_v63  ;;  %v3457_v45 = vcombine.high %v1327_v41, %v1331_v42  ;;  %v1332_v46 = vld [vmem:[%s5329_s4 + $0x1e8] sm:$0xff]  ;;  %v3456_v49 = vcombine.low %v1327_v41, %v1331_v42  ;;  %v1319_v50 = vld [vmem:[%s5329_s4 + $0x180] sm:$0xff] }
  0x90   :  { %1150 = vmatprep.subr.bf16.mxu0 %v3894_v31  ;;  %v3458_v47 = vcombine.low %v1328_v44, %v1332_v46  ;;  %v3459_v48 = vcombine.high %v1328_v44, %v1332_v46  ;;  %v1323_v51 = vld [vmem:[%s5329_s4 + $0x1a0] sm:$0xff]  ;;  %v1320_v52 = vld [vmem:[%s5329_s4 + $0x188] sm:$0xff] }
  0x91   :  { %2039 = vmatprep.subr.bf16.mxu1 %v3457_v45  ;;  %v3449_v53 = vcombine.high %v1319_v50, %v1323_v51  ;;  %v1324_v54 = vld [vmem:[%s5329_s4 + $0x1a8] sm:$0xff]  ;;  %v3448_v55 = vcombine.low %v1319_v50, %v1323_v51  ;;  %v1311_v58 = vld [vmem:[%s5329_s4 + $0x140] sm:$0xff] }
  0x92   :  { %2040 = vmatpush1.bf16.msra.mxu1 %v3456_v49  ;;  %v3450_v56 = vcombine.low %v1320_v52, %v1324_v54  ;;  %v3451_v57 = vcombine.high %v1320_v52, %v1324_v54  ;;  %v1315_v59 = vld [vmem:[%s5329_s4 + $0x160] sm:$0xff]  ;;  %v1312_v60 = vld [vmem:[%s5329_s4 + $0x148] sm:$0xff] }
  0x93   :  { %1151 = vmatpush1.bf16.msra.mxu0 %v3892_v32  ;;  %2041 = vmatprep.subr.bf16.mxu1 %v3449_v53  ;;  %v3441_v61 = vcombine.high %v1311_v58, %v1315_v59  ;;  %v1316_v62 = vld [vmem:[%s5329_s4 + $0x168] sm:$0xff]  ;;  %v3440_v0 = vcombine.low %v1311_v58, %v1315_v59  ;;  %v1303_v3 = vld [vmem:[%s5329_s4 + $0x100] sm:$0xff] }
  0x94   :  { %1152 = vmatprep.subr.bf16.mxu0 %v3897_v33  ;;  %v3442_v1 = vcombine.low %v1312_v60, %v1316_v62  ;;  %v3443_v2 = vcombine.high %v1312_v60, %v1316_v62  ;;  %v1307_v4 = vld [vmem:[%s5329_s4 + $0x120] sm:$0xff]  ;;  %v1304_v5 = vld [vmem:[%s5329_s4 + $0x108] sm:$0xff] }
  0x95   :  { %v3433_v6 = vcombine.high %v1303_v3, %v1307_v4  ;;  %v1308_v7 = vld [vmem:[%s5329_s4 + $0x128] sm:$0xff]  ;;  %v3432_v8 = vcombine.low %v1303_v3, %v1307_v4  ;;  %v1295_v11 = vld [vmem:[%s5329_s4 + $0xc0] sm:$0xff] }
  0x96   :  { %2042 = vmatpush1.bf16.msra.mxu1 %v3448_v55  ;;  %v3434_v9 = vcombine.low %v1304_v5, %v1308_v7  ;;  %v3435_v10 = vcombine.high %v1304_v5, %v1308_v7  ;;  %v1299_v12 = vld [vmem:[%s5329_s4 + $0xe0] sm:$0xff]  ;;  %v1296_v13 = vld [vmem:[%s5329_s4 + $0xc8] sm:$0xff] }
  0x97   :  { %1153 = vmatpush1.bf16.msra.mxu0 %v3895_v34  ;;  %2043 = vmatprep.subr.bf16.mxu1 %v3441_v61  ;;  %v3425_v14 = vcombine.high %v1295_v11, %v1299_v12  ;;  %v1300_v15 = vld [vmem:[%s5329_s4 + $0xe8] sm:$0xff]  ;;  %v3424_v16 = vcombine.low %v1295_v11, %v1299_v12  ;;  %v1287_v19 = vld [vmem:[%s5329_s4 + $0x80] sm:$0xff] }
  0x98   :  { %1154 = vmatprep.subr.bf16.mxu0 %v3900_v35  ;;  %v3426_v17 = vcombine.low %v1296_v13, %v1300_v15  ;;  %v3427_v18 = vcombine.high %v1296_v13, %v1300_v15  ;;  %v1291_v20 = vld [vmem:[%s5329_s4 + $0xa0] sm:$0xff]  ;;  %v1288_v21 = vld [vmem:[%s5329_s4 + $0x88] sm:$0xff] }
  0x99   :  { %v3417_v22 = vcombine.high %v1287_v19, %v1291_v20  ;;  %v1292_v23 = vld [vmem:[%s5329_s4 + $0xa8] sm:$0xff]  ;;  %v3416_v24 = vcombine.low %v1287_v19, %v1291_v20  ;;  %v1279_v27 = vld [vmem:[%s5329_s4 + $0x40] sm:$0xff] }
  0x9a   :  { %2044 = vmatpush1.bf16.msra.mxu1 %v3440_v0  ;;  %v3418_v25 = vcombine.low %v1288_v21, %v1292_v23  ;;  %v3419_v26 = vcombine.high %v1288_v21, %v1292_v23  ;;  %v1283_v28 = vld [vmem:[%s5329_s4 + $0x60] sm:$0xff]  ;;  %v1280_v29 = vld [vmem:[%s5329_s4 + $0x48] sm:$0xff] }
  0x9b   :  { %1155 = vmatpush1.bf16.msra.mxu0 %v3898_v36  ;;  %2045 = vmatprep.subr.bf16.mxu1 %v3433_v6  ;;  %v3409_v30 = vcombine.high %v1279_v27, %v1283_v28  ;;  %v1284_v63 = vld [vmem:[%s5329_s4 + $0x68] sm:$0xff]  ;;  %v3408_v31 = vcombine.low %v1279_v27, %v1283_v28  ;;  %v1271_v34 = vld [vmem:[%s5329_s4] sm:$0xff] }
  0x9c   :  { %1156 = vmatprep.subr.bf16.mxu0 %v3903_v37  ;;  %v3410_v32 = vcombine.low %v1280_v29, %v1284_v63  ;;  %v3411_v33 = vcombine.high %v1280_v29, %v1284_v63  ;;  %v1275_v35 = vld [vmem:[%s5329_s4 + $0x20] sm:$0xff]  ;;  %v1272_v36 = vld [vmem:[%s5329_s4 + $0x8] sm:$0xff] }
  0x9d   :  { %v3401_v37 = vcombine.high %v1271_v34, %v1275_v35  ;;  %v3400_v39 = vcombine.low %v1271_v34, %v1275_v35  ;;  %v1391_v42 = vld [vmem:[%s5329_s4 + $0x3c0] sm:$0xff]  ;;  %v1392_v45 = vld [vmem:[%s5329_s4 + $0x3c8] sm:$0xff] }
  0x9e   :  { %2046 = vmatpush1.bf16.msra.mxu1 %v3432_v8  ;;  %v1395_v44 = vld [vmem:[%s5329_s4 + $0x3e0] sm:$0xff]  ;;  %v1396_v49 = vld [vmem:[%s5329_s4 + $0x3e8] sm:$0xff] }
  0x9f   :  { %1157 = vmatpush1.bf16.msra.mxu0 %v3901_v38  ;;  %2047 = vmatprep.subr.bf16.mxu1 %v3425_v14  ;;  %v1276_v38 = vld [vmem:[%s5329_s4 + $0x28] sm:$0xff]  ;;  %v3521_v46 = vcombine.high %v1391_v42, %v1395_v44  ;;  %v3520_v50 = vcombine.low %v1391_v42, %v1395_v44  ;;  %v3522_v51 = vcombine.low %v1392_v45, %v1396_v49  ;;  %v1375_v6 = vld [vmem:[%s5329_s4 + $0x340] sm:$0xff] }
  0xa0   :  { %2080 = vmatprep.subr.bf16.mxu0 %v3459_v48  ;;  %v3403_v41 = vcombine.high %v1272_v36, %v1276_v38  ;;  %v3523_v52 = vcombine.high %v1392_v45, %v1396_v49  ;;  %v1384_v58 = vld [vmem:[%s5329_s4 + $0x388] sm:$0xff]  ;;  %v1379_v7 = vld [vmem:[%s5329_s4 + $0x360] sm:$0xff] }
  0xa1   :  { %v1388_v61 = vld [vmem:[%s5329_s4 + $0x3a8] sm:$0xff]  ;;  %v3504_v11 = vcombine.low %v1375_v6, %v1379_v7  ;;  %v1367_v14 = vld [vmem:[%s5329_s4 + $0x300] sm:$0xff] }
  0xa2   :  { %1175 = vmatmul.mubr.bf16.vlgmr.msra.gmra.mxu0 %v248_v40  ;;  %2048 = vmatpush1.bf16.msra.mxu1 %v3424_v16  ;;  %v3402_v40 = vcombine.low %v1272_v36, %v1276_v38  ;;  %v3515_v3 = vcombine.high %v1384_v58, %v1388_v61  ;;  %v1376_v8 = vld [vmem:[%s5329_s4 + $0x348] sm:$0xff]  ;;  %v1371_v15 = vld [vmem:[%s5329_s4 + $0x320] sm:$0xff] }
  0xa3   :  { %2081 = vmatpush1.bf16.msra.mxu0 %v3458_v47  ;;  %2049 = vmatprep.subr.bf16.mxu1 %v3417_v22  ;;  %v1368_v16 = vld [vmem:[%s5329_s4 + $0x308] sm:$0xff]  ;;  %v3496_v19 = vcombine.low %v1367_v14, %v1371_v15  ;;  %v1359_v22 = vld [vmem:[%s5329_s4 + $0x2c0] sm:$0xff] }
  0xa4   :  { %2082 = vmatprep.subr.bf16.mxu0 %v3451_v57  ;;  %v1387_v57 = vld [vmem:[%s5329_s4 + $0x3a0] sm:$0xff] }
  0xa5   :  { %v1363_v23 = vld [vmem:[%s5329_s4 + $0x2e0] sm:$0xff] }
  0xa6   :  { %2050 = vmatpush1.bf16.msra.mxu1 %v3416_v24  ;;  %v1360_v24 = vld [vmem:[%s5329_s4 + $0x2c8] sm:$0xff]  ;;  %v3488_v27 = vcombine.low %v1359_v22, %v1363_v23  ;;  %v1355_v63 = vld [vmem:[%s5329_s4 + $0x2a0] sm:$0xff] }
  0xa7   :  { %2083 = vmatpush1.bf16.msra.mxu0 %v3450_v56  ;;  %2051 = vmatprep.subr.bf16.mxu1 %v3409_v30  ;;  %v1383_v56 = vld [vmem:[%s5329_s4 + $0x380] sm:$0xff] }
  0xa8   :  { %2084 = vmatprep.subr.bf16.mxu0 %v3443_v2  ;;  %v3513_v60 = vcombine.high %v1383_v56, %v1387_v57  ;;  %v3514_v2 = vcombine.low %v1384_v58, %v1388_v61  ;;  %v1351_v30 = vld [vmem:[%s5329_s4 + $0x280] sm:$0xff] }
  0xa9   :  { %v3480_v34 = vcombine.low %v1351_v30, %v1355_v63  ;;  %v1347_v38 = vld [vmem:[%s5329_s4 + $0x260] sm:$0xff] }
  0xaa   :  { %2052 = vmatpush1.bf16.msra.mxu1 %v3408_v31  ;;  %v1352_v31 = vld [vmem:[%s5329_s4 + $0x288] sm:$0xff]  ;;  %v1339_v49 = vld [vmem:[%s5329_s4 + $0x220] sm:$0xff] }
  0xab   :  { %2085 = vmatpush1.bf16.msra.mxu0 %v3442_v1  ;;  %2053 = vmatprep.subr.bf16.mxu1 %v3401_v37  ;;  %v3512_v1 = vcombine.low %v1383_v56, %v1387_v57  ;;  %v1343_v37 = vld [vmem:[%s5329_s4 + $0x240] sm:$0xff]  ;;  %v4777_v56 = vld [vmem:[%s5329_s4 + $0x1f0] sm:$0xff]  ;;  %v4782_v57 = vld [vmem:[%s5329_s4 + $0x1d8] sm:$0xff] }
  0xac   :  { %2086 = vmatprep.subr.bf16.mxu0 %v3435_v10  ;;  %v1380_v10 = vld [vmem:[%s5329_s4 + $0x368] sm:$0xff]  ;;  %v3472_v42 = vcombine.low %v1343_v37, %v1347_v38 }
  0xad   :  { %v3506_v12 = vcombine.low %v1376_v8, %v1380_v10  ;;  %v3507_v13 = vcombine.high %v1376_v8, %v1380_v10 }
  0xae   :  { %2054 = vmatpush1.bf16.msra.mxu1 %v3400_v39  ;;  %v1344_v39 = vld [vmem:[%s5329_s4 + $0x248] sm:$0xff] }
  0xaf   :  { %2087 = vmatpush1.bf16.msra.mxu0 %v3434_v9  ;;  %2055 = vmatprep.subr.bf16.mxu1 %v3521_v46  ;;  %v3505_v9 = vcombine.high %v1375_v6, %v1379_v7  ;;  %v1335_v46 = vld [vmem:[%s5329_s4 + $0x200] sm:$0xff] }
  0xb0   :  { %2088 = vmatprep.subr.bf16.mxu0 %v3427_v18  ;;  %v1372_v18 = vld [vmem:[%s5329_s4 + $0x328] sm:$0xff] }
  0xb1   :  { %v3498_v20 = vcombine.low %v1368_v16, %v1372_v18  ;;  %v3499_v21 = vcombine.high %v1368_v16, %v1372_v18 }
  0xb2   :  { %2056 = vmatpush2.bf16.msra.mxu1 %v3520_v50  ;;  %v1340_v50 = vld [vmem:[%s5329_s4 + $0x228] sm:$0xff] }
  0xb3   :  { %2089 = vmatpush1.bf16.msra.mxu0 %v3426_v17  ;;  %2057 = vmatprep.subr.bf16.mxu1 %v3513_v60  ;;  %v3497_v17 = vcombine.high %v1367_v14, %v1371_v15  ;;  %v4789_v60 = vld [vmem:[%s5329_s4 + $0x1f8] sm:$0xff] }
  0xb4   :  { %2090 = vmatprep.subr.bf16.mxu0 %v3419_v26  ;;  %v1364_v26 = vld [vmem:[%s5329_s4 + $0x2e8] sm:$0xff] }
  0xb5   :  { %v3490_v28 = vcombine.low %v1360_v24, %v1364_v26  ;;  %v3491_v29 = vcombine.high %v1360_v24, %v1364_v26 }
  0xb6   :  { %2058 = vmatpush2.bf16.msra.mxu1 %v3512_v1 }
  0xb7   :  { %2091 = vmatpush1.bf16.msra.mxu0 %v3418_v25  ;;  %2059 = vmatprep.subr.bf16.mxu1 %v3505_v9  ;;  %v3489_v25 = vcombine.high %v1359_v22, %v1363_v23 }
  0xb8   :  { %2092 = vmatprep.subr.bf16.mxu0 %v3411_v33  ;;  %v1356_v33 = vld [vmem:[%s5329_s4 + $0x2a8] sm:$0xff] }
  0xb9   :  { %v3482_v35 = vcombine.low %v1352_v31, %v1356_v33  ;;  %v3483_v36 = vcombine.high %v1352_v31, %v1356_v33 }
  0xba   :  { %2060 = vmatpush2.bf16.msra.mxu1 %v3504_v11 }
  0xbb   :  { %2093 = vmatpush1.bf16.msra.mxu0 %v3410_v32  ;;  %2061 = vmatprep.subr.bf16.mxu1 %v3497_v17  ;;  %v3481_v32 = vcombine.high %v1351_v30, %v1355_v63 }
  0xbc   :  { %2094 = vmatprep.subr.bf16.mxu0 %v3403_v41  ;;  %v1348_v41 = vld [vmem:[%s5329_s4 + $0x268] sm:$0xff] }
  0xbd   :  { %v3474_v44 = vcombine.low %v1344_v39, %v1348_v41  ;;  %v3475_v45 = vcombine.high %v1344_v39, %v1348_v41 }
  0xbe   :  { %2062 = vmatpush2.bf16.msra.mxu1 %v3496_v19 }
  0xbf   :  { %2095 = vmatpush1.bf16.msra.mxu0 %v3402_v40  ;;  %2063 = vmatprep.subr.bf16.mxu1 %v3489_v25  ;;  %v3473_v40 = vcombine.high %v1343_v37, %v1347_v38 }
  0xc0   :  { %2096 = vmatprep.subr.bf16.mxu0 %v3523_v52 }
  0xc2   :  { %2064 = vmatpush2.bf16.msra.mxu1 %v3488_v27 }
  0xc3   :  { %2097 = vmatpush2.bf16.msra.mxu0 %v3522_v51  ;;  %2065 = vmatprep.subr.bf16.mxu1 %v3481_v32  ;;  %v3464_v51 = vcombine.low %v1335_v46, %v1339_v49 }
  0xc4   :  { %2098 = vmatprep.subr.bf16.mxu0 %v3515_v3 }
  0xc6   :  { %2066 = vmatpush2.bf16.msra.mxu1 %v3480_v34 }
  0xc7   :  { %2099 = vmatpush2.bf16.msra.mxu0 %v3514_v2  ;;  %2067 = vmatprep.subr.bf16.mxu1 %v3473_v40 }
  0xc8   :  { %2100 = vmatprep.subr.bf16.mxu0 %v3507_v13 }
  0xca   :  { %2068 = vmatpush2.bf16.msra.mxu1 %v3472_v42 }
  0xcb   :  { %2101 = vmatpush2.bf16.msra.mxu0 %v3506_v12 }
  0xcc   :  { %2102 = vmatprep.subr.bf16.mxu0 %v3499_v21 }
  0xcf   :  { %2103 = vmatpush2.bf16.msra.mxu0 %v3498_v20 }
  0xd0   :  { %2104 = vmatprep.subr.bf16.mxu0 %v3491_v29 }
  0xd3   :  { %2105 = vmatpush2.bf16.msra.mxu0 %v3490_v28 }
  0xd4   :  { %2106 = vmatprep.subr.bf16.mxu0 %v3483_v36 }
  0xd7   :  { %2107 = vmatpush2.bf16.msra.mxu0 %v3482_v35 }
  0xd8   :  { %2108 = vmatprep.subr.bf16.mxu0 %v3475_v45 }
  0xdb   :  { %2109 = vmatpush2.bf16.msra.mxu0 %v3474_v44 }
 0x102   :  { %v1012_v47 = vpop.f32.mrf.mxu0 }
 0x103   :  { %v1053_v48 = vpop.f32.mrf.mxu1 }
 0x104   :  { %v4681_v53 = vadd.f32 %v1053_v48, %v1012_v47  ;;  %v1014_v54 = vpop.f32.mrf.mxu0  ;;  %v1336_v47 = vld [vmem:[%s5329_s4 + $0x208] sm:$0xff]  ;;  %v3465_v48 = vcombine.high %v1335_v46, %v1339_v49 }
 0x105   :  { %v1055_v55 = vpop.f32.mrf.mxu1  ;;  %v3466_v52 = vcombine.low %v1336_v47, %v1340_v50 }
 0x106   :  { %v4692_v59 = vadd.f32 %v1055_v55, %v1014_v54  ;;  %v1016_v62 = vpop.f32.mrf.mxu0  ;;  %v3467_v54 = vcombine.high %v1336_v47, %v1340_v50  ;;  %2069 = vmatprep.subr.bf16.mxu1 %v3465_v48  ;;  %v4772_v55 = vld [vmem:[%s5329_s4 + $0x1d0] sm:$0xff] }
 0x107   :  { %v1057_v0 = vpop.f32.mrf.mxu1  ;;  %2070 = vmatpush2.bf16.msra.mxu1 %v3464_v51  ;;  %v3461_v58 = vcombine.high %v4772_v55, %v4777_v56  ;;  %v3460_v61 = vcombine.low %v4772_v55, %v4777_v56  ;;  %v3462_v62 = vcombine.low %v4782_v57, %v4789_v60  ;;  %v1309_v55 = vld [vmem:[%s5329_s4 + $0x130] sm:$0xff]  ;;  %v1306_v56 = vld [vmem:[%s5329_s4 + $0x118] sm:$0xff] }
 0x108   :  { %v1017_v4 = vpop.f32.mrf.mxu0  ;;  %2110 = vmatprep.subr.bf16.mxu0 %v3467_v54  ;;  %v3463_v0 = vcombine.high %v4782_v57, %v4789_v60  ;;  %v1310_v57 = vld [vmem:[%s5329_s4 + $0x138] sm:$0xff] }
 0x109   :  { %v1058_v5 = vpop.f32.mrf.mxu1  ;;  %2111 = vmatpush2.bf16.msra.mxu0 %v3466_v52  ;;  %2121 = vmatprep.subr.bf16.mxu1 %v3461_v58 }
 0x10a   :  { %2162 = vmatprep.subr.bf16.mxu0 %v3463_v0  ;;  %v4804_v0 = vsub.s32 0, %v4235_v43 }
 0x142   :  { %v1094_v1 = vpop.f32.mrf.mxu0 }
 0x143   :  { %v1135_v2 = vpop.f32.mrf.mxu1  ;;  %v1095_v9 = vadd.f32 %v1094_v1, %v4681_v53  ;;  %v1183_v1 = vld [vmem:[%s5327_s2] sm:$0x3] }
 0x144   :  { %v1096_v3 = vpop.f32.mrf.mxu0 }
 0x145   :  { %v1137_v4 = vpop.f32.mrf.mxu1  ;;  %v1097_v10 = vadd.f32 %v1096_v3, %v4692_v59  ;;  %v1136_v11 = vadd.f32 %v1135_v2, %v1095_v9  ;;  %v4810_v2 = vsub.s32 1, %v4235_v43  ;;  %v1184_v3 = vld [vmem:[%s5328_s3] sm:$0x3] }
 0x146   :  { %v1098_v5 = vpop.f32.mrf.mxu0 }
 0x147   :  { %v1139_v6 = vpop.f32.mrf.mxu1  ;;  %v1138_v13 = vadd.f32 %v1137_v4, %v1097_v10  ;;  %v1233_v4 = vrot.slane %v1183_v1, %v4804_v0 }
 0x148   :  { %v1099_v7 = vpop.f32.mrf.mxu0 }
 0x149   :  { %v1140_v8 = vpop.f32.mrf.mxu1  ;;  %v1246_v7 = vrot.slane %v1184_v3, %v4804_v0 }
 0x14a   :  { %v1237_v8 = vrot.slane %v1183_v1, %v4810_v2 }
 0x162   :  { %v1176_v12 = vpop.f32.mrf.mxu0 }
 0x163   :  { %v1177_v14 = vadd.f32 %v1176_v12, %v1136_v11  ;;  %v1250_v12 = vrot.slane %v1184_v3, %v4810_v2 }
 0x164   :  { %v1178_v15 = vpop.f32.mrf.mxu0 }
 0x165   :  { %v1186_v16 = vsel %vm1185_vm0, %v1177_v14, 0.0  ;;  %v1179_v17 = vadd.f32 %v1178_v15, %v1138_v13 }
 0x166   :  { %v1187_v18 = vrot.slane %v1186_v16, 4  ;;  %v1180_v19 = vpop.f32.mrf.mxu0 }
 0x167   :  { %v1193_v20 = vsel %vm1185_vm0, %v1179_v17, 0.0  ;;  %v1325_v19 = vld [vmem:[%s5329_s4 + $0x1b0] sm:$0xff] }
 0x168   :  { %v1188_v21 = vadd.f32 %v1187_v18, %v1186_v16  ;;  %v1194_v22 = vrot.slane %v1193_v20, 4  ;;  %v1181_v23 = vpop.f32.mrf.mxu0  ;;  %v1321_v18 = vld [vmem:[%s5329_s4 + $0x190] sm:$0xff] }
 0x16a   :  { %v1189_v24 = vrot.slane %v1188_v21, 2  ;;  %v1195_v53 = vadd.f32 %v1194_v22, %v1193_v20  ;;  %v1322_v20 = vld [vmem:[%s5329_s4 + $0x198] sm:$0xff] }
 0x16c   :  { %v1190_v25 = vadd.f32 %v1189_v24, %v1188_v21  ;;  %v1196_v59 = vrot.slane %v1195_v53, 2  ;;  %v1326_v21 = vld [vmem:[%s5329_s4 + $0x1b8] sm:$0xff] }
 0x16e   :  { %v1191_v26 = vrot.slane %v1190_v25, 1  ;;  %v1197_v27 = vadd.f32 %v1196_v59, %v1195_v53  ;;  %v1313_v53 = vld [vmem:[%s5329_s4 + $0x150] sm:$0xff]  ;;  %v3455_v59 = vcombine.high %v1322_v20, %v1326_v21 }
 0x170   :  { %v1192_v28 = vadd.f32 %v1191_v26, %v1190_v25  ;;  %v1198_v29 = vrot.slane %v1197_v27, 1  ;;  %v3453_v25 = vcombine.high %v1321_v18, %v1325_v19  ;;  %v1317_v26 = vld [vmem:[%s5329_s4 + $0x170] sm:$0xff] }
 0x171   :  { %v3444_v60 = vcombine.low %v1313_v53, %v1317_v26 }
 0x172   :  { %v1201_v30 = vmul.f32 0.5, %v1192_v28  ;;  %v1199_v63 = vadd.f32 %v1198_v29, %v1197_v27  ;;  %v1314_v27 = vld [vmem:[%s5329_s4 + $0x158] sm:$0xff]  ;;  %v3452_v29 = vcombine.low %v1321_v18, %v1325_v19 }
 0x173   :  { %v1318_v28 = vld [vmem:[%s5329_s4 + $0x178] sm:$0xff] }
 0x174   :  { %v1203_v31 = vsub.f32 %v1177_v14, %v1201_v30  ;;  %v1202_v32 = vmul.f32 0.5, %v1199_v63  ;;  %v3454_v30 = vcombine.low %v1322_v20, %v1326_v21  ;;  %v3445_v63 = vcombine.high %v1313_v53, %v1317_v26  ;;  %v1386_v53 = vld [vmem:[%s5329_s4 + $0x398] sm:$0xff] }
 0x176   :  { %v1205_v33 = vmul.f32 %v1203_v31, %v1203_v31  ;;  %v1204_v34 = vsub.f32 %v1179_v17, %v1202_v32  ;;  %v1305_v32 = vld [vmem:[%s5329_s4 + $0x110] sm:$0xff] }
 0x178   :  { %v1207_v35 = vsel %vm1185_vm0, %v1205_v33, 0.0  ;;  %v1206_v36 = vmul.f32 %v1204_v34, %v1204_v34  ;;  %v3439_v33 = vcombine.high %v1306_v56, %v1310_v57 }
 0x179   :  { %v1208_v37 = vrot.slane %v1207_v35, 4 }
 0x17a   :  { %v1214_v38 = vsel %vm1185_vm0, %v1206_v36, 0.0  ;;  %v1298_v36 = vld [vmem:[%s5329_s4 + $0xd8] sm:$0xff] }
 0x17b   :  { %v1209_v39 = vadd.f32 %v1208_v37, %v1207_v35  ;;  %v1215_v40 = vrot.slane %v1214_v38, 4  ;;  %v1301_v35 = vld [vmem:[%s5329_s4 + $0xf0] sm:$0xff]  ;;  %v1302_v37 = vld [vmem:[%s5329_s4 + $0xf8] sm:$0xff] }
 0x17d   :  { %v1210_v41 = vrot.slane %v1209_v39, 2  ;;  %v1216_v42 = vadd.f32 %v1215_v40, %v1214_v38  ;;  %v3436_v38 = vcombine.low %v1305_v32, %v1309_v55 }
 0x17f   :  { %v1211_v44 = vadd.f32 %v1210_v41, %v1209_v39  ;;  %v1217_v45 = vrot.slane %v1216_v42, 2  ;;  %v3438_v39 = vcombine.low %v1306_v56, %v1310_v57  ;;  %v3431_v41 = vcombine.high %v1298_v36, %v1302_v37 }
 0x181   :  { %v1212_v46 = vrot.slane %v1211_v44, 1  ;;  %v1218_v49 = vadd.f32 %v1217_v45, %v1216_v42  ;;  %v1289_v42 = vld [vmem:[%s5329_s4 + $0x90] sm:$0xff]  ;;  %v1290_v45 = vld [vmem:[%s5329_s4 + $0x98] sm:$0xff] }
 0x183   :  { %v1213_v47 = vadd.f32 %v1212_v46, %v1211_v44  ;;  %v1219_v48 = vrot.slane %v1218_v49, 1  ;;  %v1293_v44 = vld [vmem:[%s5329_s4 + $0xb0] sm:$0xff]  ;;  %v1294_v46 = vld [vmem:[%s5329_s4 + $0xb8] sm:$0xff] }
 0x184   :  { %v3420_v1 = vcombine.low %v1289_v42, %v1293_v44  ;;  %v3422_v3 = vcombine.low %v1290_v45, %v1294_v46 }
 0x185   :  { %v1221_v50 = vmul.f32 0.5, %v1213_v47  ;;  %v1220_v51 = vadd.f32 %v1219_v48, %v1218_v49  ;;  %v3430_v47 = vcombine.low %v1298_v36, %v1302_v37  ;;  %v3421_v48 = vcombine.high %v1289_v42, %v1293_v44 }
 0x187   :  { %v1223_v52 = vadd.f32 1e-05, %v1221_v50  ;;  %v1222_v54 = vmul.f32 0.5, %v1220_v51  ;;  %v3423_v50 = vcombine.high %v1290_v45, %v1294_v46  ;;  %v1281_v51 = vld [vmem:[%s5329_s4 + $0x50] sm:$0xff] }
 0x189   :  { %3968 = vrsqrt.f32 %v1223_v52  ;;  %v1224_v58 = vadd.f32 1e-05, %v1222_v54  ;;  %v1285_v52 = vld [vmem:[%s5329_s4 + $0x70] sm:$0xff]  ;;  %v1282_v54 = vld [vmem:[%s5329_s4 + $0x58] sm:$0xff] }
 0x18b   :  { %3970 = vrsqrt.f32 %v1224_v58  ;;  %v1286_v58 = vld [vmem:[%s5329_s4 + $0x78] sm:$0xff] }
 0x196   :  { %v3969_v5 = vpop.eup %3968 }
 0x197   :  { %v1227_v6 = vmul.f32 %v3969_v5, %v1203_v31  ;;  %v3447_v31 = vcombine.high %v1314_v27, %v1318_v28  ;;  %v3415_v5 = vcombine.high %v1282_v54, %v1286_v58 }
 0x198   :  { %v3971_v9 = vpop.eup %3970 }
 0x199   :  { %v1240_v10 = vmul.f32 %v1233_v4, %v1227_v6  ;;  %v1228_v11 = vmul.f32 %v3971_v9, %v1204_v34  ;;  %v1297_v34 = vld [vmem:[%s5329_s4 + $0xd0] sm:$0xff]  ;;  %v3413_v4 = vcombine.high %v1281_v51, %v1285_v52  ;;  %v1278_v9 = vld [vmem:[%s5329_s4 + $0x38] sm:$0xff] }
 0x19a   :  { %v3429_v40 = vcombine.high %v1297_v34, %v1301_v35  ;;  %v3428_v49 = vcombine.low %v1297_v34, %v1301_v35  ;;  %v1273_v6 = vld [vmem:[%s5329_s4 + $0x10] sm:$0xff] }
 0x19b   :  { %v1253_v13 = vadd.f32 %v1246_v7, %v1240_v10  ;;  %v1241_v14 = vmul.f32 %v1237_v8, %v1228_v11  ;;  %v1277_v7 = vld [vmem:[%s5329_s4 + $0x30] sm:$0xff]  ;;  %v1274_v8 = vld [vmem:[%s5329_s4 + $0x18] sm:$0xff]  ;;  %v3412_v10 = vcombine.low %v1281_v51, %v1285_v52  ;;  %v3414_v11 = vcombine.low %v1282_v54, %v1286_v58 }
 0x19c   :  { %v3404_v18 = vcombine.low %v1273_v6, %v1277_v7  ;;  %v3406_v19 = vcombine.low %v1274_v8, %v1278_v9 }
 0x19d   :  { %v1254_v15 = vadd.f32 %v1250_v12, %v1241_v14  ;;  %v1255_v16 = vmax.f32 %v1253_v13, 0.0  ;;  %v3405_v12 = vcombine.high %v1273_v6, %v1277_v7  ;;  %v3407_v13 = vcombine.high %v1274_v8, %v1278_v9  ;;  %v1393_v14 = vld [vmem:[%s5329_s4 + $0x3d0] sm:$0xff] }
 0x19f   :  { %v1256_v17 = vmax.f32 %v1254_v15, 0.0  ;;  %v4831_v24 = vpack.c.bf16 %v1255_v16, %v1255_v16  ;;  %v1397_v15 = vld [vmem:[%s5329_s4 + $0x3f0] sm:$0xff] }
 0x1a0   :  { %v3525_v20 = vcombine.high %v1393_v14, %v1397_v15 }
 0x1a1   :  { %v1270_v22 = vpack.c.bf16 %v1256_v17, %v1256_v17  ;;  %v1259_v23 = vcombine.low %v1255_v16, %v1256_v17  ;;  %v1394_v16 = vld [vmem:[%s5329_s4 + $0x3d8] sm:$0xff] }
 0x1a2   :  { %v1398_v17 = vld [vmem:[%s5329_s4 + $0x3f8] sm:$0xff] }
 0x1a3   :  { %2071 = vmatprep.mubr.bf16.mxu1 %v1270_v22  ;;  %2112 = vmatprep.mubr.bf16.mxu0 %v1270_v22  ;;  %3399 = vst.sshfl [vmem:[#allocation2] sm:$0x33 pattern:$0x76325410] %v1259_v23  ;;  %v3527_v21 = vcombine.high %v1394_v16, %v1398_v17  ;;  %v1389_v23 = vld [vmem:[%s5329_s4 + $0x3b0] sm:$0xff]  ;;  %v3526_v26 = vcombine.low %v1394_v16, %v1398_v17 }
 0x1a4   :  { %2072 = vmatmul.mubr.bf16.vlgmr.msra.gmra.mxu1 %v4831_v24  ;;  %2113 = vmatmul.mubr.bf16.vlgmr.msra.gmra.mxu0 %v4831_v24 }
 0x1a5   :  { %2122 = vmatpush1.bf16.msra.mxu1 %v3460_v61  ;;  %2163 = vmatpush1.bf16.msra.mxu0 %v3462_v62  ;;  %v3446_v61 = vcombine.low %v1314_v27, %v1318_v28  ;;  %v3437_v62 = vcombine.high %v1305_v32, %v1309_v55 }
 0x1a6   :  { %2153 = vmatprep.mubr.bf16.mxu1 %v1270_v22  ;;  %2194 = vmatprep.mubr.bf16.mxu0 %v1270_v22  ;;  %v1385_v22 = vld [vmem:[%s5329_s4 + $0x390] sm:$0xff] }
 0x1a7   :  { %2123 = vmatprep.subr.bf16.mxu1 %v3453_v25  ;;  %2164 = vmatprep.subr.bf16.mxu0 %v3455_v59  ;;  %v1390_v25 = vld [vmem:[%s5329_s4 + $0x3b8] sm:$0xff]  ;;  %v3524_v59 = vcombine.low %v1393_v14, %v1397_v15  ;;  %v3517_v27 = vcombine.high %v1385_v22, %v1389_v23  ;;  %v3516_v32 = vcombine.low %v1385_v22, %v1389_v23 }
 0x1a8   :  { %v3519_v28 = vcombine.high %v1386_v53, %v1390_v25  ;;  %v3518_v55 = vcombine.low %v1386_v53, %v1390_v25  ;;  %v3906_v22 = vld [vmem:[%s5332_s7 + $0x38] sm:$0xff]   ;;  %v3909_v53 = vld [vmem:[%s5332_s7 + $0xf0] sm:$0xff]  }
 0x1a9   :  { %2124 = vmatpush1.bf16.msra.mxu1 %v3452_v29  ;;  %2165 = vmatpush1.bf16.msra.mxu0 %v3454_v30  ;;  %v1377_v29 = vld [vmem:[%s5329_s4 + $0x350] sm:$0xff]  ;;  %v3907_v23 = vld [vmem:[%s5332_s7 + $0xb8] sm:$0xff]  }
 0x1aa   :  { %2125 = vmatprep.subr.bf16.mxu1 %v3445_v63  ;;  %2166 = vmatprep.subr.bf16.mxu0 %v3447_v31  ;;  %v1381_v30 = vld [vmem:[%s5329_s4 + $0x370] sm:$0xff]  ;;  %v1378_v63 = vld [vmem:[%s5329_s4 + $0x358] sm:$0xff] }
 0x1ab   :  { %v1382_v31 = vld [vmem:[%s5329_s4 + $0x378] sm:$0xff]  ;;  %v3509_v56 = vcombine.high %v1377_v29, %v1381_v30  ;;  %v3508_v34 = vcombine.low %v1377_v29, %v1381_v30  ;;  %v3910_v25 = vld [vmem:[%s5332_s7 + $0x30] sm:$0xff]   ;;  %v3915_v29 = vld [vmem:[%s5332_s7 + $0xa8] sm:$0xff]  }
 0x1ac   :  { %v3511_v57 = vcombine.high %v1378_v63, %v1382_v31  ;;  %v3510_v35 = vcombine.low %v1378_v63, %v1382_v31  ;;  %v3916_v30 = vld [vmem:[%s5332_s7 + $0x60] sm:$0xff]  }
 0x1ad   :  { %2126 = vmatpush1.bf16.msra.mxu1 %v3444_v60  ;;  %2167 = vmatpush1.bf16.msra.mxu0 %v3446_v61  ;;  %v1369_v60 = vld [vmem:[%s5329_s4 + $0x310] sm:$0xff]  ;;  %v3917_v63 = vld [vmem:[%s5332_s7 + $0xe0] sm:$0xff]  }
 0x1ae   :  { %2127 = vmatprep.subr.bf16.mxu1 %v3437_v62  ;;  %2168 = vmatprep.subr.bf16.mxu0 %v3439_v33  ;;  %v1373_v61 = vld [vmem:[%s5329_s4 + $0x330] sm:$0xff]  ;;  %v1370_v62 = vld [vmem:[%s5329_s4 + $0x318] sm:$0xff]  ;;  %v3918_v31 = vld [vmem:[%s5332_s7 + $0x20] sm:$0xff]  }
 0x1af   :  { %v1374_v33 = vld [vmem:[%s5329_s4 + $0x338] sm:$0xff]  ;;  %v3501_v36 = vcombine.high %v1369_v60, %v1373_v61  ;;  %v3500_v42 = vcombine.low %v1369_v60, %v1373_v61  ;;  %v3924_v61 = vld [vmem:[%s5332_s7 + $0x50] sm:$0xff]  }
 0x1b0   :  { %v3503_v37 = vcombine.high %v1370_v62, %v1374_v33  ;;  %v3502_v44 = vcombine.low %v1370_v62, %v1374_v33  ;;  %v3923_v60 = vld [vmem:[%s5332_s7 + $0x98] sm:$0xff]   ;;  %v3925_v62 = vld [vmem:[%s5332_s7 + $0xd0] sm:$0xff]  }
 0x1b1   :  { %2128 = vmatpush1.bf16.msra.mxu1 %v3436_v38  ;;  %2169 = vmatpush1.bf16.msra.mxu0 %v3438_v39  ;;  %v1361_v38 = vld [vmem:[%s5329_s4 + $0x2d0] sm:$0xff] }
 0x1b2   :  { %2129 = vmatprep.subr.bf16.mxu1 %v3429_v40  ;;  %2170 = vmatprep.subr.bf16.mxu0 %v3431_v41  ;;  %v1365_v39 = vld [vmem:[%s5329_s4 + $0x2f0] sm:$0xff]  ;;  %v1362_v40 = vld [vmem:[%s5329_s4 + $0x2d8] sm:$0xff] }
 0x1b3   :  { %v1366_v41 = vld [vmem:[%s5329_s4 + $0x2f8] sm:$0xff]  ;;  %v3493_v45 = vcombine.high %v1361_v38, %v1365_v39  ;;  %v3492_v51 = vcombine.low %v1361_v38, %v1365_v39  ;;  %v3926_v33 = vld [vmem:[%s5332_s7 + $0x10] sm:$0xff]   ;;  %v3931_v38 = vld [vmem:[%s5332_s7 + $0x88] sm:$0xff]  }
 0x1b4   :  { %v3495_v46 = vcombine.high %v1362_v40, %v1366_v41  ;;  %v3494_v52 = vcombine.low %v1362_v40, %v1366_v41  ;;  %v3932_v39 = vld [vmem:[%s5332_s7 + $0x40] sm:$0xff]  }
 0x1b5   :  { %2130 = vmatpush1.bf16.msra.mxu1 %v3428_v49  ;;  %2171 = vmatpush1.bf16.msra.mxu0 %v3430_v47  ;;  %v1353_v49 = vld [vmem:[%s5329_s4 + $0x290] sm:$0xff]  ;;  %v3933_v40 = vld [vmem:[%s5332_s7 + $0xc0] sm:$0xff]  }
 0x1b6   :  { %2131 = vmatprep.subr.bf16.mxu1 %v3421_v48  ;;  %2172 = vmatprep.subr.bf16.mxu0 %v3423_v50  ;;  %v1357_v47 = vld [vmem:[%s5329_s4 + $0x2b0] sm:$0xff]  ;;  %v1354_v48 = vld [vmem:[%s5329_s4 + $0x298] sm:$0xff]  ;;  %v3934_v41 = vld [vmem:[%s5332_s7] sm:$0xff]  }
 0x1b7   :  { %v1358_v50 = vld [vmem:[%s5329_s4 + $0x2b8] sm:$0xff]  ;;  %v3485_v54 = vcombine.high %v1353_v49, %v1357_v47  ;;  %v3484_v6 = vcombine.low %v1353_v49, %v1357_v47 }
 0x1b8   :  { %v3487_v58 = vcombine.high %v1354_v48, %v1358_v50  ;;  %v3486_v7 = vcombine.low %v1354_v48, %v1358_v50 }
 0x1b9   :  { %2132 = vmatpush1.bf16.msra.mxu1 %v3420_v1  ;;  %2173 = vmatpush1.bf16.msra.mxu0 %v3422_v3  ;;  %v1345_v1 = vld [vmem:[%s5329_s4 + $0x250] sm:$0xff] }
 0x1ba   :  { %2133 = vmatprep.subr.bf16.mxu1 %v3413_v4  ;;  %2174 = vmatprep.subr.bf16.mxu0 %v3415_v5  ;;  %v1349_v3 = vld [vmem:[%s5329_s4 + $0x270] sm:$0xff]  ;;  %v1346_v4 = vld [vmem:[%s5329_s4 + $0x258] sm:$0xff] }
 0x1bb   :  { %v1350_v5 = vld [vmem:[%s5329_s4 + $0x278] sm:$0xff]  ;;  %v3477_v8 = vcombine.high %v1345_v1, %v1349_v3  ;;  %v3476_v14 = vcombine.low %v1345_v1, %v1349_v3 }
 0x1bc   :  { %v3479_v9 = vcombine.high %v1346_v4, %v1350_v5  ;;  %v3478_v15 = vcombine.low %v1346_v4, %v1350_v5 }
 0x1bd   :  { %2134 = vmatpush1.bf16.msra.mxu1 %v3412_v10  ;;  %2175 = vmatpush1.bf16.msra.mxu0 %v3414_v11  ;;  %v1337_v10 = vld [vmem:[%s5329_s4 + $0x210] sm:$0xff] }
 0x1be   :  { %2135 = vmatprep.subr.bf16.mxu1 %v3405_v12  ;;  %2176 = vmatprep.subr.bf16.mxu0 %v3407_v13  ;;  %v1341_v11 = vld [vmem:[%s5329_s4 + $0x230] sm:$0xff]  ;;  %v1338_v12 = vld [vmem:[%s5329_s4 + $0x218] sm:$0xff] }
 0x1bf   :  { %v1342_v13 = vld [vmem:[%s5329_s4 + $0x238] sm:$0xff]  ;;  %v3469_v16 = vcombine.high %v1337_v10, %v1341_v11 }
 0x1c0   :  { %v3471_v17 = vcombine.high %v1338_v12, %v1342_v13 }
 0x1c1   :  { %2136 = vmatpush1.bf16.msra.mxu1 %v3404_v18  ;;  %2177 = vmatpush1.bf16.msra.mxu0 %v3406_v19  ;;  %v3468_v18 = vcombine.low %v1337_v10, %v1341_v11  ;;  %v3470_v19 = vcombine.low %v1338_v12, %v1342_v13 }
 0x1c2   :  { %2137 = vmatprep.subr.bf16.mxu1 %v3525_v20  ;;  %2178 = vmatprep.subr.bf16.mxu0 %v3527_v21  ;;  %v3904_v20 = vld [vmem:[%s5332_s7 + $0x78] sm:$0xff]  }
 0x1c3   :  { %v3905_v21 = vld [vmem:[%s5332_s7 + $0xf8] sm:$0xff]  }
 0x1c5   :  { %2138 = vmatpush2.bf16.msra.mxu1 %v3524_v59  ;;  %2179 = vmatpush2.bf16.msra.mxu0 %v3526_v26  ;;  %v3911_v59 = vld [vmem:[%s5332_s7 + $0xb0] sm:$0xff]   ;;  %v3912_v26 = vld [vmem:[%s5332_s7 + $0x68] sm:$0xff]  }
 0x1c6   :  { %2139 = vmatprep.subr.bf16.mxu1 %v3517_v27  ;;  %2180 = vmatprep.subr.bf16.mxu0 %v3519_v28  ;;  %v3913_v27 = vld [vmem:[%s5332_s7 + $0xe8] sm:$0xff]  }
 0x1c7   :  { %v3914_v28 = vld [vmem:[%s5332_s7 + $0x28] sm:$0xff]  }
 0x1c9   :  { %2140 = vmatpush2.bf16.msra.mxu1 %v3516_v32  ;;  %2181 = vmatpush2.bf16.msra.mxu0 %v3518_v55  ;;  %v3919_v32 = vld [vmem:[%s5332_s7 + $0xa0] sm:$0xff]   ;;  %v3920_v55 = vld [vmem:[%s5332_s7 + $0x58] sm:$0xff]  }
 0x1ca   :  { %2141 = vmatprep.subr.bf16.mxu1 %v3509_v56  ;;  %2182 = vmatprep.subr.bf16.mxu0 %v3511_v57  ;;  %v3921_v56 = vld [vmem:[%s5332_s7 + $0xd8] sm:$0xff]  }
 0x1cb   :  { %v3922_v57 = vld [vmem:[%s5332_s7 + $0x18] sm:$0xff]  }
 0x1cd   :  { %2142 = vmatpush2.bf16.msra.mxu1 %v3508_v34  ;;  %2183 = vmatpush2.bf16.msra.mxu0 %v3510_v35  ;;  %v3927_v34 = vld [vmem:[%s5332_s7 + $0x90] sm:$0xff]   ;;  %v3928_v35 = vld [vmem:[%s5332_s7 + $0x48] sm:$0xff]  }
 0x1ce   :  { %2143 = vmatprep.subr.bf16.mxu1 %v3501_v36  ;;  %2184 = vmatprep.subr.bf16.mxu0 %v3503_v37  ;;  %v3929_v36 = vld [vmem:[%s5332_s7 + $0xc8] sm:$0xff]  }
 0x1cf   :  { %v3930_v37 = vld [vmem:[%s5332_s7 + $0x8] sm:$0xff]  }
 0x1d1   :  { %2144 = vmatpush2.bf16.msra.mxu1 %v3500_v42  ;;  %2185 = vmatpush2.bf16.msra.mxu0 %v3502_v44  ;;  %v3935_v42 = vld [vmem:[%s5332_s7 + $0x80] sm:$0xff]   ;;  %v3936_v44 = vld [vmem:[%s5332_s7 + $0x178] sm:$0xff]  }
 0x1d2   :  { %2145 = vmatprep.subr.bf16.mxu1 %v3493_v45  ;;  %2186 = vmatprep.subr.bf16.mxu0 %v3495_v46  ;;  %v3937_v45 = vld [vmem:[%s5332_s7 + $0x1f8] sm:$0xff]  }
 0x1d5   :  { %2146 = vmatpush2.bf16.msra.mxu1 %v3492_v51  ;;  %2187 = vmatpush2.bf16.msra.mxu0 %v3494_v52 }
 0x1d6   :  { %2147 = vmatprep.subr.bf16.mxu1 %v3485_v54  ;;  %2188 = vmatprep.subr.bf16.mxu0 %v3487_v58 }
 0x1d9   :  { %2148 = vmatpush2.bf16.msra.mxu1 %v3484_v6  ;;  %2189 = vmatpush2.bf16.msra.mxu0 %v3486_v7 }
 0x1da   :  { %2149 = vmatprep.subr.bf16.mxu1 %v3477_v8  ;;  %2190 = vmatprep.subr.bf16.mxu0 %v3479_v9 }
 0x1dd   :  { %2150 = vmatpush2.bf16.msra.mxu1 %v3476_v14  ;;  %2191 = vmatpush2.bf16.msra.mxu0 %v3478_v15 }
 0x1de   :  { %2151 = vmatprep.subr.bf16.mxu1 %v3469_v16  ;;  %2192 = vmatprep.subr.bf16.mxu0 %v3471_v17 }
 0x1e1   :  { %2152 = vmatpush2.bf16.msra.mxu1 %v3468_v18  ;;  %2193 = vmatpush2.bf16.msra.mxu0 %v3470_v19 }
 0x1e2   :  { %3593 = vmatprep.subr.bf16.mxu1 %v3904_v20  ;;  %3615 = vmatprep.subr.bf16.mxu0 %v3905_v21 }
 0x1e4   :  { %2154 = vmatmul.mubr.bf16.vlgmr.msra.gmra.mxu1 %v4831_v24  ;;  %2195 = vmatmul.mubr.bf16.vlgmr.msra.gmra.mxu0 %v4831_v24  ;;  %v3908_v24 = vld [vmem:[%s5332_s7 + $0x70] sm:$0xff]  }
 0x1e5   :  { %3594 = vmatpush3.bf16.msra.mxu1 %v3906_v22  ;;  %3616 = vmatpush3.bf16.msra.mxu0 %v3907_v23 }
 0x1e6   :  { %3595 = vmatprep.subr.bf16.mxu1 %v3908_v24  ;;  %3617 = vmatprep.subr.bf16.mxu0 %v3909_v53 }
 0x1e9   :  { %3596 = vmatpush3.bf16.msra.mxu1 %v3910_v25  ;;  %3618 = vmatpush3.bf16.msra.mxu0 %v3911_v59 }
 0x1ea   :  { %3597 = vmatprep.subr.bf16.mxu1 %v3912_v26  ;;  %3619 = vmatprep.subr.bf16.mxu0 %v3913_v27 }
 0x1ed   :  { %3598 = vmatpush3.bf16.msra.mxu1 %v3914_v28  ;;  %3620 = vmatpush3.bf16.msra.mxu0 %v3915_v29 }
 0x1ee   :  { %3599 = vmatprep.subr.bf16.mxu1 %v3916_v30  ;;  %3621 = vmatprep.subr.bf16.mxu0 %v3917_v63 }
 0x1f1   :  { %3600 = vmatpush3.bf16.msra.mxu1 %v3918_v31  ;;  %3622 = vmatpush3.bf16.msra.mxu0 %v3919_v32 }
 0x1f2   :  { %3601 = vmatprep.subr.bf16.mxu1 %v3920_v55  ;;  %3623 = vmatprep.subr.bf16.mxu0 %v3921_v56 }
 0x1f5   :  { %3602 = vmatpush3.bf16.msra.mxu1 %v3922_v57  ;;  %3624 = vmatpush3.bf16.msra.mxu0 %v3923_v60 }
 0x1f6   :  { %3603 = vmatprep.subr.bf16.mxu1 %v3924_v61  ;;  %3625 = vmatprep.subr.bf16.mxu0 %v3925_v62 }
 0x1f9   :  { %3604 = vmatpush3.bf16.msra.mxu1 %v3926_v33  ;;  %3626 = vmatpush3.bf16.msra.mxu0 %v3927_v34 }
 0x1fa   :  { %3605 = vmatprep.subr.bf16.mxu1 %v3928_v35  ;;  %3627 = vmatprep.subr.bf16.mxu0 %v3929_v36 }
 0x1fd   :  { %3606 = vmatpush3.bf16.msra.mxu1 %v3930_v37  ;;  %3628 = vmatpush3.bf16.msra.mxu0 %v3931_v38 }
 0x1fe   :  { %3607 = vmatprep.subr.bf16.mxu1 %v3932_v39  ;;  %3629 = vmatprep.subr.bf16.mxu0 %v3933_v40 }
 0x201   :  { %3608 = vmatpush3.bf16.msra.mxu1 %v3934_v41  ;;  %3630 = vmatpush3.bf16.msra.mxu0 %v3935_v42 }
 0x202   :  { %3637 = vmatprep.subr.bf16.mxu1 %v3936_v44  ;;  %3659 = vmatprep.subr.bf16.mxu0 %v3937_v45 }
 0x264   :  { %v2073_v46 = vpop.f32.mrf.mxu1  ;;  %v2114_v49 = vpop.f32.mrf.mxu0 }
 0x265   :  { %v2205_v47 = vsel %vm1185_vm0, %v2073_v46, 0.0  ;;  %v2219_v48 = vsel %vm1185_vm0, %v2114_v49, 0.0 }
 0x266   :  { %v2206_v50 = vrot.slane %v2205_v47, 4  ;;  %v2220_v51 = vrot.slane %v2219_v48, 4  ;;  %v2075_v52 = vpop.f32.mrf.mxu1  ;;  %v2116_v54 = vpop.f32.mrf.mxu0 }
 0x267   :  { %v2212_v58 = vsel %vm1185_vm0, %v2075_v52, 0.0  ;;  %v2226_v1 = vsel %vm1185_vm0, %v2116_v54, 0.0 }
 0x268   :  { %v2207_v3 = vadd.f32 %v2206_v50, %v2205_v47  ;;  %v2221_v4 = vadd.f32 %v2220_v51, %v2219_v48  ;;  %v2213_v5 = vrot.slane %v2212_v58, 4  ;;  %v2227_v6 = vrot.slane %v2226_v1, 4  ;;  %v2077_v7 = vpop.f32.mrf.mxu1  ;;  %v2118_v8 = vpop.f32.mrf.mxu0 }
 0x26a   :  { %v2208_v9 = vrot.slane %v2207_v3, 2  ;;  %v2222_v10 = vrot.slane %v2221_v4, 2  ;;  %v2214_v11 = vadd.f32 %v2213_v5, %v2212_v58  ;;  %v2228_v12 = vadd.f32 %v2227_v6, %v2226_v1  ;;  %v2078_v13 = vpop.f32.mrf.mxu1  ;;  %v2119_v14 = vpop.f32.mrf.mxu0 }
 0x26c   :  { %v2209_v15 = vadd.f32 %v2208_v9, %v2207_v3  ;;  %v2223_v16 = vadd.f32 %v2222_v10, %v2221_v4  ;;  %v2215_v17 = vrot.slane %v2214_v11, 2  ;;  %v2229_v18 = vrot.slane %v2228_v12, 2 }
 0x26e   :  { %v2210_v19 = vrot.slane %v2209_v15, 1  ;;  %v2224_v20 = vrot.slane %v2223_v16, 1  ;;  %v2216_v21 = vadd.f32 %v2215_v17, %v2214_v11  ;;  %v2230_v22 = vadd.f32 %v2229_v18, %v2228_v12  ;;  %v5142_v18 = vld [vmem:[%s5331_s6] sm:$0xff] }
 0x26f   :  { %v2384_v17 = vsub.s32 2, %v4235_v43 }
 0x270   :  { %v2211_v23 = vadd.f32 %v2210_v19, %v2209_v15  ;;  %v2225_v24 = vadd.f32 %v2224_v20, %v2223_v16  ;;  %v2217_v53 = vrot.slane %v2216_v21, 1  ;;  %v2231_v25 = vrot.slane %v2230_v22, 1  ;;  %v5136_v16 = vld [vmem:[%s5330_s5] sm:$0xff] }
 0x271   :  { %v2388_v19 = vsub.s32 3, %v4235_v43  ;;  %v2377_v20 = vrot.slane %v5136_v16, %v4804_v0 }
 0x272   :  { %v2261_v59 = vmul.f32 0.5, %v2211_v23  ;;  %v2263_v26 = vmul.f32 0.5, %v2225_v24  ;;  %v2218_v27 = vadd.f32 %v2217_v53, %v2216_v21  ;;  %v2232_v28 = vadd.f32 %v2231_v25, %v2230_v22 }
 0x273   :  { %v2385_v22 = vrot.slane %v5136_v16, %v2384_v17  ;;  %v2426_v53 = vrot.slane %v5142_v18, %v4804_v0  ;;  %v2381_v25 = vrot.slane %v5136_v16, %v4810_v2 }
 0x274   :  { %v2269_v29 = vsub.f32 %v2073_v46, %v2261_v59  ;;  %v5117_v30 = vsub.f32 %v2114_v49, %v2263_v26  ;;  %v2262_v63 = vmul.f32 0.5, %v2218_v27  ;;  %v2264_v31 = vmul.f32 0.5, %v2232_v28 }
 0x275   :  { %v4054_v59 = vmov 1983009808  }
 0x276   :  { %v2277_v32 = vmul.f32 %v2269_v29, %v2269_v29  ;;  %v2279_v55 = vmul.f32 %v5117_v30, %v5117_v30  ;;  %v5121_v56 = vsub.f32 %v2075_v52, %v2262_v63  ;;  %v5123_v57 = vsub.f32 %v2116_v54, %v2264_v31 }
 0x277   :  { %v2490_v26 = vunpack.c.l.s4 %v4054_v59  ;;  %v2434_v63 = vrot.slane %v5142_v18, %v2384_v17  ;;  %v2389_v31 = vrot.slane %v5136_v16, %v2388_v19 }
 0x278   :  { %v2285_v60 = vsel %vm1185_vm0, %v2277_v32, 0.0  ;;  %v2299_v61 = vsel %vm1185_vm0, %v2279_v55, 0.0  ;;  %v2278_v62 = vmul.f32 %v5121_v56, %v5121_v56  ;;  %v2280_v33 = vmul.f32 %v5123_v57, %v5123_v57 }
 0x279   :  { %v2286_v34 = vrot.slane %v2285_v60, 4  ;;  %v2300_v35 = vrot.slane %v2299_v61, 4 }
 0x27a   :  { %v2292_v36 = vsel %vm1185_vm0, %v2278_v62, 0.0  ;;  %v2306_v37 = vsel %vm1185_vm0, %v2280_v33, 0.0  ;;  %v2438_v62 = vrot.slane %v5142_v18, %v2388_v19 }
 0x27b   :  { %v2287_v38 = vadd.f32 %v2286_v34, %v2285_v60  ;;  %v2301_v39 = vadd.f32 %v2300_v35, %v2299_v61  ;;  %v2293_v40 = vrot.slane %v2292_v36, 4  ;;  %v2307_v41 = vrot.slane %v2306_v37, 4 }
 0x27c   :  { %v2491_v35 = vunpack.c.0.s8 %v2490_v26 }
 0x27d   :  { %v2288_v42 = vrot.slane %v2287_v38, 2  ;;  %v2302_v44 = vrot.slane %v2301_v39, 2  ;;  %v2294_v45 = vadd.f32 %v2293_v40, %v2292_v36  ;;  %v2308_v46 = vadd.f32 %v2307_v41, %v2306_v37 }
 0x27f   :  { %v2289_v49 = vadd.f32 %v2288_v42, %v2287_v38  ;;  %v2303_v47 = vadd.f32 %v2302_v44, %v2301_v39  ;;  %v2295_v48 = vrot.slane %v2294_v45, 2  ;;  %v2309_v50 = vrot.slane %v2308_v46, 2 }
 0x281   :  { %v2290_v51 = vrot.slane %v2289_v49, 1  ;;  %v2304_v52 = vrot.slane %v2303_v47, 1  ;;  %v2296_v54 = vadd.f32 %v2295_v48, %v2294_v45  ;;  %v2310_v58 = vadd.f32 %v2309_v50, %v2308_v46 }
 0x283   :  { %v2291_v1 = vadd.f32 %v2290_v51, %v2289_v49  ;;  %v2305_v3 = vadd.f32 %v2304_v52, %v2303_v47  ;;  %v2297_v4 = vrot.slane %v2296_v54, 1  ;;  %v2311_v5 = vrot.slane %v2310_v58, 1  ;;  %v3939_v49 = vld [vmem:[%s5332_s7 + $0x1b8] sm:$0xff]   ;;  %v3940_v47 = vld [vmem:[%s5332_s7 + $0x170] sm:$0xff]  }
 0x284   :  { %v3941_v51 = vld [vmem:[%s5332_s7 + $0x1f0] sm:$0xff]  }
 0x285   :  { %v2341_v6 = vmul.f32 0.5, %v2291_v1  ;;  %v2343_v7 = vmul.f32 0.5, %v2305_v3  ;;  %v2298_v8 = vadd.f32 %v2297_v4, %v2296_v54  ;;  %v2312_v9 = vadd.f32 %v2311_v5, %v2310_v58  ;;  %v3942_v5 = vld [vmem:[%s5332_s7 + $0x130] sm:$0xff]  }
 0x287   :  { %v2349_v10 = vadd.f32 1e-05, %v2341_v6  ;;  %v2351_v11 = vadd.f32 1e-05, %v2343_v7  ;;  %v2342_v12 = vmul.f32 0.5, %v2298_v8  ;;  %v2344_v13 = vmul.f32 0.5, %v2312_v9 }
 0x289   :  { %3972 = vrsqrt.f32 %v2349_v10  ;;  %v2350_v14 = vadd.f32 1e-05, %v2342_v12  ;;  %v2352_v15 = vadd.f32 1e-05, %v2344_v13  ;;  %v3943_v10 = vld [vmem:[%s5332_s7 + $0x1b0] sm:$0xff]  }
 0x28a   :  { %3974 = vrsqrt.f32 %v2351_v11  ;;  %v3944_v11 = vld [vmem:[%s5332_s7 + $0x168] sm:$0xff]  }
 0x28b   :  { %3976 = vrsqrt.f32 %v2350_v14 }
 0x28c   :  { %3978 = vrsqrt.f32 %v2352_v15  ;;  %v3945_v15 = vld [vmem:[%s5332_s7 + $0x1e8] sm:$0xff]  }
 0x296   :  { %v3973_v21 = vpop.eup %3972 }
 0x297   :  { %v3975_v23 = vpop.eup %3974  ;;  %v2365_v24 = vmul.f32 %v3973_v21, %v2269_v29  ;;  %v2430_v29 = vrot.slane %v5142_v18, %v4810_v2 }
 0x298   :  { %v3977_v27 = vpop.eup %3976  ;;  %v2367_v28 = vmul.f32 %v3975_v23, %v5117_v30 }
 0x299   :  { %v3979_v32 = vpop.eup %3978  ;;  %v2414_v55 = vmul.f32 %v2377_v20, %v2365_v24  ;;  %v2366_v60 = vmul.f32 %v3977_v27, %v5121_v56  ;;  %v5161_v56 = vsub.s32 %v2491_v35, %v4235_v43  ;;  %v3946_v24 = vld [vmem:[%s5332_s7 + $0x128] sm:$0xff]  }
 0x29a   :  { %v2416_v0 = vmul.f32 %v2385_v22, %v2367_v28  ;;  %v2368_v61 = vmul.f32 %v3979_v32, %v5123_v57  ;;  %v3938_v57 = vld [vmem:[%s5332_s7 + $0x138] sm:$0xff]   ;;  %v3949_v32 = vld [vmem:[%s5332_s7 + $0x1e0] sm:$0xff]  }
 0x29b   :  { %v2463_v33 = vadd.f32 %v2426_v53, %v2414_v55  ;;  %v2415_v34 = vmul.f32 %v2381_v25, %v2366_v60 }
 0x29c   :  { %v2465_v30 = vadd.f32 %v2434_v63, %v2416_v0  ;;  %v2417_v36 = vmul.f32 %v2389_v31, %v2368_v61  ;;  %v3947_v63 = vld [vmem:[%s5332_s7 + $0x1a8] sm:$0xff]   ;;  %v3948_v31 = vld [vmem:[%s5332_s7 + $0x160] sm:$0xff]  }
 0x29d   :  { %v2464_v37 = vadd.f32 %v2430_v29, %v2415_v34  ;;  %v2471_v38 = vmax.f32 %v2463_v33, 0.0  ;;  %v3950_v61 = vld [vmem:[%s5332_s7 + $0x120] sm:$0xff]  }
 0x29e   :  { %v2466_v39 = vadd.f32 %v2438_v62, %v2417_v36  ;;  %v2473_v40 = vmax.f32 %v2465_v30, 0.0  ;;  %v3951_v30 = vld [vmem:[%s5332_s7 + $0x1a0] sm:$0xff]   ;;  %v3952_v36 = vld [vmem:[%s5332_s7 + $0x158] sm:$0xff]  }
 0x29f   :  { %v2472_v41 = vmax.f32 %v2464_v37, 0.0  ;;  %v2525_v46 = vpack.c.bf16 %v2471_v38, %v2471_v38  ;;  %v3953_v37 = vld [vmem:[%s5332_s7 + $0x1d8] sm:$0xff]  }
 0x2a0   :  { %v2474_v42 = vmax.f32 %v2466_v39, 0.0  ;;  %v2527_v50 = vpack.c.bf16 %v2473_v40, %v2473_v40 }
 0x2a1   :  { %v2526_v2 = vpack.c.bf16 %v2472_v41, %v2472_v41  ;;  %v2487_v44 = vcombine.low %v2471_v38, %v2472_v41 }
 0x2a2   :  { %v2528_v45 = vpack.c.bf16 %v2474_v42, %v2474_v42  ;;  %v2488_v48 = vcombine.low %v2473_v40, %v2474_v42  ;;  %v3954_v42 = vld [vmem:[%s5332_s7 + $0x118] sm:$0xff]  }
 0x2a3   :  { %3084 = vmatprep.mubr.bf16.mxu1 %v2526_v2  ;;  %v2495_v52 = vrot.slane %v2487_v44, %v5161_v56 }
 0x2a4   :  { %v5176_v54 = vpop.f32.mrf.mxu1  ;;  %v5178_v58 = vpop.f32.mrf.mxu0  ;;  %3124 = vmatprep.mubr.bf16.mxu0 %v2528_v45  ;;  %3085 = vmatmul.mubr.bf16.vlgmr.msra.gmra.mxu1 %v2525_v46  ;;  %v2502_v1 = vrot.slane %v2488_v48, %v5161_v56  ;;  %v3955_v46 = vld [vmem:[%s5332_s7 + $0x198] sm:$0xff]  }
 0x2a5   :  { %v2233_v3 = vsel %vm1185_vm0, %v5176_v54, 0.0  ;;  %v2247_v4 = vsel %vm1185_vm0, %v5178_v58, 0.0  ;;  %3125 = vmatmul.mubr.bf16.vlgmr.msra.gmra.mxu0 %v2527_v50  ;;  %3638 = vmatpush3.bf16.msra.mxu1 %v3938_v57 }
 0x2a6   :  { %v2234_v6 = vrot.slane %v2233_v3, 4  ;;  %v2248_v7 = vrot.slane %v2247_v4, 4  ;;  %v5188_v8 = vpop.f32.mrf.mxu1  ;;  %v5190_v9 = vpop.f32.mrf.mxu0  ;;  %3660 = vmatpush3.bf16.msra.mxu0 %v3939_v49  ;;  %3639 = vmatprep.subr.bf16.mxu1 %v3940_v47  ;;  %v2503_v12 = vcombine.low %v2495_v52, %v2502_v1  ;;  %v3956_v49 = vld [vmem:[%s5332_s7 + $0x150] sm:$0xff]  }
 0x2a7   :  { %v2240_v13 = vsel %vm1185_vm0, %v5188_v8, 0.0  ;;  %v2254_v14 = vsel %vm1185_vm0, %v5190_v9, 0.0  ;;  %3661 = vmatprep.subr.bf16.mxu0 %v3941_v51  ;;  %v3957_v47 = vld [vmem:[%s5332_s7 + $0x1d0] sm:$0xff]  }
 0x2a8   :  { %v2235_v17 = vadd.f32 %v2234_v6, %v2233_v3  ;;  %v2249_v19 = vadd.f32 %v2248_v7, %v2247_v4  ;;  %v2241_v20 = vrot.slane %v2240_v13, 4  ;;  %v2255_v21 = vrot.slane %v2254_v14, 4  ;;  %v2159_v22 = vpop.f32.mrf.mxu1  ;;  %v2200_v23 = vpop.f32.mrf.mxu0  ;;  %2523 = vst [vmem:[#allocation4] sm:$0xff] %v2503_v12  ;;  %v3958_v1 = vld [vmem:[%s5332_s7 + $0x110] sm:$0xff]   ;;  %v3960_v6 = vld [vmem:[%s5332_s7 + $0x148] sm:$0xff]  }
 0x2a9   :  { %3640 = vmatpush3.bf16.msra.mxu1 %v3942_v5  ;;  %v3961_v7 = vld [vmem:[%s5332_s7 + $0x1c8] sm:$0xff]  }
 0x2aa   :  { %v2236_v53 = vrot.slane %v2235_v17, 2  ;;  %v2250_v25 = vrot.slane %v2249_v19, 2  ;;  %v2242_v59 = vadd.f32 %v2241_v20, %v2240_v13  ;;  %v2256_v26 = vadd.f32 %v2255_v21, %v2254_v14  ;;  %v2160_v27 = vpop.f32.mrf.mxu1  ;;  %v2201_v28 = vpop.f32.mrf.mxu0  ;;  %3662 = vmatpush3.bf16.msra.mxu0 %v3943_v10  ;;  %3641 = vmatprep.subr.bf16.mxu1 %v3944_v11  ;;  %v3962_v14 = vld [vmem:[%s5332_s7 + $0x108] sm:$0xff]   ;;  %v3964_v20 = vld [vmem:[%s5332_s7 + $0x140] sm:$0xff]  }
 0x2ab   :  { %3663 = vmatprep.subr.bf16.mxu0 %v3945_v15  ;;  %v3966_v28 = vld [vmem:[%s5332_s7 + $0x100] sm:$0xff]  }
 0x2ac   :  { %v2237_v55 = vadd.f32 %v2236_v53, %v2235_v17  ;;  %v2251_v60 = vadd.f32 %v2250_v25, %v2249_v19  ;;  %v2243_v29 = vrot.slane %v2242_v59, 2  ;;  %v2257_v0 = vrot.slane %v2256_v26, 2  ;;  %v3963_v19 = vld [vmem:[%s5332_s7 + $0x188] sm:$0xff]   ;;  %v3965_v53 = vld [vmem:[%s5332_s7 + $0x1c0] sm:$0xff]  }
 0x2ad   :  { %3642 = vmatpush3.bf16.msra.mxu1 %v3946_v24 }
 0x2ae   :  { %v2238_v62 = vrot.slane %v2237_v55, 1  ;;  %v2252_v33 = vrot.slane %v2251_v60, 1  ;;  %v2244_v34 = vadd.f32 %v2243_v29, %v2242_v59  ;;  %v2258_v35 = vadd.f32 %v2257_v0, %v2256_v26  ;;  %3664 = vmatpush3.bf16.msra.mxu0 %v3947_v63  ;;  %3643 = vmatprep.subr.bf16.mxu1 %v3948_v31  ;;  %v3967_v63 = vld [vmem:[%s5332_s7 + $0x180] sm:$0xff]  }
 0x2af   :  { %3665 = vmatprep.subr.bf16.mxu0 %v3949_v32 }
 0x2b0   :  { %v2239_v38 = vadd.f32 %v2238_v62, %v2237_v55  ;;  %v2253_v39 = vadd.f32 %v2252_v33, %v2251_v60  ;;  %v2245_v40 = vrot.slane %v2244_v34, 1  ;;  %v2259_v41 = vrot.slane %v2258_v35, 1 }
 0x2b1   :  { %3644 = vmatpush3.bf16.msra.mxu1 %v3950_v61 }
 0x2b2   :  { %v2265_v2 = vmul.f32 0.5, %v2239_v38  ;;  %v2267_v57 = vmul.f32 0.5, %v2253_v39  ;;  %v2246_v44 = vadd.f32 %v2245_v40, %v2244_v34  ;;  %v2260_v45 = vadd.f32 %v2259_v41, %v2258_v35  ;;  %3666 = vmatpush3.bf16.msra.mxu0 %v3951_v30  ;;  %3645 = vmatprep.subr.bf16.mxu1 %v3952_v36 }
 0x2b3   :  { %3667 = vmatprep.subr.bf16.mxu0 %v3953_v37 }
 0x2b4   :  { %v5242_v48 = vsub.f32 %v5176_v54, %v2265_v2  ;;  %v5245_v50 = vsub.f32 %v5178_v58, %v2267_v57  ;;  %v2266_v51 = vmul.f32 0.5, %v2246_v44  ;;  %v2268_v52 = vmul.f32 0.5, %v2260_v45  ;;  %v3959_v58 = vld [vmem:[%s5332_s7 + $0x190] sm:$0xff]   ;;  %s4055_s7 = smov [#allocation4]  }
 0x2b5   :  { %3646 = vmatpush3.bf16.msra.mxu1 %v3954_v42  ;;  %v2392_v45 = vsub.s32 4, %v4235_v43  ;;  %s3229_s25 = sshll.u32 %s4055_s7, 4  ;;  %s3230_s25 = int_to_ptr.vmem [resolvable:$true] %s3229_s25 }
 0x2b6   :  { %v2281_v3 = vmul.f32 %v5242_v48, %v5242_v48  ;;  %v2283_v4 = vmul.f32 %v5245_v50, %v5245_v50  ;;  %v5255_v5 = vsub.f32 %v5188_v8, %v2266_v51  ;;  %v5258_v54 = vsub.f32 %v5190_v9, %v2268_v52  ;;  %3668 = vmatpush3.bf16.msra.mxu0 %v3955_v46  ;;  %s3988_s28 = scalar_lea.vmem %s3230_s25, 256  ;;  %p3993_p1 = scmp.lt.s32.totalorder %s3230_s25, %s3230_s25 }
 0x2b7   :  { %3647 = vmatprep.subr.bf16.mxu1 %v3956_v49  ;;  %3669 = vmatprep.subr.bf16.mxu0 %v3957_v47  ;;  %v2400_v46 = vsub.s32 6, %v4235_v43  ;;  %v2396_v49 = vsub.s32 5, %v4235_v43  ;;  %v2404_v47 = vsub.s32 7, %v4235_v43  ;;  %v2393_v51 = vrot.slane %v5136_v16, %v2392_v45  ;;  %p3989_p0 = scmp.ne.s32.totalorder %s3230_s25, %s3988_s28  ;;  %p3994_p2 = scmp.lt.s32.totalorder %s3988_s28, %s3988_s28 }
 0x2b8   :  { %v2313_v8 = vsel %vm1185_vm0, %v2281_v3, 0.0  ;;  %v2327_v9 = vsel %vm1185_vm0, %v2283_v4, 0.0  ;;  %v2282_v10 = vmul.f32 %v5255_v5, %v5255_v5  ;;  %v2284_v11 = vmul.f32 %v5258_v54, %v5258_v54 }
 0x2b9   :  { %v2314_v12 = vrot.slane %v2313_v8, 4  ;;  %v2328_v13 = vrot.slane %v2327_v9, 4  ;;  %3648 = vmatpush3.bf16.msra.mxu1 %v3958_v1  ;;  %v2401_v1 = vrot.slane %v5136_v16, %v2400_v46  ;;  %p3995_p3 = por %p3994_p2, %p3993_p1 }
 0x2ba   :  { %v2320_v15 = vsel %vm1185_vm0, %v2282_v10, 0.0  ;;  %v2334_v17 = vsel %vm1185_vm0, %v2284_v11, 0.0  ;;  %3670 = vmatpush3.bf16.msra.mxu0 %v3959_v58  ;;  %3649 = vmatprep.subr.bf16.mxu1 %v3960_v6  ;;  %v2442_v58 = vrot.slane %v5142_v18, %v2392_v45  ;;  %v2397_v6 = vrot.slane %v5136_v16, %v2396_v49 }
 0x2bb   :  { %v2315_v21 = vadd.f32 %v2314_v12, %v2313_v8  ;;  %v2329_v22 = vadd.f32 %v2328_v13, %v2327_v9  ;;  %v2321_v23 = vrot.slane %v2320_v15, 4  ;;  %v2335_v24 = vrot.slane %v2334_v17, 4  ;;  %3671 = vmatprep.subr.bf16.mxu0 %v3961_v7  ;;  %p3996_p4 = pnand %p3995_p3, %p3989_p0 }
 0x2bc   :  { %v2450_v9 = vrot.slane %v5142_v18, %v2400_v46  ;;  %v2405_v10 = vrot.slane %v5136_v16, %v2404_v47  ;;  %v2446_v13 = vrot.slane %v5142_v18, %v2396_v49 }
 0x2bd   :  { %v2316_v25 = vrot.slane %v2315_v21, 2  ;;  %v2330_v59 = vrot.slane %v2329_v22, 2  ;;  %v2322_v26 = vadd.f32 %v2321_v23, %v2320_v15  ;;  %v2336_v27 = vadd.f32 %v2335_v24, %v2334_v17  ;;  %3650 = vmatpush3.bf16.msra.mxu1 %v3962_v14 }
 0x2be   :  { %3672 = vmatpush3.bf16.msra.mxu0 %v3963_v19  ;;  %3651 = vmatprep.subr.bf16.mxu1 %v3964_v20  ;;  %v2454_v15 = vrot.slane %v5142_v18, %v2404_v47 }
 0x2bf   :  { %v2317_v31 = vadd.f32 %v2316_v25, %v2315_v21  ;;  %v2331_v32 = vadd.f32 %v2330_v59, %v2329_v22  ;;  %v2323_v55 = vrot.slane %v2322_v26, 2  ;;  %v2337_v60 = vrot.slane %v2336_v27, 2  ;;  %3673 = vmatprep.subr.bf16.mxu0 %v3965_v53 }
 0x2c1   :  { %v2318_v29 = vrot.slane %v2317_v31, 1  ;;  %v2332_v0 = vrot.slane %v2331_v32, 1  ;;  %v2324_v61 = vadd.f32 %v2323_v55, %v2322_v26  ;;  %v2338_v62 = vadd.f32 %v2337_v60, %v2336_v27  ;;  %3652 = vmatpush3.bf16.msra.mxu1 %v3966_v28 }
 0x2c2   :  { %3674 = vmatpush3.bf16.msra.mxu0 %v3967_v63 }
 0x2c3   :  { %v2319_v33 = vadd.f32 %v2318_v29, %v2317_v31  ;;  %v2333_v34 = vadd.f32 %v2332_v0, %v2331_v32  ;;  %v2325_v35 = vrot.slane %v2324_v61, 1  ;;  %v2339_v30 = vrot.slane %v2338_v62, 1 }
 0x2c5   :  { %v2345_v36 = vmul.f32 0.5, %v2319_v33  ;;  %v2347_v37 = vmul.f32 0.5, %v2333_v34  ;;  %v2326_v38 = vadd.f32 %v2325_v35, %v2324_v61  ;;  %v2340_v39 = vadd.f32 %v2339_v30, %v2338_v62 }
 0x2c7   :  { %v2353_v40 = vadd.f32 1e-05, %v2345_v36  ;;  %v2355_v41 = vadd.f32 1e-05, %v2347_v37  ;;  %v2346_v42 = vmul.f32 0.5, %v2326_v38  ;;  %v2348_v2 = vmul.f32 0.5, %v2340_v39 }
 0x2c9   :  { %3980 = vrsqrt.f32 %v2353_v40  ;;  %v2354_v57 = vadd.f32 1e-05, %v2346_v42  ;;  %v2356_v44 = vadd.f32 1e-05, %v2348_v2 }
 0x2ca   :  { %3982 = vrsqrt.f32 %v2355_v41 }
 0x2cb   :  { %3984 = vrsqrt.f32 %v2354_v57 }
 0x2cc   :  { %3986 = vrsqrt.f32 %v2356_v44 }
 0x2d6   :  { %v3981_v52 = vpop.eup %3980 }
 0x2d7   :  { %v3983_v3 = vpop.eup %3982  ;;  %v2369_v4 = vmul.f32 %v3981_v52, %v5242_v48 }
 0x2d8   :  { %v3985_v7 = vpop.eup %3984  ;;  %v2371_v8 = vmul.f32 %v3983_v3, %v5245_v50 }
 0x2d9   :  { %v3987_v43 = vpop.eup %3986  ;;  %v2418_v11 = vmul.f32 %v2393_v51, %v2369_v4  ;;  %v2370_v12 = vmul.f32 %v3985_v7, %v5255_v5 }
 0x2da   :  { %v2420_v14 = vmul.f32 %v2401_v1, %v2371_v8  ;;  %v2372_v48 = vmul.f32 %v3987_v43, %v5258_v54 }
 0x2db   :  { %v2467_v17 = vadd.f32 %v2442_v58, %v2418_v11  ;;  %v2419_v19 = vmul.f32 %v2397_v6, %v2370_v12 }
 0x2dc   :  { %v2469_v20 = vadd.f32 %v2450_v9, %v2420_v14  ;;  %v2421_v21 = vmul.f32 %v2405_v10, %v2372_v48 }
 0x2dd   :  { %v2468_v50 = vadd.f32 %v2446_v13, %v2419_v19  ;;  %v2475_v22 = vmax.f32 %v2467_v17, 0.0 }
 0x2de   :  { %v2470_v23 = vadd.f32 %v2454_v15, %v2421_v21  ;;  %v2477_v24 = vmax.f32 %v2469_v20, 0.0 }
 0x2df   :  { %v2476_v16 = vmax.f32 %v2468_v50, 0.0  ;;  %v2529_v26 = vpack.c.bf16 %v2475_v22, %v2475_v22 }
 0x2e0   :  { %v2478_v53 = vmax.f32 %v2470_v23, 0.0  ;;  %v2531_v28 = vpack.c.bf16 %v2477_v24, %v2477_v24 }
 0x2e1   :  { %v2530_v25 = vpack.c.bf16 %v2476_v16, %v2476_v16  ;;  %v2504_v59 = vcombine.low %v2475_v22, %v2476_v16 }
 0x2e2   :  { %v2532_v5 = vpack.c.bf16 %v2478_v53, %v2478_v53  ;;  %v2505_v27 = vcombine.low %v2477_v24, %v2478_v53 }
 0x2e3   :  { %3164 = vmatprep.mubr.bf16.mxu1 %v2530_v25  ;;  %v2512_v54 = vrot.slane %v2504_v59, %v5161_v56 }
 0x2e4   :  { %3204 = vmatprep.mubr.bf16.mxu0 %v2532_v5  ;;  %3165 = vmatmul.mubr.bf16.vlgmr.msra.gmra.mxu1 %v2529_v26  ;;  %v2519_v18 = vrot.slane %v2505_v27, %v5161_v56 }
 0x2e5   :  { %3205 = vmatmul.mubr.bf16.vlgmr.msra.gmra.mxu0 %v2531_v28 }
 0x2e6   :  { %v2520_v63 = vcombine.low %v2512_v54, %v2519_v18 }
 0x2e8   :  { %2524 = vst [vmem:[#allocation4 + $0x8] sm:$0xff] %v2520_v63 }
 0x2e9   :  { %3999 = shalt.err (!%p3996_p4)
}
 0x2ea   :  { %3232 = dma.vmem_to_hbm [thread:$0]  %s3230_s25, 256, %s5335_s10, [#allocation5]  }
 0x2eb   :  { %s4008_s0 = scalar_lea.vmem %s3220_s27, 64  ;;  %p4013_p6 = scmp.lt.s32.totalorder %s3220_s27, %s3220_s27 }
 0x2ec   :  { %p4009_p5 = scmp.ne.s32.totalorder %s3220_s27, %s4008_s0  ;;  %p4014_p7 = scmp.lt.s32.totalorder %s4008_s0, %s4008_s0 }
 0x2ee   :  { %p4015_p8 = por %p4014_p7, %p4013_p6 }
 0x2f0   :  { %p4016_p9 = pnand %p4015_p8, %p4009_p5 }
 0x2f2   :  { %4019 = shalt.err (!%p4016_p9)
}
 0x2f3   :  { %3222 = dma.vmem_to_hbm [thread:$0]  %s3220_s27, 64, %s5334_s9, [#allocation3]   ;;  %v3528_v33 = vld [vmem:[%s5333_s8] ss:$0 sm:$0xff] }
 0x2f4   :  { %s4057_s9 = smov [#allocation6]  }
 0x2f5   :  { %s3239_s14 = sshll.u32 %s4057_s9, 4  ;;  %s3240_s14 = int_to_ptr.vmem [resolvable:$true] %s3239_s14 }
 0x2f6   :  { %s4028_s8 = scalar_lea.vmem %s3240_s14, 32  ;;  %p4033_p11 = scmp.lt.s32.totalorder %s3240_s14, %s3240_s14 }
 0x2f7   :  { %p4029_p10 = scmp.ne.s32.totalorder %s3240_s14, %s4028_s8  ;;  %p4034_p12 = scmp.lt.s32.totalorder %s4028_s8, %s4028_s8 }
 0x2f9   :  { %p4035_p13 = por %p4034_p12, %p4033_p11 }
 0x2fb   :  { %p4036_p0 = pnand %p4035_p13, %p4029_p10 }
 0x364   :  { %v3609_v56 = vpop.f32.mrf.mxu1 }
 0x365   :  { %v3631_v31 = vpop.f32.mrf.mxu0 }
 0x366   :  { %v3610_v32 = vpop.f32.mrf.mxu1 }
 0x367   :  { %v3632_v55 = vpop.f32.mrf.mxu0  ;;  %v3611_v62 = vadd.f32 %v3610_v32, %v3609_v56 }
 0x368   :  { %v3612_v60 = vpop.f32.mrf.mxu1  ;;  %v3633_v30 = vadd.f32 %v3632_v55, %v3631_v31 }
 0x369   :  { %v3634_v29 = vpop.f32.mrf.mxu0  ;;  %v3087_v34 = vadd.f32 %v3611_v62, %v3528_v33 }
 0x36a   :  { %v3613_v0 = vpop.f32.mrf.mxu1 }
 0x36b   :  { %v3635_v61 = vpop.f32.mrf.mxu0  ;;  %v3127_v38 = vadd.f32 %v3633_v30, %v3087_v34 }
 0x3a4   :  { %v3653_v35 = vpop.f32.mrf.mxu1 }
 0x3a5   :  { %v3675_v36 = vpop.f32.mrf.mxu0 }
 0x3a6   :  { %v3654_v37 = vpop.f32.mrf.mxu1 }
 0x3a7   :  { %v3655_v39 = vadd.f32 %v3654_v37, %v3653_v35  ;;  %v3676_v40 = vpop.f32.mrf.mxu0 }
 0x3a8   :  { %v3656_v41 = vpop.f32.mrf.mxu1  ;;  %v3677_v2 = vadd.f32 %v3676_v40, %v3675_v36 }
 0x3a9   :  { %v3167_v42 = vadd.f32 %v3655_v39, %v3127_v38  ;;  %v3678_v57 = vpop.f32.mrf.mxu0 }
 0x3aa   :  { %v3657_v44 = vpop.f32.mrf.mxu1 }
 0x3ab   :  { %v3679_v45 = vpop.f32.mrf.mxu0  ;;  %v3207_v46 = vadd.f32 %v3677_v2, %v3167_v42 }
 0x3ad   :  { %3212 = vst [vmem:[#allocation6] sm:$0x3] %v3207_v46 }
 0x3ae   :  { %4039 = shalt.err (!%p4036_p0)
}
 0x3af   :  { %3242 = dma.vmem_to_hbm [thread:$0]  %s3240_s14, 32, %s5336_s11, [#allocation5]  }
 0x3b0   :  { %4048 = dma.done.wait [#allocation3], 64  }
 0x3b1   :  { %4049 = vsyncadd [#allocation3], 4294967232 }
 0x3b2   :  { %4050 = dma.done.wait [#allocation5], 288  }
 0x3b3   :  { %4051 = vsyncadd [#allocation5], 4294967008 }
 0x3b4   :  { %3252 = vsyncpa [#allocation3], 1 }
 0x3b5   :  { %3253 = vsyncpa [#allocation5], 1 }

</bundles_post_ra>
